<compile_context>
chip_gen: v5e
topology: v5e:2x2
jax: 0.10.0
libtpu: 0.0.40
codegen_flags: <defaults>
</compile_context>

<pallas_src>
import jax
import jax.numpy as jnp
from jax.experimental import pallas as pl
from jax.experimental.pallas import tpu as pltpu


# ------------------------------ fused kernel ------------------------------- #

def _block_kernel(x0_ref, x1_ref, wm_ref, bm_ref, w1_ref, b1_ref,
                  w2_ref, b2_ref, w3_ref, b3_ref,
                  m_ref, e_ref,
                  xp0, xp1, hp1, hp2, hp3):
    """Fused DFANet block for one batch element.

    x0/x1     : (1, H, W, Cin)                 inputs (NHWC)
    wm        : (9, Cin, C3)    bm: (1, C3)    main conv (BN scale folded)
    w1/w2/w3  : (9, Ci, Ci+1)   b*: (1, Ci+1)  dsc stages (dw+pw+BN folded)
    m_ref     : (1, H, W, C3)                  main-branch output
    e_ref     : (1, H, W, C3)                  ext-branch output
    xp0, xp1  : (H+2, W+2, Cin)  VMEM          padded input halos
    hp1, hp2  : (H+2, W+2, C1/C2) VMEM         padded intermediate halos
    hp3       : (H+2, W+2, C3)   VMEM          -inf padded maxpool input
    """
    _, H, W, Cin = x0_ref.shape
    C1 = b1_ref.shape[1]
    C2 = b2_ref.shape[1]
    C3 = bm_ref.shape[1]

    def fill_padded(scr, x, fill):
        # Fill the halo buffer with `fill`, then drop the interior in.
        scr[...] = jnp.full(scr.shape, fill, scr.dtype)
        scr[1:1 + H, 1:1 + W, :] = x.astype(scr.dtype)

    def conv3x3(scr, w_ref, cin):
        # Dense 3x3 conv (stride 1) on a pre-padded VMEM buffer:
        # 9 accumulated MXU matmuls, one per tap (static unroll).
        acc = None
        for t in range(9):
            dy, dx = divmod(t, 3)
            tap = scr[dy:dy + H, dx:dx + W, :].reshape(H * W, cin)
            part = jnp.dot(tap, w_ref[t], preferred_element_type=jnp.float32)
            acc = part if acc is None else acc + part
        return acc                                    # (H*W, Cout) f32

    # ---- main branch: m = BN(Conv3x3(x0)) ----
    fill_padded(xp0, x0_ref[0], 0.0)
    m = conv3x3(xp0, wm_ref, Cin) + bm_ref[...]
    m_ref[...] = m.reshape(1, H, W, C3).astype(m_ref.dtype)

    # ---- ext branch: dsc1 -> ReLU -> dsc2 -> ReLU -> dsc3 -> maxpool ----
    fill_padded(xp1, x1_ref[0], 0.0)
    h = jnp.maximum(conv3x3(xp1, w1_ref, Cin) + b1_ref[...], 0.0)

    fill_padded(hp1, h.reshape(H, W, C1), 0.0)
    h = jnp.maximum(conv3x3(hp1, w2_ref, C1) + b2_ref[...], 0.0)

    fill_padded(hp2, h.reshape(H, W, C2), 0.0)
    h = conv3x3(hp2, w3_ref, C2) + b3_ref[...]

    # MaxPool 3x3 stride 1 (halo = -inf), then residual add of m (re-read from
    # the already-written output block to keep m's live range short).
    fill_padded(hp3, h.reshape(H, W, C3), -jnp.inf)
    mx = hp3[1:1 + H, 1:1 + W, :]                     # center tap
    for dy in range(3):
        for dx in range(3):
            if dy == 1 and dx == 1:
                continue
            mx = jnp.maximum(mx, hp3[dy:dy + H, dx:dx + W, :])
    e = mx + m_ref[0].astype(jnp.float32)
    e_ref[...] = e.reshape(1, H, W, C3).astype(e_ref.dtype)


# ------------------------------ wrapper ------------------------------------ #

def block_forward(x0_nchw, x1_nchw, p):
    """(m, e) = block((x0, x1)) ; NCHW in / NCHW out (matches PyTorch)."""
    x0 = jnp.transpose(x0_nchw, (0, 2, 3, 1))         # NCHW -> NHWC
    x1 = jnp.transpose(x1_nchw, (0, 2, 3, 1))
    N, H, W, Cin = x0.shape
    C1 = p["pw1"].shape[1]
    C2 = p["pw2"].shape[1]
    C3 = p["pw3"].shape[1]

    # Trace-time weight folding (free: done once, outside the kernel):
    #   main: BN scale folded into the dense 3x3 weight.
    #   dsc : depthwise 3x3, pointwise 1x1 and BN scale folded into ONE dense
    #         3x3 weight  w[t,ci,co] = dw[t,ci] * pw[ci,co] * scale[co].
    wm = p["main_w"] * p["main_scale"][0][None, None, :]             # (9,Cin,C3)

    def dsc_weight(dw, pw, scale):
        return dw[:, :, None] * pw[None, :, :] * scale[0][None, None, :]

    w1 = dsc_weight(p["dw1"], p["pw1"], p["s1"])                      # (9,Cin,C1)
    w2 = dsc_weight(p["dw2"], p["pw2"], p["s2"])                      # (9,C1,C2)
    w3 = dsc_weight(p["dw3"], p["pw3"], p["s3"])                      # (9,C2,C3)

    def rep(shp):                      # replicated (weight/bias) block spec
        return pl.BlockSpec(shp, lambda n, _nd=len(shp): (0,) * _nd)

    m, e = pl.pallas_call(
        _block_kernel,
        out_shape=(jax.ShapeDtypeStruct((N, H, W, C3), jnp.float32),
                   jax.ShapeDtypeStruct((N, H, W, C3), jnp.float32)),
        grid=(N,),
        in_specs=[
            pl.BlockSpec((1, H, W, Cin), lambda n: (n, 0, 0, 0)),     # x0
            pl.BlockSpec((1, H, W, Cin), lambda n: (n, 0, 0, 0)),     # x1
            rep((9, Cin, C3)), rep((1, C3)),                          # main
            rep((9, Cin, C1)), rep((1, C1)),                          # dsc1
            rep((9, C1, C2)), rep((1, C2)),                           # dsc2
            rep((9, C2, C3)), rep((1, C3)),                           # dsc3
        ],
        out_specs=(pl.BlockSpec((1, H, W, C3), lambda n: (n, 0, 0, 0)),
                   pl.BlockSpec((1, H, W, C3), lambda n: (n, 0, 0, 0))),
        scratch_shapes=[
            pltpu.VMEM((H + 2, W + 2, Cin), jnp.float32),             # xp0
            pltpu.VMEM((H + 2, W + 2, Cin), jnp.float32),             # xp1
            pltpu.VMEM((H + 2, W + 2, C1), jnp.float32),              # hp1
            pltpu.VMEM((H + 2, W + 2, C2), jnp.float32),              # hp2
            pltpu.VMEM((H + 2, W + 2, C3), jnp.float32),              # hp3
        ],
        compiler_params=pltpu.CompilerParams(
            dimension_semantics=("parallel",)),                       # 2 TCs on v7x
    )(x0, x1, wm, p["main_bias"], w1, p["b1"], w2, p["b2"], w3, p["b3"])

    # NHWC -> NCHW
    return jnp.transpose(m, (0, 3, 1, 2)), jnp.transpose(e, (0, 3, 1, 2))


# ------------------------------ parameters --------------------------------- #

def _bn_fold(key, c, eps=1e-5):
    k1, k2, k3, k4 = jax.random.split(key, 4)
    gamma = jax.random.uniform(k1, (1, c), jnp.float32, 0.5, 1.5)
    beta = 0.1 * jax.random.normal(k2, (1, c), jnp.float32)
    mean = 0.1 * jax.random.normal(k3, (1, c), jnp.float32)
    var = jax.random.uniform(k4, (1, c), jnp.float32, 0.5, 1.5)
    scale = gamma / jnp.sqrt(var + eps)
    bias = beta - mean * scale
    return scale, bias


def init_block_params(key, cin, couts):
    ks = jax.random.split(key, 8)
    p = {}
    # main: dense 3x3 conv (no bias) + BN.  weight layout (9, Cin, Cout)
    p["main_w"] = 0.1 * jax.random.normal(ks[0], (9, cin, couts[2]), jnp.float32)
    p["main_scale"], p["main_bias"] = _bn_fold(ks[1], couts[2])
    # ext: three depthwise-separable convs + BN
    chans = [cin] + list(couts)
    for i in range(3):
        kdw, kpw, kbn = jax.random.split(ks[2 + i], 3)
        p[f"dw{i+1}"] = 0.1 * jax.random.normal(kdw, (9, chans[i]), jnp.float32)
        p[f"pw{i+1}"] = 0.1 * jax.random.normal(kpw, (chans[i], chans[i + 1]),
                                                jnp.float32)
        p[f"s{i+1}"], p[f"b{i+1}"] = _bn_fold(kbn, chans[i + 1])
    return p


# --------------------------------- main ------------------------------------ #

if __name__ == "__main__":
    key = jax.random.PRNGKey(0)
    k_params, k0, k1 = jax.random.split(key, 3)

    batch, in_channels, H, W = 2, 4, 16, 16
    out_channels = (8, 8, 16)

    params = init_block_params(k_params, in_channels, out_channels)

    x0 = jax.random.normal(k0, (batch, in_channels, H, W), jnp.float32)
    x1 = jax.random.normal(k1, (batch, in_channels, H, W), jnp.float32)

    fwd = jax.jit(block_forward)
    m, e = fwd(x0, x1, params)
    jax.block_until_ready((m, e))

    assert m.shape == (batch, out_channels[2], H, W)
    assert e.shape == (batch, out_channels[2], H, W)
    assert bool(jnp.all(jnp.isfinite(m))) and bool(jnp.all(jnp.isfinite(e)))
    print("KERNEL_OK")
</pallas_src>

<mosaic_0001>
module attributes {stable_mosaic.version = 11 : i64} {
  func.func @_block_kernel(%arg0: i32, %arg1: memref<1x16x16x4xf32, #tpu.memory_space<vmem>>, %arg2: memref<1x16x16x4xf32, #tpu.memory_space<vmem>>, %arg3: memref<9x4x16xf32, #tpu.memory_space<vmem>>, %arg4: memref<1x16xf32, #tpu.memory_space<vmem>>, %arg5: memref<9x4x8xf32, #tpu.memory_space<vmem>>, %arg6: memref<1x8xf32, #tpu.memory_space<vmem>>, %arg7: memref<9x8x8xf32, #tpu.memory_space<vmem>>, %arg8: memref<1x8xf32, #tpu.memory_space<vmem>>, %arg9: memref<9x8x16xf32, #tpu.memory_space<vmem>>, %arg10: memref<1x16xf32, #tpu.memory_space<vmem>>, %arg11: memref<1x16x16x16xf32, #tpu.memory_space<vmem>>, %arg12: memref<1x16x16x16xf32, #tpu.memory_space<vmem>>, %arg13: memref<18x18x4xf32, #tpu.memory_space<vmem>>, %arg14: memref<18x18x4xf32, #tpu.memory_space<vmem>>, %arg15: memref<18x18x8xf32, #tpu.memory_space<vmem>>, %arg16: memref<18x18x8xf32, #tpu.memory_space<vmem>>, %arg17: memref<18x18x16xf32, #tpu.memory_space<vmem>>) attributes {dimension_semantics = [#tpu.dimension_semantics<parallel>], iteration_bounds = array<i64: 2>, scalar_prefetch = 0 : i64, scratch_operands = 5 : i64, tpu.core_type = #tpu.core_type<tc>, window_params = [{transform_indices = @transform_0, window_bounds = array<i64: 1, 16, 16, 4>}, {transform_indices = @transform_1, window_bounds = array<i64: 1, 16, 16, 4>}, {pipeline_mode = #tpu.pipeline_mode<synchronous>, transform_indices = @transform_2, window_bounds = array<i64: 9, 4, 16>}, {pipeline_mode = #tpu.pipeline_mode<synchronous>, transform_indices = @transform_3, window_bounds = array<i64: 1, 16>}, {pipeline_mode = #tpu.pipeline_mode<synchronous>, transform_indices = @transform_4, window_bounds = array<i64: 9, 4, 8>}, {pipeline_mode = #tpu.pipeline_mode<synchronous>, transform_indices = @transform_5, window_bounds = array<i64: 1, 8>}, {pipeline_mode = #tpu.pipeline_mode<synchronous>, transform_indices = @transform_6, window_bounds = array<i64: 9, 8, 8>}, {pipeline_mode = #tpu.pipeline_mode<synchronous>, transform_indices = @transform_7, window_bounds = array<i64: 1, 8>}, {pipeline_mode = #tpu.pipeline_mode<synchronous>, transform_indices = @transform_8, window_bounds = array<i64: 9, 8, 16>}, {pipeline_mode = #tpu.pipeline_mode<synchronous>, transform_indices = @transform_9, window_bounds = array<i64: 1, 16>}, {transform_indices = @transform_10, window_bounds = array<i64: 1, 16, 16, 16>}, {transform_indices = @transform_11, window_bounds = array<i64: 1, 16, 16, 16>}]} {
    %c0 = arith.constant 0 : index
    %c0_0 = arith.constant 0 : index
    %c0_1 = arith.constant 0 : index
    %c0_2 = arith.constant 0 : index
    %0 = vector.load %arg1[%c0, %c0_0, %c0_1, %c0_2] : memref<1x16x16x4xf32, #tpu.memory_space<vmem>>, vector<1x16x16x4xf32>
    %1 = vector.shape_cast %0 : vector<1x16x16x4xf32> to vector<16x16x4xf32>
    %cst = arith.constant 0.000000e+00 : f32
    %2 = vector.broadcast %cst : f32 to vector<18x18x4xf32>
    %c0_3 = arith.constant 0 : index
    %c0_4 = arith.constant 0 : index
    %c0_5 = arith.constant 0 : index
    %3 = vector.load %arg13[%c0_3, %c0_4, %c0_5] : memref<18x18x4xf32, #tpu.memory_space<vmem>>, vector<18x18x4xf32>
    tpu.vector_store %arg13[%c0_3, %c0_4, %c0_5], %2 {strides = array<i32>} : memref<18x18x4xf32, #tpu.memory_space<vmem>>, vector<18x18x4xf32>,
    %c1 = arith.constant 1 : index
    %c1_6 = arith.constant 1 : index
    %c0_7 = arith.constant 0 : index
    %4 = vector.load %arg13[%c1, %c1_6, %c0_7] : memref<18x18x4xf32, #tpu.memory_space<vmem>>, vector<16x16x4xf32>
    tpu.vector_store %arg13[%c1, %c1_6, %c0_7], %1 {strides = array<i32>} : memref<18x18x4xf32, #tpu.memory_space<vmem>>, vector<16x16x4xf32>,
    %c0_8 = arith.constant 0 : index
    %c0_9 = arith.constant 0 : index
    %c0_10 = arith.constant 0 : index
    %5 = vector.load %arg13[%c0_8, %c0_9, %c0_10] : memref<18x18x4xf32, #tpu.memory_space<vmem>>, vector<16x16x4xf32>
    %6 = vector.shape_cast %5 : vector<16x16x4xf32> to vector<256x4xf32>
    %c0_11 = arith.constant 0 : index
    %c0_12 = arith.constant 0 : index
    %c0_13 = arith.constant 0 : index
    %7 = vector.load %arg3[%c0_11, %c0_12, %c0_13] : memref<9x4x16xf32, #tpu.memory_space<vmem>>, vector<1x4x16xf32>
    %8 = vector.shape_cast %7 : vector<1x4x16xf32> to vector<4x16xf32>
    %cst_14 = arith.constant dense<0.000000e+00> : vector<256x16xf32>
    %9 = tpu.matmul %6, %8, %cst_14 {dimension_numbers = #tpu.dot_dimension_numbers<[1], [0], [0], [1], [0, 0, 1, 1], [], []>} : vector<256x4xf32>, vector<4x16xf32>, vector<256x16xf32> -> vector<256x16xf32>
    %c0_15 = arith.constant 0 : index
    %c1_16 = arith.constant 1 : index
    %c0_17 = arith.constant 0 : index
    %10 = vector.load %arg13[%c0_15, %c1_16, %c0_17] : memref<18x18x4xf32, #tpu.memory_space<vmem>>, vector<16x16x4xf32>
    %11 = vector.shape_cast %10 : vector<16x16x4xf32> to vector<256x4xf32>
    %c1_18 = arith.constant 1 : index
    %c0_19 = arith.constant 0 : index
    %c0_20 = arith.constant 0 : index
    %12 = vector.load %arg3[%c1_18, %c0_19, %c0_20] : memref<9x4x16xf32, #tpu.memory_space<vmem>>, vector<1x4x16xf32>
    %13 = vector.shape_cast %12 : vector<1x4x16xf32> to vector<4x16xf32>
    %cst_21 = arith.constant dense<0.000000e+00> : vector<256x16xf32>
    %14 = tpu.matmul %11, %13, %cst_21 {dimension_numbers = #tpu.dot_dimension_numbers<[1], [0], [0], [1], [0, 0, 1, 1], [], []>} : vector<256x4xf32>, vector<4x16xf32>, vector<256x16xf32> -> vector<256x16xf32>
    %15 = arith.addf %9, %14 : vector<256x16xf32>
    %c0_22 = arith.constant 0 : index
    %c2 = arith.constant 2 : index
    %c0_23 = arith.constant 0 : index
    %16 = vector.load %arg13[%c0_22, %c2, %c0_23] : memref<18x18x4xf32, #tpu.memory_space<vmem>>, vector<16x16x4xf32>
    %17 = vector.shape_cast %16 : vector<16x16x4xf32> to vector<256x4xf32>
    %c2_24 = arith.constant 2 : index
    %c0_25 = arith.constant 0 : index
    %c0_26 = arith.constant 0 : index
    %18 = vector.load %arg3[%c2_24, %c0_25, %c0_26] : memref<9x4x16xf32, #tpu.memory_space<vmem>>, vector<1x4x16xf32>
    %19 = vector.shape_cast %18 : vector<1x4x16xf32> to vector<4x16xf32>
    %cst_27 = arith.constant dense<0.000000e+00> : vector<256x16xf32>
    %20 = tpu.matmul %17, %19, %cst_27 {dimension_numbers = #tpu.dot_dimension_numbers<[1], [0], [0], [1], [0, 0, 1, 1], [], []>} : vector<256x4xf32>, vector<4x16xf32>, vector<256x16xf32> -> vector<256x16xf32>
    %21 = arith.addf %15, %20 : vector<256x16xf32>
    %c1_28 = arith.constant 1 : index
    %c0_29 = arith.constant 0 : index
    %c0_30 = arith.constant 0 : index
    %22 = vector.load %arg13[%c1_28, %c0_29, %c0_30] : memref<18x18x4xf32, #tpu.memory_space<vmem>>, vector<16x16x4xf32>
    %23 = vector.shape_cast %22 : vector<16x16x4xf32> to vector<256x4xf32>
    %c3 = arith.constant 3 : index
    %c0_31 = arith.constant 0 : index
    %c0_32 = arith.constant 0 : index
    %24 = vector.load %arg3[%c3, %c0_31, %c0_32] : memref<9x4x16xf32, #tpu.memory_space<vmem>>, vector<1x4x16xf32>
    %25 = vector.shape_cast %24 : vector<1x4x16xf32> to vector<4x16xf32>
    %cst_33 = arith.constant dense<0.000000e+00> : vector<256x16xf32>
    %26 = tpu.matmul %23, %25, %cst_33 {dimension_numbers = #tpu.dot_dimension_numbers<[1], [0], [0], [1], [0, 0, 1, 1], [], []>} : vector<256x4xf32>, vector<4x16xf32>, vector<256x16xf32> -> vector<256x16xf32>
    %27 = arith.addf %21, %26 : vector<256x16xf32>
    %c1_34 = arith.constant 1 : index
    %c1_35 = arith.constant 1 : index
    %c0_36 = arith.constant 0 : index
    %28 = vector.load %arg13[%c1_34, %c1_35, %c0_36] : memref<18x18x4xf32, #tpu.memory_space<vmem>>, vector<16x16x4xf32>
    %29 = vector.shape_cast %28 : vector<16x16x4xf32> to vector<256x4xf32>
    %c4 = arith.constant 4 : index
    %c0_37 = arith.constant 0 : index
    %c0_38 = arith.constant 0 : index
    %30 = vector.load %arg3[%c4, %c0_37, %c0_38] : memref<9x4x16xf32, #tpu.memory_space<vmem>>, vector<1x4x16xf32>
    %31 = vector.shape_cast %30 : vector<1x4x16xf32> to vector<4x16xf32>
    %cst_39 = arith.constant dense<0.000000e+00> : vector<256x16xf32>
    %32 = tpu.matmul %29, %31, %cst_39 {dimension_numbers = #tpu.dot_dimension_numbers<[1], [0], [0], [1], [0, 0, 1, 1], [], []>} : vector<256x4xf32>, vector<4x16xf32>, vector<256x16xf32> -> vector<256x16xf32>
    %33 = arith.addf %27, %32 : vector<256x16xf32>
    %c1_40 = arith.constant 1 : index
    %c2_41 = arith.constant 2 : index
    %c0_42 = arith.constant 0 : index
    %34 = vector.load %arg13[%c1_40, %c2_41, %c0_42] : memref<18x18x4xf32, #tpu.memory_space<vmem>>, vector<16x16x4xf32>
    %35 = vector.shape_cast %34 : vector<16x16x4xf32> to vector<256x4xf32>
    %c5 = arith.constant 5 : index
    %c0_43 = arith.constant 0 : index
    %c0_44 = arith.constant 0 : index
    %36 = vector.load %arg3[%c5, %c0_43, %c0_44] : memref<9x4x16xf32, #tpu.memory_space<vmem>>, vector<1x4x16xf32>
    %37 = vector.shape_cast %36 : vector<1x4x16xf32> to vector<4x16xf32>
    %cst_45 = arith.constant dense<0.000000e+00> : vector<256x16xf32>
    %38 = tpu.matmul %35, %37, %cst_45 {dimension_numbers = #tpu.dot_dimension_numbers<[1], [0], [0], [1], [0, 0, 1, 1], [], []>} : vector<256x4xf32>, vector<4x16xf32>, vector<256x16xf32> -> vector<256x16xf32>
    %39 = arith.addf %33, %38 : vector<256x16xf32>
    %c2_46 = arith.constant 2 : index
    %c0_47 = arith.constant 0 : index
    %c0_48 = arith.constant 0 : index
    %40 = vector.load %arg13[%c2_46, %c0_47, %c0_48] : memref<18x18x4xf32, #tpu.memory_space<vmem>>, vector<16x16x4xf32>
    %41 = vector.shape_cast %40 : vector<16x16x4xf32> to vector<256x4xf32>
    %c6 = arith.constant 6 : index
    %c0_49 = arith.constant 0 : index
    %c0_50 = arith.constant 0 : index
    %42 = vector.load %arg3[%c6, %c0_49, %c0_50] : memref<9x4x16xf32, #tpu.memory_space<vmem>>, vector<1x4x16xf32>
    %43 = vector.shape_cast %42 : vector<1x4x16xf32> to vector<4x16xf32>
    %cst_51 = arith.constant dense<0.000000e+00> : vector<256x16xf32>
    %44 = tpu.matmul %41, %43, %cst_51 {dimension_numbers = #tpu.dot_dimension_numbers<[1], [0], [0], [1], [0, 0, 1, 1], [], []>} : vector<256x4xf32>, vector<4x16xf32>, vector<256x16xf32> -> vector<256x16xf32>
    %45 = arith.addf %39, %44 : vector<256x16xf32>
    %c2_52 = arith.constant 2 : index
    %c1_53 = arith.constant 1 : index
    %c0_54 = arith.constant 0 : index
    %46 = vector.load %arg13[%c2_52, %c1_53, %c0_54] : memref<18x18x4xf32, #tpu.memory_space<vmem>>, vector<16x16x4xf32>
    %47 = vector.shape_cast %46 : vector<16x16x4xf32> to vector<256x4xf32>
    %c7 = arith.constant 7 : index
    %c0_55 = arith.constant 0 : index
    %c0_56 = arith.constant 0 : index
    %48 = vector.load %arg3[%c7, %c0_55, %c0_56] : memref<9x4x16xf32, #tpu.memory_space<vmem>>, vector<1x4x16xf32>
    %49 = vector.shape_cast %48 : vector<1x4x16xf32> to vector<4x16xf32>
    %cst_57 = arith.constant dense<0.000000e+00> : vector<256x16xf32>
    %50 = tpu.matmul %47, %49, %cst_57 {dimension_numbers = #tpu.dot_dimension_numbers<[1], [0], [0], [1], [0, 0, 1, 1], [], []>} : vector<256x4xf32>, vector<4x16xf32>, vector<256x16xf32> -> vector<256x16xf32>
    %51 = arith.addf %45, %50 : vector<256x16xf32>
    %c2_58 = arith.constant 2 : index
    %c2_59 = arith.constant 2 : index
    %c0_60 = arith.constant 0 : index
    %52 = vector.load %arg13[%c2_58, %c2_59, %c0_60] : memref<18x18x4xf32, #tpu.memory_space<vmem>>, vector<16x16x4xf32>
    %53 = vector.shape_cast %52 : vector<16x16x4xf32> to vector<256x4xf32>
    %c8 = arith.constant 8 : index
    %c0_61 = arith.constant 0 : index
    %c0_62 = arith.constant 0 : index
    %54 = vector.load %arg3[%c8, %c0_61, %c0_62] : memref<9x4x16xf32, #tpu.memory_space<vmem>>, vector<1x4x16xf32>
    %55 = vector.shape_cast %54 : vector<1x4x16xf32> to vector<4x16xf32>
    %cst_63 = arith.constant dense<0.000000e+00> : vector<256x16xf32>
    %56 = tpu.matmul %53, %55, %cst_63 {dimension_numbers = #tpu.dot_dimension_numbers<[1], [0], [0], [1], [0, 0, 1, 1], [], []>} : vector<256x4xf32>, vector<4x16xf32>, vector<256x16xf32> -> vector<256x16xf32>
    %57 = arith.addf %51, %56 : vector<256x16xf32>
    %c0_64 = arith.constant 0 : index
    %c0_65 = arith.constant 0 : index
    %58 = vector.load %arg4[%c0_64, %c0_65] : memref<1x16xf32, #tpu.memory_space<vmem>>, vector<1x16xf32>
    %59 = vector.broadcast %58 : vector<1x16xf32> to vector<256x16xf32>
    %60 = arith.addf %57, %59 : vector<256x16xf32>
    %61 = vector.shape_cast %60 : vector<256x16xf32> to vector<1x16x16x16xf32>
    %c0_66 = arith.constant 0 : index
    %c0_67 = arith.constant 0 : index
    %c0_68 = arith.constant 0 : index
    %c0_69 = arith.constant 0 : index
    %62 = vector.load %arg11[%c0_66, %c0_67, %c0_68, %c0_69] : memref<1x16x16x16xf32, #tpu.memory_space<vmem>>, vector<1x16x16x16xf32>
    tpu.vector_store %arg11[%c0_66, %c0_67, %c0_68, %c0_69], %61 {strides = array<i32>} : memref<1x16x16x16xf32, #tpu.memory_space<vmem>>, vector<1x16x16x16xf32>,
    %c0_70 = arith.constant 0 : index
    %c0_71 = arith.constant 0 : index
    %c0_72 = arith.constant 0 : index
    %c0_73 = arith.constant 0 : index
    %63 = vector.load %arg2[%c0_70, %c0_71, %c0_72, %c0_73] : memref<1x16x16x4xf32, #tpu.memory_space<vmem>>, vector<1x16x16x4xf32>
    %64 = vector.shape_cast %63 : vector<1x16x16x4xf32> to vector<16x16x4xf32>
    %cst_74 = arith.constant 0.000000e+00 : f32
    %65 = vector.broadcast %cst_74 : f32 to vector<18x18x4xf32>
    %c0_75 = arith.constant 0 : index
    %c0_76 = arith.constant 0 : index
    %c0_77 = arith.constant 0 : index
    %66 = vector.load %arg14[%c0_75, %c0_76, %c0_77] : memref<18x18x4xf32, #tpu.memory_space<vmem>>, vector<18x18x4xf32>
    tpu.vector_store %arg14[%c0_75, %c0_76, %c0_77], %65 {strides = array<i32>} : memref<18x18x4xf32, #tpu.memory_space<vmem>>, vector<18x18x4xf32>,
    %c1_78 = arith.constant 1 : index
    %c1_79 = arith.constant 1 : index
    %c0_80 = arith.constant 0 : index
    %67 = vector.load %arg14[%c1_78, %c1_79, %c0_80] : memref<18x18x4xf32, #tpu.memory_space<vmem>>, vector<16x16x4xf32>
    tpu.vector_store %arg14[%c1_78, %c1_79, %c0_80], %64 {strides = array<i32>} : memref<18x18x4xf32, #tpu.memory_space<vmem>>, vector<16x16x4xf32>,
    %c0_81 = arith.constant 0 : index
    %c0_82 = arith.constant 0 : index
    %c0_83 = arith.constant 0 : index
    %68 = vector.load %arg14[%c0_81, %c0_82, %c0_83] : memref<18x18x4xf32, #tpu.memory_space<vmem>>, vector<16x16x4xf32>
    %69 = vector.shape_cast %68 : vector<16x16x4xf32> to vector<256x4xf32>
    %c0_84 = arith.constant 0 : index
    %c0_85 = arith.constant 0 : index
    %c0_86 = arith.constant 0 : index
    %70 = vector.load %arg5[%c0_84, %c0_85, %c0_86] : memref<9x4x8xf32, #tpu.memory_space<vmem>>, vector<1x4x8xf32>
    %71 = vector.shape_cast %70 : vector<1x4x8xf32> to vector<4x8xf32>
    %cst_87 = arith.constant dense<0.000000e+00> : vector<256x8xf32>
    %72 = tpu.matmul %69, %71, %cst_87 {dimension_numbers = #tpu.dot_dimension_numbers<[1], [0], [0], [1], [0, 0, 1, 1], [], []>} : vector<256x4xf32>, vector<4x8xf32>, vector<256x8xf32> -> vector<256x8xf32>
    %c0_88 = arith.constant 0 : index
    %c1_89 = arith.constant 1 : index
    %c0_90 = arith.constant 0 : index
    %73 = vector.load %arg14[%c0_88, %c1_89, %c0_90] : memref<18x18x4xf32, #tpu.memory_space<vmem>>, vector<16x16x4xf32>
    %74 = vector.shape_cast %73 : vector<16x16x4xf32> to vector<256x4xf32>
    %c1_91 = arith.constant 1 : index
    %c0_92 = arith.constant 0 : index
    %c0_93 = arith.constant 0 : index
    %75 = vector.load %arg5[%c1_91, %c0_92, %c0_93] : memref<9x4x8xf32, #tpu.memory_space<vmem>>, vector<1x4x8xf32>
    %76 = vector.shape_cast %75 : vector<1x4x8xf32> to vector<4x8xf32>
    %cst_94 = arith.constant dense<0.000000e+00> : vector<256x8xf32>
    %77 = tpu.matmul %74, %76, %cst_94 {dimension_numbers = #tpu.dot_dimension_numbers<[1], [0], [0], [1], [0, 0, 1, 1], [], []>} : vector<256x4xf32>, vector<4x8xf32>, vector<256x8xf32> -> vector<256x8xf32>
    %78 = arith.addf %72, %77 : vector<256x8xf32>
    %c0_95 = arith.constant 0 : index
    %c2_96 = arith.constant 2 : index
    %c0_97 = arith.constant 0 : index
    %79 = vector.load %arg14[%c0_95, %c2_96, %c0_97] : memref<18x18x4xf32, #tpu.memory_space<vmem>>, vector<16x16x4xf32>
    %80 = vector.shape_cast %79 : vector<16x16x4xf32> to vector<256x4xf32>
    %c2_98 = arith.constant 2 : index
    %c0_99 = arith.constant 0 : index
    %c0_100 = arith.constant 0 : index
    %81 = vector.load %arg5[%c2_98, %c0_99, %c0_100] : memref<9x4x8xf32, #tpu.memory_space<vmem>>, vector<1x4x8xf32>
    %82 = vector.shape_cast %81 : vector<1x4x8xf32> to vector<4x8xf32>
    %cst_101 = arith.constant dense<0.000000e+00> : vector<256x8xf32>
    %83 = tpu.matmul %80, %82, %cst_101 {dimension_numbers = #tpu.dot_dimension_numbers<[1], [0], [0], [1], [0, 0, 1, 1], [], []>} : vector<256x4xf32>, vector<4x8xf32>, vector<256x8xf32> -> vector<256x8xf32>
    %84 = arith.addf %78, %83 : vector<256x8xf32>
    %c1_102 = arith.constant 1 : index
    %c0_103 = arith.constant 0 : index
    %c0_104 = arith.constant 0 : index
    %85 = vector.load %arg14[%c1_102, %c0_103, %c0_104] : memref<18x18x4xf32, #tpu.memory_space<vmem>>, vector<16x16x4xf32>
    %86 = vector.shape_cast %85 : vector<16x16x4xf32> to vector<256x4xf32>
    %c3_105 = arith.constant 3 : index
    %c0_106 = arith.constant 0 : index
    %c0_107 = arith.constant 0 : index
    %87 = vector.load %arg5[%c3_105, %c0_106, %c0_107] : memref<9x4x8xf32, #tpu.memory_space<vmem>>, vector<1x4x8xf32>
    %88 = vector.shape_cast %87 : vector<1x4x8xf32> to vector<4x8xf32>
    %cst_108 = arith.constant dense<0.000000e+00> : vector<256x8xf32>
    %89 = tpu.matmul %86, %88, %cst_108 {dimension_numbers = #tpu.dot_dimension_numbers<[1], [0], [0], [1], [0, 0, 1, 1], [], []>} : vector<256x4xf32>, vector<4x8xf32>, vector<256x8xf32> -> vector<256x8xf32>
    %90 = arith.addf %84, %89 : vector<256x8xf32>
    %c1_109 = arith.constant 1 : index
    %c1_110 = arith.constant 1 : index
    %c0_111 = arith.constant 0 : index
    %91 = vector.load %arg14[%c1_109, %c1_110, %c0_111] : memref<18x18x4xf32, #tpu.memory_space<vmem>>, vector<16x16x4xf32>
    %92 = vector.shape_cast %91 : vector<16x16x4xf32> to vector<256x4xf32>
    %c4_112 = arith.constant 4 : index
    %c0_113 = arith.constant 0 : index
    %c0_114 = arith.constant 0 : index
    %93 = vector.load %arg5[%c4_112, %c0_113, %c0_114] : memref<9x4x8xf32, #tpu.memory_space<vmem>>, vector<1x4x8xf32>
    %94 = vector.shape_cast %93 : vector<1x4x8xf32> to vector<4x8xf32>
    %cst_115 = arith.constant dense<0.000000e+00> : vector<256x8xf32>
    %95 = tpu.matmul %92, %94, %cst_115 {dimension_numbers = #tpu.dot_dimension_numbers<[1], [0], [0], [1], [0, 0, 1, 1], [], []>} : vector<256x4xf32>, vector<4x8xf32>, vector<256x8xf32> -> vector<256x8xf32>
    %96 = arith.addf %90, %95 : vector<256x8xf32>
    %c1_116 = arith.constant 1 : index
    %c2_117 = arith.constant 2 : index
    %c0_118 = arith.constant 0 : index
    %97 = vector.load %arg14[%c1_116, %c2_117, %c0_118] : memref<18x18x4xf32, #tpu.memory_space<vmem>>, vector<16x16x4xf32>
    %98 = vector.shape_cast %97 : vector<16x16x4xf32> to vector<256x4xf32>
    %c5_119 = arith.constant 5 : index
    %c0_120 = arith.constant 0 : index
    %c0_121 = arith.constant 0 : index
    %99 = vector.load %arg5[%c5_119, %c0_120, %c0_121] : memref<9x4x8xf32, #tpu.memory_space<vmem>>, vector<1x4x8xf32>
    %100 = vector.shape_cast %99 : vector<1x4x8xf32> to vector<4x8xf32>
    %cst_122 = arith.constant dense<0.000000e+00> : vector<256x8xf32>
    %101 = tpu.matmul %98, %100, %cst_122 {dimension_numbers = #tpu.dot_dimension_numbers<[1], [0], [0], [1], [0, 0, 1, 1], [], []>} : vector<256x4xf32>, vector<4x8xf32>, vector<256x8xf32> -> vector<256x8xf32>
    %102 = arith.addf %96, %101 : vector<256x8xf32>
    %c2_123 = arith.constant 2 : index
    %c0_124 = arith.constant 0 : index
    %c0_125 = arith.constant 0 : index
    %103 = vector.load %arg14[%c2_123, %c0_124, %c0_125] : memref<18x18x4xf32, #tpu.memory_space<vmem>>, vector<16x16x4xf32>
    %104 = vector.shape_cast %103 : vector<16x16x4xf32> to vector<256x4xf32>
    %c6_126 = arith.constant 6 : index
    %c0_127 = arith.constant 0 : index
    %c0_128 = arith.constant 0 : index
    %105 = vector.load %arg5[%c6_126, %c0_127, %c0_128] : memref<9x4x8xf32, #tpu.memory_space<vmem>>, vector<1x4x8xf32>
    %106 = vector.shape_cast %105 : vector<1x4x8xf32> to vector<4x8xf32>
    %cst_129 = arith.constant dense<0.000000e+00> : vector<256x8xf32>
    %107 = tpu.matmul %104, %106, %cst_129 {dimension_numbers = #tpu.dot_dimension_numbers<[1], [0], [0], [1], [0, 0, 1, 1], [], []>} : vector<256x4xf32>, vector<4x8xf32>, vector<256x8xf32> -> vector<256x8xf32>
    %108 = arith.addf %102, %107 : vector<256x8xf32>
    %c2_130 = arith.constant 2 : index
    %c1_131 = arith.constant 1 : index
    %c0_132 = arith.constant 0 : index
    %109 = vector.load %arg14[%c2_130, %c1_131, %c0_132] : memref<18x18x4xf32, #tpu.memory_space<vmem>>, vector<16x16x4xf32>
    %110 = vector.shape_cast %109 : vector<16x16x4xf32> to vector<256x4xf32>
    %c7_133 = arith.constant 7 : index
    %c0_134 = arith.constant 0 : index
    %c0_135 = arith.constant 0 : index
    %111 = vector.load %arg5[%c7_133, %c0_134, %c0_135] : memref<9x4x8xf32, #tpu.memory_space<vmem>>, vector<1x4x8xf32>
    %112 = vector.shape_cast %111 : vector<1x4x8xf32> to vector<4x8xf32>
    %cst_136 = arith.constant dense<0.000000e+00> : vector<256x8xf32>
    %113 = tpu.matmul %110, %112, %cst_136 {dimension_numbers = #tpu.dot_dimension_numbers<[1], [0], [0], [1], [0, 0, 1, 1], [], []>} : vector<256x4xf32>, vector<4x8xf32>, vector<256x8xf32> -> vector<256x8xf32>
    %114 = arith.addf %108, %113 : vector<256x8xf32>
    %c2_137 = arith.constant 2 : index
    %c2_138 = arith.constant 2 : index
    %c0_139 = arith.constant 0 : index
    %115 = vector.load %arg14[%c2_137, %c2_138, %c0_139] : memref<18x18x4xf32, #tpu.memory_space<vmem>>, vector<16x16x4xf32>
    %116 = vector.shape_cast %115 : vector<16x16x4xf32> to vector<256x4xf32>
    %c8_140 = arith.constant 8 : index
    %c0_141 = arith.constant 0 : index
    %c0_142 = arith.constant 0 : index
    %117 = vector.load %arg5[%c8_140, %c0_141, %c0_142] : memref<9x4x8xf32, #tpu.memory_space<vmem>>, vector<1x4x8xf32>
    %118 = vector.shape_cast %117 : vector<1x4x8xf32> to vector<4x8xf32>
    %cst_143 = arith.constant dense<0.000000e+00> : vector<256x8xf32>
    %119 = tpu.matmul %116, %118, %cst_143 {dimension_numbers = #tpu.dot_dimension_numbers<[1], [0], [0], [1], [0, 0, 1, 1], [], []>} : vector<256x4xf32>, vector<4x8xf32>, vector<256x8xf32> -> vector<256x8xf32>
    %120 = arith.addf %114, %119 : vector<256x8xf32>
    %c0_144 = arith.constant 0 : index
    %c0_145 = arith.constant 0 : index
    %121 = vector.load %arg6[%c0_144, %c0_145] : memref<1x8xf32, #tpu.memory_space<vmem>>, vector<1x8xf32>
    %122 = vector.broadcast %121 : vector<1x8xf32> to vector<256x8xf32>
    %123 = arith.addf %120, %122 : vector<256x8xf32>
    %cst_146 = arith.constant 0.000000e+00 : f32
    %124 = vector.broadcast %cst_146 : f32 to vector<256x8xf32>
    %125 = arith.maximumf %123, %124 : vector<256x8xf32>
    %126 = vector.shape_cast %125 : vector<256x8xf32> to vector<16x16x8xf32>
    %cst_147 = arith.constant 0.000000e+00 : f32
    %127 = vector.broadcast %cst_147 : f32 to vector<18x18x8xf32>
    %c0_148 = arith.constant 0 : index
    %c0_149 = arith.constant 0 : index
    %c0_150 = arith.constant 0 : index
    %128 = vector.load %arg15[%c0_148, %c0_149, %c0_150] : memref<18x18x8xf32, #tpu.memory_space<vmem>>, vector<18x18x8xf32>
    tpu.vector_store %arg15[%c0_148, %c0_149, %c0_150], %127 {strides = array<i32>} : memref<18x18x8xf32, #tpu.memory_space<vmem>>, vector<18x18x8xf32>,
    %c1_151 = arith.constant 1 : index
    %c1_152 = arith.constant 1 : index
    %c0_153 = arith.constant 0 : index
    %129 = vector.load %arg15[%c1_151, %c1_152, %c0_153] : memref<18x18x8xf32, #tpu.memory_space<vmem>>, vector<16x16x8xf32>
    tpu.vector_store %arg15[%c1_151, %c1_152, %c0_153], %126 {strides = array<i32>} : memref<18x18x8xf32, #tpu.memory_space<vmem>>, vector<16x16x8xf32>,
    %c0_154 = arith.constant 0 : index
    %c0_155 = arith.constant 0 : index
    %c0_156 = arith.constant 0 : index
    %130 = vector.load %arg15[%c0_154, %c0_155, %c0_156] : memref<18x18x8xf32, #tpu.memory_space<vmem>>, vector<16x16x8xf32>
    %131 = vector.shape_cast %130 : vector<16x16x8xf32> to vector<256x8xf32>
    %c0_157 = arith.constant 0 : index
    %c0_158 = arith.constant 0 : index
    %c0_159 = arith.constant 0 : index
    %132 = vector.load %arg7[%c0_157, %c0_158, %c0_159] : memref<9x8x8xf32, #tpu.memory_space<vmem>>, vector<1x8x8xf32>
    %133 = vector.shape_cast %132 : vector<1x8x8xf32> to vector<8x8xf32>
    %cst_160 = arith.constant dense<0.000000e+00> : vector<256x8xf32>
    %134 = tpu.matmul %131, %133, %cst_160 {dimension_numbers = #tpu.dot_dimension_numbers<[1], [0], [0], [1], [0, 0, 1, 1], [], []>} : vector<256x8xf32>, vector<8x8xf32>, vector<256x8xf32> -> vector<256x8xf32>
    %c0_161 = arith.constant 0 : index
    %c1_162 = arith.constant 1 : index
    %c0_163 = arith.constant 0 : index
    %135 = vector.load %arg15[%c0_161, %c1_162, %c0_163] : memref<18x18x8xf32, #tpu.memory_space<vmem>>, vector<16x16x8xf32>
    %136 = vector.shape_cast %135 : vector<16x16x8xf32> to vector<256x8xf32>
    %c1_164 = arith.constant 1 : index
    %c0_165 = arith.constant 0 : index
    %c0_166 = arith.constant 0 : index
    %137 = vector.load %arg7[%c1_164, %c0_165, %c0_166] : memref<9x8x8xf32, #tpu.memory_space<vmem>>, vector<1x8x8xf32>
    %138 = vector.shape_cast %137 : vector<1x8x8xf32> to vector<8x8xf32>
    %cst_167 = arith.constant dense<0.000000e+00> : vector<256x8xf32>
    %139 = tpu.matmul %136, %138, %cst_167 {dimension_numbers = #tpu.dot_dimension_numbers<[1], [0], [0], [1], [0, 0, 1, 1], [], []>} : vector<256x8xf32>, vector<8x8xf32>, vector<256x8xf32> -> vector<256x8xf32>
    %140 = arith.addf %134, %139 : vector<256x8xf32>
    %c0_168 = arith.constant 0 : index
    %c2_169 = arith.constant 2 : index
    %c0_170 = arith.constant 0 : index
    %141 = vector.load %arg15[%c0_168, %c2_169, %c0_170] : memref<18x18x8xf32, #tpu.memory_space<vmem>>, vector<16x16x8xf32>
    %142 = vector.shape_cast %141 : vector<16x16x8xf32> to vector<256x8xf32>
    %c2_171 = arith.constant 2 : index
    %c0_172 = arith.constant 0 : index
    %c0_173 = arith.constant 0 : index
    %143 = vector.load %arg7[%c2_171, %c0_172, %c0_173] : memref<9x8x8xf32, #tpu.memory_space<vmem>>, vector<1x8x8xf32>
    %144 = vector.shape_cast %143 : vector<1x8x8xf32> to vector<8x8xf32>
    %cst_174 = arith.constant dense<0.000000e+00> : vector<256x8xf32>
    %145 = tpu.matmul %142, %144, %cst_174 {dimension_numbers = #tpu.dot_dimension_numbers<[1], [0], [0], [1], [0, 0, 1, 1], [], []>} : vector<256x8xf32>, vector<8x8xf32>, vector<256x8xf32> -> vector<256x8xf32>
    %146 = arith.addf %140, %145 : vector<256x8xf32>
    %c1_175 = arith.constant 1 : index
    %c0_176 = arith.constant 0 : index
    %c0_177 = arith.constant 0 : index
    %147 = vector.load %arg15[%c1_175, %c0_176, %c0_177] : memref<18x18x8xf32, #tpu.memory_space<vmem>>, vector<16x16x8xf32>
    %148 = vector.shape_cast %147 : vector<16x16x8xf32> to vector<256x8xf32>
    %c3_178 = arith.constant 3 : index
    %c0_179 = arith.constant 0 : index
    %c0_180 = arith.constant 0 : index
    %149 = vector.load %arg7[%c3_178, %c0_179, %c0_180] : memref<9x8x8xf32, #tpu.memory_space<vmem>>, vector<1x8x8xf32>
    %150 = vector.shape_cast %149 : vector<1x8x8xf32> to vector<8x8xf32>
    %cst_181 = arith.constant dense<0.000000e+00> : vector<256x8xf32>
    %151 = tpu.matmul %148, %150, %cst_181 {dimension_numbers = #tpu.dot_dimension_numbers<[1], [0], [0], [1], [0, 0, 1, 1], [], []>} : vector<256x8xf32>, vector<8x8xf32>, vector<256x8xf32> -> vector<256x8xf32>
    %152 = arith.addf %146, %151 : vector<256x8xf32>
    %c1_182 = arith.constant 1 : index
    %c1_183 = arith.constant 1 : index
    %c0_184 = arith.constant 0 : index
    %153 = vector.load %arg15[%c1_182, %c1_183, %c0_184] : memref<18x18x8xf32, #tpu.memory_space<vmem>>, vector<16x16x8xf32>
    %154 = vector.shape_cast %153 : vector<16x16x8xf32> to vector<256x8xf32>
    %c4_185 = arith.constant 4 : index
    %c0_186 = arith.constant 0 : index
    %c0_187 = arith.constant 0 : index
    %155 = vector.load %arg7[%c4_185, %c0_186, %c0_187] : memref<9x8x8xf32, #tpu.memory_space<vmem>>, vector<1x8x8xf32>
    %156 = vector.shape_cast %155 : vector<1x8x8xf32> to vector<8x8xf32>
    %cst_188 = arith.constant dense<0.000000e+00> : vector<256x8xf32>
    %157 = tpu.matmul %154, %156, %cst_188 {dimension_numbers = #tpu.dot_dimension_numbers<[1], [0], [0], [1], [0, 0, 1, 1], [], []>} : vector<256x8xf32>, vector<8x8xf32>, vector<256x8xf32> -> vector<256x8xf32>
    %158 = arith.addf %152, %157 : vector<256x8xf32>
    %c1_189 = arith.constant 1 : index
    %c2_190 = arith.constant 2 : index
    %c0_191 = arith.constant 0 : index
    %159 = vector.load %arg15[%c1_189, %c2_190, %c0_191] : memref<18x18x8xf32, #tpu.memory_space<vmem>>, vector<16x16x8xf32>
    %160 = vector.shape_cast %159 : vector<16x16x8xf32> to vector<256x8xf32>
    %c5_192 = arith.constant 5 : index
    %c0_193 = arith.constant 0 : index
    %c0_194 = arith.constant 0 : index
    %161 = vector.load %arg7[%c5_192, %c0_193, %c0_194] : memref<9x8x8xf32, #tpu.memory_space<vmem>>, vector<1x8x8xf32>
    %162 = vector.shape_cast %161 : vector<1x8x8xf32> to vector<8x8xf32>
    %cst_195 = arith.constant dense<0.000000e+00> : vector<256x8xf32>
    %163 = tpu.matmul %160, %162, %cst_195 {dimension_numbers = #tpu.dot_dimension_numbers<[1], [0], [0], [1], [0, 0, 1, 1], [], []>} : vector<256x8xf32>, vector<8x8xf32>, vector<256x8xf32> -> vector<256x8xf32>
    %164 = arith.addf %158, %163 : vector<256x8xf32>
    %c2_196 = arith.constant 2 : index
    %c0_197 = arith.constant 0 : index
    %c0_198 = arith.constant 0 : index
    %165 = vector.load %arg15[%c2_196, %c0_197, %c0_198] : memref<18x18x8xf32, #tpu.memory_space<vmem>>, vector<16x16x8xf32>
    %166 = vector.shape_cast %165 : vector<16x16x8xf32> to vector<256x8xf32>
    %c6_199 = arith.constant 6 : index
    %c0_200 = arith.constant 0 : index
    %c0_201 = arith.constant 0 : index
    %167 = vector.load %arg7[%c6_199, %c0_200, %c0_201] : memref<9x8x8xf32, #tpu.memory_space<vmem>>, vector<1x8x8xf32>
    %168 = vector.shape_cast %167 : vector<1x8x8xf32> to vector<8x8xf32>
    %cst_202 = arith.constant dense<0.000000e+00> : vector<256x8xf32>
    %169 = tpu.matmul %166, %168, %cst_202 {dimension_numbers = #tpu.dot_dimension_numbers<[1], [0], [0], [1], [0, 0, 1, 1], [], []>} : vector<256x8xf32>, vector<8x8xf32>, vector<256x8xf32> -> vector<256x8xf32>
    %170 = arith.addf %164, %169 : vector<256x8xf32>
    %c2_203 = arith.constant 2 : index
    %c1_204 = arith.constant 1 : index
    %c0_205 = arith.constant 0 : index
    %171 = vector.load %arg15[%c2_203, %c1_204, %c0_205] : memref<18x18x8xf32, #tpu.memory_space<vmem>>, vector<16x16x8xf32>
    %172 = vector.shape_cast %171 : vector<16x16x8xf32> to vector<256x8xf32>
    %c7_206 = arith.constant 7 : index
    %c0_207 = arith.constant 0 : index
    %c0_208 = arith.constant 0 : index
    %173 = vector.load %arg7[%c7_206, %c0_207, %c0_208] : memref<9x8x8xf32, #tpu.memory_space<vmem>>, vector<1x8x8xf32>
    %174 = vector.shape_cast %173 : vector<1x8x8xf32> to vector<8x8xf32>
    %cst_209 = arith.constant dense<0.000000e+00> : vector<256x8xf32>
    %175 = tpu.matmul %172, %174, %cst_209 {dimension_numbers = #tpu.dot_dimension_numbers<[1], [0], [0], [1], [0, 0, 1, 1], [], []>} : vector<256x8xf32>, vector<8x8xf32>, vector<256x8xf32> -> vector<256x8xf32>
    %176 = arith.addf %170, %175 : vector<256x8xf32>
    %c2_210 = arith.constant 2 : index
    %c2_211 = arith.constant 2 : index
    %c0_212 = arith.constant 0 : index
    %177 = vector.load %arg15[%c2_210, %c2_211, %c0_212] : memref<18x18x8xf32, #tpu.memory_space<vmem>>, vector<16x16x8xf32>
    %178 = vector.shape_cast %177 : vector<16x16x8xf32> to vector<256x8xf32>
    %c8_213 = arith.constant 8 : index
    %c0_214 = arith.constant 0 : index
    %c0_215 = arith.constant 0 : index
    %179 = vector.load %arg7[%c8_213, %c0_214, %c0_215] : memref<9x8x8xf32, #tpu.memory_space<vmem>>, vector<1x8x8xf32>
    %180 = vector.shape_cast %179 : vector<1x8x8xf32> to vector<8x8xf32>
    %cst_216 = arith.constant dense<0.000000e+00> : vector<256x8xf32>
    %181 = tpu.matmul %178, %180, %cst_216 {dimension_numbers = #tpu.dot_dimension_numbers<[1], [0], [0], [1], [0, 0, 1, 1], [], []>} : vector<256x8xf32>, vector<8x8xf32>, vector<256x8xf32> -> vector<256x8xf32>
    %182 = arith.addf %176, %181 : vector<256x8xf32>
    %c0_217 = arith.constant 0 : index
    %c0_218 = arith.constant 0 : index
    %183 = vector.load %arg8[%c0_217, %c0_218] : memref<1x8xf32, #tpu.memory_space<vmem>>, vector<1x8xf32>
    %184 = vector.broadcast %183 : vector<1x8xf32> to vector<256x8xf32>
    %185 = arith.addf %182, %184 : vector<256x8xf32>
    %cst_219 = arith.constant 0.000000e+00 : f32
    %186 = vector.broadcast %cst_219 : f32 to vector<256x8xf32>
    %187 = arith.maximumf %185, %186 : vector<256x8xf32>
    %188 = vector.shape_cast %187 : vector<256x8xf32> to vector<16x16x8xf32>
    %cst_220 = arith.constant 0.000000e+00 : f32
    %189 = vector.broadcast %cst_220 : f32 to vector<18x18x8xf32>
    %c0_221 = arith.constant 0 : index
    %c0_222 = arith.constant 0 : index
    %c0_223 = arith.constant 0 : index
    %190 = vector.load %arg16[%c0_221, %c0_222, %c0_223] : memref<18x18x8xf32, #tpu.memory_space<vmem>>, vector<18x18x8xf32>
    tpu.vector_store %arg16[%c0_221, %c0_222, %c0_223], %189 {strides = array<i32>} : memref<18x18x8xf32, #tpu.memory_space<vmem>>, vector<18x18x8xf32>,
    %c1_224 = arith.constant 1 : index
    %c1_225 = arith.constant 1 : index
    %c0_226 = arith.constant 0 : index
    %191 = vector.load %arg16[%c1_224, %c1_225, %c0_226] : memref<18x18x8xf32, #tpu.memory_space<vmem>>, vector<16x16x8xf32>
    tpu.vector_store %arg16[%c1_224, %c1_225, %c0_226], %188 {strides = array<i32>} : memref<18x18x8xf32, #tpu.memory_space<vmem>>, vector<16x16x8xf32>,
    %c0_227 = arith.constant 0 : index
    %c0_228 = arith.constant 0 : index
    %c0_229 = arith.constant 0 : index
    %192 = vector.load %arg16[%c0_227, %c0_228, %c0_229] : memref<18x18x8xf32, #tpu.memory_space<vmem>>, vector<16x16x8xf32>
    %193 = vector.shape_cast %192 : vector<16x16x8xf32> to vector<256x8xf32>
    %c0_230 = arith.constant 0 : index
    %c0_231 = arith.constant 0 : index
    %c0_232 = arith.constant 0 : index
    %194 = vector.load %arg9[%c0_230, %c0_231, %c0_232] : memref<9x8x16xf32, #tpu.memory_space<vmem>>, vector<1x8x16xf32>
    %195 = vector.shape_cast %194 : vector<1x8x16xf32> to vector<8x16xf32>
    %cst_233 = arith.constant dense<0.000000e+00> : vector<256x16xf32>
    %196 = tpu.matmul %193, %195, %cst_233 {dimension_numbers = #tpu.dot_dimension_numbers<[1], [0], [0], [1], [0, 0, 1, 1], [], []>} : vector<256x8xf32>, vector<8x16xf32>, vector<256x16xf32> -> vector<256x16xf32>
    %c0_234 = arith.constant 0 : index
    %c1_235 = arith.constant 1 : index
    %c0_236 = arith.constant 0 : index
    %197 = vector.load %arg16[%c0_234, %c1_235, %c0_236] : memref<18x18x8xf32, #tpu.memory_space<vmem>>, vector<16x16x8xf32>
    %198 = vector.shape_cast %197 : vector<16x16x8xf32> to vector<256x8xf32>
    %c1_237 = arith.constant 1 : index
    %c0_238 = arith.constant 0 : index
    %c0_239 = arith.constant 0 : index
    %199 = vector.load %arg9[%c1_237, %c0_238, %c0_239] : memref<9x8x16xf32, #tpu.memory_space<vmem>>, vector<1x8x16xf32>
    %200 = vector.shape_cast %199 : vector<1x8x16xf32> to vector<8x16xf32>
    %cst_240 = arith.constant dense<0.000000e+00> : vector<256x16xf32>
    %201 = tpu.matmul %198, %200, %cst_240 {dimension_numbers = #tpu.dot_dimension_numbers<[1], [0], [0], [1], [0, 0, 1, 1], [], []>} : vector<256x8xf32>, vector<8x16xf32>, vector<256x16xf32> -> vector<256x16xf32>
    %202 = arith.addf %196, %201 : vector<256x16xf32>
    %c0_241 = arith.constant 0 : index
    %c2_242 = arith.constant 2 : index
    %c0_243 = arith.constant 0 : index
    %203 = vector.load %arg16[%c0_241, %c2_242, %c0_243] : memref<18x18x8xf32, #tpu.memory_space<vmem>>, vector<16x16x8xf32>
    %204 = vector.shape_cast %203 : vector<16x16x8xf32> to vector<256x8xf32>
    %c2_244 = arith.constant 2 : index
    %c0_245 = arith.constant 0 : index
    %c0_246 = arith.constant 0 : index
    %205 = vector.load %arg9[%c2_244, %c0_245, %c0_246] : memref<9x8x16xf32, #tpu.memory_space<vmem>>, vector<1x8x16xf32>
    %206 = vector.shape_cast %205 : vector<1x8x16xf32> to vector<8x16xf32>
    %cst_247 = arith.constant dense<0.000000e+00> : vector<256x16xf32>
    %207 = tpu.matmul %204, %206, %cst_247 {dimension_numbers = #tpu.dot_dimension_numbers<[1], [0], [0], [1], [0, 0, 1, 1], [], []>} : vector<256x8xf32>, vector<8x16xf32>, vector<256x16xf32> -> vector<256x16xf32>
    %208 = arith.addf %202, %207 : vector<256x16xf32>
    %c1_248 = arith.constant 1 : index
    %c0_249 = arith.constant 0 : index
    %c0_250 = arith.constant 0 : index
    %209 = vector.load %arg16[%c1_248, %c0_249, %c0_250] : memref<18x18x8xf32, #tpu.memory_space<vmem>>, vector<16x16x8xf32>
    %210 = vector.shape_cast %209 : vector<16x16x8xf32> to vector<256x8xf32>
    %c3_251 = arith.constant 3 : index
    %c0_252 = arith.constant 0 : index
    %c0_253 = arith.constant 0 : index
    %211 = vector.load %arg9[%c3_251, %c0_252, %c0_253] : memref<9x8x16xf32, #tpu.memory_space<vmem>>, vector<1x8x16xf32>
    %212 = vector.shape_cast %211 : vector<1x8x16xf32> to vector<8x16xf32>
    %cst_254 = arith.constant dense<0.000000e+00> : vector<256x16xf32>
    %213 = tpu.matmul %210, %212, %cst_254 {dimension_numbers = #tpu.dot_dimension_numbers<[1], [0], [0], [1], [0, 0, 1, 1], [], []>} : vector<256x8xf32>, vector<8x16xf32>, vector<256x16xf32> -> vector<256x16xf32>
    %214 = arith.addf %208, %213 : vector<256x16xf32>
    %c1_255 = arith.constant 1 : index
    %c1_256 = arith.constant 1 : index
    %c0_257 = arith.constant 0 : index
    %215 = vector.load %arg16[%c1_255, %c1_256, %c0_257] : memref<18x18x8xf32, #tpu.memory_space<vmem>>, vector<16x16x8xf32>
    %216 = vector.shape_cast %215 : vector<16x16x8xf32> to vector<256x8xf32>
    %c4_258 = arith.constant 4 : index
    %c0_259 = arith.constant 0 : index
    %c0_260 = arith.constant 0 : index
    %217 = vector.load %arg9[%c4_258, %c0_259, %c0_260] : memref<9x8x16xf32, #tpu.memory_space<vmem>>, vector<1x8x16xf32>
    %218 = vector.shape_cast %217 : vector<1x8x16xf32> to vector<8x16xf32>
    %cst_261 = arith.constant dense<0.000000e+00> : vector<256x16xf32>
    %219 = tpu.matmul %216, %218, %cst_261 {dimension_numbers = #tpu.dot_dimension_numbers<[1], [0], [0], [1], [0, 0, 1, 1], [], []>} : vector<256x8xf32>, vector<8x16xf32>, vector<256x16xf32> -> vector<256x16xf32>
    %220 = arith.addf %214, %219 : vector<256x16xf32>
    %c1_262 = arith.constant 1 : index
    %c2_263 = arith.constant 2 : index
    %c0_264 = arith.constant 0 : index
    %221 = vector.load %arg16[%c1_262, %c2_263, %c0_264] : memref<18x18x8xf32, #tpu.memory_space<vmem>>, vector<16x16x8xf32>
    %222 = vector.shape_cast %221 : vector<16x16x8xf32> to vector<256x8xf32>
    %c5_265 = arith.constant 5 : index
    %c0_266 = arith.constant 0 : index
    %c0_267 = arith.constant 0 : index
    %223 = vector.load %arg9[%c5_265, %c0_266, %c0_267] : memref<9x8x16xf32, #tpu.memory_space<vmem>>, vector<1x8x16xf32>
    %224 = vector.shape_cast %223 : vector<1x8x16xf32> to vector<8x16xf32>
    %cst_268 = arith.constant dense<0.000000e+00> : vector<256x16xf32>
    %225 = tpu.matmul %222, %224, %cst_268 {dimension_numbers = #tpu.dot_dimension_numbers<[1], [0], [0], [1], [0, 0, 1, 1], [], []>} : vector<256x8xf32>, vector<8x16xf32>, vector<256x16xf32> -> vector<256x16xf32>
    %226 = arith.addf %220, %225 : vector<256x16xf32>
    %c2_269 = arith.constant 2 : index
    %c0_270 = arith.constant 0 : index
    %c0_271 = arith.constant 0 : index
    %227 = vector.load %arg16[%c2_269, %c0_270, %c0_271] : memref<18x18x8xf32, #tpu.memory_space<vmem>>, vector<16x16x8xf32>
    %228 = vector.shape_cast %227 : vector<16x16x8xf32> to vector<256x8xf32>
    %c6_272 = arith.constant 6 : index
    %c0_273 = arith.constant 0 : index
    %c0_274 = arith.constant 0 : index
    %229 = vector.load %arg9[%c6_272, %c0_273, %c0_274] : memref<9x8x16xf32, #tpu.memory_space<vmem>>, vector<1x8x16xf32>
    %230 = vector.shape_cast %229 : vector<1x8x16xf32> to vector<8x16xf32>
    %cst_275 = arith.constant dense<0.000000e+00> : vector<256x16xf32>
    %231 = tpu.matmul %228, %230, %cst_275 {dimension_numbers = #tpu.dot_dimension_numbers<[1], [0], [0], [1], [0, 0, 1, 1], [], []>} : vector<256x8xf32>, vector<8x16xf32>, vector<256x16xf32> -> vector<256x16xf32>
    %232 = arith.addf %226, %231 : vector<256x16xf32>
    %c2_276 = arith.constant 2 : index
    %c1_277 = arith.constant 1 : index
    %c0_278 = arith.constant 0 : index
    %233 = vector.load %arg16[%c2_276, %c1_277, %c0_278] : memref<18x18x8xf32, #tpu.memory_space<vmem>>, vector<16x16x8xf32>
    %234 = vector.shape_cast %233 : vector<16x16x8xf32> to vector<256x8xf32>
    %c7_279 = arith.constant 7 : index
    %c0_280 = arith.constant 0 : index
    %c0_281 = arith.constant 0 : index
    %235 = vector.load %arg9[%c7_279, %c0_280, %c0_281] : memref<9x8x16xf32, #tpu.memory_space<vmem>>, vector<1x8x16xf32>
    %236 = vector.shape_cast %235 : vector<1x8x16xf32> to vector<8x16xf32>
    %cst_282 = arith.constant dense<0.000000e+00> : vector<256x16xf32>
    %237 = tpu.matmul %234, %236, %cst_282 {dimension_numbers = #tpu.dot_dimension_numbers<[1], [0], [0], [1], [0, 0, 1, 1], [], []>} : vector<256x8xf32>, vector<8x16xf32>, vector<256x16xf32> -> vector<256x16xf32>
    %238 = arith.addf %232, %237 : vector<256x16xf32>
    %c2_283 = arith.constant 2 : index
    %c2_284 = arith.constant 2 : index
    %c0_285 = arith.constant 0 : index
    %239 = vector.load %arg16[%c2_283, %c2_284, %c0_285] : memref<18x18x8xf32, #tpu.memory_space<vmem>>, vector<16x16x8xf32>
    %240 = vector.shape_cast %239 : vector<16x16x8xf32> to vector<256x8xf32>
    %c8_286 = arith.constant 8 : index
    %c0_287 = arith.constant 0 : index
    %c0_288 = arith.constant 0 : index
    %241 = vector.load %arg9[%c8_286, %c0_287, %c0_288] : memref<9x8x16xf32, #tpu.memory_space<vmem>>, vector<1x8x16xf32>
    %242 = vector.shape_cast %241 : vector<1x8x16xf32> to vector<8x16xf32>
    %cst_289 = arith.constant dense<0.000000e+00> : vector<256x16xf32>
    %243 = tpu.matmul %240, %242, %cst_289 {dimension_numbers = #tpu.dot_dimension_numbers<[1], [0], [0], [1], [0, 0, 1, 1], [], []>} : vector<256x8xf32>, vector<8x16xf32>, vector<256x16xf32> -> vector<256x16xf32>
    %244 = arith.addf %238, %243 : vector<256x16xf32>
    %c0_290 = arith.constant 0 : index
    %c0_291 = arith.constant 0 : index
    %245 = vector.load %arg10[%c0_290, %c0_291] : memref<1x16xf32, #tpu.memory_space<vmem>>, vector<1x16xf32>
    %246 = vector.broadcast %245 : vector<1x16xf32> to vector<256x16xf32>
    %247 = arith.addf %244, %246 : vector<256x16xf32>
    %248 = vector.shape_cast %247 : vector<256x16xf32> to vector<16x16x16xf32>
    %cst_292 = arith.constant 0xFF800000 : f32
    %249 = vector.broadcast %cst_292 : f32 to vector<18x18x16xf32>
    %c0_293 = arith.constant 0 : index
    %c0_294 = arith.constant 0 : index
    %c0_295 = arith.constant 0 : index
    %250 = vector.load %arg17[%c0_293, %c0_294, %c0_295] : memref<18x18x16xf32, #tpu.memory_space<vmem>>, vector<18x18x16xf32>
    tpu.vector_store %arg17[%c0_293, %c0_294, %c0_295], %249 {strides = array<i32>} : memref<18x18x16xf32, #tpu.memory_space<vmem>>, vector<18x18x16xf32>,
    %c1_296 = arith.constant 1 : index
    %c1_297 = arith.constant 1 : index
    %c0_298 = arith.constant 0 : index
    %251 = vector.load %arg17[%c1_296, %c1_297, %c0_298] : memref<18x18x16xf32, #tpu.memory_space<vmem>>, vector<16x16x16xf32>
    tpu.vector_store %arg17[%c1_296, %c1_297, %c0_298], %248 {strides = array<i32>} : memref<18x18x16xf32, #tpu.memory_space<vmem>>, vector<16x16x16xf32>,
    %c1_299 = arith.constant 1 : index
    %c1_300 = arith.constant 1 : index
    %c0_301 = arith.constant 0 : index
    %252 = vector.load %arg17[%c1_299, %c1_300, %c0_301] : memref<18x18x16xf32, #tpu.memory_space<vmem>>, vector<16x16x16xf32>
    %c0_302 = arith.constant 0 : index
    %c0_303 = arith.constant 0 : index
    %c0_304 = arith.constant 0 : index
    %253 = vector.load %arg17[%c0_302, %c0_303, %c0_304] : memref<18x18x16xf32, #tpu.memory_space<vmem>>, vector<16x16x16xf32>
    %254 = arith.maximumf %252, %253 : vector<16x16x16xf32>
    %c0_305 = arith.constant 0 : index
    %c1_306 = arith.constant 1 : index
    %c0_307 = arith.constant 0 : index
    %255 = vector.load %arg17[%c0_305, %c1_306, %c0_307] : memref<18x18x16xf32, #tpu.memory_space<vmem>>, vector<16x16x16xf32>
    %256 = arith.maximumf %254, %255 : vector<16x16x16xf32>
    %c0_308 = arith.constant 0 : index
    %c2_309 = arith.constant 2 : index
    %c0_310 = arith.constant 0 : index
    %257 = vector.load %arg17[%c0_308, %c2_309, %c0_310] : memref<18x18x16xf32, #tpu.memory_space<vmem>>, vector<16x16x16xf32>
    %258 = arith.maximumf %256, %257 : vector<16x16x16xf32>
    %c1_311 = arith.constant 1 : index
    %c0_312 = arith.constant 0 : index
    %c0_313 = arith.constant 0 : index
    %259 = vector.load %arg17[%c1_311, %c0_312, %c0_313] : memref<18x18x16xf32, #tpu.memory_space<vmem>>, vector<16x16x16xf32>
    %260 = arith.maximumf %258, %259 : vector<16x16x16xf32>
    %c1_314 = arith.constant 1 : index
    %c2_315 = arith.constant 2 : index
    %c0_316 = arith.constant 0 : index
    %261 = vector.load %arg17[%c1_314, %c2_315, %c0_316] : memref<18x18x16xf32, #tpu.memory_space<vmem>>, vector<16x16x16xf32>
    %262 = arith.maximumf %260, %261 : vector<16x16x16xf32>
    %c2_317 = arith.constant 2 : index
    %c0_318 = arith.constant 0 : index
    %c0_319 = arith.constant 0 : index
    %263 = vector.load %arg17[%c2_317, %c0_318, %c0_319] : memref<18x18x16xf32, #tpu.memory_space<vmem>>, vector<16x16x16xf32>
    %264 = arith.maximumf %262, %263 : vector<16x16x16xf32>
    %c2_320 = arith.constant 2 : index
    %c1_321 = arith.constant 1 : index
    %c0_322 = arith.constant 0 : index
    %265 = vector.load %arg17[%c2_320, %c1_321, %c0_322] : memref<18x18x16xf32, #tpu.memory_space<vmem>>, vector<16x16x16xf32>
    %266 = arith.maximumf %264, %265 : vector<16x16x16xf32>
    %c2_323 = arith.constant 2 : index
    %c2_324 = arith.constant 2 : index
    %c0_325 = arith.constant 0 : index
    %267 = vector.load %arg17[%c2_323, %c2_324, %c0_325] : memref<18x18x16xf32, #tpu.memory_space<vmem>>, vector<16x16x16xf32>
    %268 = arith.maximumf %266, %267 : vector<16x16x16xf32>
    %c0_326 = arith.constant 0 : index
    %c0_327 = arith.constant 0 : index
    %c0_328 = arith.constant 0 : index
    %c0_329 = arith.constant 0 : index
    %269 = vector.load %arg11[%c0_326, %c0_327, %c0_328, %c0_329] : memref<1x16x16x16xf32, #tpu.memory_space<vmem>>, vector<1x16x16x16xf32>
    %270 = vector.shape_cast %269 : vector<1x16x16x16xf32> to vector<16x16x16xf32>
    %271 = arith.addf %268, %270 : vector<16x16x16xf32>
    %272 = vector.shape_cast %271 : vector<16x16x16xf32> to vector<1x16x16x16xf32>
    %c0_330 = arith.constant 0 : index
    %c0_331 = arith.constant 0 : index
    %c0_332 = arith.constant 0 : index
    %c0_333 = arith.constant 0 : index
    %273 = vector.load %arg12[%c0_330, %c0_331, %c0_332, %c0_333] : memref<1x16x16x16xf32, #tpu.memory_space<vmem>>, vector<1x16x16x16xf32>
    tpu.vector_store %arg12[%c0_330, %c0_331, %c0_332, %c0_333], %272 {strides = array<i32>} : memref<1x16x16x16xf32, #tpu.memory_space<vmem>>, vector<1x16x16x16xf32>,
    return
  }
  func.func @transform_0(%arg0: i32) -> (i32, i32, i32, i32) {
    %c0_i32 = arith.constant 0 : i32
    %c0_i32_0 = arith.constant 0 : i32
    %c0_i32_1 = arith.constant 0 : i32
    %c0_i32_2 = arith.constant 0 : i32
    return %arg0, %c0_i32, %c0_i32_0, %c0_i32_1 : i32, i32, i32, i32
  }
  func.func @transform_1(%arg0: i32) -> (i32, i32, i32, i32) {
    %c0_i32 = arith.constant 0 : i32
    %c0_i32_0 = arith.constant 0 : i32
    %c0_i32_1 = arith.constant 0 : i32
    %c0_i32_2 = arith.constant 0 : i32
    return %arg0, %c0_i32, %c0_i32_0, %c0_i32_1 : i32, i32, i32, i32
  }
  func.func @transform_2(%arg0: i32) -> (i32, i32, i32) {
    %c0_i32 = arith.constant 0 : i32
    %c0_i32_0 = arith.constant 0 : i32
    %c0_i32_1 = arith.constant 0 : i32
    %c0_i32_2 = arith.constant 0 : i32
    return %c0_i32, %c0_i32_0, %c0_i32_1 : i32, i32, i32
  }
  func.func @transform_3(%arg0: i32) -> (i32, i32) {
    %c0_i32 = arith.constant 0 : i32
    %c0_i32_0 = arith.constant 0 : i32
    %c0_i32_1 = arith.constant 0 : i32
    return %c0_i32, %c0_i32_0 : i32, i32
  }
  func.func @transform_4(%arg0: i32) -> (i32, i32, i32) {
    %c0_i32 = arith.constant 0 : i32
    %c0_i32_0 = arith.constant 0 : i32
    %c0_i32_1 = arith.constant 0 : i32
    %c0_i32_2 = arith.constant 0 : i32
    return %c0_i32, %c0_i32_0, %c0_i32_1 : i32, i32, i32
  }
  func.func @transform_5(%arg0: i32) -> (i32, i32) {
    %c0_i32 = arith.constant 0 : i32
    %c0_i32_0 = arith.constant 0 : i32
    %c0_i32_1 = arith.constant 0 : i32
    return %c0_i32, %c0_i32_0 : i32, i32
  }
  func.func @transform_6(%arg0: i32) -> (i32, i32, i32) {
    %c0_i32 = arith.constant 0 : i32
    %c0_i32_0 = arith.constant 0 : i32
    %c0_i32_1 = arith.constant 0 : i32
    %c0_i32_2 = arith.constant 0 : i32
    return %c0_i32, %c0_i32_0, %c0_i32_1 : i32, i32, i32
  }
  func.func @transform_7(%arg0: i32) -> (i32, i32) {
    %c0_i32 = arith.constant 0 : i32
    %c0_i32_0 = arith.constant 0 : i32
    %c0_i32_1 = arith.constant 0 : i32
    return %c0_i32, %c0_i32_0 : i32, i32
  }
  func.func @transform_8(%arg0: i32) -> (i32, i32, i32) {
    %c0_i32 = arith.constant 0 : i32
    %c0_i32_0 = arith.constant 0 : i32
    %c0_i32_1 = arith.constant 0 : i32
    %c0_i32_2 = arith.constant 0 : i32
    return %c0_i32, %c0_i32_0, %c0_i32_1 : i32, i32, i32
  }
  func.func @transform_9(%arg0: i32) -> (i32, i32) {
    %c0_i32 = arith.constant 0 : i32
    %c0_i32_0 = arith.constant 0 : i32
    %c0_i32_1 = arith.constant 0 : i32
    return %c0_i32, %c0_i32_0 : i32, i32
  }
  func.func @transform_10(%arg0: i32) -> (i32, i32, i32, i32) {
    %c0_i32 = arith.constant 0 : i32
    %c0_i32_0 = arith.constant 0 : i32
    %c0_i32_1 = arith.constant 0 : i32
    %c0_i32_2 = arith.constant 0 : i32
    return %arg0, %c0_i32, %c0_i32_0, %c0_i32_1 : i32, i32, i32, i32
  }
  func.func @transform_11(%arg0: i32) -> (i32, i32, i32, i32) {
    %c0_i32 = arith.constant 0 : i32
    %c0_i32_0 = arith.constant 0 : i32
    %c0_i32_1 = arith.constant 0 : i32
    %c0_i32_2 = arith.constant 0 : i32
    return %arg0, %c0_i32, %c0_i32_0, %c0_i32_1 : i32, i32, i32, i32
  }
}

</mosaic_0001>

<bundles_post_ra>
// kernel: block_forward.1
= control target key start
LH: loop header
LB: loop body
LE: loop exit
PB: predicated region body
PF: predicated region fallthrough
CT: control target
= control target key end

     0   :  { %s12929_s17 = smov 0   ;;  %s18532_s0 = inlined_call_operand.vmem [shape: f32[2,16,16,4], index: 0, kind: input, shape index: {}]   ;;  %s18533_s1 = inlined_call_operand.vmem [shape: f32[2,16,16,4], index: 1, kind: input, shape index: {}]   ;;  %s18534_s2 = inlined_call_operand.vmem [shape: f32[9,4,16], index: 2, kind: input, shape index: {}]   ;;  %s18535_s3 = inlined_call_operand.vmem [shape: f32[1,16], index: 3, kind: input, shape index: {}]   ;;  %s18536_s4 = inlined_call_operand.vmem [shape: f32[9,4,8], index: 4, kind: input, shape index: {}]   ;;  %s18537_s5 = inlined_call_operand.vmem [shape: f32[1,8], index: 5, kind: input, shape index: {}]   ;;  %s18538_s6 = inlined_call_operand.vmem [shape: f32[9,8,8], index: 6, kind: input, shape index: {}]   ;;  %s18539_s7 = inlined_call_operand.vmem [shape: f32[1,8], index: 7, kind: input, shape index: {}]   ;;  %s18540_s8 = inlined_call_operand.vmem [shape: f32[9,8,16], index: 8, kind: input, shape index: {}]   ;;  %s18541_s9 = inlined_call_operand.vmem [shape: f32[1,16], index: 9, kind: input, shape index: {}]   ;;  %s18542_s10 = inlined_call_operand.vmem [shape: f32[2,16,16,16], index: 10, kind: output, shape index: {0}]   ;;  %s18543_s11 = inlined_call_operand.vmem [shape: f32[2,16,16,16], index: 11, kind: output, shape index: {1}]  }
   0x1 LB: > { %s11605_s18 = sadd.s32 4294967295, %s12865_s17   ;;  %p11609_p0 = scmp.ge.s32.totalorder %s12865_s17, 1  ;;  %s12865_s17 = sphi %s12929_s17, %s22_s17  }
   0x2   : > { %p350_p1 = scmp.lt.s32.totalorder %s12865_s17, 3 }
   0x4   : > { %p351_p2 = pnand %p11609_p0, %p350_p1 }
   0x6   : > { %354 = sbr.rel (%p351_p2) target bundleno = 2851 (0xb23), region = 60 }
   0xb   : > { %v11618_v0 = vld [vmem:[%s18534_s2 + $0x4] sm:$0xf]  ;;  %vm704_vm0 = vcmask 1043456   ;;  %v573_v1 = vld [vmem:[%s18534_s2] sm:$0xf]  ;;  %vm452_vm1 = vcmask 31744  }
   0xc   : > { %11619 = vmatpush.msk.msra.mxu0 %vm704_vm0, %v11618_v0  ;;  %11652 = vmatpush.msk.msra.mxu1 %vm704_vm0, %v573_v1  ;;  %v11685_v2 = vld [vmem:[%s18534_s2 + $0x8] sm:$0xf]  ;;  %v11719_v3 = vld [vmem:[%s18534_s2 + $0xc] sm:$0xf]  ;;  %v18544_v4 = vmov 0.0   ;;  %p400_p3 = scmp.lt.s32.totalorder %s11605_s18, 1 }
   0xd   : > { %11686 = vmatpush.msk.msra.mxu2 %vm704_vm0, %v11685_v2  ;;  %453 = vst.msk [vmem:[#allocation2] sm:$0xff] %vm452_vm1, %v18544_v4  ;;  %11720 = vmatpush.msk.msra.mxu3 %vm704_vm0, %v11719_v3  ;;  %v11753_v8 = vld [vmem:[%s18534_s2 + $0x10] sm:$0xf]  ;;  %v11787_v9 = vld [vmem:[%s18534_s2 + $0x14] sm:$0xf]  ;;  %vm455_vm2 = vcmask 25600  }
   0xe   : > { %454 = vst.msk [vmem:[#allocation2 + $0x8] sm:$0xff] %vm452_vm1, %v18544_v4  ;;  %11754 = vmatpush.msk.msrb.mxu0 %vm704_vm0, %v11753_v8  ;;  %11788 = vmatpush.msk.msrb.mxu1 %vm704_vm0, %v11787_v9  ;;  %s19134_s18 = smov (!%p400_p3, %s11605_s18), 1  ;;  %v11821_v1 = vld [vmem:[%s18534_s2 + $0x18] sm:$0xf]  ;;  %vm3016_vm3 = vcmask 130048   ;;  %vm5674_vm4 = vcmask 64512  }
   0xf   : > { %457 = vst.msk [vmem:[#allocation2 + $0x18] sm:$0xff] %vm452_vm1, %v18544_v4  ;;  %s13097_s12 = sshll.u32 %s19134_s18, 8  ;;  %11822 = vmatpush.msk.msrb.mxu2 %vm704_vm0, %v11821_v1  ;;  %vm5677_vm5 = vcmask 58368   ;;  %vm10778_vm6 = vcmask 123904  }
  0x10   : > { %458 = vst.msk [vmem:[#allocation2 + $0x20] sm:$0xff] %vm452_vm1, %v18544_v4  ;;  %s13109_s15 = scalar_lea.vmem %s18532_s0, %s13097_s12  ;;  %s14069_s18 = scalar_lea.vmem %s18533_s1, %s13097_s12 }
  0x11   : > { %460 = vst.msk [vmem:[#allocation2 + $0x30] sm:$0xff] %vm452_vm1, %v18544_v4  ;;  %v420_v11 = vld [vmem:[%s13109_s15] sm:$0xff]  ;;  %v421_v16 = vld [vmem:[%s13109_s15 + $0x8] sm:$0xff]  ;;  %v422_v17 = vld [vmem:[%s13109_s15 + $0x10] sm:$0xff]  ;;  %s14250_s25 = scalar_lea.vmem %s18542_s10, %s13097_s12  ;;  %s18033_s16 = scalar_lea.vmem %s18543_s11, %s13097_s12 }
  0x12   : > { %461 = vst.msk [vmem:[#allocation2 + $0x38] sm:$0xff] %vm452_vm1, %v18544_v4  ;;  %v423_v18 = vld [vmem:[%s13109_s15 + $0x18] sm:$0xff]  ;;  %v424_v19 = vld [vmem:[%s13109_s15 + $0x20] sm:$0xff]  ;;  %v425_v20 = vld [vmem:[%s13109_s15 + $0x28] sm:$0xff] }
  0x13   : > { %463 = vst.msk [vmem:[#allocation2 + $0x48] sm:$0xff] %vm452_vm1, %v18544_v4  ;;  %v426_v24 = vld [vmem:[%s13109_s15 + $0x30] sm:$0xff]  ;;  %v427_v28 = vld [vmem:[%s13109_s15 + $0x38] sm:$0xff]  ;;  %v428_v32 = vld [vmem:[%s13109_s15 + $0x40] sm:$0xff] }
  0x14   : > { %464 = vst.msk [vmem:[#allocation2 + $0x50] sm:$0xff] %vm452_vm1, %v18544_v4  ;;  %v541_v5 = vld [vmem:[#allocation2] sm:$0xff]  ;;  %v429_v36 = vld [vmem:[%s13109_s15 + $0x48] sm:$0xff]  ;;  %v430_v40 = vld [vmem:[%s13109_s15 + $0x50] sm:$0xff] }
  0x15   : > { %v574_v6 = vld [vmem:[#allocation2 + $0x1] sm:$0xff]  ;;  %466 = vst.msk [vmem:[#allocation2 + $0x60] sm:$0xff] %vm452_vm1, %v18544_v4  ;;  %11653 = vmatmul.msk.f32.vlgmr.msra.gmra.mxu1 %vm452_vm1, %v541_v5  ;;  %v431_v44 = vld [vmem:[%s13109_s15 + $0x58] sm:$0xff]  ;;  %v434_v56 = vld [vmem:[%s13109_s15 + $0x70] sm:$0xff] }
  0x16   : > { %v1033_v7 = vld [vmem:[#allocation2 + $0x2] sm:$0xff]  ;;  %11620 = vmatmul.msk.f32.vlgmr.msra.gmra.mxu0 %vm452_vm1, %v574_v6  ;;  %467 = vst.msk [vmem:[#allocation2 + $0x68] sm:$0xff] %vm452_vm1, %v18544_v4  ;;  %v435_v60 = vld [vmem:[%s13109_s15 + $0x78] sm:$0xff] }
  0x17   : > { %11687 = vmatmul.msk.f32.vlgmr.msra.gmra.mxu2 %vm452_vm1, %v1033_v7  ;;  %469 = vst.msk [vmem:[#allocation2 + $0x78] sm:$0xff] %vm452_vm1, %v18544_v4  ;;  %v542_v10 = vld [vmem:[#allocation2 + $0x8] sm:$0xff]  ;;  %v432_v48 = vld [vmem:[%s13109_s15 + $0x60] sm:$0xff] }
  0x18   : > { %470 = vst.msk [vmem:[#allocation2 + $0x80] sm:$0xff] %vm452_vm1, %v18544_v4  ;;  %v433_v52 = vld [vmem:[%s13109_s15 + $0x68] sm:$0xff]  ;;  %v436_v0 = vld [vmem:[%s13109_s15 + $0x80] sm:$0xff] }
  0x19   : > { %472 = vst.msk [vmem:[#allocation2 + $0x90] sm:$0xff] %vm452_vm1, %v18544_v4  ;;  %v437_v6 = vld [vmem:[%s13109_s15 + $0x88] sm:$0xff] }
  0x1a   : > { %473 = vst.msk [vmem:[#allocation2 + $0x98] sm:$0xff] %vm452_vm1, %v18544_v4 }
  0x1b   : > { %475 = vst.msk [vmem:[#allocation2 + $0xa8] sm:$0xff] %vm452_vm1, %v18544_v4 }
  0x1c   : > { %476 = vst.msk [vmem:[#allocation2 + $0xb0] sm:$0xff] %vm452_vm1, %v18544_v4 }
  0x1d   : > { %478 = vst.msk [vmem:[#allocation2 + $0xc0] sm:$0xff] %vm452_vm1, %v18544_v4  ;;  %11654 = vmatmul.msk.f32.gmra.mxu1 %vm452_vm1, %v542_v10  ;;  %v438_v10 = vld [vmem:[%s13109_s15 + $0x90] sm:$0xff] }
  0x1e   : > { %479 = vst.msk [vmem:[#allocation2 + $0xc8] sm:$0xff] %vm452_vm1, %v18544_v4 }
  0x1f   : > { %481 = vst.msk [vmem:[#allocation2 + $0xd8] sm:$0xff] %vm452_vm1, %v18544_v4 }
  0x20   : > { %482 = vst.msk [vmem:[#allocation2 + $0xe0] sm:$0xff] %vm452_vm1, %v18544_v4 }
  0x21   : > { %484 = vst.msk [vmem:[#allocation2 + $0xf0] sm:$0xff] %vm452_vm1, %v18544_v4 }
  0x22   : > { %485 = vst.msk [vmem:[#allocation2 + $0xf8] sm:$0xff] %vm452_vm1, %v18544_v4 }
  0x23   : > { %487 = vst.msk [vmem:[#allocation2 + $0x108] sm:$0xff] %vm452_vm1, %v18544_v4 }
  0x24   : > { %488 = vst.msk [vmem:[#allocation2 + $0x110] sm:$0xff] %vm452_vm1, %v18544_v4 }
  0x25   : > { %490 = vst.msk [vmem:[#allocation2 + $0x120] sm:$0xff] %vm452_vm1, %v18544_v4 }
  0x26   : > { %491 = vst.msk [vmem:[#allocation2 + $0x128] sm:$0xff] %vm452_vm1, %v18544_v4 }
  0x27   : > { %493 = vst.msk [vmem:[#allocation2 + $0x138] sm:$0xff] %vm452_vm1, %v18544_v4 }
  0x28   : > { %494 = vst.msk [vmem:[#allocation2 + $0x140] sm:$0xff] %vm452_vm1, %v18544_v4 }
  0x29   : > { %496 = vst.msk [vmem:[#allocation2 + $0x150] sm:$0xff] %vm452_vm1, %v18544_v4 }
  0x2a   : > { %497 = vst.msk [vmem:[#allocation2 + $0x158] sm:$0xff] %vm452_vm1, %v18544_v4 }
  0x2b   : > { %499 = vst.msk [vmem:[#allocation2 + $0x168] sm:$0xff] %vm452_vm1, %v18544_v4 }
  0x2c   : > { %500 = vst.msk [vmem:[#allocation2 + $0x170] sm:$0xff] %vm452_vm1, %v18544_v4 }
  0x2d   : > { %502 = vst.msk [vmem:[#allocation2 + $0x180] sm:$0xff] %vm452_vm1, %v18544_v4 }
  0x2e   : > { %503 = vst.msk [vmem:[#allocation2 + $0x188] sm:$0xff] %vm452_vm1, %v18544_v4 }
  0x2f   : > { %505 = vst.msk [vmem:[#allocation2 + $0x198] sm:$0xff] %vm452_vm1, %v18544_v4 }
  0x30   : > { %506 = vst.msk [vmem:[#allocation2 + $0x1a0] sm:$0xff] %vm452_vm1, %v18544_v4 }
  0x31   : > { %3081 = vst.msk [vmem:[#allocation3] sm:$0xff] %vm452_vm1, %v18544_v4 }
  0x32   : > { %3082 = vst.msk [vmem:[#allocation3 + $0x8] sm:$0xff] %vm452_vm1, %v18544_v4 }
  0x33   : > { %3084 = vst.msk [vmem:[#allocation3 + $0x18] sm:$0xff] %vm452_vm1, %v18544_v4 }
  0x34   : > { %3085 = vst.msk [vmem:[#allocation3 + $0x20] sm:$0xff] %vm452_vm1, %v18544_v4 }
  0x35   : > { %3087 = vst.msk [vmem:[#allocation3 + $0x30] sm:$0xff] %vm452_vm1, %v18544_v4 }
  0x36   : > { %3088 = vst.msk [vmem:[#allocation3 + $0x38] sm:$0xff] %vm452_vm1, %v18544_v4 }
  0x37   : > { %3090 = vst.msk [vmem:[#allocation3 + $0x48] sm:$0xff] %vm452_vm1, %v18544_v4 }
  0x38   : > { %3091 = vst.msk [vmem:[#allocation3 + $0x50] sm:$0xff] %vm452_vm1, %v18544_v4 }
  0x39   : > { %3093 = vst.msk [vmem:[#allocation3 + $0x60] sm:$0xff] %vm452_vm1, %v18544_v4 }
  0x3a   : > { %3094 = vst.msk [vmem:[#allocation3 + $0x68] sm:$0xff] %vm452_vm1, %v18544_v4 }
  0x3b   : > { %3096 = vst.msk [vmem:[#allocation3 + $0x78] sm:$0xff] %vm452_vm1, %v18544_v4 }
  0x3c   : > { %3097 = vst.msk [vmem:[#allocation3 + $0x80] sm:$0xff] %vm452_vm1, %v18544_v4 }
  0x3d   : > { %3099 = vst.msk [vmem:[#allocation3 + $0x90] sm:$0xff] %vm452_vm1, %v18544_v4 }
  0x3e   : > { %3100 = vst.msk [vmem:[#allocation3 + $0x98] sm:$0xff] %vm452_vm1, %v18544_v4 }
  0x3f   : > { %3102 = vst.msk [vmem:[#allocation3 + $0xa8] sm:$0xff] %vm452_vm1, %v18544_v4 }
  0x40   : > { %3103 = vst.msk [vmem:[#allocation3 + $0xb0] sm:$0xff] %vm452_vm1, %v18544_v4 }
  0x41   : > { %3105 = vst.msk [vmem:[#allocation3 + $0xc0] sm:$0xff] %vm452_vm1, %v18544_v4 }
  0x42   : > { %3106 = vst.msk [vmem:[#allocation3 + $0xc8] sm:$0xff] %vm452_vm1, %v18544_v4 }
  0x43   : > { %3108 = vst.msk [vmem:[#allocation3 + $0xd8] sm:$0xff] %vm452_vm1, %v18544_v4 }
  0x44   : > { %3109 = vst.msk [vmem:[#allocation3 + $0xe0] sm:$0xff] %vm452_vm1, %v18544_v4 }
  0x45   : > { %3111 = vst.msk [vmem:[#allocation3 + $0xf0] sm:$0xff] %vm452_vm1, %v18544_v4 }
  0x46   : > { %3112 = vst.msk [vmem:[#allocation3 + $0xf8] sm:$0xff] %vm452_vm1, %v18544_v4 }
  0x47   : > { %3114 = vst.msk [vmem:[#allocation3 + $0x108] sm:$0xff] %vm452_vm1, %v18544_v4 }
  0x48   : > { %3115 = vst.msk [vmem:[#allocation3 + $0x110] sm:$0xff] %vm452_vm1, %v18544_v4 }
  0x49   : > { %3117 = vst.msk [vmem:[#allocation3 + $0x120] sm:$0xff] %vm452_vm1, %v18544_v4 }
  0x4a   : > { %3118 = vst.msk [vmem:[#allocation3 + $0x128] sm:$0xff] %vm452_vm1, %v18544_v4 }
  0x4b   : > { %3120 = vst.msk [vmem:[#allocation3 + $0x138] sm:$0xff] %vm452_vm1, %v18544_v4 }
  0x4c   : > { %3121 = vst.msk [vmem:[#allocation3 + $0x140] sm:$0xff] %vm452_vm1, %v18544_v4 }
  0x4d   : > { %3123 = vst.msk [vmem:[#allocation3 + $0x150] sm:$0xff] %vm452_vm1, %v18544_v4 }
  0x4e   : > { %3124 = vst.msk [vmem:[#allocation3 + $0x158] sm:$0xff] %vm452_vm1, %v18544_v4 }
  0x4f   : > { %3126 = vst.msk [vmem:[#allocation3 + $0x168] sm:$0xff] %vm452_vm1, %v18544_v4 }
  0x50   : > { %3127 = vst.msk [vmem:[#allocation3 + $0x170] sm:$0xff] %vm452_vm1, %v18544_v4 }
  0x51   : > { %3129 = vst.msk [vmem:[#allocation3 + $0x180] sm:$0xff] %vm452_vm1, %v18544_v4 }
  0x52   : > { %3130 = vst.msk [vmem:[#allocation3 + $0x188] sm:$0xff] %vm452_vm1, %v18544_v4 }
  0x53   : > { %3132 = vst.msk [vmem:[#allocation3 + $0x198] sm:$0xff] %vm452_vm1, %v18544_v4 }
  0x54   : > { %3133 = vst.msk [vmem:[#allocation3 + $0x1a0] sm:$0xff] %vm452_vm1, %v18544_v4 }
  0x55   : > { %509 = vst.msk [vmem:[#allocation2 + $0x19] sm:$0xff] %vm452_vm1, %v420_v11 }
  0x56   : > { %456 = vst.msk [vmem:[#allocation2 + $0x10] sm:$0x3] %vm455_vm2, %v18544_v4 }
  0x57   : > { %459 = vst.msk [vmem:[#allocation2 + $0x28] sm:$0x3] %vm455_vm2, %v18544_v4 }
  0x58   : > { %462 = vst.msk [vmem:[#allocation2 + $0x40] sm:$0x3] %vm455_vm2, %v18544_v4 }
  0x59   : > { %465 = vst.msk [vmem:[#allocation2 + $0x58] sm:$0x3] %vm455_vm2, %v18544_v4 }
  0x5a   : > { %468 = vst.msk [vmem:[#allocation2 + $0x70] sm:$0x3] %vm455_vm2, %v18544_v4 }
  0x5b   : > { %471 = vst.msk [vmem:[#allocation2 + $0x88] sm:$0x3] %vm455_vm2, %v18544_v4 }
  0x5c   : > { %v1311_v12 = vld [vmem:[#allocation2 + $0x18] sm:$0xff]  ;;  %474 = vst.msk [vmem:[#allocation2 + $0xa0] sm:$0x3] %vm455_vm2, %v18544_v4 }
  0x5d   : > { %11721 = vmatmul.msk.f32.vlgmr.msra.gmra.mxu3 %vm452_vm1, %v1311_v12  ;;  %v575_v13 = vld [vmem:[#allocation2 + $0x9] sm:$0xff]  ;;  %477 = vst.msk [vmem:[#allocation2 + $0xb8] sm:$0x3] %vm455_vm2, %v18544_v4  ;;  %11655 = vmatmul.msk.f32.gmra.mxu1 %vm452_vm1, %v1311_v12  ;;  %v13155_v15 = vld [vmem:[#allocation2 + $0x19] sm:$0xff] }
  0x5e   : > { %v1034_v14 = vld [vmem:[#allocation2 + $0xa] sm:$0xff]  ;;  %11621 = vmatmul.msk.f32.gmra.mxu0 %vm452_vm1, %v575_v13  ;;  %480 = vst.msk [vmem:[#allocation2 + $0xd0] sm:$0x3] %vm455_vm2, %v18544_v4 }
  0x5f   : > { %11688 = vmatmul.msk.f32.gmra.mxu2 %vm452_vm1, %v1034_v14  ;;  %483 = vst.msk [vmem:[#allocation2 + $0xe8] sm:$0x3] %vm455_vm2, %v18544_v4 }
  0x60   : > { %486 = vst.msk [vmem:[#allocation2 + $0x100] sm:$0x3] %vm455_vm2, %v18544_v4 }
  0x61   : > { %489 = vst.msk [vmem:[#allocation2 + $0x118] sm:$0x3] %vm455_vm2, %v18544_v4 }
  0x62   : > { %492 = vst.msk [vmem:[#allocation2 + $0x130] sm:$0x3] %vm455_vm2, %v18544_v4 }
  0x63   : > { %495 = vst.msk [vmem:[#allocation2 + $0x148] sm:$0x3] %vm455_vm2, %v18544_v4 }
  0x64   : > { %498 = vst.msk [vmem:[#allocation2 + $0x160] sm:$0x3] %vm455_vm2, %v18544_v4 }
  0x65   : > { %501 = vst.msk [vmem:[#allocation2 + $0x178] sm:$0x3] %vm455_vm2, %v18544_v4 }
  0x66   : > { %504 = vst.msk [vmem:[#allocation2 + $0x190] sm:$0x3] %vm455_vm2, %v18544_v4  ;;  %11622 = vmatmul.msk.f32.gmra.mxu0 %vm452_vm1, %v13155_v15 }
  0x67   : > { %507 = vst.msk [vmem:[#allocation2 + $0x1a8] sm:$0x3] %vm455_vm2, %v18544_v4 }
  0x68   : > { %3083 = vst.msk [vmem:[#allocation3 + $0x10] sm:$0x3] %vm455_vm2, %v18544_v4 }
  0x69   : > { %3086 = vst.msk [vmem:[#allocation3 + $0x28] sm:$0x3] %vm455_vm2, %v18544_v4 }
  0x6a   : > { %3089 = vst.msk [vmem:[#allocation3 + $0x40] sm:$0x3] %vm455_vm2, %v18544_v4 }
  0x6b   : > { %3092 = vst.msk [vmem:[#allocation3 + $0x58] sm:$0x3] %vm455_vm2, %v18544_v4 }
  0x6c   : > { %3095 = vst.msk [vmem:[#allocation3 + $0x70] sm:$0x3] %vm455_vm2, %v18544_v4 }
  0x6d   : > { %3098 = vst.msk [vmem:[#allocation3 + $0x88] sm:$0x3] %vm455_vm2, %v18544_v4 }
  0x6e   : > { %3101 = vst.msk [vmem:[#allocation3 + $0xa0] sm:$0x3] %vm455_vm2, %v18544_v4 }
  0x6f   : > { %3104 = vst.msk [vmem:[#allocation3 + $0xb8] sm:$0x3] %vm455_vm2, %v18544_v4 }
  0x70   : > { %3107 = vst.msk [vmem:[#allocation3 + $0xd0] sm:$0x3] %vm455_vm2, %v18544_v4 }
  0x71   : > { %3110 = vst.msk [vmem:[#allocation3 + $0xe8] sm:$0x3] %vm455_vm2, %v18544_v4 }
  0x72   : > { %3113 = vst.msk [vmem:[#allocation3 + $0x100] sm:$0x3] %vm455_vm2, %v18544_v4 }
  0x73   : > { %3116 = vst.msk [vmem:[#allocation3 + $0x118] sm:$0x3] %vm455_vm2, %v18544_v4 }
  0x74   : > { %3119 = vst.msk [vmem:[#allocation3 + $0x130] sm:$0x3] %vm455_vm2, %v18544_v4 }
  0x75   : > { %3122 = vst.msk [vmem:[#allocation3 + $0x148] sm:$0x3] %vm455_vm2, %v18544_v4 }
  0x76   : > { %3125 = vst.msk [vmem:[#allocation3 + $0x160] sm:$0x3] %vm455_vm2, %v18544_v4 }
  0x77   : > { %3128 = vst.msk [vmem:[#allocation3 + $0x178] sm:$0x3] %vm455_vm2, %v18544_v4 }
  0x78   : > { %3131 = vst.msk [vmem:[#allocation3 + $0x190] sm:$0x3] %vm455_vm2, %v18544_v4 }
  0x79   : > { %3134 = vst.msk [vmem:[#allocation3 + $0x1a8] sm:$0x3] %vm455_vm2, %v18544_v4 }
  0x7a   : > { %510 = vst.msk [vmem:[#allocation2 + $0x21] sm:$0xff] %vm452_vm1, %v421_v16 }
  0x7b   : > { %511 = vst.msk [vmem:[#allocation2 + $0x31] sm:$0xff] %vm452_vm1, %v422_v17  ;;  %v439_v17 = vld [vmem:[%s13109_s15 + $0x98] sm:$0xff] }
  0x7c   : > { %512 = vst.msk [vmem:[#allocation2 + $0x39] sm:$0xff] %vm452_vm1, %v423_v18 }
  0x7d   : > { %513 = vst.msk [vmem:[#allocation2 + $0x49] sm:$0xff] %vm452_vm1, %v424_v19 }
  0x7e   : > { %514 = vst.msk [vmem:[#allocation2 + $0x51] sm:$0xff] %vm452_vm1, %v425_v20 }
  0x7f   : > { %515 = vst.msk [vmem:[#allocation2 + $0x61] sm:$0xff] %vm452_vm1, %v426_v24 }
  0x80   : > { %516 = vst.msk [vmem:[#allocation2 + $0x69] sm:$0xff] %vm452_vm1, %v427_v28 }
  0x81   : > { %v1312_v21 = vld [vmem:[#allocation2 + $0x20] sm:$0xff]  ;;  %517 = vst.msk [vmem:[#allocation2 + $0x79] sm:$0xff] %vm452_vm1, %v428_v32 }
  0x82   : > { %v13213_v22 = vld [vmem:[#allocation2 + $0x1a] sm:$0xff]  ;;  %11722 = vmatmul.msk.f32.gmra.mxu3 %vm452_vm1, %v1312_v21  ;;  %11656 = vmatmul.msk.f32.gmra.mxu1 %vm452_vm1, %v1312_v21  ;;  %v13225_v25 = vld [vmem:[#allocation2 + $0x30] sm:$0xff]  ;;  %v13227_v26 = vld [vmem:[#allocation2 + $0x22] sm:$0xff]  ;;  %518 = vst.msk [vmem:[#allocation2 + $0x81] sm:$0xff] %vm452_vm1, %v429_v36 }
  0x83   : > { %v13215_v23 = vld [vmem:[#allocation2 + $0x21] sm:$0xff]  ;;  %11689 = vmatmul.msk.f32.gmra.mxu2 %vm452_vm1, %v13213_v22  ;;  %v13229_v27 = vld [vmem:[#allocation2 + $0x31] sm:$0xff]  ;;  %v13245_v31 = vld [vmem:[#allocation2 + $0x39] sm:$0xff]  ;;  %519 = vst.msk [vmem:[#allocation2 + $0x91] sm:$0xff] %vm452_vm1, %v430_v40 }
  0x84   : > { %11623 = vmatmul.msk.f32.gmra.mxu0 %vm452_vm1, %v13215_v23  ;;  %v13241_v29 = vld [vmem:[#allocation2 + $0x38] sm:$0xff]  ;;  %v13257_v33 = vld [vmem:[#allocation2 + $0x48] sm:$0xff]  ;;  %520 = vst.msk [vmem:[#allocation2 + $0x99] sm:$0xff] %vm452_vm1, %v431_v44  ;;  %v440_v32 = vld [vmem:[%s13109_s15 + $0xa0] sm:$0xff] }
  0x85   : > { %v13243_v30 = vld [vmem:[#allocation2 + $0x32] sm:$0xff]  ;;  %v13259_v34 = vld [vmem:[#allocation2 + $0x3a] sm:$0xff]  ;;  %v13261_v35 = vld [vmem:[#allocation2 + $0x49] sm:$0xff]  ;;  %521 = vst.msk [vmem:[#allocation2 + $0xa9] sm:$0xff] %vm452_vm1, %v432_v48 }
  0x86   : > { %v13273_v37 = vld [vmem:[#allocation2 + $0x50] sm:$0xff]  ;;  %v13289_v41 = vld [vmem:[#allocation2 + $0x60] sm:$0xff]  ;;  %522 = vst.msk [vmem:[#allocation2 + $0xb1] sm:$0xff] %vm452_vm1, %v433_v52 }
  0x87   : > { %v13275_v38 = vld [vmem:[#allocation2 + $0x4a] sm:$0xff]  ;;  %v13291_v42 = vld [vmem:[#allocation2 + $0x52] sm:$0xff]  ;;  %v13293_v43 = vld [vmem:[#allocation2 + $0x61] sm:$0xff]  ;;  %523 = vst.msk [vmem:[#allocation2 + $0xc1] sm:$0xff] %vm452_vm1, %v434_v56 }
  0x88   : > { %v13277_v39 = vld [vmem:[#allocation2 + $0x51] sm:$0xff]  ;;  %v13305_v45 = vld [vmem:[#allocation2 + $0x68] sm:$0xff]  ;;  %v13325_v51 = vld [vmem:[#allocation2 + $0x79] sm:$0xff]  ;;  %524 = vst.msk [vmem:[#allocation2 + $0xc9] sm:$0xff] %vm452_vm1, %v435_v60 }
  0x89   : > { %v13307_v46 = vld [vmem:[#allocation2 + $0x62] sm:$0xff]  ;;  %v13321_v49 = vld [vmem:[#allocation2 + $0x78] sm:$0xff]  ;;  %v13323_v50 = vld [vmem:[#allocation2 + $0x6a] sm:$0xff]  ;;  %525 = vst.msk [vmem:[#allocation2 + $0xd9] sm:$0xff] %vm452_vm1, %v436_v0 }
  0x8a   : > { %11723 = vmatmul.msk.f32.gmra.mxu3 %vm452_vm1, %v13225_v25  ;;  %11657 = vmatmul.msk.f32.gmra.mxu1 %vm452_vm1, %v13225_v25  ;;  %v13309_v47 = vld [vmem:[#allocation2 + $0x69] sm:$0xff]  ;;  %v13337_v53 = vld [vmem:[#allocation2 + $0x80] sm:$0xff]  ;;  %v13357_v59 = vld [vmem:[#allocation2 + $0x91] sm:$0xff]  ;;  %526 = vst.msk [vmem:[#allocation2 + $0xe1] sm:$0xff] %vm452_vm1, %v437_v6 }
  0x8b   : > { %11690 = vmatmul.msk.f32.gmra.mxu2 %vm452_vm1, %v13227_v26  ;;  %v13339_v54 = vld [vmem:[#allocation2 + $0x7a] sm:$0xff]  ;;  %v13353_v57 = vld [vmem:[#allocation2 + $0x90] sm:$0xff]  ;;  %v13355_v58 = vld [vmem:[#allocation2 + $0x82] sm:$0xff]  ;;  %527 = vst.msk [vmem:[#allocation2 + $0xf1] sm:$0xff] %vm452_vm1, %v438_v10 }
  0x8c   : > { %11624 = vmatmul.msk.f32.gmra.mxu0 %vm452_vm1, %v13229_v27  ;;  %v13341_v55 = vld [vmem:[#allocation2 + $0x81] sm:$0xff]  ;;  %v13369_v61 = vld [vmem:[#allocation2 + $0x98] sm:$0xff]  ;;  %v13393_v5 = vld [vmem:[#allocation2 + $0xa9] sm:$0xff]  ;;  %528 = vst.msk [vmem:[#allocation2 + $0xf9] sm:$0xff] %vm452_vm1, %v439_v17 }
  0x8d   : > { %v13371_v62 = vld [vmem:[#allocation2 + $0x92] sm:$0xff]  ;;  %v13389_v2 = vld [vmem:[#allocation2 + $0xa8] sm:$0xff]  ;;  %v13391_v3 = vld [vmem:[#allocation2 + $0x9a] sm:$0xff]  ;;  %529 = vst.msk [vmem:[#allocation2 + $0x109] sm:$0xff] %vm452_vm1, %v440_v32 }
  0x8e   : > { %v13373_v63 = vld [vmem:[#allocation2 + $0x99] sm:$0xff]  ;;  %v13405_v7 = vld [vmem:[#allocation2 + $0xb0] sm:$0xff]  ;;  %v13429_v16 = vld [vmem:[#allocation2 + $0xc1] sm:$0xff] }
  0x8f   : > { %v13407_v8 = vld [vmem:[#allocation2 + $0xaa] sm:$0xff]  ;;  %v13425_v13 = vld [vmem:[#allocation2 + $0xc0] sm:$0xff]  ;;  %v13427_v14 = vld [vmem:[#allocation2 + $0xb2] sm:$0xff] }
  0x90   : > { %v13409_v9 = vld [vmem:[#allocation2 + $0xb1] sm:$0xff]  ;;  %v13445_v20 = vld [vmem:[#allocation2 + $0xc8] sm:$0xff]  ;;  %v13467_v52 = vld [vmem:[#allocation2 + $0xd9] sm:$0xff] }
  0x91   : > { %v13447_v21 = vld [vmem:[#allocation2 + $0xc2] sm:$0xff]  ;;  %v13463_v44 = vld [vmem:[#allocation2 + $0xd8] sm:$0xff]  ;;  %v13465_v48 = vld [vmem:[#allocation2 + $0xca] sm:$0xff]  ;;  %18685 = vst [vmem:[#allocation14_spill] sm:$0xff] %v13467_v52 }
  0x92   : > { %11724 = vmatmul.msk.f32.gmra.mxu3 %vm452_vm1, %v13241_v29  ;;  %11658 = vmatmul.msk.f32.gmra.mxu1 %vm452_vm1, %v13241_v29  ;;  %v13418_v12 = vpop.f32.mrf.mxu1  ;;  %v13449_v24 = vld [vmem:[#allocation2 + $0xc9] sm:$0xff]  ;;  %18683 = vst [vmem:[#allocation12_spill] sm:$0xff] %v13463_v44  ;;  %v13483_v1 = vld [vmem:[#allocation2 + $0xe0] sm:$0xff] }
  0x93   : > { %11691 = vmatmul.msk.f32.gmra.mxu2 %vm452_vm1, %v13243_v30  ;;  %v13416_v11 = vpop.f32.mrf.mxu0  ;;  %18679 = vst [vmem:[#allocation8_spill] sm:$0xff] %v13418_v12  ;;  %v441_v56 = vld [vmem:[%s13109_s15 + $0xa8] sm:$0xff]  ;;  %v13485_v6 = vld [vmem:[#allocation2 + $0xda] sm:$0xff] }
  0x94   : > { %11625 = vmatmul.msk.f32.gmra.mxu0 %vm452_vm1, %v13245_v31  ;;  %18678 = vst [vmem:[#allocation7_spill] sm:$0xff] %v13416_v11  ;;  %v13487_v32 = vld [vmem:[#allocation2 + $0xe1] sm:$0xff] }
  0x95   : > { %18684 = vst [vmem:[#allocation13_spill] sm:$0xff] %v13465_v48 }
  0x96   : > { %530 = vst.msk [vmem:[#allocation2 + $0x111] sm:$0xff] %vm452_vm1, %v441_v56  ;;  %v442_v56 = vld [vmem:[%s13109_s15 + $0xb0] sm:$0xff] }
  0x97   : > { %18688 = vst [vmem:[#allocation17_spill] sm:$0xff] %v13483_v1 }
  0x98   : > { %18689 = vst [vmem:[#allocation18_spill] sm:$0xff] %v13485_v6 }
  0x99   : > { %18690 = vst [vmem:[#allocation19_spill] sm:$0xff] %v13487_v32 }
  0x9a   : > { %11725 = vmatmul.msk.f32.gmra.mxu3 %vm452_vm1, %v13257_v33  ;;  %11659 = vmatmul.msk.f32.gmra.mxu1 %vm452_vm1, %v13257_v33  ;;  %v13443_v19 = vpop.f32.mrf.mxu1  ;;  %v13451_v28 = vpop.f32.mrf.mxu2  ;;  %531 = vst.msk [vmem:[#allocation2 + $0x121] sm:$0xff] %vm452_vm1, %v442_v56 }
  0x9b   : > { %11692 = vmatmul.msk.f32.gmra.mxu2 %vm452_vm1, %v13259_v34  ;;  %18681 = vst [vmem:[#allocation10_spill] sm:$0xff] %v13443_v19 }
  0x9c   : > { %11626 = vmatmul.msk.f32.gmra.mxu0 %vm452_vm1, %v13261_v35  ;;  %18682 = vst [vmem:[#allocation11_spill] sm:$0xff] %v13451_v28  ;;  %v13503_v28 = vld [vmem:[#allocation2 + $0xe2] sm:$0xff] }
  0x9d   : > { %18693 = vst [vmem:[#allocation22_spill] sm:$0xff] %v13503_v28 }
  0xa2   : > { %11726 = vmatmul.msk.f32.gmra.mxu3 %vm452_vm1, %v13273_v37  ;;  %11660 = vmatmul.msk.f32.gmra.mxu1 %vm452_vm1, %v13273_v37 }
  0xa3   : > { %11693 = vmatmul.msk.f32.gmra.mxu2 %vm452_vm1, %v13275_v38 }
  0xa4   : > { %11627 = vmatmul.msk.f32.gmra.mxu0 %vm452_vm1, %v13277_v39 }
  0xaa   : > { %11727 = vmatmul.msk.f32.gmra.mxu3 %vm452_vm1, %v13289_v41  ;;  %11661 = vmatmul.msk.f32.gmra.mxu1 %vm452_vm1, %v13289_v41 }
  0xab   : > { %11694 = vmatmul.msk.f32.gmra.mxu2 %vm452_vm1, %v13291_v42 }
  0xac   : > { %11628 = vmatmul.msk.f32.gmra.mxu0 %vm452_vm1, %v13293_v43 }
  0xb2   : > { %11728 = vmatmul.msk.f32.gmra.mxu3 %vm452_vm1, %v13305_v45  ;;  %11662 = vmatmul.msk.f32.gmra.mxu1 %vm452_vm1, %v13305_v45 }
  0xb3   : > { %11695 = vmatmul.msk.f32.gmra.mxu2 %vm452_vm1, %v13307_v46 }
  0xb4   : > { %11629 = vmatmul.msk.f32.gmra.mxu0 %vm452_vm1, %v13309_v47 }
  0xba   : > { %11729 = vmatmul.msk.f32.gmra.mxu3 %vm452_vm1, %v13321_v49  ;;  %11663 = vmatmul.msk.f32.gmra.mxu1 %vm452_vm1, %v13321_v49 }
  0xbb   : > { %11696 = vmatmul.msk.f32.gmra.mxu2 %vm452_vm1, %v13323_v50 }
  0xbc   : > { %11630 = vmatmul.msk.f32.gmra.mxu0 %vm452_vm1, %v13325_v51 }
  0xc2   : > { %11730 = vmatmul.msk.f32.gmra.mxu3 %vm452_vm1, %v13337_v53  ;;  %11664 = vmatmul.msk.f32.gmra.mxu1 %vm452_vm1, %v13337_v53 }
  0xc3   : > { %11697 = vmatmul.msk.f32.gmra.mxu2 %vm452_vm1, %v13339_v54 }
  0xc4   : > { %11631 = vmatmul.msk.f32.gmra.mxu0 %vm452_vm1, %v13341_v55 }
  0xca   : > { %11731 = vmatmul.msk.f32.gmra.mxu3 %vm452_vm1, %v13353_v57  ;;  %11665 = vmatmul.msk.f32.gmra.mxu1 %vm452_vm1, %v13353_v57 }
  0xcb   : > { %11698 = vmatmul.msk.f32.gmra.mxu2 %vm452_vm1, %v13355_v58 }
  0xcc   : > { %11632 = vmatmul.msk.f32.gmra.mxu0 %vm452_vm1, %v13357_v59 }
  0xd2   : > { %11732 = vmatmul.msk.f32.gmra.mxu3 %vm452_vm1, %v13369_v61  ;;  %11666 = vmatmul.msk.f32.gmra.mxu1 %vm452_vm1, %v13369_v61 }
  0xd3   : > { %11699 = vmatmul.msk.f32.gmra.mxu2 %vm452_vm1, %v13371_v62 }
  0xd4   : > { %11633 = vmatmul.msk.f32.gmra.mxu0 %vm452_vm1, %v13373_v63 }
  0xda   : > { %11733 = vmatmul.msk.f32.gmra.mxu3 %vm452_vm1, %v13389_v2  ;;  %11667 = vmatmul.msk.f32.gmra.mxu1 %vm452_vm1, %v13389_v2  ;;  %v943_v40 = vpop.f32.mrf.mxu1 }
  0xdb   : > { %11700 = vmatmul.msk.f32.gmra.mxu2 %vm452_vm1, %v13391_v3  ;;  %v13441_v18 = vpop.f32.mrf.mxu0 }
  0xdc   : > { %11634 = vmatmul.msk.f32.gmra.mxu0 %vm452_vm1, %v13393_v5  ;;  %18680 = vst [vmem:[#allocation9_spill] sm:$0xff] %v13441_v18 }
  0xe0   : > { %v13475_v60 = vpop.f32.mrf.mxu3 }
  0xe1   : > { %18686 = vst [vmem:[#allocation15_spill] sm:$0xff] %v13475_v60 }
  0xe2   : > { %11734 = vmatmul.msk.f32.gmra.mxu3 %vm452_vm1, %v13405_v7  ;;  %11668 = vmatmul.msk.f32.gmra.mxu1 %vm452_vm1, %v13405_v7  ;;  %v13477_v0 = vpop.f32.mrf.mxu2 }
  0xe3   : > { %11701 = vmatmul.msk.f32.gmra.mxu2 %vm452_vm1, %v13407_v8  ;;  %v731_v36 = vpop.f32.mrf.mxu0  ;;  %18687 = vst [vmem:[#allocation16_spill] sm:$0xff] %v13477_v0  ;;  %v13501_v0 = vld [vmem:[#allocation2 + $0xf0] sm:$0xff] }
  0xe4   : > { %11635 = vmatmul.msk.f32.gmra.mxu0 %vm452_vm1, %v13409_v9  ;;  %18692 = vst [vmem:[#allocation21_spill] sm:$0xff] %v13501_v0  ;;  %v944_v56 = vadd.f32 %v943_v40, %v731_v36  ;;  %v13519_v36 = vld [vmem:[#allocation2 + $0xf8] sm:$0xff] }
  0xe5   : > { %18696 = vst [vmem:[#allocation25_spill] sm:$0xff] %v13519_v36  ;;  %v13521_v40 = vld [vmem:[#allocation2 + $0xf2] sm:$0xff] }
  0xe6   : > { %18697 = vst [vmem:[#allocation26_spill] sm:$0xff] %v13521_v40 }
  0xea   : > { %11735 = vmatmul.msk.f32.gmra.mxu3 %vm452_vm1, %v13425_v13  ;;  %11669 = vmatmul.msk.f32.gmra.mxu1 %vm452_vm1, %v13425_v13 }
  0xeb   : > { %11702 = vmatmul.msk.f32.gmra.mxu2 %vm452_vm1, %v13427_v14 }
  0xec   : > { %11636 = vmatmul.msk.f32.gmra.mxu0 %vm452_vm1, %v13429_v16 }
  0xf2   : > { %11736 = vmatmul.msk.f32.gmra.mxu3 %vm452_vm1, %v13445_v20  ;;  %11670 = vmatmul.msk.f32.gmra.mxu1 %vm452_vm1, %v13445_v20 }
  0xf3   : > { %11703 = vmatmul.msk.f32.gmra.mxu2 %vm452_vm1, %v13447_v21 }
  0xf4   : > { %11637 = vmatmul.msk.f32.gmra.mxu0 %vm452_vm1, %v13449_v24 }
  0xfa   : > { %11737 = vmatmul.msk.f32.gmra.mxu3 %vm452_vm1, %v13463_v44  ;;  %11671 = vmatmul.msk.f32.gmra.mxu1 %vm452_vm1, %v13463_v44 }
  0xfb   : > { %11704 = vmatmul.msk.f32.gmra.mxu2 %vm452_vm1, %v13465_v48 }
  0xfc   : > { %11638 = vmatmul.msk.f32.gmra.mxu0 %vm452_vm1, %v13467_v52  ;;  %v13505_v52 = vld [vmem:[#allocation2 + $0xf1] sm:$0xff] }
  0xfd   : > { %18694 = vst [vmem:[#allocation23_spill] sm:$0xff] %v13505_v52 }
  0xff   : > { %v946_v17 = vpop.f32.mrf.mxu1 }
 0x101   : > { %v734_v10 = vpop.f32.mrf.mxu0 }
 0x102   : > { %11738 = vmatmul.msk.f32.gmra.mxu3 %vm452_vm1, %v13483_v1  ;;  %11672 = vmatmul.msk.f32.gmra.mxu1 %vm452_vm1, %v13483_v1  ;;  %v947_v44 = vadd.f32 %v946_v17, %v734_v10  ;;  %v13537_v10 = vld [vmem:[#allocation2 + $0x108] sm:$0xff]  ;;  %v13539_v17 = vld [vmem:[#allocation2 + $0xfa] sm:$0xff] }
 0x103   : > { %11705 = vmatmul.msk.f32.gmra.mxu2 %vm452_vm1, %v13485_v6  ;;  %v443_v6 = vld [vmem:[%s13109_s15 + $0xb8] sm:$0xff]  ;;  %18700 = vst [vmem:[#allocation29_spill] sm:$0xff] %v13537_v10 }
 0x104   : > { %11639 = vmatmul.msk.f32.gmra.mxu0 %vm452_vm1, %v13487_v32  ;;  %532 = vst.msk [vmem:[#allocation2 + $0x129] sm:$0xff] %vm452_vm1, %v443_v6  ;;  %v444_v6 = vld [vmem:[%s13109_s15 + $0xc0] sm:$0xff] }
 0x105   : > { %v13499_v4 = vpop.f32.mrf.mxu3  ;;  %533 = vst.msk [vmem:[#allocation2 + $0x139] sm:$0xff] %vm452_vm1, %v444_v6  ;;  %v445_v6 = vld [vmem:[%s13109_s15 + $0xc8] sm:$0xff] }
 0x106   : > { %18691 = vst [vmem:[#allocation20_spill] sm:$0xff] %v13499_v4  ;;  %v1189_v60 = vpop.f32.mrf.mxu2 }
 0x107   : > { %v949_v18 = vpop.f32.mrf.mxu1  ;;  %v1281_v32 = vadd.f32 %v1189_v60, %v944_v56  ;;  %18701 = vst [vmem:[#allocation30_spill] sm:$0xff] %v13539_v17 }
 0x108   : > { %534 = vst.msk [vmem:[#allocation2 + $0x141] sm:$0xff] %vm452_vm1, %v445_v6  ;;  %v446_v6 = vld [vmem:[%s13109_s15 + $0xd0] sm:$0xff] }
 0x109   : > { %v737_v19 = vpop.f32.mrf.mxu0  ;;  %535 = vst.msk [vmem:[#allocation2 + $0x151] sm:$0xff] %vm452_vm1, %v446_v6  ;;  %v447_v6 = vld [vmem:[%s13109_s15 + $0xd8] sm:$0xff] }
 0x10a   : > { %11739 = vmatmul.msk.f32.gmra.mxu3 %vm452_vm1, %v13501_v0  ;;  %11673 = vmatmul.msk.f32.gmra.mxu1 %vm452_vm1, %v13501_v0  ;;  %v950_v0 = vadd.f32 %v949_v18, %v737_v19  ;;  %v13555_v18 = vld [vmem:[#allocation2 + $0x110] sm:$0xff]  ;;  %536 = vst.msk [vmem:[#allocation2 + $0x159] sm:$0xff] %vm452_vm1, %v447_v6  ;;  %v448_v6 = vld [vmem:[%s13109_s15 + $0xe0] sm:$0xff] }
 0x10b   : > { %11706 = vmatmul.msk.f32.gmra.mxu2 %vm452_vm1, %v13503_v28  ;;  %v13523_v28 = vld [vmem:[#allocation2 + $0xf9] sm:$0xff]  ;;  %18704 = vst [vmem:[#allocation33_spill] sm:$0xff] %v13555_v18  ;;  %v13557_v19 = vld [vmem:[#allocation2 + $0x10a] sm:$0xff] }
 0x10c   : > { %11640 = vmatmul.msk.f32.gmra.mxu0 %vm452_vm1, %v13505_v52  ;;  %18698 = vst [vmem:[#allocation27_spill] sm:$0xff] %v13523_v28 }
 0x10d   : > { %v1467_v4 = vpop.f32.mrf.mxu3  ;;  %18705 = vst [vmem:[#allocation34_spill] sm:$0xff] %v13557_v19 }
 0x10e   : > { %v1192_v1 = vpop.f32.mrf.mxu2  ;;  %v13517_v12 = vadd.f32 %v1467_v4, %v1281_v32  ;;  %537 = vst.msk [vmem:[#allocation2 + $0x169] sm:$0xff] %vm452_vm1, %v448_v6  ;;  %v449_v6 = vld [vmem:[%s13109_s15 + $0xe8] sm:$0xff] }
 0x10f   : > { %v952_v48 = vpop.f32.mrf.mxu1  ;;  %v1282_v4 = vadd.f32 %v1192_v1, %v947_v44  ;;  %538 = vst.msk [vmem:[#allocation2 + $0x171] sm:$0xff] %vm452_vm1, %v449_v6  ;;  %v450_v6 = vld [vmem:[%s13109_s15 + $0xf0] sm:$0xff] }
 0x110   : > { %18695 = vst [vmem:[#allocation24_spill] sm:$0xff] %v13517_v12 }
 0x111   : > { %v740_v11 = vpop.f32.mrf.mxu0  ;;  %539 = vst.msk [vmem:[#allocation2 + $0x181] sm:$0xff] %vm452_vm1, %v450_v6  ;;  %v451_v6 = vld [vmem:[%s13109_s15 + $0xf8] sm:$0xff] }
 0x112   : > { %11740 = vmatmul.msk.f32.gmra.mxu3 %vm452_vm1, %v13519_v36  ;;  %11674 = vmatmul.msk.f32.gmra.mxu1 %vm452_vm1, %v13519_v36  ;;  %v953_v36 = vadd.f32 %v952_v48, %v740_v11  ;;  %v13573_v11 = vld [vmem:[#allocation2 + $0x120] sm:$0xff]  ;;  %v13575_v48 = vld [vmem:[#allocation2 + $0x112] sm:$0xff]  ;;  %540 = vst.msk [vmem:[#allocation2 + $0x189] sm:$0xff] %vm452_vm1, %v451_v6 }
 0x113   : > { %11707 = vmatmul.msk.f32.gmra.mxu2 %vm452_vm1, %v13521_v40  ;;  %v13541_v40 = vld [vmem:[#allocation2 + $0x109] sm:$0xff]  ;;  %18708 = vst [vmem:[#allocation37_spill] sm:$0xff] %v13573_v11  ;;  %v13671_v6 = vld [vmem:[#allocation2 + $0x159] sm:$0xff] }
 0x114   : > { %11641 = vmatmul.msk.f32.gmra.mxu0 %vm452_vm1, %v13523_v28  ;;  %18702 = vst [vmem:[#allocation31_spill] sm:$0xff] %v13541_v40 }
 0x115   : > { %v1470_v60 = vpop.f32.mrf.mxu3  ;;  %18709 = vst [vmem:[#allocation38_spill] sm:$0xff] %v13575_v48 }
 0x116   : > { %v1195_v32 = vpop.f32.mrf.mxu2  ;;  %v13535_v56 = vadd.f32 %v1470_v60, %v1282_v4  ;;  %18729 = vst [vmem:[#allocation58_spill] sm:$0xff] %v13671_v6 }
 0x117   : > { %v955_v12 = vpop.f32.mrf.mxu1  ;;  %v1283_v44 = vadd.f32 %v1195_v32, %v950_v0 }
 0x118   : > { %18699 = vst [vmem:[#allocation28_spill] sm:$0xff] %v13535_v56 }
 0x119   : > { %v743_v52 = vpop.f32.mrf.mxu0 }
 0x11a   : > { %11741 = vmatmul.msk.f32.gmra.mxu3 %vm452_vm1, %v13537_v10  ;;  %11675 = vmatmul.msk.f32.gmra.mxu1 %vm452_vm1, %v13537_v10  ;;  %v956_v10 = vadd.f32 %v955_v12, %v743_v52  ;;  %v13591_v12 = vld [vmem:[#allocation2 + $0x128] sm:$0xff] }
 0x11b   : > { %11708 = vmatmul.msk.f32.gmra.mxu2 %vm452_vm1, %v13539_v17  ;;  %v13559_v17 = vld [vmem:[#allocation2 + $0x111] sm:$0xff]  ;;  %18712 = vst [vmem:[#allocation41_spill] sm:$0xff] %v13591_v12  ;;  %v13593_v52 = vld [vmem:[#allocation2 + $0x122] sm:$0xff] }
 0x11c   : > { %11642 = vmatmul.msk.f32.gmra.mxu0 %vm452_vm1, %v13541_v40  ;;  %18706 = vst [vmem:[#allocation35_spill] sm:$0xff] %v13559_v17 }
 0x11d   : > { %v1473_v1 = vpop.f32.mrf.mxu3  ;;  %18713 = vst [vmem:[#allocation42_spill] sm:$0xff] %v13593_v52 }
 0x11e   : > { %v1198_v4 = vpop.f32.mrf.mxu2  ;;  %v13553_v60 = vadd.f32 %v1473_v1, %v1283_v44 }
 0x11f   : > { %v958_v56 = vpop.f32.mrf.mxu1  ;;  %v1284_v0 = vadd.f32 %v1198_v4, %v953_v36 }
 0x120   : > { %18703 = vst [vmem:[#allocation32_spill] sm:$0xff] %v13553_v60 }
 0x121   : > { %v746_v28 = vpop.f32.mrf.mxu0 }
 0x122   : > { %11742 = vmatmul.msk.f32.gmra.mxu3 %vm452_vm1, %v13555_v18  ;;  %11676 = vmatmul.msk.f32.gmra.mxu1 %vm452_vm1, %v13555_v18  ;;  %v959_v18 = vadd.f32 %v958_v56, %v746_v28  ;;  %v13609_v28 = vld [vmem:[#allocation2 + $0x138] sm:$0xff]  ;;  %v13611_v56 = vld [vmem:[#allocation2 + $0x12a] sm:$0xff] }
 0x123   : > { %11709 = vmatmul.msk.f32.gmra.mxu2 %vm452_vm1, %v13557_v19  ;;  %v13577_v19 = vld [vmem:[#allocation2 + $0x121] sm:$0xff]  ;;  %18716 = vst [vmem:[#allocation45_spill] sm:$0xff] %v13609_v28 }
 0x124   : > { %11643 = vmatmul.msk.f32.gmra.mxu0 %vm452_vm1, %v13559_v17  ;;  %18710 = vst [vmem:[#allocation39_spill] sm:$0xff] %v13577_v19 }
 0x125   : > { %v1476_v32 = vpop.f32.mrf.mxu3  ;;  %18717 = vst [vmem:[#allocation46_spill] sm:$0xff] %v13611_v56 }
 0x126   : > { %v1201_v44 = vpop.f32.mrf.mxu2  ;;  %v13571_v1 = vadd.f32 %v1476_v32, %v1284_v0 }
 0x127   : > { %v961_v60 = vpop.f32.mrf.mxu1  ;;  %v1285_v36 = vadd.f32 %v1201_v44, %v956_v10 }
 0x128   : > { %18707 = vst [vmem:[#allocation36_spill] sm:$0xff] %v13571_v1 }
 0x129   : > { %v749_v40 = vpop.f32.mrf.mxu0 }
 0x12a   : > { %11743 = vmatmul.msk.f32.gmra.mxu3 %vm452_vm1, %v13573_v11  ;;  %11677 = vmatmul.msk.f32.gmra.mxu1 %vm452_vm1, %v13573_v11  ;;  %v962_v11 = vadd.f32 %v961_v60, %v749_v40  ;;  %v13627_v40 = vld [vmem:[#allocation2 + $0x140] sm:$0xff] }
 0x12b   : > { %11710 = vmatmul.msk.f32.gmra.mxu2 %vm452_vm1, %v13575_v48  ;;  %v13595_v48 = vld [vmem:[#allocation2 + $0x129] sm:$0xff]  ;;  %18720 = vst [vmem:[#allocation49_spill] sm:$0xff] %v13627_v40  ;;  %v13629_v60 = vld [vmem:[#allocation2 + $0x13a] sm:$0xff] }
 0x12c   : > { %11644 = vmatmul.msk.f32.gmra.mxu0 %vm452_vm1, %v13577_v19  ;;  %18714 = vst [vmem:[#allocation43_spill] sm:$0xff] %v13595_v48 }
 0x12d   : > { %v1479_v4 = vpop.f32.mrf.mxu3  ;;  %18721 = vst [vmem:[#allocation50_spill] sm:$0xff] %v13629_v60 }
 0x12e   : > { %v1204_v0 = vpop.f32.mrf.mxu2  ;;  %v13589_v32 = vadd.f32 %v1479_v4, %v1285_v36 }
 0x12f   : > { %v964_v1 = vpop.f32.mrf.mxu1  ;;  %v1286_v10 = vadd.f32 %v1204_v0, %v959_v18 }
 0x130   : > { %18711 = vst [vmem:[#allocation40_spill] sm:$0xff] %v13589_v32 }
 0x131   : > { %v752_v17 = vpop.f32.mrf.mxu0 }
 0x132   : > { %11744 = vmatmul.msk.f32.gmra.mxu3 %vm452_vm1, %v13591_v12  ;;  %11678 = vmatmul.msk.f32.gmra.mxu1 %vm452_vm1, %v13591_v12  ;;  %v965_v12 = vadd.f32 %v964_v1, %v752_v17  ;;  %v13645_v17 = vld [vmem:[#allocation2 + $0x150] sm:$0xff]  ;;  %v13647_v1 = vld [vmem:[#allocation2 + $0x142] sm:$0xff] }
 0x133   : > { %11711 = vmatmul.msk.f32.gmra.mxu2 %vm452_vm1, %v13593_v52  ;;  %v13613_v52 = vld [vmem:[#allocation2 + $0x139] sm:$0xff]  ;;  %18724 = vst [vmem:[#allocation53_spill] sm:$0xff] %v13647_v1 }
 0x134   : > { %11645 = vmatmul.msk.f32.gmra.mxu0 %vm452_vm1, %v13595_v48  ;;  %18718 = vst [vmem:[#allocation47_spill] sm:$0xff] %v13613_v52 }
 0x135   : > { %v1482_v44 = vpop.f32.mrf.mxu3 }
 0x136   : > { %v1207_v36 = vpop.f32.mrf.mxu2  ;;  %v13607_v4 = vadd.f32 %v1482_v44, %v1286_v10 }
 0x137   : > { %v967_v32 = vpop.f32.mrf.mxu1  ;;  %v1287_v18 = vadd.f32 %v1207_v36, %v962_v11 }
 0x138   : > { %18715 = vst [vmem:[#allocation44_spill] sm:$0xff] %v13607_v4 }
 0x139   : > { %v755_v19 = vpop.f32.mrf.mxu0 }
 0x13a   : > { %11745 = vmatmul.msk.f32.gmra.mxu3 %vm452_vm1, %v13609_v28  ;;  %11679 = vmatmul.msk.f32.gmra.mxu1 %vm452_vm1, %v13609_v28  ;;  %v968_v28 = vadd.f32 %v967_v32, %v755_v19 }
 0x13b   : > { %11712 = vmatmul.msk.f32.gmra.mxu2 %vm452_vm1, %v13611_v56  ;;  %v13631_v56 = vld [vmem:[#allocation2 + $0x141] sm:$0xff] }
 0x13c   : > { %11646 = vmatmul.msk.f32.gmra.mxu0 %vm452_vm1, %v13613_v52  ;;  %18722 = vst [vmem:[#allocation51_spill] sm:$0xff] %v13631_v56 }
 0x13d   : > { %v1485_v0 = vpop.f32.mrf.mxu3 }
 0x13e   : > { %v1210_v10 = vpop.f32.mrf.mxu2  ;;  %v13625_v44 = vadd.f32 %v1485_v0, %v1287_v18 }
 0x13f   : > { %v970_v4 = vpop.f32.mrf.mxu1  ;;  %v1288_v11 = vadd.f32 %v1210_v10, %v965_v12  ;;  %v11855_v12 = vld [vmem:[%s18534_s2 + $0x1c] sm:$0xf] }
 0x140   : > { %18719 = vst [vmem:[#allocation48_spill] sm:$0xff] %v13625_v44  ;;  %11856 = vmatpush.msk.msrb.mxu3 %vm704_vm0, %v11855_v12 }
 0x141   : > { %v758_v48 = vpop.f32.mrf.mxu0 }
 0x142   : > { %11746 = vmatmul.msk.f32.gmra.mxu3 %vm452_vm1, %v13627_v40  ;;  %11680 = vmatmul.msk.f32.gmra.mxu1 %vm452_vm1, %v13627_v40  ;;  %v971_v40 = vadd.f32 %v970_v4, %v758_v48 }
 0x143   : > { %11713 = vmatmul.msk.f32.gmra.mxu2 %vm452_vm1, %v13629_v60  ;;  %v13649_v60 = vld [vmem:[#allocation2 + $0x151] sm:$0xff] }
 0x144   : > { %11647 = vmatmul.msk.f32.gmra.mxu0 %vm452_vm1, %v13631_v56  ;;  %18725 = vst [vmem:[#allocation54_spill] sm:$0xff] %v13649_v60 }
 0x145   : > { %v1488_v36 = vpop.f32.mrf.mxu3 }
 0x146   : > { %v1213_v18 = vpop.f32.mrf.mxu2  ;;  %v13643_v0 = vadd.f32 %v1488_v36, %v1288_v11  ;;  %v13667_v36 = vld [vmem:[#allocation2 + $0x158] sm:$0xff] }
 0x147   : > { %v973_v44 = vpop.f32.mrf.mxu1  ;;  %v1289_v10 = vadd.f32 %v1213_v18, %v968_v28  ;;  %18727 = vst [vmem:[#allocation56_spill] sm:$0xff] %v13667_v36  ;;  %v11889_v28 = vld [vmem:[%s18534_s2 + $0x20] sm:$0xf] }
 0x148   : > { %18723 = vst [vmem:[#allocation52_spill] sm:$0xff] %v13643_v0  ;;  %11890 = vmatpush.msk.msra.mxu0 %vm704_vm0, %v11889_v28 }
 0x149   : > { %v761_v52 = vpop.f32.mrf.mxu0 }
 0x14a   : > { %11747 = vmatmul.msk.f32.gmra.mxu3 %vm452_vm1, %v13645_v17  ;;  %11681 = vmatmul.msk.f32.gmra.mxu1 %vm452_vm1, %v13645_v17 }
 0x14b   : > { %11714 = vmatmul.msk.f32.gmra.mxu2 %vm452_vm1, %v13647_v1  ;;  %v13669_v1 = vld [vmem:[#allocation2 + $0x152] sm:$0xff] }
 0x14c   : > { %11648 = vmatmul.msk.f32.gmra.mxu0 %vm452_vm1, %v13649_v60  ;;  %18728 = vst [vmem:[#allocation57_spill] sm:$0xff] %v13669_v1 }
 0x14d   : > { %v1491_v19 = vpop.f32.mrf.mxu3 }
 0x14e   : > { %v1216_v32 = vpop.f32.mrf.mxu2  ;;  %v13665_v11 = vadd.f32 %v1491_v19, %v1289_v10  ;;  %v11923_v10 = vld [vmem:[%s18536_s4 + $0x4] sm:$0xf]  ;;  %v13690_v19 = vld [vmem:[#allocation2 + $0x168] sm:$0xff] }
 0x14f   : > { %v976_v0 = vpop.f32.mrf.mxu1  ;;  %v1290_v18 = vadd.f32 %v1216_v32, %v971_v40  ;;  %18731 = vst [vmem:[#allocation60_spill] sm:$0xff] %v13690_v19  ;;  %11924 = vmatpush.msk.msra.mxu1 %vm704_vm0, %v11923_v10  ;;  %v974_v40 = vadd.f32 %v973_v44, %v761_v52  ;;  %v13707_v10 = vld [vmem:[#allocation2 + $0x170] sm:$0xff] }
 0x150   : > { %18726 = vst [vmem:[#allocation55_spill] sm:$0xff] %v13665_v11  ;;  %v13709_v52 = vld [vmem:[#allocation2 + $0x16a] sm:$0xff] }
 0x151   : > { %v764_v56 = vpop.f32.mrf.mxu0  ;;  %v13711_v11 = vld [vmem:[#allocation2 + $0x171] sm:$0xff] }
 0x152   : > { %11748 = vmatmul.msk.f32.gmra.mxu3 %vm452_vm1, %v13667_v36  ;;  %11682 = vmatmul.msk.f32.gmra.mxu1 %vm452_vm1, %v13667_v36  ;;  %v13695_v36 = vld [vmem:[#allocation2 + $0x169] sm:$0xff]  ;;  %18735 = vst [vmem:[#allocation64_spill] sm:$0xff] %v13711_v11 }
 0x153   : > { %11715 = vmatmul.msk.f32.gmra.mxu2 %vm452_vm1, %v13669_v1  ;;  %v13692_v1 = vld [vmem:[#allocation2 + $0x15a] sm:$0xff]  ;;  %18733 = vst [vmem:[#allocation62_spill] sm:$0xff] %v13695_v36 }
 0x154   : > { %11649 = vmatmul.msk.f32.gmra.mxu0 %vm452_vm1, %v13671_v6  ;;  %18732 = vst [vmem:[#allocation61_spill] sm:$0xff] %v13692_v1 }
 0x155   : > { %v1494_v48 = vpop.f32.mrf.mxu3 }
 0x156   : > { %v1219_v4 = vpop.f32.mrf.mxu2  ;;  %v13685_v12 = vadd.f32 %v1494_v48, %v1290_v18 }
 0x157   : > { %v979_v60 = vpop.f32.mrf.mxu1  ;;  %v1291_v32 = vadd.f32 %v1219_v4, %v974_v40 }
 0x158   : > { %18730 = vst [vmem:[#allocation59_spill] sm:$0xff] %v13685_v12 }
 0x159   : > { %v767_v6 = vpop.f32.mrf.mxu0 }
 0x15a   : > { %11749 = vmatmul.msk.f32.gmra.mxu3 %vm452_vm1, %v13690_v19  ;;  %11683 = vmatmul.msk.f32.gmra.mxu1 %vm452_vm1, %v13690_v19  ;;  %v980_v19 = vadd.f32 %v979_v60, %v767_v6 }
 0x15b   : > { %11716 = vmatmul.msk.f32.gmra.mxu2 %vm452_vm1, %v13692_v1  ;;  %v977_v1 = vadd.f32 %v976_v0, %v764_v56  ;;  %v13725_v56 = vld [vmem:[#allocation2 + $0x172] sm:$0xff] }
 0x15c   : > { %11650 = vmatmul.msk.f32.gmra.mxu0 %vm452_vm1, %v13695_v36  ;;  %v13723_v36 = vld [vmem:[#allocation2 + $0x180] sm:$0xff] }
 0x15d   : > { %v1497_v28 = vpop.f32.mrf.mxu3 }
 0x15e   : > { %v1222_v18 = vpop.f32.mrf.mxu2  ;;  %v13705_v48 = vadd.f32 %v1497_v28, %v1291_v32 }
 0x15f   : > { %v982_v12 = vpop.f32.mrf.mxu1  ;;  %v1292_v4 = vadd.f32 %v1222_v18, %v977_v1 }
 0x160   : > { %18734 = vst [vmem:[#allocation63_spill] sm:$0xff] %v13705_v48 }
 0x161   : > { %v770_v44 = vpop.f32.mrf.mxu0 }
 0x162   : > { %11750 = vmatmul.msk.f32.gmra.mxu3 %vm452_vm1, %v13707_v10  ;;  %11684 = vmatmul.msk.f32.gmra.mxu1 %vm452_vm1, %v13707_v10 }
 0x163   : > { %11717 = vmatmul.msk.f32.gmra.mxu2 %vm452_vm1, %v13709_v52 }
 0x164   : > { %11651 = vmatmul.msk.f32.gmra.mxu0 %vm452_vm1, %v13711_v11  ;;  %v13737_v11 = vld [vmem:[#allocation2 + $0x188] sm:$0xff] }
 0x165   : > { %v1500_v40 = vpop.f32.mrf.mxu3 }
 0x166   : > { %v1225_v32 = vpop.f32.mrf.mxu2  ;;  %v13721_v28 = vadd.f32 %v1500_v40, %v1292_v4 }
 0x167   : > { %v985_v48 = vpop.f32.mrf.mxu1  ;;  %v1293_v1 = vadd.f32 %v1225_v32, %v980_v19 }
 0x168   : > { %18736 = vst [vmem:[#allocation65_spill] sm:$0xff] %v13721_v28  ;;  %v983_v28 = vadd.f32 %v982_v12, %v770_v44 }
 0x169   : > { %v773_v0 = vpop.f32.mrf.mxu0 }
 0x16a   : > { %11751 = vmatmul.msk.f32.gmra.mxu3 %vm452_vm1, %v13723_v36  ;;  %11789 = vmatmul.msk.f32.vlgmr.msrb.gmra.mxu1 %vm452_vm1, %v13213_v22  ;;  %v986_v12 = vadd.f32 %v985_v48, %v773_v0 }
 0x16b   : > { %11718 = vmatmul.msk.f32.gmra.mxu2 %vm452_vm1, %v13725_v56 }
 0x16c   : > { %11755 = vmatmul.msk.f32.vlgmr.msrb.gmra.mxu0 %vm452_vm1, %v13155_v15 }
 0x16d   : > { %v1503_v18 = vpop.f32.mrf.mxu3 }
 0x16e   : > { %v1228_v4 = vpop.f32.mrf.mxu2  ;;  %v13735_v40 = vadd.f32 %v1503_v18, %v1293_v1 }
 0x16f   : > { %v988_v6 = vpop.f32.mrf.mxu1  ;;  %v1294_v15 = vadd.f32 %v1228_v4, %v983_v28 }
 0x171   : > { %v776_v60 = vpop.f32.mrf.mxu0 }
 0x172   : > { %11752 = vmatmul.msk.f32.gmra.mxu3 %vm452_vm1, %v13737_v11  ;;  %11790 = vmatmul.msk.f32.gmra.mxu1 %vm452_vm1, %v13227_v26  ;;  %v989_v48 = vadd.f32 %v988_v6, %v776_v60 }
 0x173   : > { %11823 = vmatmul.msk.f32.vlgmr.msrb.gmra.mxu2 %vm452_vm1, %v13225_v25 }
 0x174   : > { %11756 = vmatmul.msk.f32.gmra.mxu0 %vm452_vm1, %v13215_v23 }
 0x175   : > { %v1506_v22 = vpop.f32.mrf.mxu3 }
 0x176   : > { %v1231_v19 = vpop.f32.mrf.mxu2  ;;  %v13747_v32 = vadd.f32 %v1506_v22, %v1294_v15 }
 0x177   : > { %v991_v18 = vpop.f32.mrf.mxu1  ;;  %v1295_v23 = vadd.f32 %v1231_v19, %v986_v12 }
 0x179   : > { %v779_v1 = vpop.f32.mrf.mxu0 }
 0x17a   : > { %11857 = vmatmul.msk.f32.vlgmr.msrb.gmra.mxu3 %vm452_vm1, %v13229_v27  ;;  %11791 = vmatmul.msk.f32.gmra.mxu1 %vm452_vm1, %v13243_v30  ;;  %v992_v60 = vadd.f32 %v991_v18, %v779_v1 }
 0x17b   : > { %11824 = vmatmul.msk.f32.gmra.mxu2 %vm452_vm1, %v13241_v29 }
 0x17c   : > { %11757 = vmatmul.msk.f32.gmra.mxu0 %vm452_vm1, %v13229_v27 }
 0x17d   : > { %v1509_v25 = vpop.f32.mrf.mxu3 }
 0x17e   : > { %v1234_v26 = vpop.f32.mrf.mxu2  ;;  %v13757_v44 = vadd.f32 %v1509_v25, %v1295_v23 }
 0x17f   : > { %v994_v4 = vpop.f32.mrf.mxu1  ;;  %v1296_v27 = vadd.f32 %v1234_v26, %v989_v48 }
 0x181   : > { %v782_v28 = vpop.f32.mrf.mxu0 }
 0x182   : > { %11858 = vmatmul.msk.f32.gmra.mxu3 %vm452_vm1, %v13245_v31  ;;  %11792 = vmatmul.msk.f32.gmra.mxu1 %vm452_vm1, %v13259_v34  ;;  %v995_v1 = vadd.f32 %v994_v4, %v782_v28 }
 0x183   : > { %11825 = vmatmul.msk.f32.gmra.mxu2 %vm452_vm1, %v13257_v33 }
 0x184   : > { %11758 = vmatmul.msk.f32.gmra.mxu0 %vm452_vm1, %v13245_v31 }
 0x185   : > { %v1512_v29 = vpop.f32.mrf.mxu3 }
 0x186   : > { %v1237_v30 = vpop.f32.mrf.mxu2  ;;  %v13767_v0 = vadd.f32 %v1512_v29, %v1296_v27 }
 0x187   : > { %v997_v22 = vpop.f32.mrf.mxu1  ;;  %v1297_v31 = vadd.f32 %v1237_v30, %v992_v60 }
 0x189   : > { %v785_v15 = vpop.f32.mrf.mxu0 }
 0x18a   : > { %11859 = vmatmul.msk.f32.gmra.mxu3 %vm452_vm1, %v13261_v35  ;;  %11793 = vmatmul.msk.f32.gmra.mxu1 %vm452_vm1, %v13275_v38  ;;  %v998_v26 = vadd.f32 %v997_v22, %v785_v15 }
 0x18b   : > { %11826 = vmatmul.msk.f32.gmra.mxu2 %vm452_vm1, %v13273_v37 }
 0x18c   : > { %11759 = vmatmul.msk.f32.gmra.mxu0 %vm452_vm1, %v13261_v35 }
 0x18d   : > { %v1515_v33 = vpop.f32.mrf.mxu3 }
 0x18e   : > { %v1240_v34 = vpop.f32.mrf.mxu2  ;;  %v13777_v6 = vadd.f32 %v1515_v33, %v1297_v31 }
 0x18f   : > { %v1000_v12 = vpop.f32.mrf.mxu1  ;;  %v1298_v35 = vadd.f32 %v1240_v34, %v995_v1 }
 0x191   : > { %v788_v19 = vpop.f32.mrf.mxu0 }
 0x192   : > { %11860 = vmatmul.msk.f32.gmra.mxu3 %vm452_vm1, %v13277_v39  ;;  %11794 = vmatmul.msk.f32.gmra.mxu1 %vm452_vm1, %v13291_v42  ;;  %v1001_v27 = vadd.f32 %v1000_v12, %v788_v19 }
 0x193   : > { %11827 = vmatmul.msk.f32.gmra.mxu2 %vm452_vm1, %v13289_v41 }
 0x194   : > { %11760 = vmatmul.msk.f32.gmra.mxu0 %vm452_vm1, %v13277_v39 }
 0x195   : > { %v1518_v37 = vpop.f32.mrf.mxu3 }
 0x196   : > { %v1243_v38 = vpop.f32.mrf.mxu2  ;;  %v13787_v18 = vadd.f32 %v1518_v37, %v1298_v35 }
 0x197   : > { %v1003_v25 = vpop.f32.mrf.mxu1  ;;  %v1299_v39 = vadd.f32 %v1243_v38, %v998_v26 }
 0x199   : > { %v791_v23 = vpop.f32.mrf.mxu0 }
 0x19a   : > { %11861 = vmatmul.msk.f32.gmra.mxu3 %vm452_vm1, %v13293_v43  ;;  %11795 = vmatmul.msk.f32.gmra.mxu1 %vm452_vm1, %v13307_v46  ;;  %v1004_v22 = vadd.f32 %v1003_v25, %v791_v23 }
 0x19b   : > { %11828 = vmatmul.msk.f32.gmra.mxu2 %vm452_vm1, %v13305_v45 }
 0x19c   : > { %11761 = vmatmul.msk.f32.gmra.mxu0 %vm452_vm1, %v13293_v43 }
 0x19d   : > { %v1521_v41 = vpop.f32.mrf.mxu3 }
 0x19e   : > { %v1246_v42 = vpop.f32.mrf.mxu2  ;;  %v13797_v28 = vadd.f32 %v1521_v41, %v1299_v39 }
 0x19f   : > { %v1006_v48 = vpop.f32.mrf.mxu1  ;;  %v1300_v43 = vadd.f32 %v1246_v42, %v1001_v27 }
 0x1a1   : > { %v794_v4 = vpop.f32.mrf.mxu0 }
 0x1a2   : > { %11862 = vmatmul.msk.f32.gmra.mxu3 %vm452_vm1, %v13309_v47  ;;  %11796 = vmatmul.msk.f32.gmra.mxu1 %vm452_vm1, %v13323_v50  ;;  %v1007_v34 = vadd.f32 %v1006_v48, %v794_v4 }
 0x1a3   : > { %11829 = vmatmul.msk.f32.gmra.mxu2 %vm452_vm1, %v13321_v49 }
 0x1a4   : > { %11762 = vmatmul.msk.f32.gmra.mxu0 %vm452_vm1, %v13309_v47 }
 0x1a5   : > { %v1524_v45 = vpop.f32.mrf.mxu3 }
 0x1a6   : > { %v1249_v46 = vpop.f32.mrf.mxu2  ;;  %v13807_v29 = vadd.f32 %v1524_v45, %v1300_v43 }
 0x1a7   : > { %v1009_v15 = vpop.f32.mrf.mxu1  ;;  %v1301_v47 = vadd.f32 %v1249_v46, %v1004_v22 }
 0x1a9   : > { %v797_v30 = vpop.f32.mrf.mxu0 }
 0x1aa   : > { %11863 = vmatmul.msk.f32.gmra.mxu3 %vm452_vm1, %v13325_v51  ;;  %11797 = vmatmul.msk.f32.gmra.mxu1 %vm452_vm1, %v13339_v54  ;;  %v1010_v35 = vadd.f32 %v1009_v15, %v797_v30 }
 0x1ab   : > { %11830 = vmatmul.msk.f32.gmra.mxu2 %vm452_vm1, %v13337_v53 }
 0x1ac   : > { %11763 = vmatmul.msk.f32.gmra.mxu0 %vm452_vm1, %v13325_v51 }
 0x1ad   : > { %v1527_v49 = vpop.f32.mrf.mxu3 }
 0x1ae   : > { %v1252_v50 = vpop.f32.mrf.mxu2  ;;  %v13817_v60 = vadd.f32 %v1527_v49, %v1301_v47 }
 0x1af   : > { %v1012_v33 = vpop.f32.mrf.mxu1  ;;  %v1302_v51 = vadd.f32 %v1252_v50, %v1007_v34 }
 0x1b1   : > { %v800_v31 = vpop.f32.mrf.mxu0 }
 0x1b2   : > { %11864 = vmatmul.msk.f32.gmra.mxu3 %vm452_vm1, %v13341_v55  ;;  %11798 = vmatmul.msk.f32.gmra.mxu1 %vm452_vm1, %v13355_v58  ;;  %v1013_v25 = vadd.f32 %v1012_v33, %v800_v31  ;;  %v18737_v33 = vld [vmem:[#allocation12_spill] sm:$0xff] }
 0x1b3   : > { %11831 = vmatmul.msk.f32.gmra.mxu2 %vm452_vm1, %v13353_v57 }
 0x1b4   : > { %11764 = vmatmul.msk.f32.gmra.mxu0 %vm452_vm1, %v13341_v55 }
 0x1b5   : > { %v1530_v53 = vpop.f32.mrf.mxu3 }
 0x1b6   : > { %v1255_v54 = vpop.f32.mrf.mxu2  ;;  %v13827_v19 = vadd.f32 %v1530_v53, %v1302_v51 }
 0x1b7   : > { %v1015_v1 = vpop.f32.mrf.mxu1  ;;  %v1303_v55 = vadd.f32 %v1255_v54, %v1010_v35 }
 0x1b9   : > { %v803_v12 = vpop.f32.mrf.mxu0 }
 0x1ba   : > { %11865 = vmatmul.msk.f32.gmra.mxu3 %vm452_vm1, %v13357_v59  ;;  %11799 = vmatmul.msk.f32.gmra.mxu1 %vm452_vm1, %v13371_v62  ;;  %v1016_v42 = vadd.f32 %v1015_v1, %v803_v12  ;;  %v18739_v12 = vld [vmem:[#allocation7_spill] sm:$0xff]  ;;  %v18740_v1 = vld [vmem:[#allocation8_spill] sm:$0xff] }
 0x1bb   : > { %11832 = vmatmul.msk.f32.gmra.mxu2 %vm452_vm1, %v13369_v61  ;;  %v938_v35 = vadd.f32 %v18740_v1, %v18739_v12  ;;  %v18754_v12 = vld [vmem:[#allocation23_spill] sm:$0xff]  ;;  %v18755_v1 = vld [vmem:[#allocation25_spill] sm:$0xff] }
 0x1bc   : > { %11765 = vmatmul.msk.f32.gmra.mxu0 %vm452_vm1, %v13357_v59 }
 0x1bd   : > { %v1533_v57 = vpop.f32.mrf.mxu3 }
 0x1be   : > { %v1258_v58 = vpop.f32.mrf.mxu2  ;;  %v13837_v37 = vadd.f32 %v1533_v57, %v1303_v55  ;;  %v18741_v57 = vld [vmem:[#allocation14_spill] sm:$0xff] }
 0x1bf   : > { %v1018_v23 = vpop.f32.mrf.mxu1  ;;  %v1304_v59 = vadd.f32 %v1258_v58, %v1013_v25  ;;  %v18742_v58 = vld [vmem:[#allocation17_spill] sm:$0xff]  ;;  %v18745_v25 = vld [vmem:[#allocation18_spill] sm:$0xff] }
 0x1c1   : > { %v806_v38 = vpop.f32.mrf.mxu0 }
 0x1c2   : > { %11866 = vmatmul.msk.f32.gmra.mxu3 %vm452_vm1, %v13373_v63  ;;  %11800 = vmatmul.msk.f32.gmra.mxu1 %vm452_vm1, %v13391_v3  ;;  %v1019_v43 = vadd.f32 %v1018_v23, %v806_v38  ;;  %v18744_v38 = vld [vmem:[#allocation10_spill] sm:$0xff] }
 0x1c3   : > { %11833 = vmatmul.msk.f32.gmra.mxu2 %vm452_vm1, %v13389_v2 }
 0x1c4   : > { %11766 = vmatmul.msk.f32.gmra.mxu0 %vm452_vm1, %v13373_v63 }
 0x1c5   : > { %v1536_v61 = vpop.f32.mrf.mxu3 }
 0x1c6   : > { %v1261_v62 = vpop.f32.mrf.mxu2  ;;  %v13847_v26 = vadd.f32 %v1536_v61, %v1304_v59  ;;  %v18746_v59 = vld [vmem:[#allocation11_spill] sm:$0xff] }
 0x1c7   : > { %v1021_v41 = vpop.f32.mrf.mxu1  ;;  %v1305_v63 = vadd.f32 %v1261_v62, %v1016_v42  ;;  %v1279_v61 = vadd.f32 %v18746_v59, %v938_v35 }
 0x1c9   : > { %v809_v39 = vpop.f32.mrf.mxu0 }
 0x1ca   : > { %11867 = vmatmul.msk.f32.gmra.mxu3 %vm452_vm1, %v13393_v5  ;;  %11801 = vmatmul.msk.f32.gmra.mxu1 %vm452_vm1, %v13407_v8 }
 0x1cb   : > { %11834 = vmatmul.msk.f32.gmra.mxu2 %vm452_vm1, %v13405_v7 }
 0x1cc   : > { %11767 = vmatmul.msk.f32.gmra.mxu0 %vm452_vm1, %v13393_v5  ;;  %v3200_v5 = vld [vmem:[%s18536_s4] sm:$0xf] }
 0x1cd   : > { %v1539_v2 = vpop.f32.mrf.mxu3  ;;  %11957 = vmatpush.msk.msra.mxu2 %vm704_vm0, %v3200_v5 }
 0x1ce   : > { %v1264_v3 = vpop.f32.mrf.mxu2  ;;  %v13857_v4 = vadd.f32 %v1539_v2, %v1305_v63  ;;  %v18748_v2 = vld [vmem:[#allocation15_spill] sm:$0xff] }
 0x1cf   : > { %v1024_v27 = vpop.f32.mrf.mxu1  ;;  %v1306_v7 = vadd.f32 %v1264_v3, %v1019_v43  ;;  %v1557_v3 = vadd.f32 %v18748_v2, %v1279_v61  ;;  %v18758_v61 = vld [vmem:[#allocation27_spill] sm:$0xff] }
 0x1d1   : > { %v812_v48 = vpop.f32.mrf.mxu0 }
 0x1d2   : > { %11868 = vmatmul.msk.f32.gmra.mxu3 %vm452_vm1, %v13409_v9  ;;  %11802 = vmatmul.msk.f32.gmra.mxu1 %vm452_vm1, %v13427_v14  ;;  %v1025_v31 = vadd.f32 %v1024_v27, %v812_v48  ;;  %v18749_v27 = vld [vmem:[#allocation20_spill] sm:$0xff] }
 0x1d3   : > { %11835 = vmatmul.msk.f32.gmra.mxu2 %vm452_vm1, %v13425_v13  ;;  %v1022_v13 = vadd.f32 %v1021_v41, %v809_v39  ;;  %v18747_v39 = vld [vmem:[#allocation16_spill] sm:$0xff] }
 0x1d4   : > { %11768 = vmatmul.msk.f32.gmra.mxu0 %vm452_vm1, %v13409_v9 }
 0x1d5   : > { %v1542_v8 = vpop.f32.mrf.mxu3 }
 0x1d6   : > { %v1267_v45 = vpop.f32.mrf.mxu2  ;;  %v13871_v46 = vadd.f32 %v1542_v8, %v1306_v7 }
 0x1d7   : > { %v1027_v15 = vpop.f32.mrf.mxu1  ;;  %v1307_v9 = vadd.f32 %v1267_v45, %v1022_v13  ;;  %v18751_v13 = vld [vmem:[#allocation21_spill] sm:$0xff] }
 0x1d9   : > { %v815_v30 = vpop.f32.mrf.mxu0 }
 0x1da   : > { %11869 = vmatmul.msk.f32.gmra.mxu3 %vm452_vm1, %v13429_v16  ;;  %11803 = vmatmul.msk.f32.gmra.mxu1 %vm452_vm1, %v13447_v21  ;;  %v1028_v55 = vadd.f32 %v1027_v15, %v815_v30  ;;  %v18750_v15 = vld [vmem:[#allocation19_spill] sm:$0xff] }
 0x1db   : > { %11836 = vmatmul.msk.f32.gmra.mxu2 %vm452_vm1, %v13445_v20 }
 0x1dc   : > { %11769 = vmatmul.msk.f32.gmra.mxu0 %vm452_vm1, %v13429_v16  ;;  %v18738_v16 = vld [vmem:[#allocation13_spill] sm:$0xff] }
 0x1dd   : > { %v1545_v14 = vpop.f32.mrf.mxu3 }
 0x1de   : > { %v1270_v22 = vpop.f32.mrf.mxu2  ;;  %v13881_v47 = vadd.f32 %v1545_v14, %v1307_v9  ;;  %v18752_v14 = vld [vmem:[#allocation22_spill] sm:$0xff] }
 0x1df   : > { %v1030_v50 = vpop.f32.mrf.mxu1  ;;  %v1308_v20 = vadd.f32 %v1270_v22, %v1025_v31 }
 0x1e1   : > { %v818_v49 = vpop.f32.mrf.mxu0 }
 0x1e2   : > { %11870 = vmatmul.msk.f32.gmra.mxu3 %vm452_vm1, %v13449_v24  ;;  %11804 = vmatmul.msk.f32.gmra.mxu1 %vm452_vm1, %v18738_v16  ;;  %v1031_v30 = vadd.f32 %v1030_v50, %v818_v49 }
 0x1e3   : > { %11837 = vmatmul.msk.f32.gmra.mxu2 %vm452_vm1, %v18737_v33 }
 0x1e4   : > { %11770 = vmatmul.msk.f32.gmra.mxu0 %vm452_vm1, %v13449_v24  ;;  %v18743_v24 = vld [vmem:[#allocation9_spill] sm:$0xff] }
 0x1e5   : > { %v1548_v21 = vpop.f32.mrf.mxu3  ;;  %v941_v23 = vadd.f32 %v18744_v38, %v18743_v24 }
 0x1e6   : > { %v1273_v34 = vpop.f32.mrf.mxu2  ;;  %v13891_v51 = vadd.f32 %v1548_v21, %v1308_v20 }
 0x1e7   : > { %v2017_v54 = vpop.f32.mrf.mxu1  ;;  %v1309_v62 = vadd.f32 %v1273_v34, %v1028_v55  ;;  %v1280_v41 = vadd.f32 %v18747_v39, %v941_v23  ;;  %v18753_v34 = vld [vmem:[#allocation24_spill] sm:$0xff] }
 0x1e9   : > { %v1739_v53 = vpop.f32.mrf.mxu0  ;;  %v1558_v43 = vadd.f32 %v18749_v27, %v1280_v41  ;;  %v18760_v41 = vld [vmem:[#allocation30_spill] sm:$0xff] }
 0x1ea   : > { %11871 = vmatmul.msk.f32.gmra.mxu3 %vm452_vm1, %v18741_v57  ;;  %11805 = vmatmul.msk.f32.gmra.mxu1 %vm452_vm1, %v18745_v25  ;;  %v1835_v5 = vadd.f32 %v1739_v53, %v1557_v3  ;;  %v18757_v25 = vld [vmem:[#allocation28_spill] sm:$0xff] }
 0x1eb   : > { %11838 = vmatmul.msk.f32.gmra.mxu2 %vm452_vm1, %v18742_v58 }
 0x1ec   : > { %11771 = vmatmul.msk.f32.gmra.mxu0 %vm452_vm1, %v18741_v57  ;;  %v2113_v31 = vadd.f32 %v2017_v54, %v1835_v5  ;;  %v18756_v54 = vld [vmem:[#allocation26_spill] sm:$0xff]  ;;  %v18761_v5 = vld [vmem:[#allocation32_spill] sm:$0xff] }
 0x1ed   : > { %v1551_v42 = vpop.f32.mrf.mxu3 }
 0x1ee   : > { %v1276_v63 = vpop.f32.mrf.mxu2  ;;  %v13908_v48 = vadd.f32 %v1551_v42, %v1309_v62  ;;  %v18759_v62 = vld [vmem:[#allocation29_spill] sm:$0xff] }
 0x1ef   : > { %v2020_v8 = vpop.f32.mrf.mxu1  ;;  %v1310_v22 = vadd.f32 %v1276_v63, %v1031_v30 }
 0x1f1   : > { %v1742_v7 = vpop.f32.mrf.mxu0 }
 0x1f2   : > { %v1836_v45 = vadd.f32 %v1742_v7, %v1558_v43  ;;  %11872 = vmatmul.msk.f32.gmra.mxu3 %vm452_vm1, %v18750_v15  ;;  %11806 = vmatmul.msk.f32.gmra.mxu1 %vm452_vm1, %v18752_v14 }
 0x1f3   : > { %11839 = vmatmul.msk.f32.gmra.mxu2 %vm452_vm1, %v18751_v13 }
 0x1f4   : > { %v2114_v9 = vadd.f32 %v2020_v8, %v1836_v45  ;;  %11772 = vmatmul.msk.f32.gmra.mxu0 %vm452_vm1, %v18750_v15  ;;  %v18762_v8 = vld [vmem:[#allocation31_spill] sm:$0xff]  ;;  %v18763_v45 = vld [vmem:[#allocation33_spill] sm:$0xff]  ;;  %v18764_v15 = vld [vmem:[#allocation34_spill] sm:$0xff] }
 0x1f5   : > { %v1554_v33 = vpop.f32.mrf.mxu3 }
 0x1f6   : > { %v2296_v16 = vpop.f32.mrf.mxu2  ;;  %v13919_v20 = vadd.f32 %v1554_v33, %v1310_v22 }
 0x1f7   : > { %v2392_v49 = vadd.f32 %v2296_v16, %v2113_v31  ;;  %v2023_v21 = vpop.f32.mrf.mxu1  ;;  %v18765_v16 = vld [vmem:[#allocation36_spill] sm:$0xff] }
 0x1f9   : > { %v1745_v50 = vpop.f32.mrf.mxu0 }
 0x1fa   : > { %v1837_v53 = vadd.f32 %v1745_v50, %v18753_v34  ;;  %11873 = vmatmul.msk.f32.gmra.mxu3 %vm452_vm1, %v18754_v12  ;;  %11807 = vmatmul.msk.f32.gmra.mxu1 %vm452_vm1, %v18756_v54  ;;  %v18766_v50 = vld [vmem:[#allocation35_spill] sm:$0xff] }
 0x1fb   : > { %11840 = vmatmul.msk.f32.gmra.mxu2 %vm452_vm1, %v18755_v1 }
 0x1fc   : > { %v2115_v35 = vadd.f32 %v2023_v21, %v1837_v53  ;;  %11773 = vmatmul.msk.f32.gmra.mxu0 %vm452_vm1, %v18754_v12  ;;  %v18767_v21 = vld [vmem:[#allocation37_spill] sm:$0xff]  ;;  %v18768_v53 = vld [vmem:[#allocation38_spill] sm:$0xff] }
 0x1fd   : > { %v2574_v55 = vpop.f32.mrf.mxu3 }
 0x1fe   : > { %v2299_v57 = vpop.f32.mrf.mxu2  ;;  %v13930_v58 = vadd.f32 %v2574_v55, %v2392_v49 }
 0x1ff   : > { %v2393_v24 = vadd.f32 %v2299_v57, %v2114_v9  ;;  %v2026_v23 = vpop.f32.mrf.mxu1 }
 0x201   : > { %v1748_v38 = vpop.f32.mrf.mxu0 }
 0x202   : > { %v1838_v59 = vadd.f32 %v1748_v38, %v18757_v25  ;;  %11874 = vmatmul.msk.f32.gmra.mxu3 %vm452_vm1, %v18758_v61  ;;  %11808 = vmatmul.msk.f32.gmra.mxu1 %vm452_vm1, %v18760_v41  ;;  %v18771_v25 = vld [vmem:[#allocation41_spill] sm:$0xff] }
 0x203   : > { %11841 = vmatmul.msk.f32.gmra.mxu2 %vm452_vm1, %v18759_v62 }
 0x204   : > { %v2116_v39 = vadd.f32 %v2026_v23, %v1838_v59  ;;  %11774 = vmatmul.msk.f32.gmra.mxu0 %vm452_vm1, %v18758_v61  ;;  %v18770_v23 = vld [vmem:[#allocation39_spill] sm:$0xff]  ;;  %v18772_v61 = vld [vmem:[#allocation42_spill] sm:$0xff] }
 0x205   : > { %v2577_v42 = vpop.f32.mrf.mxu3 }
 0x206   : > { %v2302_v63 = vpop.f32.mrf.mxu2  ;;  %v13941_v2 = vadd.f32 %v2577_v42, %v2393_v24  ;;  %v18769_v24 = vld [vmem:[#allocation40_spill] sm:$0xff] }
 0x207   : > { %v2394_v3 = vadd.f32 %v2302_v63, %v2115_v35  ;;  %v2029_v43 = vpop.f32.mrf.mxu1 }
 0x209   : > { %v1751_v27 = vpop.f32.mrf.mxu0 }
 0x20a   : > { %v1839_v7 = vadd.f32 %v1751_v27, %v18761_v5  ;;  %11875 = vmatmul.msk.f32.gmra.mxu3 %vm452_vm1, %v18762_v8  ;;  %11809 = vmatmul.msk.f32.gmra.mxu1 %vm452_vm1, %v18764_v15  ;;  %v18773_v27 = vld [vmem:[#allocation44_spill] sm:$0xff]  ;;  %v18774_v5 = vld [vmem:[#allocation43_spill] sm:$0xff] }
 0x20b   : > { %11842 = vmatmul.msk.f32.gmra.mxu2 %vm452_vm1, %v18763_v45  ;;  %v18776_v45 = vld [vmem:[#allocation46_spill] sm:$0xff] }
 0x20c   : > { %v2117_v30 = vadd.f32 %v2029_v43, %v1839_v7  ;;  %11775 = vmatmul.msk.f32.gmra.mxu0 %vm452_vm1, %v18762_v8  ;;  %v18775_v7 = vld [vmem:[#allocation45_spill] sm:$0xff] }
 0x20d   : > { %v2580_v13 = vpop.f32.mrf.mxu3 }
 0x20e   : > { %v2305_v9 = vpop.f32.mrf.mxu2  ;;  %v13952_v14 = vadd.f32 %v2580_v13, %v2394_v3 }
 0x20f   : > { %v2395_v22 = vadd.f32 %v2305_v9, %v2116_v39  ;;  %v2032_v33 = vpop.f32.mrf.mxu1 }
 0x211   : > { %v1754_v31 = vpop.f32.mrf.mxu0 }
 0x212   : > { %v1840_v49 = vadd.f32 %v1754_v31, %v18765_v16  ;;  %11876 = vmatmul.msk.f32.gmra.mxu3 %vm452_vm1, %v18766_v50  ;;  %11810 = vmatmul.msk.f32.gmra.mxu1 %vm452_vm1, %v18768_v53 }
 0x213   : > { %11843 = vmatmul.msk.f32.gmra.mxu2 %vm452_vm1, %v18767_v21 }
 0x214   : > { %v2118_v34 = vadd.f32 %v2032_v33, %v1840_v49  ;;  %11776 = vmatmul.msk.f32.gmra.mxu0 %vm452_vm1, %v18766_v50  ;;  %v18777_v33 = vld [vmem:[#allocation48_spill] sm:$0xff]  ;;  %v18778_v49 = vld [vmem:[#allocation47_spill] sm:$0xff]  ;;  %v18779_v50 = vld [vmem:[#allocation49_spill] sm:$0xff] }
 0x215   : > { %v2583_v12 = vpop.f32.mrf.mxu3 }
 0x216   : > { %v2308_v1 = vpop.f32.mrf.mxu2  ;;  %v13963_v35 = vadd.f32 %v2583_v12, %v2395_v22 }
 0x217   : > { %v2396_v54 = vadd.f32 %v2308_v1, %v2117_v30  ;;  %v2035_v57 = vpop.f32.mrf.mxu1 }
 0x219   : > { %v1757_v55 = vpop.f32.mrf.mxu0 }
 0x21a   : > { %v1841_v38 = vadd.f32 %v1757_v55, %v18769_v24  ;;  %11877 = vmatmul.msk.f32.gmra.mxu3 %vm452_vm1, %v18770_v23  ;;  %11811 = vmatmul.msk.f32.gmra.mxu1 %vm452_vm1, %v18772_v61  ;;  %v18781_v24 = vld [vmem:[#allocation52_spill] sm:$0xff] }
 0x21b   : > { %11844 = vmatmul.msk.f32.gmra.mxu2 %vm452_vm1, %v18771_v25 }
 0x21c   : > { %v2119_v59 = vadd.f32 %v2035_v57, %v1841_v38  ;;  %11777 = vmatmul.msk.f32.gmra.mxu0 %vm452_vm1, %v18770_v23  ;;  %v18782_v23 = vld [vmem:[#allocation51_spill] sm:$0xff] }
 0x21d   : > { %v2586_v62 = vpop.f32.mrf.mxu3 }
 0x21e   : > { %v2311_v39 = vpop.f32.mrf.mxu2  ;;  %v13974_v41 = vadd.f32 %v2586_v62, %v2396_v54 }
 0x21f   : > { %v2397_v42 = vadd.f32 %v2311_v39, %v2118_v34  ;;  %v2038_v3 = vpop.f32.mrf.mxu1  ;;  %v18780_v34 = vld [vmem:[#allocation50_spill] sm:$0xff] }
 0x221   : > { %v1760_v63 = vpop.f32.mrf.mxu0 }
 0x222   : > { %v1842_v43 = vadd.f32 %v1760_v63, %v18773_v27  ;;  %11878 = vmatmul.msk.f32.gmra.mxu3 %vm452_vm1, %v18774_v5  ;;  %11812 = vmatmul.msk.f32.gmra.mxu1 %vm452_vm1, %v18776_v45  ;;  %v18784_v27 = vld [vmem:[#allocation55_spill] sm:$0xff] }
 0x223   : > { %11845 = vmatmul.msk.f32.gmra.mxu2 %vm452_vm1, %v18775_v7 }
 0x224   : > { %v2120_v8 = vadd.f32 %v2038_v3, %v1842_v43  ;;  %11778 = vmatmul.msk.f32.gmra.mxu0 %vm452_vm1, %v18774_v5  ;;  %v18785_v5 = vld [vmem:[#allocation54_spill] sm:$0xff] }
 0x225   : > { %v2589_v30 = vpop.f32.mrf.mxu3 }
 0x226   : > { %v2314_v15 = vpop.f32.mrf.mxu2  ;;  %v13985_v13 = vadd.f32 %v2589_v30, %v2397_v42 }
 0x227   : > { %v2398_v9 = vadd.f32 %v2314_v15, %v2119_v59  ;;  %v2041_v31 = vpop.f32.mrf.mxu1  ;;  %v18783_v59 = vld [vmem:[#allocation53_spill] sm:$0xff] }
 0x229   : > { %v1763_v22 = vpop.f32.mrf.mxu0 }
 0x22a   : > { %v1843_v16 = vadd.f32 %v1763_v22, %v18777_v33  ;;  %11879 = vmatmul.msk.f32.gmra.mxu3 %vm452_vm1, %v18778_v49  ;;  %11813 = vmatmul.msk.f32.gmra.mxu1 %vm452_vm1, %v18780_v34  ;;  %v18788_v33 = vld [vmem:[#allocation59_spill] sm:$0xff]  ;;  %v18791_v34 = vld [vmem:[#allocation61_spill] sm:$0xff] }
 0x22b   : > { %11846 = vmatmul.msk.f32.gmra.mxu2 %vm452_vm1, %v18779_v50  ;;  %v18790_v50 = vld [vmem:[#allocation60_spill] sm:$0xff] }
 0x22c   : > { %v2121_v21 = vadd.f32 %v2041_v31, %v1843_v16  ;;  %11779 = vmatmul.msk.f32.gmra.mxu0 %vm452_vm1, %v18778_v49  ;;  %v18789_v49 = vld [vmem:[#allocation58_spill] sm:$0xff] }
 0x22d   : > { %v2592_v53 = vpop.f32.mrf.mxu3 }
 0x22e   : > { %v2317_v12 = vpop.f32.mrf.mxu2  ;;  %v13996_v1 = vadd.f32 %v2592_v53, %v2398_v9 }
 0x22f   : > { %v2399_v54 = vadd.f32 %v2317_v12, %v2120_v8  ;;  %v2044_v57 = vpop.f32.mrf.mxu1  ;;  %v18787_v8 = vld [vmem:[#allocation57_spill] sm:$0xff] }
 0x231   : > { %v1766_v55 = vpop.f32.mrf.mxu0 }
 0x232   : > { %v1844_v38 = vadd.f32 %v1766_v55, %v18781_v24  ;;  %11880 = vmatmul.msk.f32.gmra.mxu3 %vm452_vm1, %v18782_v23  ;;  %11814 = vmatmul.msk.f32.gmra.mxu1 %vm452_vm1, %v18783_v59  ;;  %v11990_v59 = vld [vmem:[%s18536_s4 + $0x8] sm:$0xf] }
 0x233   : > { %11847 = vmatmul.msk.f32.gmra.mxu2 %vm452_vm1, %v13645_v17  ;;  %v18786_v17 = vld [vmem:[#allocation56_spill] sm:$0xff]  ;;  %11991 = vmatpush.msk.msra.mxu3 %vm704_vm0, %v11990_v59 }
 0x234   : > { %v2122_v25 = vadd.f32 %v2044_v57, %v1844_v38  ;;  %11780 = vmatmul.msk.f32.gmra.mxu0 %vm452_vm1, %v18782_v23  ;;  %v18792_v38 = vld [vmem:[#allocation63_spill] sm:$0xff] }
 0x235   : > { %v2595_v61 = vpop.f32.mrf.mxu3 }
 0x236   : > { %v2320_v62 = vpop.f32.mrf.mxu2  ;;  %v14007_v39 = vadd.f32 %v2595_v61, %v2399_v54 }
 0x237   : > { %v2400_v42 = vadd.f32 %v2320_v62, %v2121_v21  ;;  %v2047_v3 = vpop.f32.mrf.mxu1 }
 0x239   : > { %v1769_v63 = vpop.f32.mrf.mxu0 }
 0x23a   : > { %v1845_v43 = vadd.f32 %v1769_v63, %v18784_v27  ;;  %11881 = vmatmul.msk.f32.gmra.mxu3 %vm452_vm1, %v18785_v5  ;;  %11815 = vmatmul.msk.f32.gmra.mxu1 %vm452_vm1, %v18787_v8 }
 0x23b   : > { %11848 = vmatmul.msk.f32.gmra.mxu2 %vm452_vm1, %v18786_v17  ;;  %v18795_v17 = vld [vmem:[#allocation64_spill] sm:$0xff] }
 0x23c   : > { %v2123_v7 = vadd.f32 %v2047_v3, %v1845_v43  ;;  %11781 = vmatmul.msk.f32.gmra.mxu0 %vm452_vm1, %v18785_v5  ;;  %v18794_v43 = vld [vmem:[#allocation65_spill] sm:$0xff] }
 0x23d   : > { %v2598_v45 = vpop.f32.mrf.mxu3 }
 0x23e   : > { %v2323_v30 = vpop.f32.mrf.mxu2  ;;  %v14018_v15 = vadd.f32 %v2598_v45, %v2400_v42 }
 0x23f   : > { %v2401_v9 = vadd.f32 %v2323_v30, %v2122_v25  ;;  %v2050_v31 = vpop.f32.mrf.mxu1  ;;  %v18793_v25 = vld [vmem:[#allocation62_spill] sm:$0xff] }
 0x241   : > { %v1772_v22 = vpop.f32.mrf.mxu0 }
 0x242   : > { %v1846_v16 = vadd.f32 %v1772_v22, %v18788_v33  ;;  %11882 = vmatmul.msk.f32.gmra.mxu3 %vm452_vm1, %v18789_v49  ;;  %11816 = vmatmul.msk.f32.gmra.mxu1 %vm452_vm1, %v18791_v34  ;;  %v2452_v22 = vld [vmem:[#allocation2 + $0x181] sm:$0xff] }
 0x243   : > { %11849 = vmatmul.msk.f32.gmra.mxu2 %vm452_vm1, %v18790_v50  ;;  %v1897_v33 = vld [vmem:[#allocation2 + $0x182] sm:$0xff] }
 0x244   : > { %v2124_v21 = vadd.f32 %v2050_v31, %v1846_v16  ;;  %11782 = vmatmul.msk.f32.gmra.mxu0 %vm452_vm1, %v18789_v49  ;;  %v3049_v50 = vld [vmem:[%s14069_s18] sm:$0xff] }
 0x245   : > { %v2601_v53 = vpop.f32.mrf.mxu3  ;;  %3136 = vst.msk [vmem:[#allocation3 + $0x19] sm:$0xff] %vm452_vm1, %v3049_v50  ;;  %v3052_v50 = vld [vmem:[%s14069_s18 + $0x18] sm:$0xff] }
 0x246   : > { %v2326_v12 = vpop.f32.mrf.mxu2  ;;  %v14029_v54 = vadd.f32 %v2601_v53, %v2401_v9  ;;  %3139 = vst.msk [vmem:[#allocation3 + $0x39] sm:$0xff] %vm452_vm1, %v3052_v50 }
 0x247   : > { %v2402_v55 = vadd.f32 %v2326_v12, %v2123_v7  ;;  %v2053_v24 = vpop.f32.mrf.mxu1 }
 0x249   : > { %v1775_v57 = vpop.f32.mrf.mxu0 }
 0x24a   : > { %v1847_v23 = vadd.f32 %v1775_v57, %v18792_v38  ;;  %11883 = vmatmul.msk.f32.gmra.mxu3 %vm452_vm1, %v18793_v25  ;;  %11817 = vmatmul.msk.f32.gmra.mxu1 %vm452_vm1, %v13709_v52  ;;  %v12024_v52 = vld [vmem:[%s18536_s4 + $0xc] sm:$0xf] }
 0x24b   : > { %11850 = vmatmul.msk.f32.gmra.mxu2 %vm452_vm1, %v13707_v10  ;;  %12025 = vmatpush.msk.msrb.mxu0 %vm704_vm0, %v12024_v52  ;;  %v1898_v38 = vld [vmem:[#allocation2 + $0x18a] sm:$0xff] }
 0x24c   : > { %v2125_v61 = vadd.f32 %v2053_v24, %v1847_v23  ;;  %11783 = vmatmul.msk.f32.gmra.mxu0 %vm452_vm1, %v18793_v25  ;;  %v3050_v23 = vld [vmem:[%s14069_s18 + $0x8] sm:$0xff]  ;;  %v3051_v52 = vld [vmem:[%s14069_s18 + $0x10] sm:$0xff] }
 0x24d   : > { %v2604_v62 = vpop.f32.mrf.mxu3  ;;  %3137 = vst.msk [vmem:[#allocation3 + $0x21] sm:$0xff] %vm452_vm1, %v3050_v23  ;;  %v3203_v23 = vld [vmem:[#allocation3 + $0x19] sm:$0xff] }
 0x24e   : > { %v2329_v42 = vpop.f32.mrf.mxu2  ;;  %v14044_v63 = vadd.f32 %v2604_v62, %v2402_v55  ;;  %v2176_v55 = vld [vmem:[#allocation2 + $0x198] sm:$0xff]  ;;  %3138 = vst.msk [vmem:[#allocation3 + $0x31] sm:$0xff] %vm452_vm1, %v3051_v52 }
 0x24f   : > { %v2403_v3 = vadd.f32 %v2329_v42, %v2124_v21  ;;  %v2056_v10 = vpop.f32.mrf.mxu1 }
 0x251   : > { %v1778_v27 = vpop.f32.mrf.mxu0 }
 0x252   : > { %v1848_v5 = vadd.f32 %v1778_v27, %v18794_v43  ;;  %11884 = vmatmul.msk.f32.gmra.mxu3 %vm452_vm1, %v18795_v17  ;;  %11818 = vmatmul.msk.f32.gmra.mxu1 %vm452_vm1, %v13725_v56  ;;  %v2702_v43 = vld [vmem:[#allocation2 + $0x32] sm:$0xff] }
 0x253   : > { %11851 = vmatmul.msk.f32.gmra.mxu2 %vm452_vm1, %v13723_v36  ;;  %v12058_v36 = vld [vmem:[%s18536_s4 + $0x10] sm:$0xf] }
 0x254   : > { %v2126_v7 = vadd.f32 %v2056_v10, %v1848_v5  ;;  %11784 = vmatmul.msk.f32.gmra.mxu0 %vm452_vm1, %v18795_v17  ;;  %12059 = vmatpush.msk.msrb.mxu1 %vm704_vm0, %v12058_v36  ;;  %v3201_v5 = vld [vmem:[#allocation3 + $0x1] sm:$0xff] }
 0x255   : > { %v2607_v8 = vpop.f32.mrf.mxu3  ;;  %v3205_v50 = vld [vmem:[#allocation3 + $0x31] sm:$0xff] }
 0x256   : > { %v2332_v45 = vpop.f32.mrf.mxu2  ;;  %v14059_v30 = vadd.f32 %v2607_v8, %v2403_v3  ;;  %v2454_v3 = vld [vmem:[#allocation2 + $0x199] sm:$0xff] }
 0x257   : > { %v2404_v9 = vadd.f32 %v2332_v45, %v2125_v61  ;;  %v2059_v56 = vpop.f32.mrf.mxu1 }
 0x259   : > { %v1781_v31 = vpop.f32.mrf.mxu0 }
 0x25a   : > { %v1849_v16 = vadd.f32 %v1781_v31, %v13735_v40  ;;  %11885 = vmatmul.msk.f32.gmra.mxu3 %vm452_vm1, %v2452_v22  ;;  %11819 = vmatmul.msk.f32.gmra.mxu1 %vm452_vm1, %v1897_v33  ;;  %v2453_v40 = vld [vmem:[#allocation2 + $0x189] sm:$0xff]  ;;  %v2703_v33 = vld [vmem:[#allocation2 + $0x3a] sm:$0xff] }
 0x25b   : > { %11852 = vmatmul.msk.f32.gmra.mxu2 %vm452_vm1, %v13737_v11 }
 0x25c   : > { %v2127_v49 = vadd.f32 %v2059_v56, %v1849_v16  ;;  %11785 = vmatmul.msk.f32.gmra.mxu0 %vm452_vm1, %v2452_v22  ;;  %v2455_v22 = vld [vmem:[#allocation2 + $0x1a1] sm:$0xff]  ;;  %v3202_v16 = vld [vmem:[#allocation3 + $0x9] sm:$0xff] }
 0x25d   : > { %v2610_v21 = vpop.f32.mrf.mxu3 }
 0x25e   : > { %v2335_v34 = vpop.f32.mrf.mxu2  ;;  %v14079_v53 = vadd.f32 %v2610_v21, %v2404_v9 }
 0x25f   : > { %v2405_v12 = vadd.f32 %v2335_v34, %v2126_v7  ;;  %v2062_v24 = vpop.f32.mrf.mxu1 }
 0x261   : > { %v1784_v57 = vpop.f32.mrf.mxu0 }
 0x262   : > { %v1850_v11 = vadd.f32 %v1784_v57, %v13747_v32  ;;  %11886 = vmatmul.msk.f32.gmra.mxu3 %vm452_vm1, %v2453_v40  ;;  %11820 = vmatmul.msk.f32.gmra.mxu1 %vm452_vm1, %v1898_v38  ;;  %v2177_v32 = vld [vmem:[#allocation2 + $0x1a0] sm:$0xff]  ;;  %v3659_v57 = vld [vmem:[#allocation3 + $0x2] sm:$0xff] }
 0x263   : > { %11853 = vmatmul.msk.f32.gmra.mxu2 %vm452_vm1, %v2176_v55 }
 0x264   : > { %v2128_v25 = vadd.f32 %v2062_v24, %v1850_v11  ;;  %11786 = vmatmul.msk.f32.gmra.mxu0 %vm452_vm1, %v2453_v40  ;;  %v2704_v11 = vld [vmem:[#allocation2 + $0x4a] sm:$0xff] }
 0x265   : > { %v2613_v59 = vpop.f32.mrf.mxu3 }
 0x266   : > { %v2338_v61 = vpop.f32.mrf.mxu2  ;;  %v14088_v62 = vadd.f32 %v2613_v59, %v2405_v12 }
 0x267   : > { %v2406_v42 = vadd.f32 %v2338_v61, %v2127_v49  ;;  %v2065_v10 = vpop.f32.mrf.mxu1  ;;  %v3053_v61 = vld [vmem:[%s14069_s18 + $0x20] sm:$0xff] }
 0x268   : > { %3140 = vst.msk [vmem:[#allocation3 + $0x49] sm:$0xff] %vm452_vm1, %v3053_v61 }
 0x269   : > { %v1787_v27 = vpop.f32.mrf.mxu0 }
 0x26a   : > { %v1851_v17 = vadd.f32 %v1787_v27, %v13757_v44  ;;  %11887 = vmatmul.msk.f32.gmra.mxu3 %vm452_vm1, %v2454_v3  ;;  %11925 = vmatmul.msk.f32.vlgmr.msra.gmra.mxu1 %vm452_vm1, %v3201_v5  ;;  %v3168_v44 = vld [vmem:[#allocation3] sm:$0xff] }
 0x26b   : > { %11854 = vmatmul.msk.f32.gmra.mxu2 %vm452_vm1, %v2177_v32 }
 0x26c   : > { %v2129_v7 = vadd.f32 %v2065_v10, %v1851_v17  ;;  %11891 = vmatmul.msk.f32.vlgmr.msra.gmra.mxu0 %vm452_vm1, %v2702_v43  ;;  %v3660_v10 = vld [vmem:[#allocation3 + $0xa] sm:$0xff]  ;;  %v2705_v17 = vld [vmem:[#allocation2 + $0x52] sm:$0xff] }
 0x26d   : > { %v2616_v8 = vpop.f32.mrf.mxu3 }
 0x26e   : > { %v2341_v45 = vpop.f32.mrf.mxu2  ;;  %v14097_v9 = vadd.f32 %v2616_v8, %v2406_v42  ;;  %v3054_v8 = vld [vmem:[%s14069_s18 + $0x28] sm:$0xff] }
 0x26f   : > { %v2407_v36 = vadd.f32 %v2341_v45, %v2128_v25  ;;  %v2068_v56 = vpop.f32.mrf.mxu1  ;;  %3141 = vst.msk [vmem:[#allocation3 + $0x51] sm:$0xff] %vm452_vm1, %v3054_v8  ;;  %v3207_v8 = vld [vmem:[#allocation3 + $0x49] sm:$0xff] }
 0x271   : > { %v1790_v31 = vpop.f32.mrf.mxu0 }
 0x272   : > { %v1852_v49 = vadd.f32 %v1790_v31, %v13767_v0  ;;  %11888 = vmatmul.msk.f32.gmra.mxu3 %vm452_vm1, %v2455_v22  ;;  %11926 = vmatmul.msk.f32.gmra.mxu1 %vm452_vm1, %v3202_v16  ;;  %v3169_v0 = vld [vmem:[#allocation3 + $0x8] sm:$0xff] }
 0x273   : > { %11958 = vmatmul.msk.f32.vlgmr.msra.gmra.mxu2 %vm452_vm1, %v3168_v44 }
 0x274   : > { %v2130_v21 = vadd.f32 %v2068_v56, %v1852_v49  ;;  %11892 = vmatmul.msk.f32.gmra.mxu0 %vm452_vm1, %v2703_v33  ;;  %v3661_v56 = vld [vmem:[#allocation3 + $0x1a] sm:$0xff]  ;;  %v2706_v49 = vld [vmem:[#allocation2 + $0x62] sm:$0xff] }
 0x275   : > { %v2619_v34 = vpop.f32.mrf.mxu3 }
 0x276   : > { %v2344_v12 = vpop.f32.mrf.mxu2  ;;  %v14106_v40 = vadd.f32 %v2619_v34, %v2407_v36 }
 0x277   : > { %v2408_v55 = vadd.f32 %v2344_v12, %v2129_v7  ;;  %v2071_v38 = vpop.f32.mrf.mxu1  ;;  %v3204_v7 = vld [vmem:[#allocation3 + $0x21] sm:$0xff] }
 0x278   : > { %v3055_v12 = vld [vmem:[%s14069_s18 + $0x30] sm:$0xff] }
 0x279   : > { %v1793_v24 = vpop.f32.mrf.mxu0  ;;  %3142 = vst.msk [vmem:[#allocation3 + $0x61] sm:$0xff] %vm452_vm1, %v3055_v12 }
 0x27a   : > { %v1853_v25 = vadd.f32 %v1793_v24, %v13777_v6  ;;  %11992 = vmatmul.msk.f32.vlgmr.msra.gmra.mxu3 %vm452_vm1, %v3659_v57  ;;  %11927 = vmatmul.msk.f32.gmra.mxu1 %vm452_vm1, %v3203_v23  ;;  %v3170_v6 = vld [vmem:[#allocation3 + $0x18] sm:$0xff] }
 0x27b   : > { %11959 = vmatmul.msk.f32.gmra.mxu2 %vm452_vm1, %v3169_v0 }
 0x27c   : > { %v2131_v59 = vadd.f32 %v2071_v38, %v1853_v25  ;;  %11893 = vmatmul.msk.f32.gmra.mxu0 %vm452_vm1, %v2704_v11  ;;  %v3662_v38 = vld [vmem:[#allocation3 + $0x22] sm:$0xff]  ;;  %v2707_v25 = vld [vmem:[#allocation2 + $0x6a] sm:$0xff] }
 0x27d   : > { %v2622_v42 = vpop.f32.mrf.mxu3 }
 0x27e   : > { %v2347_v3 = vpop.f32.mrf.mxu2  ;;  %v14115_v32 = vadd.f32 %v2622_v42, %v2408_v55  ;;  %v3056_v42 = vld [vmem:[%s14069_s18 + $0x38] sm:$0xff] }
 0x27f   : > { %v2409_v27 = vadd.f32 %v2347_v3, %v2130_v21  ;;  %v2074_v5 = vpop.f32.mrf.mxu1  ;;  %3143 = vst.msk [vmem:[#allocation3 + $0x69] sm:$0xff] %vm452_vm1, %v3056_v42 }
 0x280   : > { %v3209_v42 = vld [vmem:[#allocation3 + $0x61] sm:$0xff] }
 0x281   : > { %v1796_v43 = vpop.f32.mrf.mxu0 }
 0x282   : > { %v1854_v52 = vadd.f32 %v1796_v43, %v13787_v18  ;;  %11993 = vmatmul.msk.f32.gmra.mxu3 %vm452_vm1, %v3660_v10  ;;  %11928 = vmatmul.msk.f32.gmra.mxu1 %vm452_vm1, %v3204_v7  ;;  %v3171_v18 = vld [vmem:[#allocation3 + $0x20] sm:$0xff] }
 0x283   : > { %11960 = vmatmul.msk.f32.gmra.mxu2 %vm452_vm1, %v3170_v6 }
 0x284   : > { %v2132_v45 = vadd.f32 %v2074_v5, %v1854_v52  ;;  %11894 = vmatmul.msk.f32.gmra.mxu0 %vm452_vm1, %v2705_v17  ;;  %v3663_v5 = vld [vmem:[#allocation3 + $0x32] sm:$0xff]  ;;  %v2708_v52 = vld [vmem:[#allocation2 + $0x7a] sm:$0xff] }
 0x285   : > { %v2625_v36 = vpop.f32.mrf.mxu3 }
 0x286   : > { %v2350_v22 = vpop.f32.mrf.mxu2  ;;  %v14124_v44 = vadd.f32 %v2625_v36, %v2409_v27 }
 0x287   : > { %v2410_v31 = vadd.f32 %v2350_v22, %v2131_v59  ;;  %v2077_v16 = vpop.f32.mrf.mxu1  ;;  %v3206_v59 = vld [vmem:[#allocation3 + $0x39] sm:$0xff]  ;;  %v3057_v22 = vld [vmem:[%s14069_s18 + $0x40] sm:$0xff] }
 0x288   : > { %3144 = vst.msk [vmem:[#allocation3 + $0x79] sm:$0xff] %vm452_vm1, %v3057_v22 }
 0x289   : > { %v1799_v33 = vpop.f32.mrf.mxu0 }
 0x28a   : > { %v1855_v21 = vadd.f32 %v1799_v33, %v13797_v28  ;;  %11994 = vmatmul.msk.f32.gmra.mxu3 %vm452_vm1, %v3661_v56  ;;  %11929 = vmatmul.msk.f32.gmra.mxu1 %vm452_vm1, %v3205_v50  ;;  %v3172_v28 = vld [vmem:[#allocation3 + $0x30] sm:$0xff] }
 0x28b   : > { %11961 = vmatmul.msk.f32.gmra.mxu2 %vm452_vm1, %v3171_v18 }
 0x28c   : > { %v2133_v34 = vadd.f32 %v2077_v16, %v1855_v21  ;;  %11895 = vmatmul.msk.f32.gmra.mxu0 %vm452_vm1, %v2706_v49  ;;  %v3664_v16 = vld [vmem:[#allocation3 + $0x3a] sm:$0xff]  ;;  %v2709_v21 = vld [vmem:[#allocation2 + $0x82] sm:$0xff] }
 0x28d   : > { %v2628_v55 = vpop.f32.mrf.mxu3 }
 0x28e   : > { %v2353_v57 = vpop.f32.mrf.mxu2  ;;  %v14133_v0 = vadd.f32 %v2628_v55, %v2410_v31  ;;  %v3058_v55 = vld [vmem:[%s14069_s18 + $0x48] sm:$0xff] }
 0x28f   : > { %v2411_v24 = vadd.f32 %v2353_v57, %v2132_v45  ;;  %v2080_v23 = vpop.f32.mrf.mxu1  ;;  %3145 = vst.msk [vmem:[#allocation3 + $0x81] sm:$0xff] %vm452_vm1, %v3058_v55  ;;  %v3211_v55 = vld [vmem:[#allocation3 + $0x79] sm:$0xff] }
 0x291   : > { %v1802_v11 = vpop.f32.mrf.mxu0 }
 0x292   : > { %v1856_v61 = vadd.f32 %v1802_v11, %v13807_v29  ;;  %11995 = vmatmul.msk.f32.gmra.mxu3 %vm452_vm1, %v3662_v38  ;;  %11930 = vmatmul.msk.f32.gmra.mxu1 %vm452_vm1, %v3206_v59  ;;  %v3173_v29 = vld [vmem:[#allocation3 + $0x38] sm:$0xff] }
 0x293   : > { %11962 = vmatmul.msk.f32.gmra.mxu2 %vm452_vm1, %v3172_v28 }
 0x294   : > { %v2134_v3 = vadd.f32 %v2080_v23, %v1856_v61  ;;  %11896 = vmatmul.msk.f32.gmra.mxu0 %vm452_vm1, %v2707_v25  ;;  %v3665_v23 = vld [vmem:[#allocation3 + $0x4a] sm:$0xff]  ;;  %v2710_v61 = vld [vmem:[#allocation2 + $0x92] sm:$0xff] }
 0x295   : > { %v2631_v27 = vpop.f32.mrf.mxu3 }
 0x296   : > { %v2356_v10 = vpop.f32.mrf.mxu2  ;;  %v14142_v6 = vadd.f32 %v2631_v27, %v2411_v24 }
 0x297   : > { %v2412_v43 = vadd.f32 %v2356_v10, %v2133_v34  ;;  %v2083_v7 = vpop.f32.mrf.mxu1  ;;  %v3208_v34 = vld [vmem:[#allocation3 + $0x51] sm:$0xff]  ;;  %v3059_v10 = vld [vmem:[%s14069_s18 + $0x50] sm:$0xff] }
 0x298   : > { %3146 = vst.msk [vmem:[#allocation3 + $0x91] sm:$0xff] %vm452_vm1, %v3059_v10 }
 0x299   : > { %v1805_v17 = vpop.f32.mrf.mxu0 }
 0x29a   : > { %v1857_v45 = vadd.f32 %v1805_v17, %v13817_v60  ;;  %11996 = vmatmul.msk.f32.gmra.mxu3 %vm452_vm1, %v3663_v5  ;;  %11931 = vmatmul.msk.f32.gmra.mxu1 %vm452_vm1, %v3207_v8  ;;  %v3174_v60 = vld [vmem:[#allocation3 + $0x48] sm:$0xff] }
 0x29b   : > { %11963 = vmatmul.msk.f32.gmra.mxu2 %vm452_vm1, %v3173_v29 }
 0x29c   : > { %v2135_v36 = vadd.f32 %v2083_v7, %v1857_v45  ;;  %11897 = vmatmul.msk.f32.gmra.mxu0 %vm452_vm1, %v2708_v52  ;;  %v3666_v7 = vld [vmem:[#allocation3 + $0x52] sm:$0xff]  ;;  %v2711_v45 = vld [vmem:[#allocation2 + $0x9a] sm:$0xff] }
 0x29d   : > { %v2634_v31 = vpop.f32.mrf.mxu3 }
 0x29e   : > { %v2359_v56 = vpop.f32.mrf.mxu2  ;;  %v14151_v18 = vadd.f32 %v2634_v31, %v2412_v43  ;;  %v3060_v31 = vld [vmem:[%s14069_s18 + $0x58] sm:$0xff] }
 0x29f   : > { %v2413_v33 = vadd.f32 %v2359_v56, %v2134_v3  ;;  %v2086_v50 = vpop.f32.mrf.mxu1  ;;  %3147 = vst.msk [vmem:[#allocation3 + $0x99] sm:$0xff] %vm452_vm1, %v3060_v31  ;;  %v3213_v31 = vld [vmem:[#allocation3 + $0x91] sm:$0xff] }
 0x2a1   : > { %v1808_v49 = vpop.f32.mrf.mxu0 }
 0x2a2   : > { %v1858_v12 = vadd.f32 %v1808_v49, %v13827_v19  ;;  %11997 = vmatmul.msk.f32.gmra.mxu3 %vm452_vm1, %v3664_v16  ;;  %11932 = vmatmul.msk.f32.gmra.mxu1 %vm452_vm1, %v3208_v34  ;;  %v3175_v19 = vld [vmem:[#allocation3 + $0x50] sm:$0xff] }
 0x2a3   : > { %11964 = vmatmul.msk.f32.gmra.mxu2 %vm452_vm1, %v3174_v60 }
 0x2a4   : > { %v2136_v57 = vadd.f32 %v2086_v50, %v1858_v12  ;;  %11898 = vmatmul.msk.f32.gmra.mxu0 %vm452_vm1, %v2709_v21  ;;  %v3667_v50 = vld [vmem:[#allocation3 + $0x62] sm:$0xff]  ;;  %v2712_v12 = vld [vmem:[#allocation2 + $0xaa] sm:$0xff] }
 0x2a5   : > { %v2637_v24 = vpop.f32.mrf.mxu3 }
 0x2a6   : > { %v2362_v38 = vpop.f32.mrf.mxu2  ;;  %v14160_v28 = vadd.f32 %v2637_v24, %v2413_v33 }
 0x2a7   : > { %v2414_v11 = vadd.f32 %v2362_v38, %v2135_v36  ;;  %v2089_v59 = vpop.f32.mrf.mxu1  ;;  %v3210_v36 = vld [vmem:[#allocation3 + $0x69] sm:$0xff] }
 0x2a8   : > { %v3061_v38 = vld [vmem:[%s14069_s18 + $0x60] sm:$0xff] }
 0x2a9   : > { %v1811_v25 = vpop.f32.mrf.mxu0  ;;  %3148 = vst.msk [vmem:[#allocation3 + $0xa9] sm:$0xff] %vm452_vm1, %v3061_v38 }
 0x2aa   : > { %v1859_v3 = vadd.f32 %v1811_v25, %v13837_v37  ;;  %11998 = vmatmul.msk.f32.gmra.mxu3 %vm452_vm1, %v3665_v23  ;;  %11933 = vmatmul.msk.f32.gmra.mxu1 %vm452_vm1, %v3209_v42  ;;  %v3176_v37 = vld [vmem:[#allocation3 + $0x60] sm:$0xff] }
 0x2ab   : > { %11965 = vmatmul.msk.f32.gmra.mxu2 %vm452_vm1, %v3175_v19 }
 0x2ac   : > { %v2137_v27 = vadd.f32 %v2089_v59, %v1859_v3  ;;  %11899 = vmatmul.msk.f32.gmra.mxu0 %vm452_vm1, %v2710_v61  ;;  %v3668_v59 = vld [vmem:[#allocation3 + $0x6a] sm:$0xff]  ;;  %v2713_v3 = vld [vmem:[#allocation2 + $0xb2] sm:$0xff] }
 0x2ad   : > { %v2640_v43 = vpop.f32.mrf.mxu3 }
 0x2ae   : > { %v2365_v5 = vpop.f32.mrf.mxu2  ;;  %v14169_v29 = vadd.f32 %v2640_v43, %v2414_v11  ;;  %v3062_v43 = vld [vmem:[%s14069_s18 + $0x68] sm:$0xff] }
 0x2af   : > { %v2415_v17 = vadd.f32 %v2365_v5, %v2136_v57  ;;  %v2092_v8 = vpop.f32.mrf.mxu1  ;;  %3149 = vst.msk [vmem:[#allocation3 + $0xb1] sm:$0xff] %vm452_vm1, %v3062_v43  ;;  %v2716_v43 = vld [vmem:[#allocation2 + $0xda] sm:$0xff] }
 0x2b1   : > { %v1814_v52 = vpop.f32.mrf.mxu0 }
 0x2b2   : > { %v1860_v22 = vadd.f32 %v1814_v52, %v13847_v26  ;;  %11999 = vmatmul.msk.f32.gmra.mxu3 %vm452_vm1, %v3666_v7  ;;  %11934 = vmatmul.msk.f32.gmra.mxu1 %vm452_vm1, %v3210_v36  ;;  %v3177_v26 = vld [vmem:[#allocation3 + $0x68] sm:$0xff] }
 0x2b3   : > { %11966 = vmatmul.msk.f32.gmra.mxu2 %vm452_vm1, %v3176_v37 }
 0x2b4   : > { %v2138_v56 = vadd.f32 %v2092_v8, %v1860_v22  ;;  %11900 = vmatmul.msk.f32.gmra.mxu0 %vm452_vm1, %v2711_v45  ;;  %v3669_v8 = vld [vmem:[#allocation3 + $0x7a] sm:$0xff]  ;;  %v2714_v22 = vld [vmem:[#allocation2 + $0xc2] sm:$0xff] }
 0x2b5   : > { %v2643_v33 = vpop.f32.mrf.mxu3 }
 0x2b6   : > { %v2368_v16 = vpop.f32.mrf.mxu2  ;;  %v14178_v60 = vadd.f32 %v2643_v33, %v2415_v17 }
 0x2b7   : > { %v2416_v49 = vadd.f32 %v2368_v16, %v2137_v27  ;;  %v2095_v34 = vpop.f32.mrf.mxu1  ;;  %v3212_v27 = vld [vmem:[#allocation3 + $0x81] sm:$0xff] }
 0x2b8   : > { %v3063_v16 = vld [vmem:[%s14069_s18 + $0x70] sm:$0xff] }
 0x2b9   : > { %v1817_v21 = vpop.f32.mrf.mxu0  ;;  %3150 = vst.msk [vmem:[#allocation3 + $0xc1] sm:$0xff] %vm452_vm1, %v3063_v16  ;;  %v3216_v16 = vld [vmem:[#allocation3 + $0xb1] sm:$0xff] }
 0x2ba   : > { %v1861_v57 = vadd.f32 %v1817_v21, %v13857_v4  ;;  %12000 = vmatmul.msk.f32.gmra.mxu3 %vm452_vm1, %v3667_v50  ;;  %11935 = vmatmul.msk.f32.gmra.mxu1 %vm452_vm1, %v3211_v55  ;;  %v3178_v4 = vld [vmem:[#allocation3 + $0x78] sm:$0xff] }
 0x2bb   : > { %11967 = vmatmul.msk.f32.gmra.mxu2 %vm452_vm1, %v3177_v26 }
 0x2bc   : > { %v2139_v24 = vadd.f32 %v2095_v34, %v1861_v57  ;;  %11901 = vmatmul.msk.f32.gmra.mxu0 %vm452_vm1, %v2712_v12  ;;  %v3670_v34 = vld [vmem:[#allocation3 + $0x82] sm:$0xff]  ;;  %v2715_v57 = vld [vmem:[#allocation2 + $0xca] sm:$0xff] }
 0x2bd   : > { %v2646_v11 = vpop.f32.mrf.mxu3 }
 0x2be   : > { %v2371_v23 = vpop.f32.mrf.mxu2  ;;  %v14187_v19 = vadd.f32 %v2646_v11, %v2416_v49  ;;  %v3064_v11 = vld [vmem:[%s14069_s18 + $0x78] sm:$0xff] }
 0x2bf   : > { %v2417_v25 = vadd.f32 %v2371_v23, %v2138_v56  ;;  %v2098_v42 = vpop.f32.mrf.mxu1  ;;  %3151 = vst.msk [vmem:[#allocation3 + $0xc9] sm:$0xff] %vm452_vm1, %v3064_v11 }
 0x2c1   : > { %v1820_v61 = vpop.f32.mrf.mxu0 }
 0x2c2   : > { %v1862_v10 = vadd.f32 %v1820_v61, %v13871_v46  ;;  %12001 = vmatmul.msk.f32.gmra.mxu3 %vm452_vm1, %v3668_v59  ;;  %11936 = vmatmul.msk.f32.gmra.mxu1 %vm452_vm1, %v3212_v27  ;;  %v3179_v46 = vld [vmem:[#allocation3 + $0x80] sm:$0xff] }
 0x2c3   : > { %11968 = vmatmul.msk.f32.gmra.mxu2 %vm452_vm1, %v3178_v4 }
 0x2c4   : > { %v2140_v5 = vadd.f32 %v2098_v42, %v1862_v10  ;;  %11902 = vmatmul.msk.f32.gmra.mxu0 %vm452_vm1, %v2713_v3  ;;  %v3671_v42 = vld [vmem:[#allocation3 + $0x92] sm:$0xff] }
 0x2c5   : > { %v2649_v17 = vpop.f32.mrf.mxu3  ;;  %v3181_v3 = vld [vmem:[#allocation3 + $0x98] sm:$0xff] }
 0x2c6   : > { %v2374_v7 = vpop.f32.mrf.mxu2  ;;  %v14196_v37 = vadd.f32 %v2649_v17, %v2417_v25  ;;  %v12092_v25 = vld [vmem:[%s18536_s4 + $0x14] sm:$0xf] }
 0x2c7   : > { %v2418_v52 = vadd.f32 %v2374_v7, %v2139_v24  ;;  %v2101_v36 = vpop.f32.mrf.mxu1  ;;  %v3214_v24 = vld [vmem:[#allocation3 + $0x99] sm:$0xff]  ;;  %12093 = vmatpush.msk.msrb.mxu2 %vm704_vm0, %v12092_v25  ;;  %v3217_v25 = vld [vmem:[#allocation3 + $0xc1] sm:$0xff] }
 0x2c9   : > { %v1823_v45 = vpop.f32.mrf.mxu0 }
 0x2ca   : > { %v1863_v56 = vadd.f32 %v1823_v45, %v13881_v47  ;;  %12002 = vmatmul.msk.f32.gmra.mxu3 %vm452_vm1, %v3669_v8  ;;  %11937 = vmatmul.msk.f32.gmra.mxu1 %vm452_vm1, %v3213_v31  ;;  %v3180_v47 = vld [vmem:[#allocation3 + $0x90] sm:$0xff] }
 0x2cb   : > { %11969 = vmatmul.msk.f32.gmra.mxu2 %vm452_vm1, %v3179_v46 }
 0x2cc   : > { %v2141_v33 = vadd.f32 %v2101_v36, %v1863_v56  ;;  %11903 = vmatmul.msk.f32.gmra.mxu0 %vm452_vm1, %v2714_v22  ;;  %v3672_v22 = vld [vmem:[#allocation3 + $0x9a] sm:$0xff] }
 0x2cd   : > { %v2652_v49 = vpop.f32.mrf.mxu3 }
 0x2ce   : > { %v2377_v50 = vpop.f32.mrf.mxu2  ;;  %v14205_v26 = vadd.f32 %v2652_v49, %v2418_v52  ;;  %v3065_v52 = vld [vmem:[%s14069_s18 + $0x80] sm:$0xff] }
 0x2cf   : > { %v2419_v21 = vadd.f32 %v2377_v50, %v2140_v5  ;;  %v2104_v55 = vpop.f32.mrf.mxu1  ;;  %v3215_v5 = vld [vmem:[#allocation3 + $0xa9] sm:$0xff]  ;;  %3152 = vst.msk [vmem:[#allocation3 + $0xd9] sm:$0xff] %vm452_vm1, %v3065_v52  ;;  %v3066_v50 = vld [vmem:[%s14069_s18 + $0x88] sm:$0xff] }
 0x2d0   : > { %3153 = vst.msk [vmem:[#allocation3 + $0xe1] sm:$0xff] %vm452_vm1, %v3066_v50  ;;  %v3218_v52 = vld [vmem:[#allocation3 + $0xc9] sm:$0xff]  ;;  %v2720_v50 = vld [vmem:[#allocation2 + $0x10a] sm:$0xff] }
 0x2d1   : > { %v1826_v12 = vpop.f32.mrf.mxu0 }
 0x2d2   : > { %v1864_v38 = vadd.f32 %v1826_v12, %v13891_v51  ;;  %12003 = vmatmul.msk.f32.gmra.mxu3 %vm452_vm1, %v3670_v34  ;;  %11938 = vmatmul.msk.f32.gmra.mxu1 %vm452_vm1, %v3214_v24  ;;  %v14241_v24 = vld [vmem:[%s18535_s3] ss:$0 sm:$0xff] }
 0x2d3   : > { %11970 = vmatmul.msk.f32.gmra.mxu2 %vm452_vm1, %v3180_v47 }
 0x2d4   : > { %v2142_v23 = vadd.f32 %v2104_v55, %v1864_v38  ;;  %11904 = vmatmul.msk.f32.gmra.mxu0 %vm452_vm1, %v2715_v57  ;;  %v3183_v57 = vld [vmem:[#allocation3 + $0xb0] sm:$0xff] }
 0x2d5   : > { %v2655_v59 = vpop.f32.mrf.mxu3 }
 0x2d6   : > { %v2380_v4 = vpop.f32.mrf.mxu2  ;;  %v14218_v51 = vadd.f32 %v2655_v59, %v2419_v21 }
 0x2d7   : > { %v2420_v61 = vadd.f32 %v2380_v4, %v2141_v33  ;;  %v2107_v10 = vpop.f32.mrf.mxu1  ;;  %v2717_v33 = vld [vmem:[#allocation2 + $0xe2] sm:$0xff] }
 0x2d9   : > { %v1829_v27 = vpop.f32.mrf.mxu0 }
 0x2da   : > { %v1865_v17 = vadd.f32 %v1829_v27, %v13908_v48  ;;  %12004 = vmatmul.msk.f32.gmra.mxu3 %vm452_vm1, %v3671_v42  ;;  %11939 = vmatmul.msk.f32.gmra.mxu1 %vm452_vm1, %v3215_v5  ;;  %v3182_v48 = vld [vmem:[#allocation3 + $0xa8] sm:$0xff] }
 0x2db   : > { %11971 = vmatmul.msk.f32.gmra.mxu2 %vm452_vm1, %v3181_v3 }
 0x2dc   : > { %v2143_v7 = vadd.f32 %v2107_v10, %v1865_v17  ;;  %11905 = vmatmul.msk.f32.gmra.mxu0 %vm452_vm1, %v2716_v43  ;;  %v3674_v10 = vld [vmem:[#allocation3 + $0xb2] sm:$0xff]  ;;  %v3184_v43 = vld [vmem:[#allocation3 + $0xc0] sm:$0xff] }
 0x2dd   : > { %v2658_v8 = vpop.f32.mrf.mxu3 }
 0x2de   : > { %v2383_v46 = vpop.f32.mrf.mxu2  ;;  %v14227_v45 = vadd.f32 %v2658_v8, %v2420_v61  ;;  %v3067_v61 = vld [vmem:[%s14069_s18 + $0x90] sm:$0xff] }
 0x2df   : > { %v2421_v36 = vadd.f32 %v2383_v46, %v2142_v23  ;;  %v2110_v56 = vpop.f32.mrf.mxu1  ;;  %v2718_v23 = vld [vmem:[#allocation2 + $0xf2] sm:$0xff]  ;;  %3154 = vst.msk [vmem:[#allocation3 + $0xf1] sm:$0xff] %vm452_vm1, %v3067_v61 }
 0x2e0   : > { %v3068_v46 = vld [vmem:[%s14069_s18 + $0x98] sm:$0xff] }
 0x2e1   : > { %v1832_v31 = vpop.f32.mrf.mxu0  ;;  %3155 = vst.msk [vmem:[#allocation3 + $0xf9] sm:$0xff] %vm452_vm1, %v3068_v46  ;;  %v3220_v61 = vld [vmem:[#allocation3 + $0xe1] sm:$0xff]  ;;  %v2722_v46 = vld [vmem:[#allocation2 + $0x122] sm:$0xff] }
 0x2e2   : > { %v1866_v49 = vadd.f32 %v1832_v31, %v13919_v20  ;;  %12005 = vmatmul.msk.f32.gmra.mxu3 %vm452_vm1, %v3672_v22  ;;  %11940 = vmatmul.msk.f32.gmra.mxu1 %vm452_vm1, %v3216_v16  ;;  %v3673_v20 = vld [vmem:[#allocation3 + $0xaa] sm:$0xff] }
 0x2e3   : > { %11972 = vmatmul.msk.f32.gmra.mxu2 %vm452_vm1, %v3182_v48 }
 0x2e4   : > { %v2144_v21 = vadd.f32 %v2110_v56, %v1866_v49  ;;  %11906 = vmatmul.msk.f32.gmra.mxu0 %vm452_vm1, %v2717_v33  ;;  %v3675_v56 = vld [vmem:[#allocation3 + $0xc2] sm:$0xff] }
 0x2e5   : > { %v2661_v34 = vpop.f32.mrf.mxu3  ;;  %v3185_v33 = vld [vmem:[#allocation3 + $0xc8] sm:$0xff] }
 0x2e6   : > { %v2386_v47 = vpop.f32.mrf.mxu2  ;;  %v14236_v12 = vadd.f32 %v2661_v34, %v2421_v36 }
 0x2e7   : > { %v2422_v55 = vadd.f32 %v2386_v47, %v2143_v7  ;;  %v3351_v11 = vpop.f32.mrf.mxu1  ;;  %v2719_v7 = vld [vmem:[#allocation2 + $0xfa] sm:$0xff] }
 0x2e9   : > { %v2852_v38 = vpop.f32.mrf.mxu0 }
 0x2ea   : > { %v2948_v59 = vadd.f32 %v2852_v38, %v13930_v58  ;;  %12006 = vmatmul.msk.f32.gmra.mxu3 %vm452_vm1, %v3673_v20  ;;  %11941 = vmatmul.msk.f32.gmra.mxu1 %vm452_vm1, %v3217_v25 }
 0x2eb   : > { %11973 = vmatmul.msk.f32.gmra.mxu2 %vm452_vm1, %v3183_v57 }
 0x2ec   : > { %v2984_v4 = vadd.f32 %v14241_v24, %v2948_v59  ;;  %11907 = vmatmul.msk.f32.gmra.mxu0 %vm452_vm1, %v2718_v23  ;;  %v3186_v23 = vld [vmem:[#allocation3 + $0xd8] sm:$0xff] }
 0x2ed   : > { %v2664_v58 = vpop.f32.mrf.mxu3 }
 0x2ee   : > { %v2389_v42 = vpop.f32.mrf.mxu2  ;;  %3017 = vst.msk [vmem:[%s14250_s25] sm:$0xff] %vm3016_vm3, %v2984_v4  ;;  %v14258_v3 = vadd.f32 %v2664_v58, %v2422_v55  ;;  %v3069_v55 = vld [vmem:[%s14069_s18 + $0xa0] sm:$0xff]  ;;  %v2721_v4 = vld [vmem:[#allocation2 + $0x112] sm:$0xff] }
 0x2ef   : > { %v2423_v27 = vadd.f32 %v2389_v42, %v2144_v21  ;;  %v3354_v17 = vpop.f32.mrf.mxu1  ;;  %v3219_v21 = vld [vmem:[#allocation3 + $0xd9] sm:$0xff]  ;;  %3156 = vst.msk [vmem:[#allocation3 + $0x109] sm:$0xff] %vm452_vm1, %v3069_v55 }
 0x2f0   : > { %v3070_v42 = vld [vmem:[%s14069_s18 + $0xa8] sm:$0xff] }
 0x2f1   : > { %v2855_v5 = vpop.f32.mrf.mxu0  ;;  %3157 = vst.msk [vmem:[#allocation3 + $0x111] sm:$0xff] %vm452_vm1, %v3070_v42  ;;  %v3222_v55 = vld [vmem:[#allocation3 + $0xf9] sm:$0xff]  ;;  %v2724_v42 = vld [vmem:[#allocation2 + $0x13a] sm:$0xff] }
 0x2f2   : > { %v2949_v8 = vadd.f32 %v2855_v5, %v13941_v2  ;;  %12007 = vmatmul.msk.f32.gmra.mxu3 %vm452_vm1, %v3674_v10  ;;  %11942 = vmatmul.msk.f32.gmra.mxu1 %vm452_vm1, %v3218_v52 }
 0x2f3   : > { %11974 = vmatmul.msk.f32.gmra.mxu2 %vm452_vm1, %v3184_v43 }
 0x2f4   : > { %v2985_v36 = vadd.f32 %v14241_v24, %v2949_v8  ;;  %11908 = vmatmul.msk.f32.gmra.mxu0 %vm452_vm1, %v2719_v7  ;;  %v3187_v7 = vld [vmem:[#allocation3 + $0xe0] sm:$0xff] }
 0x2f5   : > { %v2667_v22 = vpop.f32.mrf.mxu3 }
 0x2f6   : > { %v3563_v48 = vpop.f32.mrf.mxu2  ;;  %3018 = vst.msk [vmem:[%s14250_s25 + $0x8] sm:$0xff] %vm3016_vm3, %v2985_v36  ;;  %v14271_v31 = vadd.f32 %v2667_v22, %v2423_v27  ;;  %v3221_v36 = vld [vmem:[#allocation3 + $0xf1] sm:$0xff] }
 0x2f7   : > { %v3564_v2 = vadd.f32 %v3563_v48, %v3351_v11  ;;  %v3357_v49 = vpop.f32.mrf.mxu1 }
 0x2f9   : > { %v2858_v16 = vpop.f32.mrf.mxu0 }
 0x2fa   : > { %v2950_v34 = vadd.f32 %v2858_v16, %v13952_v14  ;;  %12008 = vmatmul.msk.f32.gmra.mxu3 %vm452_vm1, %v3675_v56  ;;  %11943 = vmatmul.msk.f32.gmra.mxu1 %vm452_vm1, %v3219_v21  ;;  %v3676_v14 = vld [vmem:[#allocation3 + $0xca] sm:$0xff] }
 0x2fb   : > { %11975 = vmatmul.msk.f32.gmra.mxu2 %vm452_vm1, %v3185_v33 }
 0x2fc   : > { %v2986_v47 = vadd.f32 %v14241_v24, %v2950_v34  ;;  %11909 = vmatmul.msk.f32.gmra.mxu0 %vm452_vm1, %v2720_v50  ;;  %v3188_v50 = vld [vmem:[#allocation3 + $0xf0] sm:$0xff] }
 0x2fd   : > { %v3809_v20 = vpop.f32.mrf.mxu3 }
 0x2fe   : > { %v3566_v57 = vpop.f32.mrf.mxu2  ;;  %3019 = vst.msk [vmem:[%s14250_s25 + $0x10] sm:$0xff] %vm3016_vm3, %v2986_v47  ;;  %v14282_v38 = vadd.f32 %v3809_v20, %v3564_v2  ;;  %v3071_v2 = vld [vmem:[%s14069_s18 + $0xb0] sm:$0xff] }
 0x2ff   : > { %v3567_v11 = vadd.f32 %v3566_v57, %v3354_v17  ;;  %v3360_v59 = vpop.f32.mrf.mxu1  ;;  %v3677_v17 = vld [vmem:[#allocation3 + $0xda] sm:$0xff]  ;;  %3158 = vst.msk [vmem:[#allocation3 + $0x121] sm:$0xff] %vm452_vm1, %v3071_v2  ;;  %v3072_v57 = vld [vmem:[%s14069_s18 + $0xb8] sm:$0xff]  ;;  %v3224_v2 = vld [vmem:[#allocation3 + $0x111] sm:$0xff] }
 0x300   : > { %v2723_v47 = vld [vmem:[#allocation2 + $0x12a] sm:$0xff]  ;;  %3159 = vst.msk [vmem:[#allocation3 + $0x129] sm:$0xff] %vm452_vm1, %v3072_v57  ;;  %v2726_v57 = vld [vmem:[#allocation2 + $0x152] sm:$0xff] }
 0x301   : > { %v2861_v25 = vpop.f32.mrf.mxu0 }
 0x302   : > { %v2951_v58 = vadd.f32 %v2861_v25, %v13963_v35  ;;  %12009 = vmatmul.msk.f32.gmra.mxu3 %vm452_vm1, %v3676_v14  ;;  %11944 = vmatmul.msk.f32.gmra.mxu1 %vm452_vm1, %v3220_v61 }
 0x303   : > { %11976 = vmatmul.msk.f32.gmra.mxu2 %vm452_vm1, %v3186_v23 }
 0x304   : > { %v2987_v27 = vadd.f32 %v14241_v24, %v2951_v58  ;;  %11910 = vmatmul.msk.f32.gmra.mxu0 %vm452_vm1, %v2721_v4  ;;  %v3189_v4 = vld [vmem:[#allocation3 + $0xf8] sm:$0xff] }
 0x305   : > { %v3812_v10 = vpop.f32.mrf.mxu3 }
 0x306   : > { %v3569_v43 = vpop.f32.mrf.mxu2  ;;  %3020 = vst.msk [vmem:[%s14250_s25 + $0x18] sm:$0xff] %vm3016_vm3, %v2987_v27  ;;  %v14295_v5 = vadd.f32 %v3812_v10, %v3567_v11  ;;  %v3223_v27 = vld [vmem:[#allocation3 + $0x109] sm:$0xff] }
 0x307   : > { %v3570_v35 = vadd.f32 %v3569_v43, %v3357_v49  ;;  %v3363_v8 = vpop.f32.mrf.mxu1 }
 0x309   : > { %v2864_v52 = vpop.f32.mrf.mxu0 }
 0x30a   : > { %v2952_v22 = vadd.f32 %v2864_v52, %v13974_v41  ;;  %12010 = vmatmul.msk.f32.gmra.mxu3 %vm452_vm1, %v3677_v17  ;;  %11945 = vmatmul.msk.f32.gmra.mxu1 %vm452_vm1, %v3221_v36  ;;  %v3678_v41 = vld [vmem:[#allocation3 + $0xe2] sm:$0xff] }
 0x30b   : > { %11977 = vmatmul.msk.f32.gmra.mxu2 %vm452_vm1, %v3187_v7 }
 0x30c   : > { %v2988_v48 = vadd.f32 %v14241_v24, %v2952_v22  ;;  %11911 = vmatmul.msk.f32.gmra.mxu0 %vm452_vm1, %v2722_v46  ;;  %v3190_v46 = vld [vmem:[#allocation3 + $0x108] sm:$0xff] }
 0x30d   : > { %v3815_v56 = vpop.f32.mrf.mxu3 }
 0x30e   : > { %v3572_v33 = vpop.f32.mrf.mxu2  ;;  %3021 = vst.msk [vmem:[%s14250_s25 + $0x20] sm:$0xff] %vm3016_vm3, %v2988_v48  ;;  %v14306_v16 = vadd.f32 %v3815_v56, %v3570_v35  ;;  %v3073_v35 = vld [vmem:[%s14069_s18 + $0xc0] sm:$0xff] }
 0x30f   : > { %v3573_v49 = vadd.f32 %v3572_v33, %v3360_v59  ;;  %v3366_v34 = vpop.f32.mrf.mxu1  ;;  %v3679_v59 = vld [vmem:[#allocation3 + $0xf2] sm:$0xff]  ;;  %3160 = vst.msk [vmem:[#allocation3 + $0x139] sm:$0xff] %vm452_vm1, %v3073_v35  ;;  %v3226_v35 = vld [vmem:[#allocation3 + $0x129] sm:$0xff] }
 0x310   : > { %v2725_v48 = vld [vmem:[#allocation2 + $0x142] sm:$0xff] }
 0x311   : > { %v2867_v21 = vpop.f32.mrf.mxu0  ;;  %v3074_v33 = vld [vmem:[%s14069_s18 + $0xc8] sm:$0xff] }
 0x312   : > { %v2953_v20 = vadd.f32 %v2867_v21, %v13985_v13  ;;  %12011 = vmatmul.msk.f32.gmra.mxu3 %vm452_vm1, %v3678_v41  ;;  %11946 = vmatmul.msk.f32.gmra.mxu1 %vm452_vm1, %v3222_v55  ;;  %3161 = vst.msk [vmem:[#allocation3 + $0x141] sm:$0xff] %vm452_vm1, %v3074_v33  ;;  %v2728_v33 = vld [vmem:[#allocation2 + $0x16a] sm:$0xff] }
 0x313   : > { %11978 = vmatmul.msk.f32.gmra.mxu2 %vm452_vm1, %v3188_v50 }
 0x314   : > { %v2989_v11 = vadd.f32 %v14241_v24, %v2953_v20  ;;  %11912 = vmatmul.msk.f32.gmra.mxu0 %vm452_vm1, %v2723_v47  ;;  %v3191_v47 = vld [vmem:[#allocation3 + $0x110] sm:$0xff] }
 0x315   : > { %v3818_v14 = vpop.f32.mrf.mxu3 }
 0x316   : > { %v3575_v23 = vpop.f32.mrf.mxu2  ;;  %3022 = vst.msk [vmem:[%s14250_s25 + $0x28] sm:$0xff] %vm3016_vm3, %v2989_v11  ;;  %v14319_v25 = vadd.f32 %v3818_v14, %v3573_v49  ;;  %v3225_v11 = vld [vmem:[#allocation3 + $0x121] sm:$0xff] }
 0x317   : > { %v3576_v13 = vadd.f32 %v3575_v23, %v3363_v8  ;;  %v3369_v58 = vpop.f32.mrf.mxu1 }
 0x319   : > { %v2870_v61 = vpop.f32.mrf.mxu0 }
 0x31a   : > { %v2954_v10 = vadd.f32 %v2870_v61, %v13996_v1  ;;  %12012 = vmatmul.msk.f32.gmra.mxu3 %vm452_vm1, %v3679_v59  ;;  %11947 = vmatmul.msk.f32.gmra.mxu1 %vm452_vm1, %v3223_v27  ;;  %v3680_v1 = vld [vmem:[#allocation3 + $0xfa] sm:$0xff] }
 0x31b   : > { %11979 = vmatmul.msk.f32.gmra.mxu2 %vm452_vm1, %v3189_v4 }
 0x31c   : > { %v2990_v43 = vadd.f32 %v14241_v24, %v2954_v10  ;;  %11913 = vmatmul.msk.f32.gmra.mxu0 %vm452_vm1, %v2724_v42  ;;  %v3192_v42 = vld [vmem:[#allocation3 + $0x120] sm:$0xff] }
 0x31d   : > { %v3821_v17 = vpop.f32.mrf.mxu3 }
 0x31e   : > { %v3578_v7 = vpop.f32.mrf.mxu2  ;;  %3023 = vst.msk [vmem:[%s14250_s25 + $0x30] sm:$0xff] %vm3016_vm3, %v2990_v43  ;;  %v14330_v52 = vadd.f32 %v3821_v17, %v3576_v13  ;;  %v3075_v13 = vld [vmem:[%s14069_s18 + $0xd0] sm:$0xff]  ;;  %v2727_v43 = vld [vmem:[#allocation2 + $0x15a] sm:$0xff] }
 0x31f   : > { %v3579_v8 = vadd.f32 %v3578_v7, %v3366_v34  ;;  %v3372_v22 = vpop.f32.mrf.mxu1  ;;  %v3681_v34 = vld [vmem:[#allocation3 + $0x10a] sm:$0xff]  ;;  %3162 = vst.msk [vmem:[#allocation3 + $0x151] sm:$0xff] %vm452_vm1, %v3075_v13  ;;  %v3228_v13 = vld [vmem:[#allocation3 + $0x141] sm:$0xff] }
 0x320   : > { %v3076_v7 = vld [vmem:[%s14069_s18 + $0xd8] sm:$0xff] }
 0x321   : > { %v2873_v36 = vpop.f32.mrf.mxu0  ;;  %3163 = vst.msk [vmem:[#allocation3 + $0x159] sm:$0xff] %vm452_vm1, %v3076_v7  ;;  %v2730_v7 = vld [vmem:[#allocation2 + $0x182] sm:$0xff] }
 0x322   : > { %v2955_v56 = vadd.f32 %v2873_v36, %v14007_v39  ;;  %12013 = vmatmul.msk.f32.gmra.mxu3 %vm452_vm1, %v3680_v1  ;;  %11948 = vmatmul.msk.f32.gmra.mxu1 %vm452_vm1, %v3224_v2 }
 0x323   : > { %11980 = vmatmul.msk.f32.gmra.mxu2 %vm452_vm1, %v3190_v46 }
 0x324   : > { %v2991_v49 = vadd.f32 %v14241_v24, %v2955_v56  ;;  %11914 = vmatmul.msk.f32.gmra.mxu0 %vm452_vm1, %v2725_v48  ;;  %v3193_v48 = vld [vmem:[#allocation3 + $0x128] sm:$0xff] }
 0x325   : > { %v3824_v41 = vpop.f32.mrf.mxu3 }
 0x326   : > { %v3581_v50 = vpop.f32.mrf.mxu2  ;;  %3024 = vst.msk [vmem:[%s14250_s25 + $0x38] sm:$0xff] %vm3016_vm3, %v2991_v49  ;;  %v14343_v21 = vadd.f32 %v3824_v41, %v3579_v8  ;;  %v3227_v49 = vld [vmem:[#allocation3 + $0x139] sm:$0xff] }
 0x327   : > { %v3582_v39 = vadd.f32 %v3581_v50, %v3369_v58  ;;  %v3375_v20 = vpop.f32.mrf.mxu1 }
 0x329   : > { %v2876_v55 = vpop.f32.mrf.mxu0 }
 0x32a   : > { %v2956_v14 = vadd.f32 %v2876_v55, %v14018_v15  ;;  %12014 = vmatmul.msk.f32.gmra.mxu3 %vm452_vm1, %v3681_v34  ;;  %11949 = vmatmul.msk.f32.gmra.mxu1 %vm452_vm1, %v3225_v11  ;;  %v3682_v15 = vld [vmem:[#allocation3 + $0x112] sm:$0xff] }
 0x32b   : > { %11981 = vmatmul.msk.f32.gmra.mxu2 %vm452_vm1, %v3191_v47 }
 0x32c   : > { %v2992_v23 = vadd.f32 %v14241_v24, %v2956_v14  ;;  %11915 = vmatmul.msk.f32.gmra.mxu0 %vm452_vm1, %v2726_v57  ;;  %v3194_v57 = vld [vmem:[#allocation3 + $0x138] sm:$0xff] }
 0x32d   : > { %v3827_v59 = vpop.f32.mrf.mxu3 }
 0x32e   : > { %v3584_v4 = vpop.f32.mrf.mxu2  ;;  %3025 = vst.msk [vmem:[%s14250_s25 + $0x40] sm:$0xff] %vm3016_vm3, %v2992_v23  ;;  %v14354_v61 = vadd.f32 %v3827_v59, %v3582_v39  ;;  %v3077_v39 = vld [vmem:[%s14069_s18 + $0xe0] sm:$0xff]  ;;  %v2729_v23 = vld [vmem:[#allocation2 + $0x172] sm:$0xff] }
 0x32f   : > { %v3585_v58 = vadd.f32 %v3584_v4, %v3372_v22  ;;  %v3378_v10 = vpop.f32.mrf.mxu1  ;;  %v3683_v22 = vld [vmem:[#allocation3 + $0x122] sm:$0xff]  ;;  %3164 = vst.msk [vmem:[#allocation3 + $0x169] sm:$0xff] %vm452_vm1, %v3077_v39  ;;  %v3078_v4 = vld [vmem:[%s14069_s18 + $0xe8] sm:$0xff] }
 0x330   : > { %3165 = vst.msk [vmem:[#allocation3 + $0x171] sm:$0xff] %vm452_vm1, %v3078_v4  ;;  %v3230_v39 = vld [vmem:[#allocation3 + $0x159] sm:$0xff] }
 0x331   : > { %v2879_v27 = vpop.f32.mrf.mxu0 }
 0x332   : > { %v2957_v17 = vadd.f32 %v2879_v27, %v14029_v54  ;;  %12015 = vmatmul.msk.f32.gmra.mxu3 %vm452_vm1, %v3682_v15  ;;  %11950 = vmatmul.msk.f32.gmra.mxu1 %vm452_vm1, %v3226_v35 }
 0x333   : > { %11982 = vmatmul.msk.f32.gmra.mxu2 %vm452_vm1, %v3192_v42 }
 0x334   : > { %v2993_v8 = vadd.f32 %v14241_v24, %v2957_v17  ;;  %11916 = vmatmul.msk.f32.gmra.mxu0 %vm452_vm1, %v2727_v43  ;;  %v3195_v43 = vld [vmem:[#allocation3 + $0x140] sm:$0xff] }
 0x335   : > { %v3830_v1 = vpop.f32.mrf.mxu3 }
 0x336   : > { %v3587_v46 = vpop.f32.mrf.mxu2  ;;  %3026 = vst.msk [vmem:[%s14250_s25 + $0x48] sm:$0xff] %vm3016_vm3, %v2993_v8  ;;  %v14367_v36 = vadd.f32 %v3830_v1, %v3585_v58  ;;  %v3229_v8 = vld [vmem:[#allocation3 + $0x151] sm:$0xff] }
 0x337   : > { %v3588_v54 = vadd.f32 %v3587_v46, %v3375_v20  ;;  %v3381_v56 = vpop.f32.mrf.mxu1 }
 0x339   : > { %v2882_v2 = vpop.f32.mrf.mxu0 }
 0x33a   : > { %v2958_v41 = vadd.f32 %v2882_v2, %v14044_v63  ;;  %12016 = vmatmul.msk.f32.gmra.mxu3 %vm452_vm1, %v3683_v22  ;;  %11951 = vmatmul.msk.f32.gmra.mxu1 %vm452_vm1, %v3227_v49  ;;  %v3684_v63 = vld [vmem:[#allocation3 + $0x12a] sm:$0xff] }
 0x33b   : > { %11983 = vmatmul.msk.f32.gmra.mxu2 %vm452_vm1, %v3193_v48 }
 0x33c   : > { %v2994_v50 = vadd.f32 %v14241_v24, %v2958_v41  ;;  %11917 = vmatmul.msk.f32.gmra.mxu0 %vm452_vm1, %v2728_v33  ;;  %v14407_v33 = vld [vmem:[#allocation3 + $0x150] sm:$0xff] }
 0x33d   : > { %v3833_v34 = vpop.f32.mrf.mxu3 }
 0x33e   : > { %v3590_v47 = vpop.f32.mrf.mxu2  ;;  %3027 = vst.msk [vmem:[%s14250_s25 + $0x50] sm:$0xff] %vm3016_vm3, %v2994_v50  ;;  %v14378_v55 = vadd.f32 %v3833_v34, %v3588_v54  ;;  %v12126_v54 = vld [vmem:[%s18536_s4 + $0x18] sm:$0xf]  ;;  %v2731_v50 = vld [vmem:[#allocation2 + $0x18a] sm:$0xff] }
 0x33f   : > { %v3591_v20 = vadd.f32 %v3590_v47, %v3378_v10  ;;  %v3384_v14 = vpop.f32.mrf.mxu1  ;;  %v3685_v10 = vld [vmem:[#allocation3 + $0x13a] sm:$0xff]  ;;  %12127 = vmatpush.msk.msrb.mxu3 %vm704_vm0, %v12126_v54  ;;  %v3232_v54 = vld [vmem:[#allocation3 + $0x171] sm:$0xff] }
 0x341   : > { %v2885_v11 = vpop.f32.mrf.mxu0 }
 0x342   : > { %v2959_v59 = vadd.f32 %v2885_v11, %v14059_v30  ;;  %12017 = vmatmul.msk.f32.gmra.mxu3 %vm452_vm1, %v3684_v63  ;;  %11952 = vmatmul.msk.f32.gmra.mxu1 %vm452_vm1, %v3228_v13  ;;  %v14427_v13 = vld [vmem:[#allocation3 + $0x158] sm:$0xff] }
 0x343   : > { %11984 = vmatmul.msk.f32.gmra.mxu2 %vm452_vm1, %v3194_v57 }
 0x344   : > { %v2995_v58 = vadd.f32 %v14241_v24, %v2959_v59  ;;  %11918 = vmatmul.msk.f32.gmra.mxu0 %vm452_vm1, %v2729_v23  ;;  %v3687_v23 = vld [vmem:[#allocation3 + $0x152] sm:$0xff] }
 0x345   : > { %v3836_v15 = vpop.f32.mrf.mxu3 }
 0x346   : > { %v3593_v42 = vpop.f32.mrf.mxu2  ;;  %3028 = vst.msk [vmem:[%s14250_s25 + $0x58] sm:$0xff] %vm3016_vm3, %v2995_v58  ;;  %v14391_v27 = vadd.f32 %v3836_v15, %v3591_v20  ;;  %v12160_v20 = vld [vmem:[%s18536_s4 + $0x1c] sm:$0xf] }
 0x347   : > { %v3594_v30 = vadd.f32 %v3593_v42, %v3381_v56  ;;  %v3387_v17 = vpop.f32.mrf.mxu1  ;;  %v3686_v56 = vld [vmem:[#allocation3 + $0x142] sm:$0xff]  ;;  %12161 = vmatpush.msk.msra.mxu0 %vm704_vm0, %v12160_v20  ;;  %v2732_v58 = vld [vmem:[#allocation2 + $0x19a] sm:$0xff]  ;;  %v4215_v20 = vld [vmem:[#allocation3 + $0x19] sm:$0xff] }
 0x348   : > { %v3231_v15 = vld [vmem:[#allocation3 + $0x169] sm:$0xff] }
 0x349   : > { %v2888_v35 = vpop.f32.mrf.mxu0 }
 0x34a   : > { %v2960_v1 = vadd.f32 %v2888_v35, %v14079_v53  ;;  %12018 = vmatmul.msk.f32.gmra.mxu3 %vm452_vm1, %v3685_v10  ;;  %11953 = vmatmul.msk.f32.gmra.mxu1 %vm452_vm1, %v3229_v8 }
 0x34b   : > { %11985 = vmatmul.msk.f32.gmra.mxu2 %vm452_vm1, %v3195_v43 }
 0x34c   : > { %v2996_v46 = vadd.f32 %v14241_v24, %v2960_v1  ;;  %11919 = vmatmul.msk.f32.gmra.mxu0 %vm452_vm1, %v2730_v7  ;;  %v14441_v7 = vld [vmem:[#allocation3 + $0x168] sm:$0xff] }
 0x34d   : > { %v3839_v22 = vpop.f32.mrf.mxu3 }
 0x34e   : > { %v3596_v48 = vpop.f32.mrf.mxu2  ;;  %3029 = vst.msk [vmem:[%s14250_s25 + $0x60] sm:$0xff] %vm3016_vm3, %v2996_v46  ;;  %v14405_v53 = vadd.f32 %v3839_v22, %v3594_v30  ;;  %v2733_v46 = vld [vmem:[#allocation2 + $0x1a2] sm:$0xff] }
 0x34f   : > { %v3597_v2 = vadd.f32 %v3596_v48, %v3384_v14  ;;  %v3390_v41 = vpop.f32.mrf.mxu1  ;;  %v12194_v14 = vld [vmem:[%s18536_s4 + $0x20] sm:$0xf] }
 0x350   : > { %12195 = vmatpush.msk.msra.mxu1 %vm704_vm0, %v12194_v14 }
 0x351   : > { %v2891_v49 = vpop.f32.mrf.mxu0 }
 0x352   : > { %v2961_v34 = vadd.f32 %v2891_v49, %v14088_v62  ;;  %12019 = vmatmul.msk.f32.gmra.mxu3 %vm452_vm1, %v3686_v56  ;;  %11954 = vmatmul.msk.f32.gmra.mxu1 %vm452_vm1, %v3230_v39 }
 0x353   : > { %11986 = vmatmul.msk.f32.gmra.mxu2 %vm452_vm1, %v14407_v33 }
 0x354   : > { %v2997_v47 = vadd.f32 %v14241_v24, %v2961_v34  ;;  %11920 = vmatmul.msk.f32.gmra.mxu0 %vm452_vm1, %v2731_v50  ;;  %v14456_v50 = vld [vmem:[#allocation3 + $0x170] sm:$0xff] }
 0x355   : > { %v3842_v63 = vpop.f32.mrf.mxu3 }
 0x356   : > { %v3599_v57 = vpop.f32.mrf.mxu2  ;;  %3030 = vst.msk [vmem:[%s14250_s25 + $0x68] sm:$0xff] %vm3016_vm3, %v2997_v47  ;;  %v14422_v62 = vadd.f32 %v3842_v63, %v3597_v2  ;;  %v3937_v47 = vld [vmem:[#allocation3 + $0x18] sm:$0xff] }
 0x357   : > { %v3600_v11 = vadd.f32 %v3599_v57, %v3387_v17  ;;  %v3393_v4 = vpop.f32.mrf.mxu1 }
 0x359   : > { %v2894_v59 = vpop.f32.mrf.mxu0 }
 0x35a   : > { %v2962_v42 = vadd.f32 %v2894_v59, %v14097_v9  ;;  %12020 = vmatmul.msk.f32.gmra.mxu3 %vm452_vm1, %v3687_v23  ;;  %11955 = vmatmul.msk.f32.gmra.mxu1 %vm452_vm1, %v3231_v15  ;;  %v3688_v9 = vld [vmem:[#allocation3 + $0x15a] sm:$0xff]  ;;  %v14470_v59 = vld [vmem:[#allocation3 + $0x172] sm:$0xff] }
 0x35b   : > { %11987 = vmatmul.msk.f32.gmra.mxu2 %vm452_vm1, %v14427_v13 }
 0x35c   : > { %v2998_v30 = vadd.f32 %v14241_v24, %v2962_v42  ;;  %11921 = vmatmul.msk.f32.gmra.mxu0 %vm452_vm1, %v2732_v58  ;;  %v3938_v42 = vld [vmem:[#allocation3 + $0x20] sm:$0xff] }
 0x35d   : > { %v3845_v10 = vpop.f32.mrf.mxu3 }
 0x35e   : > { %v3602_v43 = vpop.f32.mrf.mxu2  ;;  %3031 = vst.msk [vmem:[%s14250_s25 + $0x70] sm:$0xff] %vm3016_vm3, %v2998_v30  ;;  %v14439_v35 = vadd.f32 %v3845_v10, %v3600_v11  ;;  %v4216_v30 = vld [vmem:[#allocation3 + $0x21] sm:$0xff] }
 0x35f   : > { %v3603_v17 = vadd.f32 %v3602_v43, %v3390_v41  ;;  %v3396_v1 = vpop.f32.mrf.mxu1 }
 0x361   : > { %v2897_v8 = vpop.f32.mrf.mxu0 }
 0x362   : > { %v2963_v22 = vadd.f32 %v2897_v8, %v14106_v40  ;;  %12021 = vmatmul.msk.f32.gmra.mxu3 %vm452_vm1, %v3688_v9  ;;  %11956 = vmatmul.msk.f32.gmra.mxu1 %vm452_vm1, %v3232_v54  ;;  %v14454_v40 = vld [vmem:[#allocation3 + $0x16a] sm:$0xff] }
 0x363   : > { %11988 = vmatmul.msk.f32.gmra.mxu2 %vm452_vm1, %v14441_v7 }
 0x364   : > { %v2999_v48 = vadd.f32 %v14241_v24, %v2963_v22  ;;  %11922 = vmatmul.msk.f32.gmra.mxu0 %vm452_vm1, %v2733_v46  ;;  %v4494_v46 = vld [vmem:[#allocation3 + $0x22] sm:$0xff] }
 0x365   : > { %v3848_v2 = vpop.f32.mrf.mxu3 }
 0x366   : > { %v3605_v56 = vpop.f32.mrf.mxu2  ;;  %3032 = vst.msk [vmem:[%s14250_s25 + $0x78] sm:$0xff] %vm3016_vm3, %v2999_v48  ;;  %v14452_v49 = vadd.f32 %v3848_v2, %v3603_v17  ;;  %v14483_v48 = vld [vmem:[#allocation3 + $0x31] sm:$0xff] }
 0x367   : > { %v3606_v41 = vadd.f32 %v3605_v56, %v3393_v4  ;;  %v3399_v34 = vpop.f32.mrf.mxu1  ;;  %v4493_v4 = vld [vmem:[#allocation3 + $0x1a] sm:$0xff] }
 0x369   : > { %v2900_v39 = vpop.f32.mrf.mxu0 }
 0x36a   : > { %v2964_v63 = vadd.f32 %v2900_v39, %v14115_v32  ;;  %12022 = vmatmul.msk.f32.gmra.mxu3 %vm452_vm1, %v14454_v40  ;;  %12060 = vmatmul.msk.f32.vlgmr.msrb.gmra.mxu1 %vm452_vm1, %v4215_v20  ;;  %v14496_v20 = vld [vmem:[#allocation3 + $0x32] sm:$0xff] }
 0x36b   : > { %11989 = vmatmul.msk.f32.gmra.mxu2 %vm452_vm1, %v14456_v50 }
 0x36c   : > { %v3000_v57 = vadd.f32 %v14241_v24, %v2964_v63  ;;  %12026 = vmatmul.msk.f32.vlgmr.msrb.gmra.mxu0 %vm452_vm1, %v3937_v47 }
 0x36d   : > { %v3851_v11 = vpop.f32.mrf.mxu3 }
 0x36e   : > { %v3608_v14 = vpop.f32.mrf.mxu2  ;;  %3033 = vst.msk [vmem:[%s14250_s25 + $0x80] sm:$0xff] %vm3016_vm3, %v3000_v57  ;;  %v14468_v23 = vadd.f32 %v3851_v11, %v3606_v41  ;;  %v14498_v11 = vld [vmem:[#allocation3 + $0x39] sm:$0xff] }
 0x36f   : > { %v3609_v32 = vadd.f32 %v3608_v14, %v3396_v1  ;;  %v3402_v15 = vpop.f32.mrf.mxu1 }
 0x371   : > { %v2903_v58 = vpop.f32.mrf.mxu0 }
 0x372   : > { %v2965_v10 = vadd.f32 %v2903_v58, %v14124_v44  ;;  %12023 = vmatmul.msk.f32.gmra.mxu3 %vm452_vm1, %v14470_v59  ;;  %12061 = vmatmul.msk.f32.gmra.mxu1 %vm452_vm1, %v4216_v30  ;;  %v4772_v44 = vld [vmem:[#allocation3 + $0x30] sm:$0xff]  ;;  %v14512_v30 = vld [vmem:[#allocation3 + $0x3a] sm:$0xff] }
 0x373   : > { %12094 = vmatmul.msk.f32.vlgmr.msrb.gmra.mxu2 %vm452_vm1, %v4493_v4 }
 0x374   : > { %v3001_v43 = vadd.f32 %v14241_v24, %v2965_v10  ;;  %12027 = vmatmul.msk.f32.gmra.mxu0 %vm452_vm1, %v3938_v42  ;;  %v4774_v42 = vld [vmem:[#allocation3 + $0x48] sm:$0xff] }
 0x375   : > { %v3854_v17 = vpop.f32.mrf.mxu3 }
 0x376   : > { %v3611_v9 = vpop.f32.mrf.mxu2  ;;  %3034 = vst.msk [vmem:[%s14250_s25 + $0x88] sm:$0xff] %vm3016_vm3, %v3001_v43  ;;  %v14481_v8 = vadd.f32 %v3854_v17, %v3609_v32  ;;  %v14514_v17 = vld [vmem:[#allocation3 + $0x49] sm:$0xff] }
 0x377   : > { %v3612_v1 = vadd.f32 %v3611_v9, %v3399_v34  ;;  %v3405_v22 = vpop.f32.mrf.mxu1 }
 0x379   : > { %v2906_v54 = vpop.f32.mrf.mxu0 }
 0x37a   : > { %v2966_v2 = vadd.f32 %v2906_v54, %v14133_v0  ;;  %12128 = vmatmul.msk.f32.vlgmr.msrb.gmra.mxu3 %vm452_vm1, %v4772_v44  ;;  %12062 = vmatmul.msk.f32.gmra.mxu1 %vm452_vm1, %v14483_v48  ;;  %v4773_v0 = vld [vmem:[#allocation3 + $0x38] sm:$0xff] }
 0x37b   : > { %12095 = vmatmul.msk.f32.gmra.mxu2 %vm452_vm1, %v4494_v46 }
 0x37c   : > { %v3002_v56 = vadd.f32 %v14241_v24, %v2966_v2  ;;  %12028 = vmatmul.msk.f32.gmra.mxu0 %vm452_vm1, %v4772_v44  ;;  %v14528_v2 = vld [vmem:[#allocation3 + $0x4a] sm:$0xff] }
 0x37d   : > { %v3857_v41 = vpop.f32.mrf.mxu3 }
 0x37e   : > { %v3614_v39 = vpop.f32.mrf.mxu2  ;;  %3035 = vst.msk [vmem:[%s14250_s25 + $0x90] sm:$0xff] %vm3016_vm3, %v3002_v56  ;;  %v14494_v34 = vadd.f32 %v3857_v41, %v3612_v1 }
 0x37f   : > { %v3615_v47 = vadd.f32 %v3614_v39, %v3402_v15  ;;  %v3408_v57 = vpop.f32.mrf.mxu1  ;;  %v14530_v39 = vld [vmem:[#allocation3 + $0x51] sm:$0xff] }
 0x381   : > { %v2909_v63 = vpop.f32.mrf.mxu0 }
 0x382   : > { %v2967_v14 = vadd.f32 %v2909_v63, %v14142_v6  ;;  %12129 = vmatmul.msk.f32.gmra.mxu3 %vm452_vm1, %v4773_v0  ;;  %12063 = vmatmul.msk.f32.gmra.mxu1 %vm452_vm1, %v14498_v11 }
 0x383   : > { %12096 = vmatmul.msk.f32.gmra.mxu2 %vm452_vm1, %v14496_v20 }
 0x384   : > { %v3003_v32 = vadd.f32 %v14241_v24, %v2967_v14  ;;  %12029 = vmatmul.msk.f32.gmra.mxu0 %vm452_vm1, %v4773_v0 }
 0x385   : > { %v3860_v4 = vpop.f32.mrf.mxu3 }
 0x386   : > { %v3617_v58 = vpop.f32.mrf.mxu2  ;;  %3036 = vst.msk [vmem:[%s14250_s25 + $0x98] sm:$0xff] %vm3016_vm3, %v3003_v32  ;;  %v14510_v15 = vadd.f32 %v3860_v4, %v3615_v47  ;;  %v4776_v32 = vld [vmem:[#allocation3 + $0x60] sm:$0xff]  ;;  %v14544_v4 = vld [vmem:[#allocation3 + $0x52] sm:$0xff] }
 0x387   : > { %v3618_v6 = vadd.f32 %v3617_v58, %v3405_v22  ;;  %v3411_v43 = vpop.f32.mrf.mxu1  ;;  %v4775_v22 = vld [vmem:[#allocation3 + $0x50] sm:$0xff] }
 0x389   : > { %v2912_v10 = vpop.f32.mrf.mxu0 }
 0x38a   : > { %v2968_v9 = vadd.f32 %v2912_v10, %v14151_v18  ;;  %12130 = vmatmul.msk.f32.gmra.mxu3 %vm452_vm1, %v4774_v42  ;;  %12064 = vmatmul.msk.f32.gmra.mxu1 %vm452_vm1, %v14514_v17 }
 0x38b   : > { %12097 = vmatmul.msk.f32.gmra.mxu2 %vm452_vm1, %v14512_v30 }
 0x38c   : > { %v3004_v1 = vadd.f32 %v14241_v24, %v2968_v9  ;;  %12030 = vmatmul.msk.f32.gmra.mxu0 %vm452_vm1, %v4774_v42  ;;  %v14546_v42 = vld [vmem:[#allocation3 + $0x61] sm:$0xff] }
 0x38d   : > { %v3863_v44 = vpop.f32.mrf.mxu3 }
 0x38e   : > { %v3620_v46 = vpop.f32.mrf.mxu2  ;;  %3037 = vst.msk [vmem:[%s14250_s25 + $0xa0] sm:$0xff] %vm3016_vm3, %v3004_v1  ;;  %v14526_v54 = vadd.f32 %v3863_v44, %v3618_v6 }
 0x38f   : > { %v3621_v18 = vadd.f32 %v3620_v46, %v3408_v57  ;;  %v3414_v41 = vpop.f32.mrf.mxu1  ;;  %v4777_v46 = vld [vmem:[#allocation3 + $0x68] sm:$0xff] }
 0x391   : > { %v2915_v56 = vpop.f32.mrf.mxu0 }
 0x392   : > { %v2969_v47 = vadd.f32 %v2915_v56, %v14160_v28  ;;  %12131 = vmatmul.msk.f32.gmra.mxu3 %vm452_vm1, %v4775_v22  ;;  %12065 = vmatmul.msk.f32.gmra.mxu1 %vm452_vm1, %v14530_v39 }
 0x393   : > { %12098 = vmatmul.msk.f32.gmra.mxu2 %vm452_vm1, %v14528_v2 }
 0x394   : > { %v3005_v0 = vadd.f32 %v14241_v24, %v2969_v47  ;;  %12031 = vmatmul.msk.f32.gmra.mxu0 %vm452_vm1, %v4775_v22  ;;  %v14562_v47 = vld [vmem:[#allocation3 + $0x69] sm:$0xff] }
 0x395   : > { %v3866_v63 = vpop.f32.mrf.mxu3 }
 0x396   : > { %v3623_v57 = vpop.f32.mrf.mxu2  ;;  %3038 = vst.msk [vmem:[%s14250_s25 + $0xa8] sm:$0xff] %vm3016_vm3, %v3005_v0  ;;  %v14542_v14 = vadd.f32 %v3866_v63, %v3621_v18  ;;  %v14560_v18 = vld [vmem:[#allocation3 + $0x62] sm:$0xff] }
 0x397   : > { %v3624_v28 = vadd.f32 %v3623_v57, %v3411_v43  ;;  %v3417_v6 = vpop.f32.mrf.mxu1 }
 0x399   : > { %v2918_v58 = vpop.f32.mrf.mxu0 }
 0x39a   : > { %v2970_v10 = vadd.f32 %v2918_v58, %v14169_v29  ;;  %12132 = vmatmul.msk.f32.gmra.mxu3 %vm452_vm1, %v4776_v32  ;;  %12066 = vmatmul.msk.f32.gmra.mxu1 %vm452_vm1, %v14546_v42  ;;  %v14576_v58 = vld [vmem:[#allocation3 + $0x6a] sm:$0xff] }
 0x39b   : > { %12099 = vmatmul.msk.f32.gmra.mxu2 %vm452_vm1, %v14544_v4 }
 0x39c   : > { %v3006_v9 = vadd.f32 %v14241_v24, %v2970_v10  ;;  %12032 = vmatmul.msk.f32.gmra.mxu0 %vm452_vm1, %v4776_v32  ;;  %v4778_v32 = vld [vmem:[#allocation3 + $0x78] sm:$0xff] }
 0x39d   : > { %v3869_v43 = vpop.f32.mrf.mxu3 }
 0x39e   : > { %v3626_v1 = vpop.f32.mrf.mxu2  ;;  %3039 = vst.msk [vmem:[%s14250_s25 + $0xb0] sm:$0xff] %vm3016_vm3, %v3006_v9  ;;  %v14558_v44 = vadd.f32 %v3869_v43, %v3624_v28  ;;  %v14578_v43 = vld [vmem:[#allocation3 + $0x79] sm:$0xff] }
 0x39f   : > { %v3627_v29 = vadd.f32 %v3626_v1, %v3414_v41  ;;  %v3420_v56 = vpop.f32.mrf.mxu1  ;;  %18796 = vst [vmem:[#allocation12_spill] sm:$0xff] %v14578_v43 }
 0x3a1   : > { %v2921_v22 = vpop.f32.mrf.mxu0 }
 0x3a2   : > { %v2971_v0 = vadd.f32 %v2921_v22, %v14178_v60  ;;  %12133 = vmatmul.msk.f32.gmra.mxu3 %vm452_vm1, %v4777_v46  ;;  %12067 = vmatmul.msk.f32.gmra.mxu1 %vm452_vm1, %v14562_v47 }
 0x3a3   : > { %12100 = vmatmul.msk.f32.gmra.mxu2 %vm452_vm1, %v14560_v18 }
 0x3a4   : > { %v3007_v63 = vadd.f32 %v14241_v24, %v2971_v0  ;;  %12033 = vmatmul.msk.f32.gmra.mxu0 %vm452_vm1, %v4777_v46  ;;  %v4779_v0 = vld [vmem:[#allocation3 + $0x80] sm:$0xff] }
 0x3a5   : > { %v3872_v41 = vpop.f32.mrf.mxu3 }
 0x3a6   : > { %v3629_v57 = vpop.f32.mrf.mxu2  ;;  %3040 = vst.msk [vmem:[%s14250_s25 + $0xb8] sm:$0xff] %vm3016_vm3, %v3007_v63  ;;  %v14574_v28 = vadd.f32 %v3872_v41, %v3627_v29  ;;  %v14592_v63 = vld [vmem:[#allocation3 + $0x7a] sm:$0xff] }
 0x3a7   : > { %v3630_v60 = vadd.f32 %v3629_v57, %v3417_v6  ;;  %v3423_v9 = vpop.f32.mrf.mxu1  ;;  %18797 = vst [vmem:[#allocation13_spill] sm:$0xff] %v14592_v63 }
 0x3a9   : > { %v2924_v10 = vpop.f32.mrf.mxu0 }
 0x3aa   : > { %v2972_v1 = vadd.f32 %v2924_v10, %v14187_v19  ;;  %12134 = vmatmul.msk.f32.gmra.mxu3 %vm452_vm1, %v4778_v32  ;;  %12068 = vmatmul.msk.f32.gmra.mxu1 %vm452_vm1, %v14578_v43  ;;  %v14594_v10 = vld [vmem:[#allocation3 + $0x81] sm:$0xff]  ;;  %v14610_v43 = vld [vmem:[#allocation3 + $0x91] sm:$0xff] }
 0x3ab   : > { %12101 = vmatmul.msk.f32.gmra.mxu2 %vm452_vm1, %v14576_v58  ;;  %18798 = vst [vmem:[#allocation7_spill] sm:$0xff] %v14594_v10 }
 0x3ac   : > { %v3008_v46 = vadd.f32 %v14241_v24, %v2972_v1  ;;  %12034 = vmatmul.msk.f32.gmra.mxu0 %vm452_vm1, %v4778_v32  ;;  %18800 = vst [vmem:[#allocation14_spill] sm:$0xff] %v14610_v43 }
 0x3ad   : > { %v3875_v6 = vpop.f32.mrf.mxu3 }
 0x3ae   : > { %v3632_v29 = vpop.f32.mrf.mxu2  ;;  %3041 = vst.msk [vmem:[%s14250_s25 + $0xc0] sm:$0xff] %vm3016_vm3, %v3008_v46  ;;  %v14590_v22 = vadd.f32 %v3875_v6, %v3630_v60  ;;  %v4780_v6 = vld [vmem:[#allocation3 + $0x90] sm:$0xff] }
 0x3af   : > { %v3633_v19 = vadd.f32 %v3632_v29, %v3420_v56  ;;  %v3426_v57 = vpop.f32.mrf.mxu1  ;;  %v14608_v29 = vld [vmem:[#allocation3 + $0x82] sm:$0xff] }
 0x3b0   : > { %18799 = vst [vmem:[#allocation8_spill] sm:$0xff] %v14608_v29 }
 0x3b1   : > { %v2927_v41 = vpop.f32.mrf.mxu0 }
 0x3b2   : > { %v2973_v32 = vadd.f32 %v2927_v41, %v14196_v37  ;;  %12135 = vmatmul.msk.f32.gmra.mxu3 %vm452_vm1, %v4779_v0  ;;  %12069 = vmatmul.msk.f32.gmra.mxu1 %vm452_vm1, %v14594_v10  ;;  %v14626_v10 = vld [vmem:[#allocation3 + $0x99] sm:$0xff] }
 0x3b3   : > { %12102 = vmatmul.msk.f32.gmra.mxu2 %vm452_vm1, %v14592_v63 }
 0x3b4   : > { %v3009_v1 = vadd.f32 %v14241_v24, %v2973_v32  ;;  %12035 = vmatmul.msk.f32.gmra.mxu0 %vm452_vm1, %v4779_v0 }
 0x3b5   : > { %v3878_v56 = vpop.f32.mrf.mxu3 }
 0x3b6   : > { %v3635_v60 = vpop.f32.mrf.mxu2  ;;  %3042 = vst.msk [vmem:[%s14250_s25 + $0xc8] sm:$0xff] %vm3016_vm3, %v3009_v1  ;;  %v14606_v46 = vadd.f32 %v3878_v56, %v3633_v19  ;;  %v4781_v56 = vld [vmem:[#allocation3 + $0x98] sm:$0xff] }
 0x3b7   : > { %v3636_v37 = vadd.f32 %v3635_v60, %v3423_v9  ;;  %v3429_v63 = vpop.f32.mrf.mxu1  ;;  %v14624_v60 = vld [vmem:[#allocation3 + $0x92] sm:$0xff] }
 0x3b8   : > { %18801 = vst [vmem:[#allocation17_spill] sm:$0xff] %v14624_v60 }
 0x3b9   : > { %v2930_v41 = vpop.f32.mrf.mxu0 }
 0x3ba   : > { %v2974_v0 = vadd.f32 %v2930_v41, %v14205_v26  ;;  %12136 = vmatmul.msk.f32.gmra.mxu3 %vm452_vm1, %v4780_v6  ;;  %12070 = vmatmul.msk.f32.gmra.mxu1 %vm452_vm1, %v14610_v43  ;;  %v14642_v43 = vld [vmem:[#allocation3 + $0xa9] sm:$0xff] }
 0x3bb   : > { %12103 = vmatmul.msk.f32.gmra.mxu2 %vm452_vm1, %v14608_v29 }
 0x3bc   : > { %v3010_v32 = vadd.f32 %v14241_v24, %v2974_v0  ;;  %12036 = vmatmul.msk.f32.gmra.mxu0 %vm452_vm1, %v4780_v6 }
 0x3bd   : > { %v3881_v9 = vpop.f32.mrf.mxu3 }
 0x3be   : > { %v3638_v19 = vpop.f32.mrf.mxu2  ;;  %3043 = vst.msk [vmem:[%s14250_s25 + $0xd0] sm:$0xff] %vm3016_vm3, %v3010_v32  ;;  %v14622_v1 = vadd.f32 %v3881_v9, %v3636_v37  ;;  %v4782_v9 = vld [vmem:[#allocation3 + $0xa8] sm:$0xff] }
 0x3bf   : > { %v3639_v26 = vadd.f32 %v3638_v19, %v3426_v57  ;;  %v3432_v29 = vpop.f32.mrf.mxu1  ;;  %v14640_v19 = vld [vmem:[#allocation3 + $0x9a] sm:$0xff] }
 0x3c0   : > { %18803 = vst [vmem:[#allocation10_spill] sm:$0xff] %v14640_v19 }
 0x3c1   : > { %v2933_v41 = vpop.f32.mrf.mxu0 }
 0x3c2   : > { %v2975_v6 = vadd.f32 %v2933_v41, %v14218_v51  ;;  %12137 = vmatmul.msk.f32.gmra.mxu3 %vm452_vm1, %v4781_v56  ;;  %12071 = vmatmul.msk.f32.gmra.mxu1 %vm452_vm1, %v14626_v10 }
 0x3c3   : > { %12104 = vmatmul.msk.f32.gmra.mxu2 %vm452_vm1, %v14624_v60 }
 0x3c4   : > { %v3011_v0 = vadd.f32 %v14241_v24, %v2975_v6  ;;  %12037 = vmatmul.msk.f32.gmra.mxu0 %vm452_vm1, %v4781_v56 }
 0x3c5   : > { %v3884_v57 = vpop.f32.mrf.mxu3 }
 0x3c6   : > { %v3641_v37 = vpop.f32.mrf.mxu2  ;;  %3044 = vst.msk [vmem:[%s14250_s25 + $0xd8] sm:$0xff] %vm3016_vm3, %v3011_v0  ;;  %v14638_v32 = vadd.f32 %v3884_v57, %v3639_v26 }
 0x3c7   : > { %v3642_v51 = vadd.f32 %v3641_v37, %v3429_v63  ;;  %v3435_v60 = vpop.f32.mrf.mxu1  ;;  %v14656_v37 = vld [vmem:[#allocation3 + $0xaa] sm:$0xff] }
 0x3c8   : > { %18802 = vst [vmem:[#allocation9_spill] sm:$0xff] %v14638_v32 }
 0x3c9   : > { %v2936_v41 = vpop.f32.mrf.mxu0  ;;  %18805 = vst [vmem:[#allocation11_spill] sm:$0xff] %v14656_v37 }
 0x3ca   : > { %v2976_v56 = vadd.f32 %v2936_v41, %v14227_v45  ;;  %12138 = vmatmul.msk.f32.gmra.mxu3 %vm452_vm1, %v4782_v9  ;;  %12072 = vmatmul.msk.f32.gmra.mxu1 %vm452_vm1, %v14642_v43  ;;  %v4783_v45 = vld [vmem:[#allocation3 + $0xb0] sm:$0xff] }
 0x3cb   : > { %12105 = vmatmul.msk.f32.gmra.mxu2 %vm452_vm1, %v14640_v19  ;;  %v14658_v19 = vld [vmem:[#allocation3 + $0xb1] sm:$0xff] }
 0x3cc   : > { %v3012_v6 = vadd.f32 %v14241_v24, %v2976_v56  ;;  %12038 = vmatmul.msk.f32.gmra.mxu0 %vm452_vm1, %v4782_v9 }
 0x3cd   : > { %v3887_v63 = vpop.f32.mrf.mxu3 }
 0x3ce   : > { %v3644_v26 = vpop.f32.mrf.mxu2  ;;  %3045 = vst.msk [vmem:[%s14250_s25 + $0xe0] sm:$0xff] %vm3016_vm3, %v3012_v6  ;;  %v14654_v0 = vadd.f32 %v3887_v63, %v3642_v51  ;;  %v12228_v51 = vld [vmem:[%s18538_s6 + $0x8] sm:$0xff] }
 0x3cf   : > { %v3645_v57 = vadd.f32 %v3644_v26, %v3432_v29  ;;  %v3438_v32 = vpop.f32.mrf.mxu1  ;;  %v12840_v29 = vld [vmem:[%s18535_s3] ss:$0 sm:$0xff]  ;;  %5941 = vmatpush.msra.mxu2 %v12228_v51  ;;  %v4784_v26 = vld [vmem:[#allocation3 + $0xc0] sm:$0xff] }
 0x3d0   : > { %18804 = vst [vmem:[#allocation18_spill] sm:$0xff] %v14654_v0 }
 0x3d1   : > { %v2939_v41 = vpop.f32.mrf.mxu0 }
 0x3d2   : > { %v2977_v24 = vadd.f32 %v2939_v41, %v14236_v12  ;;  %12139 = vmatmul.msk.f32.gmra.mxu3 %vm452_vm1, %v4783_v45  ;;  %12073 = vmatmul.msk.f32.gmra.mxu1 %vm452_vm1, %v14658_v19  ;;  %v14677_v41 = vld [vmem:[#allocation3 + $0xb2] sm:$0xff] }
 0x3d3   : > { %12106 = vmatmul.msk.f32.gmra.mxu2 %vm452_vm1, %v14656_v37  ;;  %18807 = vst [vmem:[#allocation15_spill] sm:$0xff] %v14677_v41 }
 0x3d4   : > { %v3013_v9 = vadd.f32 %v12840_v29, %v2977_v24  ;;  %12039 = vmatmul.msk.f32.gmra.mxu0 %vm452_vm1, %v4783_v45  ;;  %v14679_v24 = vld [vmem:[#allocation3 + $0xc1] sm:$0xff] }
 0x3d5   : > { %v3890_v12 = vpop.f32.mrf.mxu3  ;;  %18808 = vst [vmem:[#allocation20_spill] sm:$0xff] %v14679_v24 }
 0x3d6   : > { %v3647_v56 = vpop.f32.mrf.mxu2  ;;  %3046 = vst.msk [vmem:[%s14250_s25 + $0xe8] sm:$0xff] %vm3016_vm3, %v3013_v9  ;;  %v14675_v6 = vadd.f32 %v3890_v12, %v3645_v57 }
 0x3d7   : > { %v3648_v63 = vadd.f32 %v3647_v56, %v3435_v60  ;;  %v3441_v37 = vpop.f32.mrf.mxu1 }
 0x3d8   : > { %18806 = vst [vmem:[#allocation16_spill] sm:$0xff] %v14675_v6 }
 0x3d9   : > { %v2942_v0 = vpop.f32.mrf.mxu0 }
 0x3da   : > { %v2978_v45 = vadd.f32 %v2942_v0, %v14258_v3  ;;  %12140 = vmatmul.msk.f32.gmra.mxu3 %vm452_vm1, %v4784_v26  ;;  %12074 = vmatmul.msk.f32.gmra.mxu1 %vm452_vm1, %v14679_v24  ;;  %v4785_v3 = vld [vmem:[#allocation3 + $0xc8] sm:$0xff]  ;;  %v14709_v24 = vld [vmem:[#allocation3 + $0xd9] sm:$0xff] }
 0x3db   : > { %12107 = vmatmul.msk.f32.gmra.mxu2 %vm452_vm1, %v14677_v41  ;;  %v14692_v0 = vld [vmem:[#allocation3 + $0xc2] sm:$0xff] }
 0x3dc   : > { %v3014_v51 = vadd.f32 %v12840_v29, %v2978_v45  ;;  %12040 = vmatmul.msk.f32.gmra.mxu0 %vm452_vm1, %v4784_v26  ;;  %v14694_v41 = vld [vmem:[#allocation3 + $0xc9] sm:$0xff] }
 0x3dd   : > { %v3893_v60 = vpop.f32.mrf.mxu3 }
 0x3de   : > { %v3650_v57 = vpop.f32.mrf.mxu2  ;;  %3047 = vst.msk [vmem:[%s14250_s25 + $0xf0] sm:$0xff] %vm3016_vm3, %v3014_v51  ;;  %v14690_v9 = vadd.f32 %v3893_v60, %v3648_v63 }
 0x3df   : > { %v3651_v12 = vadd.f32 %v3650_v57, %v3438_v32  ;;  %v3444_v6 = vpop.f32.mrf.mxu1  ;;  %v4786_v57 = vld [vmem:[#allocation3 + $0xd8] sm:$0xff] }
 0x3e0   : > { %18809 = vst [vmem:[#allocation19_spill] sm:$0xff] %v14690_v9 }
 0x3e1   : > { %v2945_v56 = vpop.f32.mrf.mxu0 }
 0x3e2   : > { %v2979_v26 = vadd.f32 %v2945_v56, %v14271_v31  ;;  %12141 = vmatmul.msk.f32.gmra.mxu3 %vm452_vm1, %v4785_v3  ;;  %12075 = vmatmul.msk.f32.gmra.mxu1 %vm452_vm1, %v14694_v41  ;;  %v14707_v31 = vld [vmem:[#allocation3 + $0xca] sm:$0xff] }
 0x3e3   : > { %12108 = vmatmul.msk.f32.gmra.mxu2 %vm452_vm1, %v14692_v0  ;;  %18811 = vst [vmem:[#allocation22_spill] sm:$0xff] %v14707_v31 }
 0x3e4   : > { %v3015_v45 = vadd.f32 %v12840_v29, %v2979_v26  ;;  %12041 = vmatmul.msk.f32.gmra.mxu0 %vm452_vm1, %v4785_v3 }
 0x3e5   : > { %v3896_v32 = vpop.f32.mrf.mxu3 }
 0x3e6   : > { %v3653_v63 = vpop.f32.mrf.mxu2  ;;  %3048 = vst.msk [vmem:[%s14250_s25 + $0xf8] sm:$0xff] %vm3016_vm3, %v3015_v45  ;;  %v14705_v51 = vadd.f32 %v3896_v32, %v3651_v12  ;;  %v4787_v32 = vld [vmem:[#allocation3 + $0xe0] sm:$0xff] }
 0x3e7   : > { %v3654_v60 = vadd.f32 %v3653_v63, %v3441_v37  ;;  %v4365_v9 = vpop.f32.mrf.mxu1  ;;  %v14720_v63 = vld [vmem:[#allocation3 + $0xda] sm:$0xff] }
 0x3e8   : > { %18810 = vst [vmem:[#allocation21_spill] sm:$0xff] %v14705_v51  ;;  %v14722_v51 = vld [vmem:[#allocation3 + $0xe1] sm:$0xff] }
 0x3e9   : > { %v4087_v56 = vpop.f32.mrf.mxu0  ;;  %18813 = vst [vmem:[#allocation23_spill] sm:$0xff] %v14720_v63 }
 0x3ea   : > { %v4183_v29 = vadd.f32 %v4087_v56, %v14282_v38  ;;  %12142 = vmatmul.msk.f32.gmra.mxu3 %vm452_vm1, %v4786_v57  ;;  %12076 = vmatmul.msk.f32.gmra.mxu1 %vm452_vm1, %v14709_v24  ;;  %18814 = vst [vmem:[#allocation25_spill] sm:$0xff] %v14722_v51 }
 0x3eb   : > { %12109 = vmatmul.msk.f32.gmra.mxu2 %vm452_vm1, %v14707_v31 }
 0x3ec   : > { %v4461_v3 = vadd.f32 %v4365_v9, %v4183_v29  ;;  %12042 = vmatmul.msk.f32.gmra.mxu0 %vm452_vm1, %v4786_v57 }
 0x3ed   : > { %v3899_v37 = vpop.f32.mrf.mxu3 }
 0x3ee   : > { %v3656_v12 = vpop.f32.mrf.mxu2  ;;  %v14718_v26 = vadd.f32 %v3899_v37, %v3654_v60  ;;  %v4788_v37 = vld [vmem:[#allocation3 + $0xf0] sm:$0xff] }
 0x3ef   : > { %v3657_v45 = vadd.f32 %v3656_v12, %v3444_v6  ;;  %v4368_v56 = vpop.f32.mrf.mxu1  ;;  %v14733_v12 = vld [vmem:[#allocation3 + $0xe2] sm:$0xff] }
 0x3f0   : > { %18812 = vst [vmem:[#allocation24_spill] sm:$0xff] %v14718_v26  ;;  %v14735_v26 = vld [vmem:[#allocation3 + $0xf1] sm:$0xff] }
 0x3f1   : > { %v4090_v38 = vpop.f32.mrf.mxu0  ;;  %18816 = vst [vmem:[#allocation28_spill] sm:$0xff] %v14735_v26 }
 0x3f2   : > { %v4184_v31 = vadd.f32 %v4090_v38, %v14295_v5  ;;  %12143 = vmatmul.msk.f32.gmra.mxu3 %vm452_vm1, %v4787_v32  ;;  %12077 = vmatmul.msk.f32.gmra.mxu1 %vm452_vm1, %v14722_v51 }
 0x3f3   : > { %12110 = vmatmul.msk.f32.gmra.mxu2 %vm452_vm1, %v14720_v63 }
 0x3f4   : > { %v4462_v9 = vadd.f32 %v4368_v56, %v4184_v31  ;;  %12043 = vmatmul.msk.f32.gmra.mxu0 %vm452_vm1, %v4787_v32 }
 0x3f5   : > { %v3902_v6 = vpop.f32.mrf.mxu3 }
 0x3f6   : > { %v4643_v60 = vpop.f32.mrf.mxu2  ;;  %v14731_v57 = vadd.f32 %v3902_v6, %v3657_v45  ;;  %v4789_v6 = vld [vmem:[#allocation3 + $0xf8] sm:$0xff] }
 0x3f7   : > { %v4739_v29 = vadd.f32 %v4643_v60, %v4461_v3  ;;  %v4371_v38 = vpop.f32.mrf.mxu1  ;;  %v14746_v60 = vld [vmem:[#allocation3 + $0xf2] sm:$0xff] }
 0x3f8   : > { %18815 = vst [vmem:[#allocation26_spill] sm:$0xff] %v14731_v57  ;;  %v4234_v57 = vld [vmem:[#allocation3 + $0xf9] sm:$0xff] }
 0x3f9   : > { %v4093_v5 = vpop.f32.mrf.mxu0  ;;  %18818 = vst [vmem:[#allocation29_spill] sm:$0xff] %v14746_v60 }
 0x3fa   : > { %v4185_v63 = vadd.f32 %v4093_v5, %v14306_v16  ;;  %12144 = vmatmul.msk.f32.gmra.mxu3 %vm452_vm1, %v4788_v37  ;;  %12078 = vmatmul.msk.f32.gmra.mxu1 %vm452_vm1, %v14735_v26 }
 0x3fb   : > { %12111 = vmatmul.msk.f32.gmra.mxu2 %vm452_vm1, %v14733_v12 }
 0x3fc   : > { %v4463_v31 = vadd.f32 %v4371_v38, %v4185_v63  ;;  %12044 = vmatmul.msk.f32.gmra.mxu0 %vm452_vm1, %v4788_v37 }
 0x3fd   : > { %v4922_v3 = vpop.f32.mrf.mxu3 }
 0x3fe   : > { %v4646_v45 = vpop.f32.mrf.mxu2  ;;  %v14744_v32 = vadd.f32 %v4922_v3, %v4739_v29  ;;  %v4790_v3 = vld [vmem:[#allocation3 + $0x108] sm:$0xff] }
 0x3ff   : > { %v4740_v56 = vadd.f32 %v4646_v45, %v4462_v9  ;;  %v4374_v5 = vpop.f32.mrf.mxu1  ;;  %v4512_v45 = vld [vmem:[#allocation3 + $0xfa] sm:$0xff] }
 0x400   : > { %18817 = vst [vmem:[#allocation27_spill] sm:$0xff] %v14744_v32 }
 0x401   : > { %v4096_v16 = vpop.f32.mrf.mxu0 }
 0x402   : > { %v4186_v51 = vadd.f32 %v4096_v16, %v14319_v25  ;;  %12145 = vmatmul.msk.f32.gmra.mxu3 %vm452_vm1, %v4789_v6  ;;  %12079 = vmatmul.msk.f32.gmra.mxu1 %vm452_vm1, %v4234_v57  ;;  %v4235_v25 = vld [vmem:[#allocation3 + $0x109] sm:$0xff] }
 0x403   : > { %12112 = vmatmul.msk.f32.gmra.mxu2 %vm452_vm1, %v14746_v60  ;;  %v4236_v60 = vld [vmem:[#allocation3 + $0x111] sm:$0xff] }
 0x404   : > { %v4464_v63 = vadd.f32 %v4374_v5, %v4186_v51  ;;  %12045 = vmatmul.msk.f32.gmra.mxu0 %vm452_vm1, %v4789_v6  ;;  %v4791_v5 = vld [vmem:[#allocation3 + $0x110] sm:$0xff] }
 0x405   : > { %v4925_v29 = vpop.f32.mrf.mxu3 }
 0x406   : > { %v4649_v9 = vpop.f32.mrf.mxu2  ;;  %v14754_v37 = vadd.f32 %v4925_v29, %v4740_v56  ;;  %v4513_v29 = vld [vmem:[#allocation3 + $0x10a] sm:$0xff] }
 0x407   : > { %v4741_v38 = vadd.f32 %v4649_v9, %v4463_v31  ;;  %v4377_v32 = vpop.f32.mrf.mxu1 }
 0x408   : > { %18819 = vst [vmem:[#allocation30_spill] sm:$0xff] %v14754_v37 }
 0x409   : > { %v4099_v26 = vpop.f32.mrf.mxu0 }
 0x40a   : > { %v4187_v16 = vadd.f32 %v4099_v26, %v14330_v52  ;;  %12146 = vmatmul.msk.f32.gmra.mxu3 %vm452_vm1, %v4790_v3  ;;  %12080 = vmatmul.msk.f32.gmra.mxu1 %vm452_vm1, %v4235_v25  ;;  %v4514_v25 = vld [vmem:[#allocation3 + $0x112] sm:$0xff] }
 0x40b   : > { %12113 = vmatmul.msk.f32.gmra.mxu2 %vm452_vm1, %v4512_v45  ;;  %v4792_v45 = vld [vmem:[#allocation3 + $0x120] sm:$0xff] }
 0x40c   : > { %v4465_v51 = vadd.f32 %v4377_v32, %v4187_v16  ;;  %12046 = vmatmul.msk.f32.gmra.mxu0 %vm452_vm1, %v4790_v3 }
 0x40d   : > { %v4928_v57 = vpop.f32.mrf.mxu3 }
 0x40e   : > { %v4652_v56 = vpop.f32.mrf.mxu2  ;;  %v14761_v6 = vadd.f32 %v4928_v57, %v4741_v38 }
 0x40f   : > { %v4742_v31 = vadd.f32 %v4652_v56, %v4464_v63  ;;  %v4380_v37 = vpop.f32.mrf.mxu1  ;;  %v4237_v56 = vld [vmem:[#allocation3 + $0x121] sm:$0xff] }
 0x411   : > { %v4102_v9 = vpop.f32.mrf.mxu0 }
 0x412   : > { %v4188_v52 = vadd.f32 %v4102_v9, %v14343_v21  ;;  %12147 = vmatmul.msk.f32.gmra.mxu3 %vm452_vm1, %v4791_v5  ;;  %12081 = vmatmul.msk.f32.gmra.mxu1 %vm452_vm1, %v4236_v60  ;;  %v4515_v9 = vld [vmem:[#allocation3 + $0x122] sm:$0xff] }
 0x413   : > { %12114 = vmatmul.msk.f32.gmra.mxu2 %vm452_vm1, %v4513_v29  ;;  %v4793_v29 = vld [vmem:[#allocation3 + $0x128] sm:$0xff] }
 0x414   : > { %v4466_v26 = vadd.f32 %v4380_v37, %v4188_v52  ;;  %12047 = vmatmul.msk.f32.gmra.mxu0 %vm452_vm1, %v4791_v5 }
 0x415   : > { %v4931_v32 = vpop.f32.mrf.mxu3 }
 0x416   : > { %v4655_v38 = vpop.f32.mrf.mxu2  ;;  %v14768_v3 = vadd.f32 %v4931_v32, %v4742_v31 }
 0x417   : > { %v4743_v63 = vadd.f32 %v4655_v38, %v4465_v51  ;;  %v4383_v57 = vpop.f32.mrf.mxu1  ;;  %v4238_v38 = vld [vmem:[#allocation3 + $0x129] sm:$0xff] }
 0x419   : > { %v4105_v16 = vpop.f32.mrf.mxu0 }
 0x41a   : > { %v4189_v21 = vadd.f32 %v4105_v16, %v14354_v61  ;;  %12148 = vmatmul.msk.f32.gmra.mxu3 %vm452_vm1, %v4792_v45  ;;  %12082 = vmatmul.msk.f32.gmra.mxu1 %vm452_vm1, %v4237_v56  ;;  %v4516_v56 = vld [vmem:[#allocation3 + $0x12a] sm:$0xff] }
 0x41b   : > { %12115 = vmatmul.msk.f32.gmra.mxu2 %vm452_vm1, %v4514_v25 }
 0x41c   : > { %v4467_v37 = vadd.f32 %v4383_v57, %v4189_v21  ;;  %12048 = vmatmul.msk.f32.gmra.mxu0 %vm452_vm1, %v4792_v45  ;;  %v4794_v57 = vld [vmem:[#allocation3 + $0x138] sm:$0xff] }
 0x41d   : > { %v4934_v60 = vpop.f32.mrf.mxu3 }
 0x41e   : > { %v4658_v31 = vpop.f32.mrf.mxu2  ;;  %v14775_v5 = vadd.f32 %v4934_v60, %v4743_v63 }
 0x41f   : > { %v4744_v51 = vadd.f32 %v4658_v31, %v4466_v26  ;;  %v4386_v32 = vpop.f32.mrf.mxu1  ;;  %v4239_v31 = vld [vmem:[#allocation3 + $0x139] sm:$0xff] }
 0x421   : > { %v4108_v52 = vpop.f32.mrf.mxu0 }
 0x422   : > { %v4190_v61 = vadd.f32 %v4108_v52, %v14367_v36  ;;  %12149 = vmatmul.msk.f32.gmra.mxu3 %vm452_vm1, %v4793_v29  ;;  %12083 = vmatmul.msk.f32.gmra.mxu1 %vm452_vm1, %v4238_v38  ;;  %v4517_v38 = vld [vmem:[#allocation3 + $0x13a] sm:$0xff] }
 0x423   : > { %12116 = vmatmul.msk.f32.gmra.mxu2 %vm452_vm1, %v4515_v9 }
 0x424   : > { %v4468_v25 = vadd.f32 %v4386_v32, %v4190_v61  ;;  %12049 = vmatmul.msk.f32.gmra.mxu0 %vm452_vm1, %v4793_v29  ;;  %v4795_v32 = vld [vmem:[#allocation3 + $0x140] sm:$0xff] }
 0x425   : > { %v4937_v45 = vpop.f32.mrf.mxu3 }
 0x426   : > { %v4661_v63 = vpop.f32.mrf.mxu2  ;;  %v14782_v16 = vadd.f32 %v4937_v45, %v4744_v51  ;;  %v4240_v45 = vld [vmem:[#allocation3 + $0x141] sm:$0xff] }
 0x427   : > { %v4745_v26 = vadd.f32 %v4661_v63, %v4467_v37  ;;  %v4389_v60 = vpop.f32.mrf.mxu1 }
 0x429   : > { %v4111_v21 = vpop.f32.mrf.mxu0 }
 0x42a   : > { %v4191_v36 = vadd.f32 %v4111_v21, %v14378_v55  ;;  %12150 = vmatmul.msk.f32.gmra.mxu3 %vm452_vm1, %v4794_v57  ;;  %12084 = vmatmul.msk.f32.gmra.mxu1 %vm452_vm1, %v4239_v31  ;;  %v4518_v21 = vld [vmem:[#allocation3 + $0x142] sm:$0xff]  ;;  %v3963_v31 = vld [vmem:[#allocation3 + $0x150] sm:$0xff] }
 0x42b   : > { %12117 = vmatmul.msk.f32.gmra.mxu2 %vm452_vm1, %v4516_v56  ;;  %v3079_v56 = vld [vmem:[%s14069_s18 + $0xf0] sm:$0xff] }
 0x42c   : > { %v14787_v29 = vadd.f32 %v4389_v60, %v4191_v36  ;;  %12050 = vmatmul.msk.f32.gmra.mxu0 %vm452_vm1, %v4794_v57  ;;  %3166 = vst.msk [vmem:[#allocation3 + $0x181] sm:$0xff] %vm452_vm1, %v3079_v56  ;;  %v4241_v36 = vld [vmem:[#allocation3 + $0x151] sm:$0xff] }
 0x42d   : > { %v4940_v51 = vpop.f32.mrf.mxu3 }
 0x42e   : > { %v4664_v37 = vpop.f32.mrf.mxu2  ;;  %v14791_v9 = vadd.f32 %v4940_v51, %v4745_v26 }
 0x42f   : > { %v4746_v52 = vadd.f32 %v4664_v37, %v4468_v25  ;;  %v4392_v55 = vpop.f32.mrf.mxu1  ;;  %v3080_v37 = vld [vmem:[%s14069_s18 + $0xf8] sm:$0xff] }
 0x430   : > { %3167 = vst.msk [vmem:[#allocation3 + $0x189] sm:$0xff] %vm452_vm1, %v3080_v37 }
 0x431   : > { %v4114_v61 = vpop.f32.mrf.mxu0 }
 0x432   : > { %v4192_v63 = vadd.f32 %v4114_v61, %v14391_v27  ;;  %12151 = vmatmul.msk.f32.gmra.mxu3 %vm452_vm1, %v4795_v32  ;;  %12085 = vmatmul.msk.f32.gmra.mxu1 %vm452_vm1, %v4240_v45  ;;  %v4242_v45 = vld [vmem:[#allocation3 + $0x159] sm:$0xff] }
 0x433   : > { %12118 = vmatmul.msk.f32.gmra.mxu2 %vm452_vm1, %v4517_v38 }
 0x434   : > { %v14798_v57 = vadd.f32 %v4392_v55, %v4192_v63  ;;  %12051 = vmatmul.msk.f32.gmra.mxu0 %vm452_vm1, %v4795_v32  ;;  %v3964_v55 = vld [vmem:[#allocation3 + $0x158] sm:$0xff] }
 0x435   : > { %v4943_v25 = vpop.f32.mrf.mxu3  ;;  %v4520_v63 = vld [vmem:[#allocation3 + $0x15a] sm:$0xff] }
 0x436   : > { %v14802_v26 = vadd.f32 %v4943_v25, %v4746_v52  ;;  %v4519_v52 = vld [vmem:[#allocation3 + $0x152] sm:$0xff] }
 0x437   : > { %v4395_v27 = vpop.f32.mrf.mxu1 }
 0x439   : > { %v4117_v60 = vpop.f32.mrf.mxu0 }
 0x43a   : > { %v4193_v51 = vadd.f32 %v4117_v60, %v14405_v53  ;;  %12152 = vmatmul.msk.f32.gmra.mxu3 %vm452_vm1, %v14407_v33  ;;  %12086 = vmatmul.msk.f32.gmra.mxu1 %vm452_vm1, %v4241_v36  ;;  %v4243_v60 = vld [vmem:[#allocation3 + $0x169] sm:$0xff] }
 0x43b   : > { %12119 = vmatmul.msk.f32.gmra.mxu2 %vm452_vm1, %v4518_v21  ;;  %v3965_v21 = vld [vmem:[#allocation3 + $0x168] sm:$0xff]  ;;  %v3966_v36 = vld [vmem:[#allocation3 + $0x170] sm:$0xff] }
 0x43c   : > { %v14810_v32 = vadd.f32 %v4395_v27, %v4193_v51  ;;  %12052 = vmatmul.msk.f32.gmra.mxu0 %vm452_vm1, %v3963_v31  ;;  %v4244_v51 = vld [vmem:[#allocation3 + $0x171] sm:$0xff] }
 0x43f   : > { %v4398_v61 = vpop.f32.mrf.mxu1 }
 0x441   : > { %v4120_v38 = vpop.f32.mrf.mxu0 }
 0x442   : > { %v4194_v53 = vadd.f32 %v4120_v38, %v14422_v62  ;;  %12153 = vmatmul.msk.f32.gmra.mxu3 %vm452_vm1, %v14427_v13  ;;  %12087 = vmatmul.msk.f32.gmra.mxu1 %vm452_vm1, %v4242_v45  ;;  %v4523_v45 = vld [vmem:[#allocation3 + $0x182] sm:$0xff] }
 0x443   : > { %12120 = vmatmul.msk.f32.gmra.mxu2 %vm452_vm1, %v4519_v52  ;;  %v4800_v52 = vld [vmem:[#allocation3 + $0x180] sm:$0xff] }
 0x444   : > { %v14818_v33 = vadd.f32 %v4398_v61, %v4194_v53  ;;  %12053 = vmatmul.msk.f32.gmra.mxu0 %vm452_vm1, %v3964_v55  ;;  %v4245_v61 = vld [vmem:[#allocation3 + $0x181] sm:$0xff] }
 0x445   : > { %v4801_v55 = vld [vmem:[#allocation3 + $0x188] sm:$0xff] }
 0x447   : > { %v4401_v25 = vpop.f32.mrf.mxu1 }
 0x449   : > { %v4123_v56 = vpop.f32.mrf.mxu0 }
 0x44a   : > { %v4195_v27 = vadd.f32 %v4123_v56, %v14439_v35  ;;  %12154 = vmatmul.msk.f32.gmra.mxu3 %vm452_vm1, %v14441_v7  ;;  %12088 = vmatmul.msk.f32.gmra.mxu1 %vm452_vm1, %v4243_v60  ;;  %v5795_v35 = vld [vmem:[%s18538_s6] sm:$0xff] }
 0x44b   : > { %12121 = vmatmul.msk.f32.gmra.mxu2 %vm452_vm1, %v4520_v63  ;;  %6150 = vmatpush.msra.mxu3 %v5795_v35  ;;  %v4246_v56 = vld [vmem:[#allocation3 + $0x189] sm:$0xff] }
 0x44c   : > { %v14826_v62 = vadd.f32 %v4401_v25, %v4195_v27  ;;  %12054 = vmatmul.msk.f32.gmra.mxu0 %vm452_vm1, %v3965_v21  ;;  %v4524_v21 = vld [vmem:[#allocation3 + $0x18a] sm:$0xff] }
 0x44f   : > { %v4404_v31 = vpop.f32.mrf.mxu1 }
 0x451   : > { %v4126_v13 = vpop.f32.mrf.mxu0 }
 0x452   : > { %v4196_v37 = vadd.f32 %v4126_v13, %v14452_v49  ;;  %12155 = vmatmul.msk.f32.gmra.mxu3 %vm452_vm1, %v14456_v50  ;;  %12089 = vmatmul.msk.f32.gmra.mxu1 %vm452_vm1, %v4244_v51 }
 0x453   : > { %12122 = vmatmul.msk.f32.gmra.mxu2 %vm452_vm1, %v14454_v40 }
 0x454   : > { %v14838_v7 = vadd.f32 %v4404_v31, %v4196_v37  ;;  %12055 = vmatmul.msk.f32.gmra.mxu0 %vm452_vm1, %v3966_v36  ;;  %v4803_v31 = vld [vmem:[#allocation3 + $0x1a0] sm:$0xff] }
 0x457   : > { %v4407_v49 = vpop.f32.mrf.mxu1 }
 0x459   : > { %v4129_v38 = vpop.f32.mrf.mxu0 }
 0x45a   : > { %v4197_v50 = vadd.f32 %v4129_v38, %v14468_v23  ;;  %12156 = vmatmul.msk.f32.gmra.mxu3 %vm452_vm1, %v4800_v52  ;;  %12090 = vmatmul.msk.f32.gmra.mxu1 %vm452_vm1, %v4245_v61 }
 0x45b   : > { %12123 = vmatmul.msk.f32.gmra.mxu2 %vm452_vm1, %v14470_v59  ;;  %v4802_v59 = vld [vmem:[#allocation3 + $0x198] sm:$0xff] }
 0x45c   : > { %v14846_v40 = vadd.f32 %v4407_v49, %v4197_v50  ;;  %12056 = vmatmul.msk.f32.gmra.mxu0 %vm452_vm1, %v4800_v52 }
 0x45f   : > { %v4410_v63 = vpop.f32.mrf.mxu1 }
 0x461   : > { %v4132_v53 = vpop.f32.mrf.mxu0 }
 0x462   : > { %v4198_v25 = vadd.f32 %v4132_v53, %v14481_v8  ;;  %12157 = vmatmul.msk.f32.gmra.mxu3 %vm452_vm1, %v4801_v55  ;;  %12091 = vmatmul.msk.f32.gmra.mxu1 %vm452_vm1, %v4246_v56  ;;  %v18824_v56 = vld [vmem:[#allocation7_spill] sm:$0xff] }
 0x463   : > { %12124 = vmatmul.msk.f32.gmra.mxu2 %vm452_vm1, %v4523_v45  ;;  %v18821_v45 = vld [vmem:[#allocation12_spill] sm:$0xff] }
 0x464   : > { %v14853_v23 = vadd.f32 %v4410_v63, %v4198_v25  ;;  %12057 = vmatmul.msk.f32.gmra.mxu0 %vm452_vm1, %v4801_v55 }
 0x467   : > { %v4413_v27 = vpop.f32.mrf.mxu1 }
 0x469   : > { %v4135_v60 = vpop.f32.mrf.mxu0 }
 0x46a   : > { %v4199_v13 = vadd.f32 %v4135_v60, %v14494_v34  ;;  %12158 = vmatmul.msk.f32.gmra.mxu3 %vm452_vm1, %v4802_v59  ;;  %12196 = vmatmul.msk.f32.vlgmr.msra.gmra.mxu1 %vm452_vm1, %v14496_v20  ;;  %v14919_v60 = vpop.f32.mrf.mxu3 }
 0x46b   : > { %12125 = vmatmul.msk.f32.gmra.mxu2 %vm452_vm1, %v4524_v21  ;;  %v14917_v21 = vpop.f32.mrf.mxu2 }
 0x46c   : > { %v14860_v8 = vadd.f32 %v4413_v27, %v4199_v13  ;;  %12162 = vmatmul.msk.f32.vlgmr.msra.gmra.mxu0 %vm452_vm1, %v14483_v48  ;;  %v18827_v13 = vld [vmem:[#allocation14_spill] sm:$0xff] }
 0x46f   : > { %v4416_v51 = vpop.f32.mrf.mxu1 }
 0x471   : > { %v4138_v36 = vpop.f32.mrf.mxu0 }
 0x472   : > { %v4200_v37 = vadd.f32 %v4138_v36, %v14510_v15  ;;  %12159 = vmatmul.msk.f32.gmra.mxu3 %vm452_vm1, %v4803_v31  ;;  %12197 = vmatmul.msk.f32.gmra.mxu1 %vm452_vm1, %v14512_v30 }
 0x474   : > { %v14868_v34 = vadd.f32 %v4416_v51, %v4200_v37  ;;  %12163 = vmatmul.msk.f32.gmra.mxu0 %vm452_vm1, %v14498_v11  ;;  %v14935_v51 = vpop.f32.mrf.mxu2  ;;  %v14937_v37 = vpop.f32.mrf.mxu3 }
 0x477   : > { %v4419_v48 = vpop.f32.mrf.mxu1 }
 0x479   : > { %v4141_v35 = vpop.f32.mrf.mxu0 }
 0x47a   : > { %v4201_v52 = vadd.f32 %v4141_v35, %v14526_v54  ;;  %12198 = vmatmul.msk.f32.gmra.mxu1 %vm452_vm1, %v14528_v2 }
 0x47c   : > { %v14875_v20 = vadd.f32 %v4419_v48, %v4201_v52  ;;  %12164 = vmatmul.msk.f32.gmra.mxu0 %vm452_vm1, %v14514_v17  ;;  %v18834_v52 = vld [vmem:[#allocation11_spill] sm:$0xff] }
 0x47f   : > { %v4422_v38 = vpop.f32.mrf.mxu1 }
 0x481   : > { %v4144_v15 = vpop.f32.mrf.mxu0 }
 0x482   : > { %v4202_v49 = vadd.f32 %v4144_v15, %v14542_v14  ;;  %12199 = vmatmul.msk.f32.gmra.mxu1 %vm452_vm1, %v14544_v4  ;;  %v14947_v15 = vpop.f32.mrf.mxu2 }
 0x484   : > { %v14882_v11 = vadd.f32 %v4422_v38, %v4202_v49  ;;  %12165 = vmatmul.msk.f32.gmra.mxu0 %vm452_vm1, %v14530_v39 }
 0x487   : > { %v4425_v54 = vpop.f32.mrf.mxu1 }
 0x489   : > { %v4147_v30 = vpop.f32.mrf.mxu0 }
 0x48a   : > { %v4203_v61 = vadd.f32 %v4147_v30, %v14558_v44  ;;  %12200 = vmatmul.msk.f32.gmra.mxu1 %vm452_vm1, %v14560_v18  ;;  %v18822_v18 = vld [vmem:[#allocation13_spill] sm:$0xff]  ;;  %v18837_v30 = vld [vmem:[#allocation15_spill] sm:$0xff] }
 0x48c   : > { %v14889_v17 = vadd.f32 %v4425_v54, %v4203_v61  ;;  %12166 = vmatmul.msk.f32.gmra.mxu0 %vm452_vm1, %v14546_v42  ;;  %v14963_v61 = vpop.f32.mrf.mxu2 }
 0x48f   : > { %v4428_v14 = vpop.f32.mrf.mxu1 }
 0x491   : > { %v4150_v2 = vpop.f32.mrf.mxu0 }
 0x492   : > { %v4204_v50 = vadd.f32 %v4150_v2, %v14574_v28  ;;  %12201 = vmatmul.msk.f32.gmra.mxu1 %vm452_vm1, %v14576_v58  ;;  %v18825_v58 = vld [vmem:[#allocation8_spill] sm:$0xff] }
 0x494   : > { %v14896_v39 = vadd.f32 %v4428_v14, %v4204_v50  ;;  %12167 = vmatmul.msk.f32.gmra.mxu0 %vm452_vm1, %v14562_v47  ;;  %v18840_v14 = vmov 0.0   ;;  %v18841_v50 = vld [vmem:[#allocation20_spill] sm:$0xff] }
 0x495   : > { %5679 = vst.msk [vmem:[#allocation4 + $0x18] sm:$0xff] %vm5674_vm4, %v18840_v14 }
 0x496   : > { %5680 = vst.msk [vmem:[#allocation4 + $0x20] sm:$0xff] %vm5674_vm4, %v18840_v14 }
 0x497   : > { %v4431_v44 = vpop.f32.mrf.mxu1  ;;  %5675 = vst.msk [vmem:[#allocation4] sm:$0xff] %vm5674_vm4, %v18840_v14 }
 0x498   : > { %5676 = vst.msk [vmem:[#allocation4 + $0x8] sm:$0xff] %vm5674_vm4, %v18840_v14 }
 0x499   : > { %v4153_v4 = vpop.f32.mrf.mxu0  ;;  %5682 = vst.msk [vmem:[#allocation4 + $0x30] sm:$0xff] %vm5674_vm4, %v18840_v14 }
 0x49a   : > { %v4205_v55 = vadd.f32 %v4153_v4, %v14590_v22  ;;  %12202 = vmatmul.msk.f32.gmra.mxu1 %vm452_vm1, %v18822_v18  ;;  %5683 = vst.msk [vmem:[#allocation4 + $0x38] sm:$0xff] %vm5674_vm4, %v18840_v14 }
 0x49b   : > { %5685 = vst.msk [vmem:[#allocation4 + $0x48] sm:$0xff] %vm5674_vm4, %v18840_v14 }
 0x49c   : > { %v14903_v42 = vadd.f32 %v4431_v44, %v4205_v55  ;;  %12168 = vmatmul.msk.f32.gmra.mxu0 %vm452_vm1, %v18821_v45  ;;  %5686 = vst.msk [vmem:[#allocation4 + $0x50] sm:$0xff] %vm5674_vm4, %v18840_v14  ;;  %v18844_v44 = vld [vmem:[#allocation22_spill] sm:$0xff] }
 0x49d   : > { %5688 = vst.msk [vmem:[#allocation4 + $0x60] sm:$0xff] %vm5674_vm4, %v18840_v14 }
 0x49e   : > { %18820 = vst [vmem:[#allocation32_spill] sm:$0xff] %v14903_v42  ;;  %v5763_v55 = vld [vmem:[#allocation4] sm:$0xff] }
 0x49f   : > { %v4434_v53 = vpop.f32.mrf.mxu1  ;;  %5689 = vst.msk [vmem:[#allocation4 + $0x68] sm:$0xff] %vm5674_vm4, %v18840_v14  ;;  %v5796_v18 = vld [vmem:[#allocation4 + $0x1] sm:$0xff]  ;;  %12261 = vmatmul.msk.f32.vlgmr.msra.gmra.mxu3 %vm5674_vm4, %v5763_v55 }
 0x4a0   : > { %5691 = vst.msk [vmem:[#allocation4 + $0x78] sm:$0xff] %vm5674_vm4, %v18840_v14  ;;  %12229 = vmatmul.msk.f32.vlgmr.msra.gmra.mxu2 %vm5674_vm4, %v5796_v18 }
 0x4a1   : > { %v4156_v28 = vpop.f32.mrf.mxu0  ;;  %5692 = vst.msk [vmem:[#allocation4 + $0x80] sm:$0xff] %vm5674_vm4, %v18840_v14 }
 0x4a2   : > { %v4206_v63 = vadd.f32 %v4156_v28, %v14606_v46  ;;  %12203 = vmatmul.msk.f32.gmra.mxu1 %vm452_vm1, %v18825_v58  ;;  %v18828_v46 = vld [vmem:[#allocation17_spill] sm:$0xff]  ;;  %5694 = vst.msk [vmem:[#allocation4 + $0x90] sm:$0xff] %vm5674_vm4, %v18840_v14 }
 0x4a3   : > { %5695 = vst.msk [vmem:[#allocation4 + $0x98] sm:$0xff] %vm5674_vm4, %v18840_v14 }
 0x4a4   : > { %v14910_v47 = vadd.f32 %v4434_v53, %v4206_v63  ;;  %12169 = vmatmul.msk.f32.gmra.mxu0 %vm452_vm1, %v18824_v56  ;;  %5697 = vst.msk [vmem:[#allocation4 + $0xa8] sm:$0xff] %vm5674_vm4, %v18840_v14  ;;  %v18847_v53 = vld [vmem:[#allocation23_spill] sm:$0xff] }
 0x4a5   : > { %5698 = vst.msk [vmem:[#allocation4 + $0xb0] sm:$0xff] %vm5674_vm4, %v18840_v14 }
 0x4a6   : > { %18823 = vst [vmem:[#allocation31_spill] sm:$0xff] %v14910_v47 }
 0x4a7   : > { %v4437_v25 = vpop.f32.mrf.mxu1  ;;  %5700 = vst.msk [vmem:[#allocation4 + $0xc0] sm:$0xff] %vm5674_vm4, %v18840_v14 }
 0x4a8   : > { %5701 = vst.msk [vmem:[#allocation4 + $0xc8] sm:$0xff] %vm5674_vm4, %v18840_v14 }
 0x4a9   : > { %v4159_v22 = vpop.f32.mrf.mxu0  ;;  %5703 = vst.msk [vmem:[#allocation4 + $0xd8] sm:$0xff] %vm5674_vm4, %v18840_v14 }
 0x4aa   : > { %v4207_v59 = vadd.f32 %v4159_v22, %v14622_v1  ;;  %12204 = vmatmul.msk.f32.gmra.mxu1 %vm452_vm1, %v18828_v46  ;;  %v18831_v1 = vld [vmem:[#allocation10_spill] sm:$0xff]  ;;  %5704 = vst.msk [vmem:[#allocation4 + $0xe0] sm:$0xff] %vm5674_vm4, %v18840_v14  ;;  %v18850_v22 = vld [vmem:[#allocation25_spill] sm:$0xff] }
 0x4ab   : > { %5706 = vst.msk [vmem:[#allocation4 + $0xf0] sm:$0xff] %vm5674_vm4, %v18840_v14 }
 0x4ac   : > { %v14921_v27 = vadd.f32 %v4437_v25, %v4207_v59  ;;  %12170 = vmatmul.msk.f32.gmra.mxu0 %vm452_vm1, %v18827_v13  ;;  %5707 = vst.msk [vmem:[#allocation4 + $0xf8] sm:$0xff] %vm5674_vm4, %v18840_v14  ;;  %v18851_v13 = vld [vmem:[#allocation27_spill] sm:$0xff] }
 0x4ad   : > { %5709 = vst.msk [vmem:[#allocation4 + $0x108] sm:$0xff] %vm5674_vm4, %v18840_v14 }
 0x4ae   : > { %18826 = vst [vmem:[#allocation33_spill] sm:$0xff] %v14921_v27  ;;  %v5349_v27 = vld [vmem:[#allocation3 + $0x12a] sm:$0xff] }
 0x4af   : > { %v14929_v36 = vpop.f32.mrf.mxu1  ;;  %5710 = vst.msk [vmem:[#allocation4 + $0x110] sm:$0xff] %vm5674_vm4, %v18840_v14 }
 0x4b0   : > { %18830 = vst [vmem:[#allocation36_spill] sm:$0xff] %v14929_v36 }
 0x4b1   : > { %v14927_v31 = vpop.f32.mrf.mxu0  ;;  %5712 = vst.msk [vmem:[#allocation4 + $0x120] sm:$0xff] %vm5674_vm4, %v18840_v14 }
 0x4b2   : > { %18829 = vst [vmem:[#allocation34_spill] sm:$0xff] %v14927_v31  ;;  %12205 = vmatmul.msk.f32.gmra.mxu1 %vm452_vm1, %v18831_v1  ;;  %v15075_v1 = vld [vmem:[%s18537_s5] ss:$0 sm:$0xff] }
 0x4b3   : > { %5713 = vst.msk [vmem:[#allocation4 + $0x128] sm:$0xff] %vm5674_vm4, %v18840_v14  ;;  %v5071_v31 = vld [vmem:[#allocation3 + $0x129] sm:$0xff] }
 0x4b4   : > { %12171 = vmatmul.msk.f32.gmra.mxu0 %vm452_vm1, %v14626_v10  ;;  %v14949_v10 = vpop.f32.mrf.mxu3  ;;  %5715 = vst.msk [vmem:[#allocation4 + $0x138] sm:$0xff] %vm5674_vm4, %v18840_v14 }
 0x4b5   : > { %5716 = vst.msk [vmem:[#allocation4 + $0x140] sm:$0xff] %vm5674_vm4, %v18840_v14 }
 0x4b6   : > { %5718 = vst.msk [vmem:[#allocation4 + $0x150] sm:$0xff] %vm5674_vm4, %v18840_v14 }
 0x4b7   : > { %v14941_v48 = vpop.f32.mrf.mxu1  ;;  %5719 = vst.msk [vmem:[#allocation4 + $0x158] sm:$0xff] %vm5674_vm4, %v18840_v14 }
 0x4b8   : > { %18833 = vst [vmem:[#allocation37_spill] sm:$0xff] %v14941_v48 }
 0x4b9   : > { %v14939_v35 = vpop.f32.mrf.mxu0  ;;  %5721 = vst.msk [vmem:[#allocation4 + $0x168] sm:$0xff] %vm5674_vm4, %v18840_v14 }
 0x4ba   : > { %18832 = vst [vmem:[#allocation35_spill] sm:$0xff] %v14939_v35  ;;  %12206 = vmatmul.msk.f32.gmra.mxu1 %vm452_vm1, %v18834_v52 }
 0x4bb   : > { %5722 = vst.msk [vmem:[#allocation4 + $0x170] sm:$0xff] %vm5674_vm4, %v18840_v14 }
 0x4bc   : > { %12172 = vmatmul.msk.f32.gmra.mxu0 %vm452_vm1, %v14642_v43  ;;  %v14965_v2 = vpop.f32.mrf.mxu3  ;;  %5724 = vst.msk [vmem:[#allocation4 + $0x180] sm:$0xff] %vm5674_vm4, %v18840_v14 }
 0x4bd   : > { %5725 = vst.msk [vmem:[#allocation4 + $0x188] sm:$0xff] %vm5674_vm4, %v18840_v14 }
 0x4be   : > { %5727 = vst.msk [vmem:[#allocation4 + $0x198] sm:$0xff] %vm5674_vm4, %v18840_v14 }
 0x4bf   : > { %v14953_v49 = vpop.f32.mrf.mxu1  ;;  %5728 = vst.msk [vmem:[#allocation4 + $0x1a0] sm:$0xff] %vm5674_vm4, %v18840_v14 }
 0x4c0   : > { %18836 = vst [vmem:[#allocation40_spill] sm:$0xff] %v14953_v49  ;;  %v5070_v49 = vld [vmem:[#allocation3 + $0x121] sm:$0xff] }
 0x4c1   : > { %v14951_v38 = vpop.f32.mrf.mxu0  ;;  %8242 = vst.msk [vmem:[#allocation5] sm:$0xff] %vm5674_vm4, %v18840_v14 }
 0x4c2   : > { %18835 = vst [vmem:[#allocation38_spill] sm:$0xff] %v14951_v38  ;;  %12207 = vmatmul.msk.f32.gmra.mxu1 %vm452_vm1, %v18837_v30  ;;  %v5348_v38 = vld [vmem:[#allocation3 + $0x122] sm:$0xff] }
 0x4c3   : > { %8243 = vst.msk [vmem:[#allocation5 + $0x8] sm:$0xff] %vm5674_vm4, %v18840_v14 }
 0x4c4   : > { %12173 = vmatmul.msk.f32.gmra.mxu0 %vm452_vm1, %v14658_v19  ;;  %v15001_v45 = vpop.f32.mrf.mxu3  ;;  %8245 = vst.msk [vmem:[#allocation5 + $0x18] sm:$0xff] %vm5674_vm4, %v18840_v14 }
 0x4c5   : > { %8246 = vst.msk [vmem:[#allocation5 + $0x20] sm:$0xff] %vm5674_vm4, %v18840_v14 }
 0x4c6   : > { %8248 = vst.msk [vmem:[#allocation5 + $0x30] sm:$0xff] %vm5674_vm4, %v18840_v14 }
 0x4c7   : > { %v14961_v43 = vpop.f32.mrf.mxu1  ;;  %8249 = vst.msk [vmem:[#allocation5 + $0x38] sm:$0xff] %vm5674_vm4, %v18840_v14 }
 0x4c8   : > { %18839 = vst [vmem:[#allocation41_spill] sm:$0xff] %v14961_v43 }
 0x4c9   : > { %v14959_v54 = vpop.f32.mrf.mxu0  ;;  %8251 = vst.msk [vmem:[#allocation5 + $0x48] sm:$0xff] %vm5674_vm4, %v18840_v14 }
 0x4ca   : > { %18838 = vst [vmem:[#allocation39_spill] sm:$0xff] %v14959_v54  ;;  %12208 = vmatmul.msk.f32.gmra.mxu1 %vm452_vm1, %v14692_v0  ;;  %v14993_v0 = vpop.f32.mrf.mxu2 }
 0x4cb   : > { %8252 = vst.msk [vmem:[#allocation5 + $0x50] sm:$0xff] %vm5674_vm4, %v18840_v14 }
 0x4cc   : > { %12174 = vmatmul.msk.f32.gmra.mxu0 %vm452_vm1, %v18841_v50  ;;  %v15035_v56 = vpop.f32.mrf.mxu3  ;;  %v18852_v50 = vld [vmem:[#allocation28_spill] sm:$0xff]  ;;  %8254 = vst.msk [vmem:[#allocation5 + $0x60] sm:$0xff] %vm5674_vm4, %v18840_v14 }
 0x4cd   : > { %8255 = vst.msk [vmem:[#allocation5 + $0x68] sm:$0xff] %vm5674_vm4, %v18840_v14 }
 0x4ce   : > { %8257 = vst.msk [vmem:[#allocation5 + $0x78] sm:$0xff] %vm5674_vm4, %v18840_v14 }
 0x4cf   : > { %v14985_v4 = vpop.f32.mrf.mxu1  ;;  %8258 = vst.msk [vmem:[#allocation5 + $0x80] sm:$0xff] %vm5674_vm4, %v18840_v14 }
 0x4d0   : > { %18843 = vst [vmem:[#allocation44_spill] sm:$0xff] %v14985_v4 }
 0x4d1   : > { %v14983_v19 = vpop.f32.mrf.mxu0  ;;  %8260 = vst.msk [vmem:[#allocation5 + $0x90] sm:$0xff] %vm5674_vm4, %v18840_v14 }
 0x4d2   : > { %18842 = vst [vmem:[#allocation42_spill] sm:$0xff] %v14983_v19  ;;  %12209 = vmatmul.msk.f32.gmra.mxu1 %vm452_vm1, %v18844_v44  ;;  %v15031_v63 = vpop.f32.mrf.mxu2  ;;  %v18853_v44 = vld [vmem:[#allocation29_spill] sm:$0xff] }
 0x4d3   : > { %8261 = vst.msk [vmem:[#allocation5 + $0x98] sm:$0xff] %vm5674_vm4, %v18840_v14 }
 0x4d4   : > { %12175 = vmatmul.msk.f32.gmra.mxu0 %vm452_vm1, %v14694_v41  ;;  %v15067_v59 = vpop.f32.mrf.mxu3  ;;  %8263 = vst.msk [vmem:[#allocation5 + $0xa8] sm:$0xff] %vm5674_vm4, %v18840_v14 }
 0x4d5   : > { %8264 = vst.msk [vmem:[#allocation5 + $0xb0] sm:$0xff] %vm5674_vm4, %v18840_v14 }
 0x4d6   : > { %8266 = vst.msk [vmem:[#allocation5 + $0xc0] sm:$0xff] %vm5674_vm4, %v18840_v14 }
 0x4d7   : > { %v15015_v28 = vpop.f32.mrf.mxu1  ;;  %8267 = vst.msk [vmem:[#allocation5 + $0xc8] sm:$0xff] %vm5674_vm4, %v18840_v14 }
 0x4d8   : > { %18846 = vst [vmem:[#allocation45_spill] sm:$0xff] %v15015_v28  ;;  %v5068_v28 = vld [vmem:[#allocation3 + $0x109] sm:$0xff] }
 0x4d9   : > { %v15013_v41 = vpop.f32.mrf.mxu0  ;;  %8269 = vst.msk [vmem:[#allocation5 + $0xd8] sm:$0xff] %vm5674_vm4, %v18840_v14 }
 0x4da   : > { %18845 = vst [vmem:[#allocation43_spill] sm:$0xff] %v15013_v41  ;;  %12210 = vmatmul.msk.f32.gmra.mxu1 %vm452_vm1, %v18847_v53  ;;  %v15063_v25 = vpop.f32.mrf.mxu2  ;;  %v5346_v41 = vld [vmem:[#allocation3 + $0x10a] sm:$0xff] }
 0x4db   : > { %8270 = vst.msk [vmem:[#allocation5 + $0xe0] sm:$0xff] %vm5674_vm4, %v18840_v14 }
 0x4dc   : > { %12176 = vmatmul.msk.f32.gmra.mxu0 %vm452_vm1, %v14709_v24  ;;  %8272 = vst.msk [vmem:[#allocation5 + $0xf0] sm:$0xff] %vm5674_vm4, %v18840_v14 }
 0x4dd   : > { %8273 = vst.msk [vmem:[#allocation5 + $0xf8] sm:$0xff] %vm5674_vm4, %v18840_v14 }
 0x4de   : > { %8275 = vst.msk [vmem:[#allocation5 + $0x108] sm:$0xff] %vm5674_vm4, %v18840_v14 }
 0x4df   : > { %v15043_v58 = vpop.f32.mrf.mxu1  ;;  %8276 = vst.msk [vmem:[#allocation5 + $0x110] sm:$0xff] %vm5674_vm4, %v18840_v14 }
 0x4e0   : > { %18849 = vst [vmem:[#allocation48_spill] sm:$0xff] %v15043_v58 }
 0x4e1   : > { %v15041_v24 = vpop.f32.mrf.mxu0  ;;  %8278 = vst.msk [vmem:[#allocation5 + $0x120] sm:$0xff] %vm5674_vm4, %v18840_v14 }
 0x4e2   : > { %18848 = vst [vmem:[#allocation46_spill] sm:$0xff] %v15041_v24  ;;  %12211 = vmatmul.msk.f32.gmra.mxu1 %vm452_vm1, %v14733_v12  ;;  %v15099_v53 = vpop.f32.mrf.mxu2 }
 0x4e3   : > { %8279 = vst.msk [vmem:[#allocation5 + $0x128] sm:$0xff] %vm5674_vm4, %v18840_v14 }
 0x4e4   : > { %12177 = vmatmul.msk.f32.gmra.mxu0 %vm452_vm1, %v18850_v22  ;;  %v15101_v22 = vpop.f32.mrf.mxu3  ;;  %8281 = vst.msk [vmem:[#allocation5 + $0x138] sm:$0xff] %vm5674_vm4, %v18840_v14 }
 0x4e5   : > { %8282 = vst.msk [vmem:[#allocation5 + $0x140] sm:$0xff] %vm5674_vm4, %v18840_v14 }
 0x4e6   : > { %8284 = vst.msk [vmem:[#allocation5 + $0x150] sm:$0xff] %vm5674_vm4, %v18840_v14 }
 0x4e7   : > { %v5478_v52 = vpop.f32.mrf.mxu1  ;;  %8285 = vst.msk [vmem:[#allocation5 + $0x158] sm:$0xff] %vm5674_vm4, %v18840_v14 }
 0x4e8   : > { %8287 = vst.msk [vmem:[#allocation5 + $0x168] sm:$0xff] %vm5674_vm4, %v18840_v14 }
 0x4e9   : > { %v5200_v12 = vpop.f32.mrf.mxu0  ;;  %8288 = vst.msk [vmem:[#allocation5 + $0x170] sm:$0xff] %vm5674_vm4, %v18840_v14 }
 0x4ea   : > { %v5296_v46 = vadd.f32 %v5200_v12, %v18851_v13  ;;  %12212 = vmatmul.msk.f32.gmra.mxu1 %vm452_vm1, %v18853_v44  ;;  %v12359_v12 = vld [vmem:[%s18538_s6 + $0x20] sm:$0xff]  ;;  %v12293_v13 = vld [vmem:[%s18538_s6 + $0x10] sm:$0xff]  ;;  %8290 = vst.msk [vmem:[#allocation5 + $0x180] sm:$0xff] %vm5674_vm4, %v18840_v14 }
 0x4eb   : > { %6943 = vmatpush.msrb.mxu2 %v12359_v12  ;;  %6393 = vmatpush.msrb.mxu0 %v12293_v13  ;;  %v5067_v44 = vld [vmem:[#allocation3 + $0xf9] sm:$0xff]  ;;  %8291 = vst.msk [vmem:[#allocation5 + $0x188] sm:$0xff] %vm5674_vm4, %v18840_v14 }
 0x4ec   : > { %v5574_v30 = vadd.f32 %v5478_v52, %v5296_v46  ;;  %12178 = vmatmul.msk.f32.gmra.mxu0 %vm452_vm1, %v18852_v50  ;;  %v12326_v46 = vld [vmem:[%s18538_s6 + $0x18] sm:$0xff]  ;;  %v15132_v52 = vpop.f32.mrf.mxu2  ;;  %v5764_v50 = vld [vmem:[#allocation4 + $0x8] sm:$0xff]  ;;  %8293 = vst.msk [vmem:[#allocation5 + $0x198] sm:$0xff] %vm5674_vm4, %v18840_v14 }
 0x4ed   : > { %6668 = vmatpush.msrb.mxu1 %v12326_v46  ;;  %12262 = vmatmul.msk.f32.gmra.mxu3 %vm5674_vm4, %v5764_v50  ;;  %v18854_v13 = vld [vmem:[#allocation30_spill] sm:$0xff]  ;;  %8294 = vst.msk [vmem:[#allocation5 + $0x1a0] sm:$0xff] %vm5674_vm4, %v18840_v14 }
 0x4ee   : > { %v5610_v55 = vadd.f32 %v15075_v1, %v5574_v30  ;;  %v15134_v30 = vpop.f32.mrf.mxu3  ;;  %5681 = vst.msk [vmem:[#allocation4 + $0x28] sm:$0x3] %vm5677_vm5, %v18840_v14 }
 0x4ef   : > { %v5481_v12 = vpop.f32.mrf.mxu1  ;;  %5678 = vst.msk [vmem:[#allocation4 + $0x10] sm:$0x3] %vm5677_vm5, %v18840_v14 }
 0x4f0   : > { %v5642_v18 = vmax.f32 %v5610_v55, 0.0  ;;  %v5345_v55 = vld [vmem:[#allocation3 + $0xfa] sm:$0xff]  ;;  %5684 = vst.msk [vmem:[#allocation4 + $0x40] sm:$0x3] %vm5677_vm5, %v18840_v14 }
 0x4f1   : > { %5687 = vst.msk [vmem:[#allocation4 + $0x58] sm:$0x3] %vm5677_vm5, %v18840_v14 }
 0x4f2   : > { %5731 = vst.msk [vmem:[#allocation4 + $0x19] sm:$0xff] %vm5674_vm4, %v5642_v18  ;;  %12213 = vmatmul.msk.f32.gmra.mxu1 %vm452_vm1, %v5345_v55  ;;  %v5203_v18 = vpop.f32.mrf.mxu0 }
 0x4f3   : > { %v5297_v46 = vadd.f32 %v5203_v18, %v18854_v13  ;;  %5690 = vst.msk [vmem:[#allocation4 + $0x70] sm:$0x3] %vm5677_vm5, %v18840_v14 }
 0x4f4   : > { %12179 = vmatmul.msk.f32.gmra.mxu0 %vm452_vm1, %v5067_v44  ;;  %v15160_v50 = vpop.f32.mrf.mxu2  ;;  %5693 = vst.msk [vmem:[#allocation4 + $0x88] sm:$0x3] %vm5677_vm5, %v18840_v14 }
 0x4f5   : > { %v5575_v55 = vadd.f32 %v5481_v12, %v5297_v46  ;;  %5696 = vst.msk [vmem:[#allocation4 + $0xa0] sm:$0x3] %vm5677_vm5, %v18840_v14 }
 0x4f6   : > { %v15162_v44 = vpop.f32.mrf.mxu3  ;;  %5699 = vst.msk [vmem:[#allocation4 + $0xb8] sm:$0x3] %vm5677_vm5, %v18840_v14  ;;  %v5797_v54 = vld [vmem:[#allocation4 + $0x9] sm:$0xff] }
 0x4f7   : > { %v5611_v18 = vadd.f32 %v15075_v1, %v5575_v55  ;;  %v15183_v12 = vpop.f32.mrf.mxu1  ;;  %5702 = vst.msk [vmem:[#allocation4 + $0xd0] sm:$0x3] %vm5677_vm5, %v18840_v14  ;;  %12230 = vmatmul.msk.f32.gmra.mxu2 %vm5674_vm4, %v5797_v54 }
 0x4f8   : > { %5705 = vst.msk [vmem:[#allocation4 + $0xe8] sm:$0x3] %vm5677_vm5, %v18840_v14 }
 0x4f9   : > { %v15189_v46 = vld [vmem:[#allocation4 + $0x18] sm:$0xff]  ;;  %v5643_v55 = vmax.f32 %v5611_v18, 0.0  ;;  %5708 = vst.msk [vmem:[#allocation4 + $0x100] sm:$0x3] %vm5677_vm5, %v18840_v14 }
 0x4fa   : > { %v15181_v13 = vpop.f32.mrf.mxu0  ;;  %12263 = vmatmul.msk.f32.gmra.mxu3 %vm5674_vm4, %v15189_v46  ;;  %12214 = vmatmul.msk.f32.gmra.mxu1 %vm452_vm1, %v5346_v41  ;;  %v5069_v41 = vld [vmem:[#allocation3 + $0x111] sm:$0xff]  ;;  %5711 = vst.msk [vmem:[#allocation4 + $0x118] sm:$0x3] %vm5677_vm5, %v18840_v14  ;;  %v5798_v54 = vld [vmem:[#allocation4 + $0x19] sm:$0xff] }
 0x4fb   : > { %5732 = vst.msk [vmem:[#allocation4 + $0x21] sm:$0xff] %vm5674_vm4, %v5643_v55  ;;  %v5298_v36 = vadd.f32 %v15181_v13, %v14761_v6 }
 0x4fc   : > { %v15191_v58 = vpop.f32.mrf.mxu2  ;;  %12180 = vmatmul.msk.f32.gmra.mxu0 %vm452_vm1, %v5068_v28  ;;  %v5347_v28 = vld [vmem:[#allocation3 + $0x112] sm:$0xff]  ;;  %5714 = vst.msk [vmem:[#allocation4 + $0x130] sm:$0x3] %vm5677_vm5, %v18840_v14 }
 0x4fd   : > { %5717 = vst.msk [vmem:[#allocation4 + $0x148] sm:$0x3] %vm5677_vm5, %v18840_v14 }
 0x4fe   : > { %v15193_v24 = vpop.f32.mrf.mxu3  ;;  %5720 = vst.msk [vmem:[#allocation4 + $0x160] sm:$0x3] %vm5677_vm5, %v18840_v14 }
 0x4ff   : > { %v5487_v4 = vpop.f32.mrf.mxu1  ;;  %5723 = vst.msk [vmem:[#allocation4 + $0x178] sm:$0x3] %vm5677_vm5, %v18840_v14  ;;  %12231 = vmatmul.msk.f32.gmra.mxu2 %vm5674_vm4, %v5798_v54 }
 0x500   : > { %5726 = vst.msk [vmem:[#allocation4 + $0x190] sm:$0x3] %vm5677_vm5, %v18840_v14 }
 0x501   : > { %5729 = vst.msk [vmem:[#allocation4 + $0x1a8] sm:$0x3] %vm5677_vm5, %v18840_v14 }
 0x502   : > { %v5209_v18 = vpop.f32.mrf.mxu0  ;;  %12215 = vmatmul.msk.f32.gmra.mxu1 %vm452_vm1, %v5347_v28  ;;  %v15228_v43 = vld [vmem:[#allocation4 + $0x20] sm:$0xff]  ;;  %8244 = vst.msk [vmem:[#allocation5 + $0x10] sm:$0x3] %vm5677_vm5, %v18840_v14 }
 0x503   : > { %12264 = vmatmul.msk.f32.gmra.mxu3 %vm5674_vm4, %v15228_v43  ;;  %8247 = vst.msk [vmem:[#allocation5 + $0x28] sm:$0x3] %vm5677_vm5, %v18840_v14  ;;  %v5299_v54 = vadd.f32 %v5209_v18, %v14768_v3  ;;  %v5799_v47 = vld [vmem:[#allocation4 + $0x21] sm:$0xff]  ;;  %v5576_v3 = vadd.f32 %v15183_v12, %v5298_v36  ;;  %v5072_v12 = vld [vmem:[#allocation3 + $0x139] sm:$0xff] }
 0x504   : > { %v15218_v55 = vpop.f32.mrf.mxu2  ;;  %12181 = vmatmul.msk.f32.gmra.mxu0 %vm452_vm1, %v5069_v41  ;;  %8250 = vst.msk [vmem:[#allocation5 + $0x40] sm:$0x3] %vm5677_vm5, %v18840_v14 }
 0x505   : > { %8253 = vst.msk [vmem:[#allocation5 + $0x58] sm:$0x3] %vm5677_vm5, %v18840_v14  ;;  %v5577_v13 = vadd.f32 %v5487_v4, %v5299_v54  ;;  %v5612_v4 = vadd.f32 %v15075_v1, %v5576_v3 }
 0x506   : > { %v15220_v19 = vpop.f32.mrf.mxu3  ;;  %8256 = vst.msk [vmem:[#allocation5 + $0x70] sm:$0x3] %vm5677_vm5, %v18840_v14 }
 0x507   : > { %v5490_v28 = vpop.f32.mrf.mxu1  ;;  %8259 = vst.msk [vmem:[#allocation5 + $0x88] sm:$0x3] %vm5677_vm5, %v18840_v14  ;;  %12232 = vmatmul.msk.f32.gmra.mxu2 %vm5674_vm4, %v5799_v47 }
 0x508   : > { %8262 = vst.msk [vmem:[#allocation5 + $0xa0] sm:$0x3] %vm5677_vm5, %v18840_v14 }
 0x509   : > { %8265 = vst.msk [vmem:[#allocation5 + $0xb8] sm:$0x3] %vm5677_vm5, %v18840_v14 }
 0x50a   : > { %v5212_v41 = vpop.f32.mrf.mxu0  ;;  %12216 = vmatmul.msk.f32.gmra.mxu1 %vm452_vm1, %v5348_v38  ;;  %8268 = vst.msk [vmem:[#allocation5 + $0xd0] sm:$0x3] %vm5677_vm5, %v18840_v14 }
 0x50b   : > { %v5300_v42 = vadd.f32 %v5212_v41, %v14775_v5  ;;  %8271 = vst.msk [vmem:[#allocation5 + $0xe8] sm:$0x3] %vm5677_vm5, %v18840_v14  ;;  %v5350_v41 = vld [vmem:[#allocation3 + $0x13a] sm:$0xff] }
 0x50c   : > { %12182 = vmatmul.msk.f32.gmra.mxu0 %vm452_vm1, %v5070_v49  ;;  %v15251_v48 = vpop.f32.mrf.mxu2  ;;  %8274 = vst.msk [vmem:[#allocation5 + $0x100] sm:$0x3] %vm5677_vm5, %v18840_v14 }
 0x50d   : > { %8277 = vst.msk [vmem:[#allocation5 + $0x118] sm:$0x3] %vm5677_vm5, %v18840_v14 }
 0x50e   : > { %v15253_v35 = vpop.f32.mrf.mxu3  ;;  %8280 = vst.msk [vmem:[#allocation5 + $0x130] sm:$0x3] %vm5677_vm5, %v18840_v14 }
 0x50f   : > { %v5493_v49 = vpop.f32.mrf.mxu1  ;;  %8283 = vst.msk [vmem:[#allocation5 + $0x148] sm:$0x3] %vm5677_vm5, %v18840_v14 }
 0x510   : > { %8286 = vst.msk [vmem:[#allocation5 + $0x160] sm:$0x3] %vm5677_vm5, %v18840_v14 }
 0x511   : > { %8289 = vst.msk [vmem:[#allocation5 + $0x178] sm:$0x3] %vm5677_vm5, %v18840_v14 }
 0x512   : > { %v5215_v38 = vpop.f32.mrf.mxu0  ;;  %12217 = vmatmul.msk.f32.gmra.mxu1 %vm452_vm1, %v5349_v27  ;;  %v5578_v27 = vadd.f32 %v5490_v28, %v5300_v42  ;;  %v5613_v42 = vadd.f32 %v15075_v1, %v5577_v13  ;;  %8292 = vst.msk [vmem:[#allocation5 + $0x190] sm:$0x3] %vm5677_vm5, %v18840_v14 }
 0x513   : > { %v5301_v6 = vadd.f32 %v5215_v38, %v14782_v16  ;;  %8295 = vst.msk [vmem:[#allocation5 + $0x1a8] sm:$0x3] %vm5677_vm5, %v18840_v14  ;;  %v4747_v14 = vadd.f32 %v14917_v21, %v14787_v29  ;;  %v5074_v21 = vld [vmem:[#allocation3 + $0x151] sm:$0xff] }
 0x514   : > { %12183 = vmatmul.msk.f32.gmra.mxu0 %vm452_vm1, %v5071_v31  ;;  %v15285_v5 = vpop.f32.mrf.mxu2  ;;  %v5614_v28 = vadd.f32 %v15075_v1, %v5578_v27 }
 0x515   : > { %v5579_v16 = vadd.f32 %v5493_v49, %v5301_v6  ;;  %v5644_v49 = vmax.f32 %v5612_v4, 0.0  ;;  %v5645_v6 = vmax.f32 %v5613_v42, 0.0 }
 0x516   : > { %v15287_v31 = vpop.f32.mrf.mxu3  ;;  %v5646_v3 = vmax.f32 %v5614_v28, 0.0  ;;  %v5026_v28 = vadd.f32 %v14919_v60, %v4747_v14 }
 0x517   : > { %v5496_v36 = vpop.f32.mrf.mxu1  ;;  %5733 = vst.msk [vmem:[#allocation4 + $0x31] sm:$0xff] %vm5674_vm4, %v5644_v49 }
 0x518   : > { %5734 = vst.msk [vmem:[#allocation4 + $0x39] sm:$0xff] %vm5674_vm4, %v5645_v6 }
 0x519   : > { %5735 = vst.msk [vmem:[#allocation4 + $0x49] sm:$0xff] %vm5674_vm4, %v5646_v3  ;;  %v5352_v3 = vld [vmem:[#allocation3 + $0x152] sm:$0xff] }
 0x51a   : > { %v5218_v18 = vpop.f32.mrf.mxu0  ;;  %12218 = vmatmul.msk.f32.gmra.mxu1 %vm452_vm1, %v5350_v41  ;;  %v5351_v41 = vld [vmem:[#allocation3 + $0x142] sm:$0xff] }
 0x51b   : > { %v5302_v47 = vadd.f32 %v5218_v18, %v14791_v9  ;;  %v5615_v9 = vadd.f32 %v15075_v1, %v5579_v16 }
 0x51c   : > { %12184 = vmatmul.msk.f32.gmra.mxu0 %vm452_vm1, %v5072_v12  ;;  %v15317_v18 = vpop.f32.mrf.mxu2  ;;  %v5073_v12 = vld [vmem:[#allocation3 + $0x141] sm:$0xff] }
 0x51d   : > { %v5580_v38 = vadd.f32 %v5496_v36, %v5302_v47  ;;  %v5647_v13 = vmax.f32 %v5615_v9, 0.0 }
 0x51e   : > { %v15319_v36 = vpop.f32.mrf.mxu3  ;;  %v5800_v9 = vld [vmem:[#allocation4 + $0x31] sm:$0xff] }
 0x51f   : > { %v5616_v54 = vadd.f32 %v15075_v1, %v5580_v38  ;;  %v5499_v16 = vpop.f32.mrf.mxu1  ;;  %5736 = vst.msk [vmem:[#allocation4 + $0x51] sm:$0xff] %vm5674_vm4, %v5647_v13  ;;  %v15333_v49 = vld [vmem:[#allocation4 + $0x30] sm:$0xff]  ;;  %12233 = vmatmul.msk.f32.gmra.mxu2 %vm5674_vm4, %v5800_v9 }
 0x520   : > { %12265 = vmatmul.msk.f32.gmra.mxu3 %vm5674_vm4, %v15333_v49 }
 0x521   : > { %v5648_v4 = vmax.f32 %v5616_v54, 0.0 }
 0x522   : > { %v5221_v27 = vpop.f32.mrf.mxu0  ;;  %12219 = vmatmul.msk.f32.gmra.mxu1 %vm452_vm1, %v5351_v41 }
 0x523   : > { %v5303_v47 = vadd.f32 %v5221_v27, %v14802_v26  ;;  %5737 = vst.msk [vmem:[#allocation4 + $0x61] sm:$0xff] %vm5674_vm4, %v5648_v4 }
 0x524   : > { %12185 = vmatmul.msk.f32.gmra.mxu0 %vm452_vm1, %v5073_v12  ;;  %v15339_v13 = vpop.f32.mrf.mxu2  ;;  %v15348_v12 = vld [vmem:[#allocation4 + $0x38] sm:$0xff] }
 0x525   : > { %v5581_v42 = vadd.f32 %v5499_v16, %v5303_v47  ;;  %v4748_v16 = vadd.f32 %v14935_v51, %v14798_v57  ;;  %v5801_v47 = vld [vmem:[#allocation4 + $0x39] sm:$0xff]  ;;  %v5353_v57 = vld [vmem:[#allocation3 + $0x15a] sm:$0xff] }
 0x526   : > { %v15341_v27 = vpop.f32.mrf.mxu3 }
 0x527   : > { %v5617_v26 = vadd.f32 %v15075_v1, %v5581_v42  ;;  %v5502_v6 = vpop.f32.mrf.mxu1  ;;  %v5027_v41 = vadd.f32 %v14937_v37, %v4748_v16  ;;  %12234 = vmatmul.msk.f32.gmra.mxu2 %vm5674_vm4, %v5801_v47  ;;  %v4749_v37 = vadd.f32 %v14947_v15, %v14810_v32  ;;  %v5076_v15 = vld [vmem:[#allocation3 + $0x169] sm:$0xff] }
 0x528   : > { %12266 = vmatmul.msk.f32.gmra.mxu3 %vm5674_vm4, %v15348_v12  ;;  %v5354_v47 = vld [vmem:[#allocation3 + $0x16a] sm:$0xff] }
 0x529   : > { %v5649_v38 = vmax.f32 %v5617_v26, 0.0 }
 0x52a   : > { %v5224_v54 = vpop.f32.mrf.mxu0  ;;  %12220 = vmatmul.msk.f32.gmra.mxu1 %vm452_vm1, %v5352_v3  ;;  %v5028_v3 = vadd.f32 %v14949_v10, %v4749_v37  ;;  %v4750_v10 = vadd.f32 %v14963_v61, %v14818_v33  ;;  %v5077_v61 = vld [vmem:[#allocation3 + $0x171] sm:$0xff] }
 0x52b   : > { %5738 = vst.msk [vmem:[#allocation4 + $0x69] sm:$0xff] %vm5674_vm4, %v5649_v38  ;;  %v5304_v29 = vadd.f32 %v5224_v54, %v5026_v28  ;;  %v5075_v38 = vld [vmem:[#allocation3 + $0x159] sm:$0xff] }
 0x52c   : > { %12186 = vmatmul.msk.f32.gmra.mxu0 %vm452_vm1, %v5074_v21  ;;  %v15359_v9 = vpop.f32.mrf.mxu2  ;;  %v15364_v21 = vld [vmem:[#allocation4 + $0x48] sm:$0xff] }
 0x52d   : > { %v5582_v60 = vadd.f32 %v5502_v6, %v5304_v29  ;;  %v5802_v29 = vld [vmem:[#allocation4 + $0x49] sm:$0xff] }
 0x52e   : > { %v15361_v54 = vpop.f32.mrf.mxu3 }
 0x52f   : > { %v5618_v4 = vadd.f32 %v15075_v1, %v5582_v60  ;;  %v5505_v26 = vpop.f32.mrf.mxu1  ;;  %12235 = vmatmul.msk.f32.gmra.mxu2 %vm5674_vm4, %v5802_v29  ;;  %v5355_v29 = vld [vmem:[#allocation3 + $0x172] sm:$0xff] }
 0x530   : > { %12267 = vmatmul.msk.f32.gmra.mxu3 %vm5674_vm4, %v15364_v21 }
 0x531   : > { %v5650_v42 = vmax.f32 %v5618_v4, 0.0 }
 0x532   : > { %v5227_v14 = vpop.f32.mrf.mxu0  ;;  %12221 = vmatmul.msk.f32.gmra.mxu1 %vm452_vm1, %v5353_v57 }
 0x533   : > { %5739 = vst.msk [vmem:[#allocation4 + $0x79] sm:$0xff] %vm5674_vm4, %v5650_v42  ;;  %v5305_v28 = vadd.f32 %v5227_v14, %v5027_v41  ;;  %v5803_v14 = vld [vmem:[#allocation4 + $0x51] sm:$0xff] }
 0x534   : > { %12187 = vmatmul.msk.f32.gmra.mxu0 %vm452_vm1, %v5075_v38  ;;  %v15379_v38 = vpop.f32.mrf.mxu2 }
 0x535   : > { %v5583_v51 = vadd.f32 %v5505_v26, %v5305_v28  ;;  %v15376_v26 = vld [vmem:[#allocation4 + $0x50] sm:$0xff]  ;;  %v5029_v28 = vadd.f32 %v14965_v2, %v4750_v10  ;;  %v4751_v2 = vadd.f32 %v14993_v0, %v14826_v62 }
 0x536   : > { %v15381_v57 = vpop.f32.mrf.mxu3  ;;  %v5078_v0 = vld [vmem:[#allocation3 + $0x181] sm:$0xff] }
 0x537   : > { %v5619_v6 = vadd.f32 %v15075_v1, %v5583_v51  ;;  %v5508_v4 = vpop.f32.mrf.mxu1  ;;  %12236 = vmatmul.msk.f32.gmra.mxu2 %vm5674_vm4, %v5803_v14  ;;  %v5356_v14 = vld [vmem:[#allocation3 + $0x182] sm:$0xff] }
 0x538   : > { %12268 = vmatmul.msk.f32.gmra.mxu3 %vm5674_vm4, %v15376_v26 }
 0x539   : > { %v5651_v60 = vmax.f32 %v5619_v6, 0.0 }
 0x53a   : > { %v5230_v16 = vpop.f32.mrf.mxu0  ;;  %12222 = vmatmul.msk.f32.gmra.mxu1 %vm452_vm1, %v5354_v47 }
 0x53b   : > { %5740 = vst.msk [vmem:[#allocation4 + $0x81] sm:$0xff] %vm5674_vm4, %v5651_v60  ;;  %v5306_v32 = vadd.f32 %v5230_v16, %v5028_v3  ;;  %v5804_v16 = vld [vmem:[#allocation4 + $0x61] sm:$0xff] }
 0x53c   : > { %12188 = vmatmul.msk.f32.gmra.mxu0 %vm452_vm1, %v5076_v15  ;;  %v15395_v10 = vpop.f32.mrf.mxu2 }
 0x53d   : > { %v5584_v41 = vadd.f32 %v5508_v4, %v5306_v32  ;;  %v15392_v4 = vld [vmem:[#allocation4 + $0x60] sm:$0xff]  ;;  %v5030_v32 = vadd.f32 %v15001_v45, %v4751_v2  ;;  %v4752_v45 = vadd.f32 %v15031_v63, %v14838_v7 }
 0x53e   : > { %v5079_v63 = vld [vmem:[#allocation3 + $0x189] sm:$0xff] }
 0x53f   : > { %v5620_v42 = vadd.f32 %v15075_v1, %v5584_v41  ;;  %v5511_v6 = vpop.f32.mrf.mxu1  ;;  %12237 = vmatmul.msk.f32.gmra.mxu2 %vm5674_vm4, %v5804_v16  ;;  %v5357_v2 = vld [vmem:[#allocation3 + $0x18a] sm:$0xff] }
 0x540   : > { %12269 = vmatmul.msk.f32.gmra.mxu3 %vm5674_vm4, %v15392_v4 }
 0x541   : > { %v5652_v51 = vmax.f32 %v5620_v42, 0.0  ;;  %v15397_v42 = vpop.f32.mrf.mxu3 }
 0x542   : > { %v5233_v37 = vpop.f32.mrf.mxu0  ;;  %12223 = vmatmul.msk.f32.gmra.mxu1 %vm452_vm1, %v5355_v29 }
 0x543   : > { %5741 = vst.msk [vmem:[#allocation4 + $0x91] sm:$0xff] %vm5674_vm4, %v5652_v51  ;;  %v5307_v33 = vadd.f32 %v5233_v37, %v5029_v28  ;;  %v15408_v37 = vld [vmem:[#allocation4 + $0x69] sm:$0xff] }
 0x544   : > { %12189 = vmatmul.msk.f32.gmra.mxu0 %vm452_vm1, %v5077_v61 }
 0x545   : > { %v5585_v3 = vadd.f32 %v5511_v6, %v5307_v33  ;;  %v15410_v6 = vld [vmem:[#allocation4 + $0x68] sm:$0xff]  ;;  %v5031_v33 = vadd.f32 %v15035_v56, %v4752_v45  ;;  %v4753_v56 = vadd.f32 %v15063_v25, %v14846_v40 }
 0x546   : > { %v5080_v25 = vld [vmem:[#allocation3 + $0x199] sm:$0xff] }
 0x547   : > { %v5621_v60 = vadd.f32 %v15075_v1, %v5585_v3  ;;  %v5514_v41 = vpop.f32.mrf.mxu1  ;;  %12238 = vmatmul.msk.f32.gmra.mxu2 %vm5674_vm4, %v15408_v37  ;;  %v5358_v45 = vld [vmem:[#allocation3 + $0x19a] sm:$0xff] }
 0x548   : > { %12270 = vmatmul.msk.f32.gmra.mxu3 %vm5674_vm4, %v15410_v6 }
 0x549   : > { %v5653_v15 = vmax.f32 %v5621_v60, 0.0  ;;  %v15418_v60 = vpop.f32.mrf.mxu2  ;;  %v15420_v16 = vpop.f32.mrf.mxu3 }
 0x54a   : > { %v5236_v47 = vpop.f32.mrf.mxu0  ;;  %12224 = vmatmul.msk.f32.gmra.mxu1 %vm452_vm1, %v5356_v14 }
 0x54b   : > { %5742 = vst.msk [vmem:[#allocation4 + $0x99] sm:$0xff] %vm5674_vm4, %v5653_v15  ;;  %v5308_v62 = vadd.f32 %v5236_v47, %v5030_v32  ;;  %v15427_v47 = vld [vmem:[#allocation4 + $0x79] sm:$0xff] }
 0x54c   : > { %12190 = vmatmul.msk.f32.gmra.mxu0 %vm452_vm1, %v5078_v0 }
 0x54d   : > { %v5586_v28 = vadd.f32 %v5514_v41, %v5308_v62  ;;  %v15429_v41 = vld [vmem:[#allocation4 + $0x78] sm:$0xff]  ;;  %v5032_v62 = vadd.f32 %v15067_v59, %v4753_v56  ;;  %v4754_v59 = vadd.f32 %v15099_v53, %v14853_v23 }
 0x54e   : > { %v5081_v53 = vld [vmem:[#allocation3 + $0x1a1] sm:$0xff] }
 0x54f   : > { %v5622_v51 = vadd.f32 %v15075_v1, %v5586_v28  ;;  %v5517_v3 = vpop.f32.mrf.mxu1  ;;  %12239 = vmatmul.msk.f32.gmra.mxu2 %vm5674_vm4, %v15427_v47 }
 0x550   : > { %12271 = vmatmul.msk.f32.gmra.mxu3 %vm5674_vm4, %v15429_v41 }
 0x551   : > { %v5654_v61 = vmax.f32 %v5622_v51, 0.0 }
 0x552   : > { %v5239_v29 = vpop.f32.mrf.mxu0  ;;  %12225 = vmatmul.msk.f32.gmra.mxu1 %vm452_vm1, %v5357_v2 }
 0x553   : > { %5743 = vst.msk [vmem:[#allocation4 + $0xa9] sm:$0xff] %vm5674_vm4, %v5654_v61  ;;  %v5309_v7 = vadd.f32 %v5239_v29, %v5031_v33  ;;  %v15441_v33 = vpop.f32.mrf.mxu2  ;;  %v15443_v61 = vpop.f32.mrf.mxu3 }
 0x554   : > { %12191 = vmatmul.msk.f32.gmra.mxu0 %vm452_vm1, %v5079_v63  ;;  %v5033_v63 = vadd.f32 %v15101_v22, %v4754_v59  ;;  %v4755_v22 = vadd.f32 %v15132_v52, %v14860_v8  ;;  %v6248_v52 = vld [vmem:[#allocation4 + $0x2] sm:$0xff] }
 0x555   : > { %v5587_v32 = vadd.f32 %v5517_v3, %v5309_v7  ;;  %v15446_v3 = vld [vmem:[#allocation4 + $0x81] sm:$0xff] }
 0x556   : > { %v15448_v7 = vld [vmem:[#allocation4 + $0x80] sm:$0xff] }
 0x557   : > { %v5623_v15 = vadd.f32 %v15075_v1, %v5587_v32  ;;  %v5520_v28 = vpop.f32.mrf.mxu1  ;;  %12240 = vmatmul.msk.f32.gmra.mxu2 %vm5674_vm4, %v15446_v3 }
 0x558   : > { %12272 = vmatmul.msk.f32.gmra.mxu3 %vm5674_vm4, %v15448_v7 }
 0x559   : > { %v5655_v0 = vmax.f32 %v5623_v15, 0.0  ;;  %v5359_v15 = vld [vmem:[#allocation3 + $0x1a2] sm:$0xff] }
 0x55a   : > { %v5242_v14 = vpop.f32.mrf.mxu0  ;;  %12226 = vmatmul.msk.f32.gmra.mxu1 %vm452_vm1, %v5358_v45 }
 0x55b   : > { %5744 = vst.msk [vmem:[#allocation4 + $0xb1] sm:$0xff] %vm5674_vm4, %v5655_v0  ;;  %v5310_v40 = vadd.f32 %v5242_v14, %v5032_v62  ;;  %v15461_v14 = vld [vmem:[#allocation4 + $0x91] sm:$0xff]  ;;  %v15468_v45 = vpop.f32.mrf.mxu3 }
 0x55c   : > { %12192 = vmatmul.msk.f32.gmra.mxu0 %vm452_vm1, %v5080_v25  ;;  %v15466_v25 = vpop.f32.mrf.mxu2 }
 0x55d   : > { %v5588_v51 = vadd.f32 %v5520_v28, %v5310_v40  ;;  %v15463_v28 = vld [vmem:[#allocation4 + $0x90] sm:$0xff]  ;;  %v5034_v40 = vadd.f32 %v15134_v30, %v4755_v22  ;;  %v12392_v30 = vld [vmem:[%s18538_s6 + $0x28] sm:$0xff] }
 0x55e   : > { %7218 = vmatpush.msrb.mxu3 %v12392_v30 }
 0x55f   : > { %v5624_v29 = vadd.f32 %v15075_v1, %v5588_v51  ;;  %v5523_v56 = vpop.f32.mrf.mxu1  ;;  %12241 = vmatmul.msk.f32.gmra.mxu2 %vm5674_vm4, %v15461_v14 }
 0x560   : > { %12273 = vmatmul.msk.f32.gmra.mxu3 %vm5674_vm4, %v15463_v28 }
 0x561   : > { %v5656_v2 = vmax.f32 %v5624_v29, 0.0 }
 0x562   : > { %v5245_v32 = vpop.f32.mrf.mxu0  ;;  %12227 = vmatmul.msk.f32.gmra.mxu1 %vm452_vm1, %v5359_v15 }
 0x563   : > { %5745 = vst.msk [vmem:[#allocation4 + $0xc1] sm:$0xff] %vm5674_vm4, %v5656_v2  ;;  %v5311_v23 = vadd.f32 %v5245_v32, %v5033_v63  ;;  %v4756_v2 = vadd.f32 %v15160_v50, %v14868_v34  ;;  %v6249_v50 = vld [vmem:[#allocation4 + $0xa] sm:$0xff] }
 0x564   : > { %12193 = vmatmul.msk.f32.gmra.mxu0 %vm452_vm1, %v5081_v53 }
 0x565   : > { %v5589_v62 = vadd.f32 %v5523_v56, %v5311_v23  ;;  %v15484_v56 = vld [vmem:[#allocation4 + $0x99] sm:$0xff]  ;;  %v5035_v53 = vadd.f32 %v15162_v44, %v4756_v2  ;;  %v4757_v44 = vadd.f32 %v15191_v58, %v14875_v20 }
 0x566   : > { %v15486_v23 = vld [vmem:[#allocation4 + $0x98] sm:$0xff] }
 0x567   : > { %v5625_v0 = vadd.f32 %v15075_v1, %v5589_v62  ;;  %v5526_v29 = vpop.f32.mrf.mxu1  ;;  %12242 = vmatmul.msk.f32.gmra.mxu2 %vm5674_vm4, %v15484_v56 }
 0x568   : > { %12274 = vmatmul.msk.f32.gmra.mxu3 %vm5674_vm4, %v15486_v23 }
 0x569   : > { %v5657_v51 = vmax.f32 %v5625_v0, 0.0  ;;  %v15489_v0 = vpop.f32.mrf.mxu3 }
 0x56a   : > { %v5248_v59 = vpop.f32.mrf.mxu0  ;;  %12327 = vmatmul.msk.f32.vlgmr.msrb.gmra.mxu1 %vm5674_vm4, %v15189_v46  ;;  %v15496_v46 = vpop.f32.mrf.mxu2 }
 0x56b   : > { %5746 = vst.msk [vmem:[#allocation4 + $0xc9] sm:$0xff] %vm5674_vm4, %v5657_v51  ;;  %v5312_v8 = vadd.f32 %v5248_v59, %v5034_v40  ;;  %v15504_v59 = vld [vmem:[#allocation4 + $0xa9] sm:$0xff] }
 0x56c   : > { %12294 = vmatmul.msk.f32.vlgmr.msrb.gmra.mxu0 %vm5674_vm4, %v6248_v52 }
 0x56d   : > { %v5590_v63 = vadd.f32 %v5526_v29, %v5312_v8  ;;  %v15506_v29 = vld [vmem:[#allocation4 + $0xa8] sm:$0xff]  ;;  %v5036_v8 = vadd.f32 %v15193_v24, %v4757_v44 }
 0x56f   : > { %v5626_v32 = vadd.f32 %v15075_v1, %v5590_v63  ;;  %v5529_v22 = vpop.f32.mrf.mxu1  ;;  %12243 = vmatmul.msk.f32.gmra.mxu2 %vm5674_vm4, %v15504_v59 }
 0x570   : > { %12275 = vmatmul.msk.f32.gmra.mxu3 %vm5674_vm4, %v15506_v29 }
 0x571   : > { %v5658_v15 = vmax.f32 %v5626_v32, 0.0  ;;  %v15516_v58 = vpop.f32.mrf.mxu3  ;;  %v4758_v32 = vadd.f32 %v15218_v55, %v14882_v11  ;;  %v15537_v55 = vld [vmem:[#allocation4 + $0x22] sm:$0xff] }
 0x572   : > { %v5251_v62 = vpop.f32.mrf.mxu0  ;;  %12328 = vmatmul.msk.f32.gmra.mxu1 %vm5674_vm4, %v15228_v43  ;;  %v15514_v43 = vld [vmem:[#allocation4 + $0x1a] sm:$0xff]  ;;  %v15522_v24 = vpop.f32.mrf.mxu2 }
 0x573   : > { %5747 = vst.msk [vmem:[#allocation4 + $0xd9] sm:$0xff] %vm5674_vm4, %v5658_v15  ;;  %v5313_v34 = vadd.f32 %v5251_v62, %v5035_v53  ;;  %v15527_v15 = vld [vmem:[#allocation4 + $0xb1] sm:$0xff] }
 0x574   : > { %12295 = vmatmul.msk.f32.gmra.mxu0 %vm5674_vm4, %v6249_v50  ;;  %v15529_v62 = vld [vmem:[#allocation4 + $0xb0] sm:$0xff] }
 0x575   : > { %v5591_v40 = vadd.f32 %v5529_v22, %v5313_v34  ;;  %v5037_v22 = vadd.f32 %v15220_v19, %v4758_v32 }
 0x577   : > { %v5627_v51 = vadd.f32 %v15075_v1, %v5591_v40  ;;  %v5532_v63 = vpop.f32.mrf.mxu1  ;;  %12244 = vmatmul.msk.f32.gmra.mxu2 %vm5674_vm4, %v15527_v15 }
 0x578   : > { %12276 = vmatmul.msk.f32.gmra.mxu3 %vm5674_vm4, %v15529_v62 }
 0x579   : > { %v5659_v52 = vmax.f32 %v5627_v51, 0.0  ;;  %v4759_v51 = vadd.f32 %v15251_v48, %v14889_v17  ;;  %v15560_v48 = vld [vmem:[#allocation4 + $0x32] sm:$0xff] }
 0x57a   : > { %v5254_v30 = vpop.f32.mrf.mxu0  ;;  %12329 = vmatmul.msk.f32.gmra.mxu1 %vm5674_vm4, %v15333_v49  ;;  %v15539_v49 = vpop.f32.mrf.mxu3 }
 0x57b   : > { %5748 = vst.msk [vmem:[#allocation4 + $0xe1] sm:$0xff] %vm5674_vm4, %v5659_v52  ;;  %v5314_v20 = vadd.f32 %v5254_v30, %v5036_v8  ;;  %v15545_v19 = vpop.f32.mrf.mxu2  ;;  %v15550_v52 = vld [vmem:[#allocation4 + $0xc1] sm:$0xff] }
 0x57c   : > { %12296 = vmatmul.msk.f32.gmra.mxu0 %vm5674_vm4, %v15514_v43  ;;  %v15552_v30 = vld [vmem:[#allocation4 + $0xc0] sm:$0xff] }
 0x57d   : > { %v5592_v2 = vadd.f32 %v5532_v63, %v5314_v20  ;;  %v5038_v63 = vadd.f32 %v15253_v35, %v4759_v51  ;;  %v4760_v35 = vadd.f32 %v15285_v5, %v14896_v39 }
 0x57f   : > { %v5628_v53 = vadd.f32 %v15075_v1, %v5592_v2  ;;  %v5535_v40 = vpop.f32.mrf.mxu1  ;;  %12245 = vmatmul.msk.f32.gmra.mxu2 %vm5674_vm4, %v15550_v52 }
 0x580   : > { %12277 = vmatmul.msk.f32.gmra.mxu3 %vm5674_vm4, %v15552_v30 }
 0x581   : > { %v5660_v34 = vmax.f32 %v5628_v53, 0.0 }
 0x582   : > { %v5257_v50 = vpop.f32.mrf.mxu0  ;;  %12330 = vmatmul.msk.f32.gmra.mxu1 %vm5674_vm4, %v15348_v12  ;;  %v15568_v53 = vpop.f32.mrf.mxu3 }
 0x583   : > { %5749 = vst.msk [vmem:[#allocation4 + $0xf1] sm:$0xff] %vm5674_vm4, %v5660_v34  ;;  %v5315_v11 = vadd.f32 %v5257_v50, %v5037_v22  ;;  %v15571_v34 = vld [vmem:[#allocation4 + $0xc9] sm:$0xff] }
 0x584   : > { %12297 = vmatmul.msk.f32.gmra.mxu0 %vm5674_vm4, %v15537_v55  ;;  %18855 = vst [vmem:[#allocation47_spill] sm:$0xff] %v15568_v53  ;;  %v15573_v50 = vld [vmem:[#allocation4 + $0xc8] sm:$0xff] }
 0x585   : > { %v5593_v44 = vadd.f32 %v5535_v40, %v5315_v11  ;;  %v15575_v40 = vpop.f32.mrf.mxu2  ;;  %v5039_v11 = vadd.f32 %v15287_v31, %v4760_v35  ;;  %v18856_v31 = vld [vmem:[#allocation32_spill] sm:$0xff]  ;;  %v12843_v53 = vld [vmem:[#allocation4 + $0x21] sm:$0xff] }
 0x587   : > { %v5629_v8 = vadd.f32 %v15075_v1, %v5593_v44  ;;  %v5538_v17 = vpop.f32.mrf.mxu1  ;;  %12246 = vmatmul.msk.f32.gmra.mxu2 %vm5674_vm4, %v15571_v34 }
 0x588   : > { %12278 = vmatmul.msk.f32.gmra.mxu3 %vm5674_vm4, %v15573_v50 }
 0x589   : > { %v5661_v20 = vmax.f32 %v5629_v8, 0.0 }
 0x58a   : > { %v5260_v2 = vpop.f32.mrf.mxu0  ;;  %12331 = vmatmul.msk.f32.gmra.mxu1 %vm5674_vm4, %v15364_v21  ;;  %v15583_v21 = vld [vmem:[#allocation4 + $0x3a] sm:$0xff] }
 0x58b   : > { %5750 = vst.msk [vmem:[#allocation4 + $0xf9] sm:$0xff] %vm5674_vm4, %v5661_v20  ;;  %v5316_v12 = vadd.f32 %v5260_v2, %v5038_v63  ;;  %v4761_v63 = vadd.f32 %v15317_v18, %v18856_v31  ;;  %v15592_v2 = vld [vmem:[#allocation4 + $0xd9] sm:$0xff] }
 0x58c   : > { %12298 = vmatmul.msk.f32.gmra.mxu0 %vm5674_vm4, %v15560_v48  ;;  %v15617_v31 = vld [vmem:[#allocation4 + $0xe0] sm:$0xff] }
 0x58d   : > { %v5594_v32 = vadd.f32 %v5538_v17, %v5316_v12  ;;  %v15594_v12 = vld [vmem:[#allocation4 + $0xd8] sm:$0xff]  ;;  %v5040_v17 = vadd.f32 %v15319_v36, %v4761_v63  ;;  %v18859_v36 = vld [vmem:[#allocation31_spill] sm:$0xff] }
 0x58f   : > { %v5630_v22 = vadd.f32 %v15075_v1, %v5594_v32  ;;  %v5541_v5 = vpop.f32.mrf.mxu1  ;;  %v15597_v32 = vpop.f32.mrf.mxu3  ;;  %12247 = vmatmul.msk.f32.gmra.mxu2 %vm5674_vm4, %v15592_v2 }
 0x590   : > { %18857 = vst [vmem:[#allocation49_spill] sm:$0xff] %v15597_v32  ;;  %12279 = vmatmul.msk.f32.gmra.mxu3 %vm5674_vm4, %v15594_v12 }
 0x591   : > { %v5662_v44 = vmax.f32 %v5630_v22, 0.0  ;;  %v15599_v22 = vpop.f32.mrf.mxu2 }
 0x592   : > { %v5263_v51 = vpop.f32.mrf.mxu0  ;;  %12332 = vmatmul.msk.f32.gmra.mxu1 %vm5674_vm4, %v15376_v26  ;;  %18858 = vst [vmem:[#allocation50_spill] sm:$0xff] %v15599_v22 }
 0x593   : > { %5751 = vst.msk [vmem:[#allocation4 + $0x109] sm:$0xff] %vm5674_vm4, %v5662_v44  ;;  %v5317_v39 = vadd.f32 %v5263_v51, %v5039_v11  ;;  %v15606_v44 = vld [vmem:[#allocation4 + $0x4a] sm:$0xff] }
 0x594   : > { %12299 = vmatmul.msk.f32.gmra.mxu0 %vm5674_vm4, %v15583_v21 }
 0x595   : > { %v5595_v8 = vadd.f32 %v5541_v5, %v5317_v39  ;;  %v4762_v39 = vadd.f32 %v15339_v13, %v18859_v36 }
 0x597   : > { %v5631_v20 = vadd.f32 %v15075_v1, %v5595_v8  ;;  %v5544_v26 = vpop.f32.mrf.mxu1  ;;  %v15615_v8 = vld [vmem:[#allocation4 + $0xe1] sm:$0xff]  ;;  %v5041_v63 = vadd.f32 %v15341_v27, %v4762_v39  ;;  %v15638_v39 = vld [vmem:[#allocation4 + $0xf1] sm:$0xff] }
 0x598   : > { %18860 = vst [vmem:[#allocation52_spill] sm:$0xff] %v15615_v8  ;;  %12248 = vmatmul.msk.f32.gmra.mxu2 %vm5674_vm4, %v15615_v8  ;;  %12280 = vmatmul.msk.f32.gmra.mxu3 %vm5674_vm4, %v15617_v31  ;;  %v18863_v27 = vld [vmem:[#allocation33_spill] sm:$0xff] }
 0x599   : > { %v5663_v35 = vmax.f32 %v5631_v20, 0.0  ;;  %18864 = vst [vmem:[#allocation55_spill] sm:$0xff] %v15638_v39  ;;  %v12842_v8 = vld [vmem:[#allocation4 + $0x19] sm:$0xff] }
 0x59a   : > { %v5266_v11 = vpop.f32.mrf.mxu0  ;;  %12333 = vmatmul.msk.f32.gmra.mxu1 %vm5674_vm4, %v15392_v4 }
 0x59b   : > { %5752 = vst.msk [vmem:[#allocation4 + $0x111] sm:$0xff] %vm5674_vm4, %v5663_v35  ;;  %v5318_v18 = vadd.f32 %v5266_v11, %v5040_v17  ;;  %v15625_v35 = vpop.f32.mrf.mxu2  ;;  %v15627_v11 = vpop.f32.mrf.mxu3 }
 0x59c   : > { %12300 = vmatmul.msk.f32.gmra.mxu0 %vm5674_vm4, %v15606_v44  ;;  %18861 = vst [vmem:[#allocation51_spill] sm:$0xff] %v15625_v35 }
 0x59d   : > { %v5596_v51 = vadd.f32 %v5544_v26, %v5318_v18  ;;  %18862 = vst [vmem:[#allocation53_spill] sm:$0xff] %v15627_v11  ;;  %v15629_v18 = vld [vmem:[#allocation4 + $0x52] sm:$0xff] }
 0x59f   : > { %v5632_v5 = vadd.f32 %v15075_v1, %v5596_v51  ;;  %v5547_v13 = vpop.f32.mrf.mxu1  ;;  %v4763_v51 = vadd.f32 %v15359_v9, %v18863_v27  ;;  %v18867_v27 = vld [vmem:[#allocation36_spill] sm:$0xff] }
 0x5a0   : > { %12249 = vmatmul.msk.f32.gmra.mxu2 %vm5674_vm4, %v15638_v39 }
 0x5a1   : > { %v5664_v20 = vmax.f32 %v5632_v5, 0.0  ;;  %v15640_v5 = vld [vmem:[#allocation4 + $0xf0] sm:$0xff] }
 0x5a2   : > { %v5269_v17 = vpop.f32.mrf.mxu0  ;;  %12334 = vmatmul.msk.f32.gmra.mxu1 %vm5674_vm4, %v15410_v6  ;;  %12281 = vmatmul.msk.f32.gmra.mxu3 %vm5674_vm4, %v15640_v5 }
 0x5a3   : > { %5753 = vst.msk [vmem:[#allocation4 + $0x121] sm:$0xff] %vm5674_vm4, %v5664_v20  ;;  %v5319_v4 = vadd.f32 %v5269_v17, %v5041_v63  ;;  %v18865_v63 = vld [vmem:[#allocation9_spill] sm:$0xff]  ;;  %v18866_v20 = vld [vmem:[#allocation34_spill] sm:$0xff] }
 0x5a4   : > { %12301 = vmatmul.msk.f32.gmra.mxu0 %vm5674_vm4, %v15629_v18  ;;  %v4208_v17 = vadd.f32 %v18866_v20, %v18865_v63  ;;  %v15661_v20 = vld [vmem:[#allocation4 + $0xf9] sm:$0xff] }
 0x5a5   : > { %v5597_v26 = vadd.f32 %v5547_v13, %v5319_v4  ;;  %v5042_v4 = vadd.f32 %v15361_v54, %v4763_v51  ;;  %v5955_v54 = vpop.f32.mrf.mxu2  ;;  %v6164_v51 = vpop.f32.mrf.mxu3  ;;  %18868 = vst [vmem:[#allocation54_spill] sm:$0xff] %v15661_v20 }
 0x5a6   : > { %v4486_v35 = vadd.f32 %v18867_v27, %v4208_v17  ;;  %v15658_v63 = vadd.f32 %v6164_v51, %v5955_v54  ;;  %v18869_v17 = vld [vmem:[#allocation18_spill] sm:$0xff] }
 0x5a7   : > { %v5633_v36 = vadd.f32 %v15075_v1, %v5597_v26  ;;  %v5550_v6 = vpop.f32.mrf.mxu1  ;;  %v15650_v26 = vld [vmem:[#allocation4 + $0x62] sm:$0xff] }
 0x5a8   : > { %12250 = vmatmul.msk.f32.gmra.mxu2 %vm5674_vm4, %v15661_v20 }
 0x5a9   : > { %v5665_v13 = vmax.f32 %v5633_v36, 0.0  ;;  %v4764_v36 = vadd.f32 %v15379_v38, %v4486_v35 }
 0x5aa   : > { %v5272_v11 = vpop.f32.mrf.mxu0  ;;  %12335 = vmatmul.msk.f32.gmra.mxu1 %vm5674_vm4, %v15429_v41  ;;  %v15673_v41 = vld [vmem:[#allocation4 + $0x6a] sm:$0xff] }
 0x5ab   : > { %5754 = vst.msk [vmem:[#allocation4 + $0x129] sm:$0xff] %vm5674_vm4, %v5665_v13  ;;  %v5320_v9 = vadd.f32 %v5272_v11, %v5042_v4  ;;  %v15663_v4 = vld [vmem:[#allocation4 + $0xf8] sm:$0xff]  ;;  %v18870_v13 = vld [vmem:[#allocation35_spill] sm:$0xff] }
 0x5ac   : > { %12302 = vmatmul.msk.f32.gmra.mxu0 %vm5674_vm4, %v15650_v26  ;;  %12282 = vmatmul.msk.f32.gmra.mxu3 %vm5674_vm4, %v15663_v4 }
 0x5ad   : > { %v5598_v32 = vadd.f32 %v5550_v6, %v5320_v9  ;;  %v4209_v9 = vadd.f32 %v18870_v13, %v18869_v17  ;;  %v5043_v6 = vadd.f32 %v15381_v57, %v4764_v36  ;;  %v5958_v57 = vpop.f32.mrf.mxu2  ;;  %v6167_v51 = vpop.f32.mrf.mxu3  ;;  %v15689_v13 = vld [vmem:[#allocation4 + $0x109] sm:$0xff] }
 0x5ae   : > { %18872 = vst [vmem:[#allocation56_spill] sm:$0xff] %v15689_v13 }
 0x5af   : > { %v5634_v11 = vadd.f32 %v15075_v1, %v5598_v32  ;;  %v5553_v38 = vpop.f32.mrf.mxu1  ;;  %v18871_v32 = vld [vmem:[#allocation37_spill] sm:$0xff] }
 0x5b0   : > { %v4487_v35 = vadd.f32 %v18871_v32, %v4209_v9  ;;  %v15691_v9 = vld [vmem:[#allocation4 + $0x108] sm:$0xff]  ;;  %12251 = vmatmul.msk.f32.gmra.mxu2 %vm5674_vm4, %v15689_v13 }
 0x5b1   : > { %v5666_v27 = vmax.f32 %v5634_v11, 0.0  ;;  %v15681_v11 = vadd.f32 %v6167_v51, %v5958_v57  ;;  %v18875_v57 = vld [vmem:[#allocation40_spill] sm:$0xff] }
 0x5b2   : > { %v5275_v39 = vpop.f32.mrf.mxu0  ;;  %12336 = vmatmul.msk.f32.gmra.mxu1 %vm5674_vm4, %v15448_v7  ;;  %v4765_v36 = vadd.f32 %v15395_v10, %v4487_v35 }
 0x5b3   : > { %5755 = vst.msk [vmem:[#allocation4 + $0x139] sm:$0xff] %vm5674_vm4, %v5666_v27  ;;  %v5321_v1 = vadd.f32 %v5275_v39, %v5043_v6  ;;  %v15686_v39 = vld [vmem:[%s18537_s5] ss:$0 sm:$0xff]  ;;  %v18873_v6 = vld [vmem:[#allocation16_spill] sm:$0xff]  ;;  %v18874_v27 = vld [vmem:[#allocation38_spill] sm:$0xff] }
 0x5b4   : > { %12303 = vmatmul.msk.f32.gmra.mxu0 %vm5674_vm4, %v15673_v41  ;;  %v4210_v7 = vadd.f32 %v18874_v27, %v18873_v6  ;;  %12283 = vmatmul.msk.f32.gmra.mxu3 %vm5674_vm4, %v15691_v9 }
 0x5b5   : > { %v5599_v54 = vadd.f32 %v5553_v38, %v5321_v1  ;;  %v5044_v1 = vadd.f32 %v15397_v42, %v4765_v36  ;;  %v5961_v42 = vpop.f32.mrf.mxu2  ;;  %v6170_v36 = vpop.f32.mrf.mxu3 }
 0x5b6   : > { %v4488_v51 = vadd.f32 %v18875_v57, %v4210_v7  ;;  %v15709_v6 = vadd.f32 %v6170_v36, %v5961_v42  ;;  %v18877_v7 = vld [vmem:[#allocation19_spill] sm:$0xff] }
 0x5b7   : > { %v5635_v17 = vadd.f32 %v15686_v39, %v5599_v54  ;;  %v5556_v35 = vpop.f32.mrf.mxu1  ;;  %v15701_v54 = vld [vmem:[#allocation4 + $0x7a] sm:$0xff] }
 0x5b9   : > { %v5667_v38 = vmax.f32 %v5635_v17, 0.0  ;;  %v4766_v17 = vadd.f32 %v15418_v60, %v4488_v51  ;;  %v18879_v51 = vld [vmem:[#allocation41_spill] sm:$0xff] }
 0x5ba   : > { %v5278_v10 = vpop.f32.mrf.mxu0  ;;  %12337 = vmatmul.msk.f32.gmra.mxu1 %vm5674_vm4, %v15463_v28 }
 0x5bb   : > { %5756 = vst.msk [vmem:[#allocation4 + $0x141] sm:$0xff] %vm5674_vm4, %v5667_v38  ;;  %v5322_v32 = vadd.f32 %v5278_v10, %v5044_v1  ;;  %v15712_v1 = vld [vmem:[#allocation4 + $0x111] sm:$0xff] }
 0x5bc   : > { %12304 = vmatmul.msk.f32.gmra.mxu0 %vm5674_vm4, %v15701_v54  ;;  %18876 = vst [vmem:[#allocation57_spill] sm:$0xff] %v15712_v1  ;;  %v15714_v38 = vld [vmem:[#allocation4 + $0x110] sm:$0xff]  ;;  %12252 = vmatmul.msk.f32.gmra.mxu2 %vm5674_vm4, %v15712_v1 }
 0x5bd   : > { %v5600_v20 = vadd.f32 %v5556_v35, %v5322_v32  ;;  %v18878_v10 = vld [vmem:[#allocation39_spill] sm:$0xff]  ;;  %v5045_v35 = vadd.f32 %v15420_v16, %v4766_v17  ;;  %12284 = vmatmul.msk.f32.gmra.mxu3 %vm5674_vm4, %v15714_v38  ;;  %v5964_v16 = vpop.f32.mrf.mxu2  ;;  %v6173_v17 = vpop.f32.mrf.mxu3 }
 0x5be   : > { %v4211_v32 = vadd.f32 %v18878_v10, %v18877_v7  ;;  %v15732_v7 = vadd.f32 %v6173_v17, %v5964_v16  ;;  %v15735_v10 = vld [vmem:[#allocation4 + $0x121] sm:$0xff] }
 0x5bf   : > { %v5636_v27 = vadd.f32 %v15686_v39, %v5600_v20  ;;  %v5559_v28 = vpop.f32.mrf.mxu1  ;;  %v15724_v20 = vld [vmem:[#allocation4 + $0x82] sm:$0xff]  ;;  %18880 = vst [vmem:[#allocation59_spill] sm:$0xff] %v15735_v10 }
 0x5c0   : > { %v4489_v42 = vadd.f32 %v18879_v51, %v4211_v32  ;;  %v18881_v32 = vld [vmem:[#allocation21_spill] sm:$0xff] }
 0x5c1   : > { %v5668_v57 = vmax.f32 %v5636_v27, 0.0 }
 0x5c2   : > { %v5281_v13 = vpop.f32.mrf.mxu0  ;;  %12338 = vmatmul.msk.f32.gmra.mxu1 %vm5674_vm4, %v15486_v23  ;;  %v4767_v27 = vadd.f32 %v15441_v33, %v4489_v42  ;;  %v15747_v42 = vld [vmem:[#allocation4 + $0x92] sm:$0xff] }
 0x5c3   : > { %5757 = vst.msk [vmem:[#allocation4 + $0x151] sm:$0xff] %vm5674_vm4, %v5668_v57  ;;  %v5323_v60 = vadd.f32 %v5281_v13, %v5045_v35  ;;  %v15737_v35 = vld [vmem:[#allocation4 + $0x120] sm:$0xff]  ;;  %v18882_v57 = vld [vmem:[#allocation42_spill] sm:$0xff] }
 0x5c4   : > { %12305 = vmatmul.msk.f32.gmra.mxu0 %vm5674_vm4, %v15724_v20  ;;  %12253 = vmatmul.msk.f32.gmra.mxu2 %vm5674_vm4, %v15735_v10 }
 0x5c5   : > { %v5601_v36 = vadd.f32 %v5559_v28, %v5323_v60  ;;  %v4212_v60 = vadd.f32 %v18882_v57, %v18881_v32  ;;  %v5046_v28 = vadd.f32 %v15443_v61, %v4767_v27  ;;  %12285 = vmatmul.msk.f32.gmra.mxu3 %vm5674_vm4, %v15737_v35  ;;  %v5967_v61 = vpop.f32.mrf.mxu2  ;;  %v6176_v27 = vpop.f32.mrf.mxu3  ;;  %v15758_v57 = vld [vmem:[#allocation4 + $0x129] sm:$0xff] }
 0x5c6   : > { %v15755_v32 = vadd.f32 %v6176_v27, %v5967_v61  ;;  %18884 = vst [vmem:[#allocation58_spill] sm:$0xff] %v15758_v57 }
 0x5c7   : > { %v5637_v13 = vadd.f32 %v15686_v39, %v5601_v36  ;;  %v5562_v23 = vpop.f32.mrf.mxu1  ;;  %v18883_v36 = vld [vmem:[#allocation44_spill] sm:$0xff] }
 0x5c8   : > { %v4490_v16 = vadd.f32 %v18883_v36, %v4212_v60  ;;  %v18885_v60 = vld [vmem:[#allocation24_spill] sm:$0xff] }
 0x5c9   : > { %v5669_v51 = vmax.f32 %v5637_v13, 0.0 }
 0x5ca   : > { %v5284_v1 = vpop.f32.mrf.mxu0  ;;  %12339 = vmatmul.msk.f32.gmra.mxu1 %vm5674_vm4, %v15506_v29  ;;  %v4768_v13 = vadd.f32 %v15466_v25, %v4490_v16  ;;  %v15770_v16 = vld [vmem:[#allocation4 + $0x9a] sm:$0xff] }
 0x5cb   : > { %5758 = vst.msk [vmem:[#allocation4 + $0x159] sm:$0xff] %vm5674_vm4, %v5669_v51  ;;  %v5324_v33 = vadd.f32 %v5284_v1, %v5046_v28  ;;  %v15760_v28 = vld [vmem:[#allocation4 + $0x128] sm:$0xff]  ;;  %v18886_v51 = vld [vmem:[#allocation43_spill] sm:$0xff] }
 0x5cc   : > { %12306 = vmatmul.msk.f32.gmra.mxu0 %vm5674_vm4, %v15747_v42  ;;  %12254 = vmatmul.msk.f32.gmra.mxu2 %vm5674_vm4, %v15758_v57 }
 0x5cd   : > { %v5602_v17 = vadd.f32 %v5562_v23, %v5324_v33  ;;  %v4213_v33 = vadd.f32 %v18886_v51, %v18885_v60  ;;  %v5047_v23 = vadd.f32 %v15468_v45, %v4768_v13  ;;  %12286 = vmatmul.msk.f32.gmra.mxu3 %vm5674_vm4, %v15760_v28  ;;  %v5970_v45 = vpop.f32.mrf.mxu2  ;;  %v6179_v13 = vpop.f32.mrf.mxu3  ;;  %v15781_v51 = vld [vmem:[#allocation4 + $0x139] sm:$0xff] }
 0x5ce   : > { %v15778_v60 = vadd.f32 %v6179_v13, %v5970_v45  ;;  %18888 = vst [vmem:[#allocation60_spill] sm:$0xff] %v15781_v51 }
 0x5cf   : > { %v5638_v1 = vadd.f32 %v15686_v39, %v5602_v17  ;;  %v5565_v29 = vpop.f32.mrf.mxu1  ;;  %v18887_v17 = vld [vmem:[#allocation45_spill] sm:$0xff] }
 0x5d0   : > { %v4491_v61 = vadd.f32 %v18887_v17, %v4213_v33  ;;  %v18889_v33 = vld [vmem:[#allocation26_spill] sm:$0xff] }
 0x5d1   : > { %v5670_v36 = vmax.f32 %v5638_v1, 0.0 }
 0x5d2   : > { %v5287_v10 = vpop.f32.mrf.mxu0  ;;  %12340 = vmatmul.msk.f32.gmra.mxu1 %vm5674_vm4, %v15529_v62  ;;  %v4769_v1 = vadd.f32 %v15496_v46, %v4491_v61  ;;  %v15793_v61 = vld [vmem:[#allocation4 + $0xaa] sm:$0xff] }
 0x5d3   : > { %5759 = vst.msk [vmem:[#allocation4 + $0x169] sm:$0xff] %vm5674_vm4, %v5670_v36  ;;  %v5325_v25 = vadd.f32 %v5287_v10, %v5047_v23  ;;  %v15783_v23 = vld [vmem:[#allocation4 + $0x138] sm:$0xff]  ;;  %v18890_v36 = vld [vmem:[#allocation46_spill] sm:$0xff] }
 0x5d4   : > { %12307 = vmatmul.msk.f32.gmra.mxu0 %vm5674_vm4, %v15770_v16  ;;  %12255 = vmatmul.msk.f32.gmra.mxu2 %vm5674_vm4, %v15781_v51  ;;  %v15885_v51 = vld [vmem:[#allocation4 + $0xda] sm:$0xff] }
 0x5d5   : > { %v5603_v27 = vadd.f32 %v5565_v29, %v5325_v25  ;;  %v4214_v25 = vadd.f32 %v18890_v36, %v18889_v33  ;;  %v5048_v29 = vadd.f32 %v15489_v0, %v4769_v1  ;;  %12287 = vmatmul.msk.f32.gmra.mxu3 %vm5674_vm4, %v15783_v23  ;;  %v5973_v0 = vpop.f32.mrf.mxu2  ;;  %v6182_v1 = vpop.f32.mrf.mxu3  ;;  %v15804_v36 = vld [vmem:[#allocation4 + $0x141] sm:$0xff] }
 0x5d6   : > { %v15801_v33 = vadd.f32 %v6182_v1, %v5973_v0  ;;  %18892 = vst [vmem:[#allocation61_spill] sm:$0xff] %v15804_v36  ;;  %v15823_v1 = vld [vmem:[#allocation4 + $0x151] sm:$0xff] }
 0x5d7   : > { %v5639_v10 = vadd.f32 %v15686_v39, %v5603_v27  ;;  %v5568_v62 = vpop.f32.mrf.mxu1  ;;  %v18891_v27 = vld [vmem:[#allocation48_spill] sm:$0xff]  ;;  %18893 = vst [vmem:[#allocation63_spill] sm:$0xff] %v15823_v1 }
 0x5d8   : > { %v4492_v45 = vadd.f32 %v18891_v27, %v4214_v25 }
 0x5d9   : > { %v5671_v17 = vmax.f32 %v5639_v10, 0.0 }
 0x5da   : > { %v5290_v57 = vpop.f32.mrf.mxu0  ;;  %12341 = vmatmul.msk.f32.gmra.mxu1 %vm5674_vm4, %v15552_v30  ;;  %v4770_v10 = vadd.f32 %v15522_v24, %v4492_v45 }
 0x5db   : > { %5760 = vst.msk [vmem:[#allocation4 + $0x171] sm:$0xff] %vm5674_vm4, %v5671_v17  ;;  %v5326_v46 = vadd.f32 %v5290_v57, %v5048_v29  ;;  %v15806_v29 = vld [vmem:[#allocation4 + $0x140] sm:$0xff] }
 0x5dc   : > { %12308 = vmatmul.msk.f32.gmra.mxu0 %vm5674_vm4, %v15793_v61  ;;  %v5049_v25 = vadd.f32 %v15516_v58, %v4770_v10  ;;  %12256 = vmatmul.msk.f32.gmra.mxu2 %vm5674_vm4, %v15804_v36  ;;  %v15825_v10 = vld [vmem:[#allocation4 + $0x150] sm:$0xff] }
 0x5dd   : > { %v5604_v13 = vadd.f32 %v5568_v62, %v5326_v46  ;;  %12288 = vmatmul.msk.f32.gmra.mxu3 %vm5674_vm4, %v15806_v29  ;;  %v15814_v62 = vld [vmem:[#allocation4 + $0xb2] sm:$0xff]  ;;  %v5976_v58 = vpop.f32.mrf.mxu2  ;;  %v6185_v45 = vpop.f32.mrf.mxu3 }
 0x5df   : > { %v5640_v57 = vadd.f32 %v15686_v39, %v5604_v13  ;;  %v5571_v30 = vpop.f32.mrf.mxu1  ;;  %v15820_v13 = vadd.f32 %v6185_v45, %v5976_v58  ;;  %v12458_v58 = vld [vmem:[%s18538_s6 + $0x38] sm:$0xff] }
 0x5e0   : > { %v15853_v45 = vld [vmem:[#allocation4 + $0x159] sm:$0xff]  ;;  %7769 = vmatpush.msra.mxu1 %v12458_v58  ;;  %v15873_v58 = vld [vmem:[#allocation4 + $0x169] sm:$0xff] }
 0x5e1   : > { %v5672_v17 = vmax.f32 %v5640_v57, 0.0  ;;  %18894 = vst [vmem:[#allocation62_spill] sm:$0xff] %v15853_v45 }
 0x5e2   : > { %v5293_v46 = vpop.f32.mrf.mxu0  ;;  %12342 = vmatmul.msk.f32.gmra.mxu1 %vm5674_vm4, %v15573_v50  ;;  %18897 = vst [vmem:[#allocation12_spill] sm:$0xff] %v15873_v58 }
 0x5e3   : > { %5761 = vst.msk [vmem:[#allocation4 + $0x181] sm:$0xff] %vm5674_vm4, %v5672_v17  ;;  %v5327_v24 = vadd.f32 %v5293_v46, %v5049_v25  ;;  %v12425_v17 = vld [vmem:[%s18538_s6 + $0x30] sm:$0xff]  ;;  %v15842_v46 = vld [vmem:[#allocation4 + $0xc2] sm:$0xff] }
 0x5e4   : > { %12309 = vmatmul.msk.f32.gmra.mxu0 %vm5674_vm4, %v15814_v62  ;;  %12257 = vmatmul.msk.f32.gmra.mxu2 %vm5674_vm4, %v15823_v1 }
 0x5e5   : > { %v5605_v27 = vadd.f32 %v5571_v30, %v5327_v24  ;;  %12289 = vmatmul.msk.f32.gmra.mxu3 %vm5674_vm4, %v15825_v10  ;;  %7494 = vmatpush.msra.mxu0 %v12425_v17  ;;  %v5979_v24 = vpop.f32.mrf.mxu2  ;;  %v6188_v30 = vpop.f32.mrf.mxu3 }
 0x5e7   : > { %v5641_v0 = vadd.f32 %v15686_v39, %v5605_v27  ;;  %v15834_v50 = vpop.f32.mrf.mxu1  ;;  %v12491_v39 = vld [vmem:[%s18538_s6 + $0x40] sm:$0xff]  ;;  %v15848_v27 = vadd.f32 %v6188_v30, %v5979_v24 }
 0x5e8   : > { %8044 = vmatpush.msra.mxu2 %v12491_v39  ;;  %v15865_v39 = vld [vmem:[#allocation4 + $0xca] sm:$0xff] }
 0x5e9   : > { %v5673_v57 = vmax.f32 %v5641_v0, 0.0  ;;  %v15855_v0 = vld [vmem:[#allocation4 + $0x158] sm:$0xff] }
 0x5ea   : > { %v15827_v25 = vpop.f32.mrf.mxu0  ;;  %12343 = vmatmul.msk.f32.gmra.mxu1 %vm5674_vm4, %v15594_v12 }
 0x5eb   : > { %5762 = vst.msk [vmem:[#allocation4 + $0x189] sm:$0xff] %vm5674_vm4, %v5673_v57 }
 0x5ec   : > { %12310 = vmatmul.msk.f32.gmra.mxu0 %vm5674_vm4, %v15842_v46  ;;  %12258 = vmatmul.msk.f32.gmra.mxu2 %vm5674_vm4, %v15853_v45  ;;  %v15875_v45 = vld [vmem:[#allocation4 + $0x168] sm:$0xff] }
 0x5ed   : > { %12290 = vmatmul.msk.f32.gmra.mxu3 %vm5674_vm4, %v15855_v0  ;;  %v5982_v17 = vpop.f32.mrf.mxu2  ;;  %v6191_v24 = vpop.f32.mrf.mxu3 }
 0x5ee   : > { %v15871_v30 = vadd.f32 %v6191_v24, %v5982_v17 }
 0x5ef   : > { %v15863_v12 = vpop.f32.mrf.mxu1 }
 0x5f0   : > { %18896 = vst [vmem:[#allocation64_spill] sm:$0xff] %v15863_v12  ;;  %v15905_v12 = vld [vmem:[#allocation4 + $0xe2] sm:$0xff] }
 0x5f1   : > { %18903 = vst [vmem:[#allocation10_spill] sm:$0xff] %v15905_v12 }
 0x5f2   : > { %v15857_v57 = vpop.f32.mrf.mxu0  ;;  %12344 = vmatmul.msk.f32.gmra.mxu1 %vm5674_vm4, %v15617_v31 }
 0x5f3   : > { %18895 = vst [vmem:[#allocation65_spill] sm:$0xff] %v15857_v57  ;;  %v15917_v57 = vld [vmem:[#allocation4 + $0xf2] sm:$0xff] }
 0x5f4   : > { %12311 = vmatmul.msk.f32.gmra.mxu0 %vm5674_vm4, %v15865_v39  ;;  %12259 = vmatmul.msk.f32.gmra.mxu2 %vm5674_vm4, %v15873_v58  ;;  %v15895_v58 = vld [vmem:[#allocation4 + $0x170] sm:$0xff] }
 0x5f5   : > { %12291 = vmatmul.msk.f32.gmra.mxu3 %vm5674_vm4, %v15875_v45  ;;  %v5985_v31 = vpop.f32.mrf.mxu2  ;;  %v6194_v17 = vpop.f32.mrf.mxu3 }
 0x5f6   : > { %v15891_v24 = vadd.f32 %v6194_v17, %v5985_v31 }
 0x5f7   : > { %v15883_v36 = vpop.f32.mrf.mxu1 }
 0x5f8   : > { %18899 = vst [vmem:[#allocation7_spill] sm:$0xff] %v15883_v36 }
 0x5fa   : > { %v15877_v1 = vpop.f32.mrf.mxu0  ;;  %12345 = vmatmul.msk.f32.gmra.mxu1 %vm5674_vm4, %v15640_v5 }
 0x5fb   : > { %18898 = vst [vmem:[#allocation13_spill] sm:$0xff] %v15877_v1  ;;  %v15893_v1 = vld [vmem:[#allocation4 + $0x171] sm:$0xff] }
 0x5fc   : > { %12312 = vmatmul.msk.f32.gmra.mxu0 %vm5674_vm4, %v15885_v51  ;;  %18900 = vst [vmem:[#allocation8_spill] sm:$0xff] %v15893_v1  ;;  %12260 = vmatmul.msk.f32.gmra.mxu2 %vm5674_vm4, %v15893_v1 }
 0x5fd   : > { %12292 = vmatmul.msk.f32.gmra.mxu3 %vm5674_vm4, %v15895_v58  ;;  %v5988_v5 = vpop.f32.mrf.mxu2  ;;  %v6197_v31 = vpop.f32.mrf.mxu3 }
 0x5fe   : > { %v15911_v17 = vadd.f32 %v6197_v31, %v5988_v5 }
 0x5ff   : > { %v15903_v36 = vpop.f32.mrf.mxu1 }
 0x600   : > { %18902 = vst [vmem:[#allocation17_spill] sm:$0xff] %v15903_v36 }
 0x602   : > { %v15897_v22 = vpop.f32.mrf.mxu0  ;;  %12346 = vmatmul.msk.f32.gmra.mxu1 %vm5674_vm4, %v15663_v4 }
 0x603   : > { %18901 = vst [vmem:[#allocation14_spill] sm:$0xff] %v15897_v22 }
 0x604   : > { %12313 = vmatmul.msk.f32.gmra.mxu0 %vm5674_vm4, %v15905_v12  ;;  %12360 = vmatmul.msk.f32.vlgmr.msrb.gmra.mxu2 %vm5674_vm4, %v12842_v8 }
 0x605   : > { %12393 = vmatmul.msk.f32.vlgmr.msrb.gmra.mxu3 %vm5674_vm4, %v15514_v43  ;;  %v5991_v4 = vpop.f32.mrf.mxu2  ;;  %v6200_v5 = vpop.f32.mrf.mxu3 }
 0x606   : > { %v15925_v31 = vadd.f32 %v6200_v5, %v5991_v4  ;;  %v12844_v5 = vld [vmem:[#allocation4 + $0x31] sm:$0xff] }
 0x607   : > { %v6682_v36 = vpop.f32.mrf.mxu1 }
 0x60a   : > { %v6407_v22 = vpop.f32.mrf.mxu0  ;;  %12347 = vmatmul.msk.f32.gmra.mxu1 %vm5674_vm4, %v15691_v9 }
 0x60b   : > { %v6495_v1 = vadd.f32 %v6407_v22, %v15658_v63  ;;  %v15931_v63 = vld [vmem:[#allocation4 + $0xfa] sm:$0xff] }
 0x60c   : > { %12314 = vmatmul.msk.f32.gmra.mxu0 %vm5674_vm4, %v15917_v57  ;;  %12361 = vmatmul.msk.f32.gmra.mxu2 %vm5674_vm4, %v12843_v53 }
 0x60d   : > { %v15919_v12 = vadd.f32 %v6682_v36, %v6495_v1  ;;  %12394 = vmatmul.msk.f32.gmra.mxu3 %vm5674_vm4, %v15537_v55  ;;  %v5994_v9 = vpop.f32.mrf.mxu2  ;;  %v6203_v1 = vpop.f32.mrf.mxu3 }
 0x60e   : > { %v15939_v4 = vadd.f32 %v6203_v1, %v5994_v9 }
 0x60f   : > { %v6685_v22 = vpop.f32.mrf.mxu1 }
 0x612   : > { %v6410_v8 = vpop.f32.mrf.mxu0  ;;  %12348 = vmatmul.msk.f32.gmra.mxu1 %vm5674_vm4, %v15714_v38 }
 0x613   : > { %v6496_v43 = vadd.f32 %v6410_v8, %v15681_v11  ;;  %v15945_v8 = vld [vmem:[#allocation4 + $0x10a] sm:$0xff] }
 0x614   : > { %12315 = vmatmul.msk.f32.gmra.mxu0 %vm5674_vm4, %v15931_v63  ;;  %12362 = vmatmul.msk.f32.gmra.mxu2 %vm5674_vm4, %v12844_v5  ;;  %v12845_v5 = vld [vmem:[#allocation4 + $0x39] sm:$0xff] }
 0x615   : > { %v15933_v36 = vadd.f32 %v6685_v22, %v6496_v43  ;;  %12395 = vmatmul.msk.f32.gmra.mxu3 %vm5674_vm4, %v15560_v48  ;;  %v5997_v38 = vpop.f32.mrf.mxu2  ;;  %v6206_v22 = vpop.f32.mrf.mxu3 }
 0x616   : > { %v15953_v9 = vadd.f32 %v6206_v22, %v5997_v38 }
 0x617   : > { %v6688_v11 = vpop.f32.mrf.mxu1 }
 0x61a   : > { %v6413_v53 = vpop.f32.mrf.mxu0  ;;  %12349 = vmatmul.msk.f32.gmra.mxu1 %vm5674_vm4, %v15737_v35 }
 0x61b   : > { %v6497_v55 = vadd.f32 %v6413_v53, %v15709_v6  ;;  %v15959_v53 = vld [vmem:[#allocation4 + $0x112] sm:$0xff] }
 0x61c   : > { %12316 = vmatmul.msk.f32.gmra.mxu0 %vm5674_vm4, %v15945_v8  ;;  %12363 = vmatmul.msk.f32.gmra.mxu2 %vm5674_vm4, %v12845_v5  ;;  %v12846_v5 = vld [vmem:[#allocation4 + $0x49] sm:$0xff] }
 0x61d   : > { %v15947_v43 = vadd.f32 %v6688_v11, %v6497_v55  ;;  %12396 = vmatmul.msk.f32.gmra.mxu3 %vm5674_vm4, %v15583_v21  ;;  %v6000_v35 = vpop.f32.mrf.mxu2  ;;  %v6209_v11 = vpop.f32.mrf.mxu3 }
 0x61e   : > { %v15967_v38 = vadd.f32 %v6209_v11, %v6000_v35 }
 0x61f   : > { %v6691_v6 = vpop.f32.mrf.mxu1 }
 0x622   : > { %v6416_v1 = vpop.f32.mrf.mxu0  ;;  %12350 = vmatmul.msk.f32.gmra.mxu1 %vm5674_vm4, %v15760_v28 }
 0x623   : > { %v6498_v48 = vadd.f32 %v6416_v1, %v15732_v7  ;;  %v15973_v1 = vld [vmem:[#allocation4 + $0x122] sm:$0xff] }
 0x624   : > { %12317 = vmatmul.msk.f32.gmra.mxu0 %vm5674_vm4, %v15959_v53  ;;  %12364 = vmatmul.msk.f32.gmra.mxu2 %vm5674_vm4, %v12846_v5  ;;  %v12847_v5 = vld [vmem:[#allocation4 + $0x51] sm:$0xff] }
 0x625   : > { %v15961_v55 = vadd.f32 %v6691_v6, %v6498_v48  ;;  %12397 = vmatmul.msk.f32.gmra.mxu3 %vm5674_vm4, %v15606_v44  ;;  %v6003_v28 = vpop.f32.mrf.mxu2  ;;  %v6212_v6 = vpop.f32.mrf.mxu3 }
 0x626   : > { %v15981_v35 = vadd.f32 %v6212_v6, %v6003_v28 }
 0x627   : > { %v6694_v7 = vpop.f32.mrf.mxu1 }
 0x62a   : > { %v6419_v22 = vpop.f32.mrf.mxu0  ;;  %12351 = vmatmul.msk.f32.gmra.mxu1 %vm5674_vm4, %v15783_v23 }
 0x62b   : > { %v6499_v21 = vadd.f32 %v6419_v22, %v15755_v32  ;;  %v15987_v22 = vld [vmem:[#allocation4 + $0x12a] sm:$0xff] }
 0x62c   : > { %12318 = vmatmul.msk.f32.gmra.mxu0 %vm5674_vm4, %v15973_v1  ;;  %12365 = vmatmul.msk.f32.gmra.mxu2 %vm5674_vm4, %v12847_v5  ;;  %v12848_v5 = vld [vmem:[#allocation4 + $0x61] sm:$0xff] }
 0x62d   : > { %v15975_v48 = vadd.f32 %v6694_v7, %v6499_v21  ;;  %12398 = vmatmul.msk.f32.gmra.mxu3 %vm5674_vm4, %v15629_v18  ;;  %v6006_v23 = vpop.f32.mrf.mxu2 }
 0x62f   : > { %v6697_v32 = vpop.f32.mrf.mxu1  ;;  %v6215_v7 = vpop.f32.mrf.mxu3 }
 0x630   : > { %v15995_v28 = vadd.f32 %v6215_v7, %v6006_v23 }
 0x632   : > { %v6422_v11 = vpop.f32.mrf.mxu0  ;;  %12352 = vmatmul.msk.f32.gmra.mxu1 %vm5674_vm4, %v15806_v29 }
 0x633   : > { %v6500_v44 = vadd.f32 %v6422_v11, %v15778_v60  ;;  %v16001_v11 = vld [vmem:[#allocation4 + $0x13a] sm:$0xff] }
 0x634   : > { %12319 = vmatmul.msk.f32.gmra.mxu0 %vm5674_vm4, %v15987_v22  ;;  %12366 = vmatmul.msk.f32.gmra.mxu2 %vm5674_vm4, %v12848_v5 }
 0x635   : > { %v15989_v21 = vadd.f32 %v6697_v32, %v6500_v44  ;;  %12399 = vmatmul.msk.f32.gmra.mxu3 %vm5674_vm4, %v15650_v26  ;;  %v6009_v29 = vpop.f32.mrf.mxu2 }
 0x637   : > { %v6700_v60 = vpop.f32.mrf.mxu1  ;;  %v6218_v32 = vpop.f32.mrf.mxu3 }
 0x638   : > { %v16009_v23 = vadd.f32 %v6218_v32, %v6009_v29  ;;  %v16031_v29 = vld [vmem:[#allocation4 + $0x152] sm:$0xff] }
 0x63a   : > { %v6425_v6 = vpop.f32.mrf.mxu0  ;;  %12353 = vmatmul.msk.f32.gmra.mxu1 %vm5674_vm4, %v15825_v10 }
 0x63b   : > { %v6501_v18 = vadd.f32 %v6425_v6, %v15801_v33  ;;  %v16016_v6 = vld [vmem:[#allocation4 + $0x142] sm:$0xff] }
 0x63c   : > { %12320 = vmatmul.msk.f32.gmra.mxu0 %vm5674_vm4, %v16001_v11  ;;  %12367 = vmatmul.msk.f32.gmra.mxu2 %vm5674_vm4, %v15408_v37 }
 0x63d   : > { %v16003_v44 = vadd.f32 %v6700_v60, %v6501_v18  ;;  %12400 = vmatmul.msk.f32.gmra.mxu3 %vm5674_vm4, %v15673_v41 }
 0x63f   : > { %v6703_v33 = vpop.f32.mrf.mxu1  ;;  %v6012_v10 = vpop.f32.mrf.mxu2 }
 0x640   : > { %v6221_v18 = vpop.f32.mrf.mxu3 }
 0x641   : > { %v16024_v60 = vadd.f32 %v6221_v18, %v6012_v10 }
 0x642   : > { %v6428_v7 = vpop.f32.mrf.mxu0  ;;  %12354 = vmatmul.msk.f32.gmra.mxu1 %vm5674_vm4, %v15855_v0 }
 0x643   : > { %v6502_v26 = vadd.f32 %v6428_v7, %v15820_v13 }
 0x644   : > { %12321 = vmatmul.msk.f32.gmra.mxu0 %vm5674_vm4, %v16016_v6  ;;  %12368 = vmatmul.msk.f32.gmra.mxu2 %vm5674_vm4, %v15427_v47 }
 0x645   : > { %v16018_v5 = vadd.f32 %v6703_v33, %v6502_v26  ;;  %12401 = vmatmul.msk.f32.gmra.mxu3 %vm5674_vm4, %v15701_v54  ;;  %v16046_v33 = vld [vmem:[#allocation4 + $0x15a] sm:$0xff] }
 0x647   : > { %v6706_v13 = vpop.f32.mrf.mxu1  ;;  %v6015_v0 = vpop.f32.mrf.mxu2 }
 0x648   : > { %v6224_v7 = vpop.f32.mrf.mxu3 }
 0x649   : > { %v16039_v26 = vadd.f32 %v6224_v7, %v6015_v0 }
 0x64a   : > { %v6431_v37 = vpop.f32.mrf.mxu0  ;;  %12355 = vmatmul.msk.f32.gmra.mxu1 %vm5674_vm4, %v15875_v45 }
 0x64b   : > { %v6503_v41 = vadd.f32 %v6431_v37, %v15848_v27 }
 0x64c   : > { %12322 = vmatmul.msk.f32.gmra.mxu0 %vm5674_vm4, %v16031_v29  ;;  %12369 = vmatmul.msk.f32.gmra.mxu2 %vm5674_vm4, %v15446_v3 }
 0x64d   : > { %v16033_v32 = vadd.f32 %v6706_v13, %v6503_v41  ;;  %12402 = vmatmul.msk.f32.gmra.mxu3 %vm5674_vm4, %v15724_v20  ;;  %v16061_v41 = vld [vmem:[#allocation4 + $0x16a] sm:$0xff]  ;;  %v16063_v13 = vld [vmem:[#allocation4 + $0x180] sm:$0xff] }
 0x64f   : > { %v6709_v27 = vpop.f32.mrf.mxu1  ;;  %v6018_v45 = vpop.f32.mrf.mxu2 }
 0x650   : > { %v6227_v18 = vpop.f32.mrf.mxu3 }
 0x651   : > { %v16054_v37 = vadd.f32 %v6227_v18, %v6018_v45 }
 0x652   : > { %v6434_v47 = vpop.f32.mrf.mxu0  ;;  %12356 = vmatmul.msk.f32.gmra.mxu1 %vm5674_vm4, %v15895_v58 }
 0x653   : > { %v6504_v54 = vadd.f32 %v6434_v47, %v15871_v30 }
 0x654   : > { %12323 = vmatmul.msk.f32.gmra.mxu0 %vm5674_vm4, %v16046_v33  ;;  %12370 = vmatmul.msk.f32.gmra.mxu2 %vm5674_vm4, %v15461_v14 }
 0x655   : > { %v16048_v10 = vadd.f32 %v6709_v27, %v6504_v54  ;;  %12403 = vmatmul.msk.f32.gmra.mxu3 %vm5674_vm4, %v15747_v42  ;;  %v16078_v54 = vld [vmem:[#allocation4 + $0x172] sm:$0xff]  ;;  %v16080_v27 = vld [vmem:[#allocation4 + $0x188] sm:$0xff] }
 0x657   : > { %v6712_v30 = vpop.f32.mrf.mxu1  ;;  %v6021_v58 = vpop.f32.mrf.mxu2 }
 0x658   : > { %v6230_v14 = vpop.f32.mrf.mxu3 }
 0x659   : > { %v16071_v7 = vadd.f32 %v6230_v14, %v6021_v58  ;;  %v7349_v58 = vld [vmem:[#allocation4 + $0x30] sm:$0xff] }
 0x65a   : > { %v6437_v3 = vpop.f32.mrf.mxu0  ;;  %12357 = vmatmul.msk.f32.gmra.mxu1 %vm5674_vm4, %v16063_v13  ;;  %v7624_v14 = vld [vmem:[#allocation4 + $0x31] sm:$0xff] }
 0x65b   : > { %v6505_v20 = vadd.f32 %v6437_v3, %v15891_v24 }
 0x65c   : > { %12324 = vmatmul.msk.f32.gmra.mxu0 %vm5674_vm4, %v16061_v41  ;;  %12371 = vmatmul.msk.f32.gmra.mxu2 %vm5674_vm4, %v15484_v56 }
 0x65d   : > { %v16065_v0 = vadd.f32 %v6712_v30, %v6505_v20  ;;  %12404 = vmatmul.msk.f32.gmra.mxu3 %vm5674_vm4, %v15770_v16  ;;  %v12524_v30 = vld [vmem:[%s18540_s8 + $0x8] sm:$0xff] }
 0x65e   : > { %8507 = vmatpush.msra.mxu3 %v12524_v30 }
 0x65f   : > { %v6715_v47 = vpop.f32.mrf.mxu1  ;;  %v6024_v18 = vpop.f32.mrf.mxu2 }
 0x660   : > { %v6233_v56 = vpop.f32.mrf.mxu3 }
 0x661   : > { %v16088_v3 = vadd.f32 %v6233_v56, %v6024_v18  ;;  %v7350_v56 = vld [vmem:[#allocation4 + $0x38] sm:$0xff] }
 0x662   : > { %v6440_v42 = vpop.f32.mrf.mxu0  ;;  %12358 = vmatmul.msk.f32.gmra.mxu1 %vm5674_vm4, %v16080_v27 }
 0x663   : > { %v6506_v24 = vadd.f32 %v6440_v42, %v15911_v17 }
 0x664   : > { %12325 = vmatmul.msk.f32.gmra.mxu0 %vm5674_vm4, %v16078_v54  ;;  %12372 = vmatmul.msk.f32.gmra.mxu2 %vm5674_vm4, %v15504_v59 }
 0x665   : > { %v16082_v45 = vadd.f32 %v6715_v47, %v6506_v24  ;;  %12405 = vmatmul.msk.f32.gmra.mxu3 %vm5674_vm4, %v15793_v61 }
 0x667   : > { %v6718_v20 = vpop.f32.mrf.mxu1  ;;  %v6027_v59 = vpop.f32.mrf.mxu2 }
 0x668   : > { %v6236_v24 = vpop.f32.mrf.mxu3 }
 0x669   : > { %v16102_v47 = vadd.f32 %v6236_v24, %v6027_v59  ;;  %v7626_v59 = vld [vmem:[#allocation4 + $0x49] sm:$0xff] }
 0x66a   : > { %v6443_v16 = vpop.f32.mrf.mxu0  ;;  %12459 = vmatmul.msk.f32.vlgmr.msra.gmra.mxu1 %vm5674_vm4, %v7624_v14 }
 0x66b   : > { %v6507_v17 = vadd.f32 %v6443_v16, %v15925_v31  ;;  %v7625_v16 = vld [vmem:[#allocation4 + $0x39] sm:$0xff] }
 0x66c   : > { %12426 = vmatmul.msk.f32.vlgmr.msra.gmra.mxu0 %vm5674_vm4, %v7349_v58  ;;  %12373 = vmatmul.msk.f32.gmra.mxu2 %vm5674_vm4, %v15527_v15 }
 0x66d   : > { %v16098_v42 = vadd.f32 %v6718_v20, %v6507_v17  ;;  %12406 = vmatmul.msk.f32.gmra.mxu3 %vm5674_vm4, %v15814_v62 }
 0x66f   : > { %v6721_v18 = vpop.f32.mrf.mxu1  ;;  %v6030_v20 = vpop.f32.mrf.mxu2 }
 0x670   : > { %v6239_v30 = vpop.f32.mrf.mxu3 }
 0x671   : > { %v16113_v58 = vadd.f32 %v6239_v30, %v6030_v20 }
 0x672   : > { %v6446_v61 = vpop.f32.mrf.mxu0  ;;  %12460 = vmatmul.msk.f32.gmra.mxu1 %vm5674_vm4, %v7625_v16  ;;  %v7627_v16 = vld [vmem:[#allocation4 + $0x51] sm:$0xff] }
 0x673   : > { %v6508_v31 = vadd.f32 %v6446_v61, %v15939_v4  ;;  %v7351_v4 = vld [vmem:[#allocation4 + $0x48] sm:$0xff] }
 0x674   : > { %12427 = vmatmul.msk.f32.gmra.mxu0 %vm5674_vm4, %v7350_v56  ;;  %12374 = vmatmul.msk.f32.gmra.mxu2 %vm5674_vm4, %v15550_v52 }
 0x675   : > { %v16109_v17 = vadd.f32 %v6721_v18, %v6508_v31  ;;  %12407 = vmatmul.msk.f32.gmra.mxu3 %vm5674_vm4, %v15842_v46 }
 0x677   : > { %v6724_v62 = vpop.f32.mrf.mxu1  ;;  %v6033_v61 = vpop.f32.mrf.mxu2 }
 0x678   : > { %v6242_v31 = vpop.f32.mrf.mxu3 }
 0x679   : > { %v16124_v18 = vadd.f32 %v6242_v31, %v6033_v61  ;;  %v7628_v61 = vld [vmem:[#allocation4 + $0x61] sm:$0xff] }
 0x67a   : > { %v6449_v14 = vpop.f32.mrf.mxu0  ;;  %12461 = vmatmul.msk.f32.gmra.mxu1 %vm5674_vm4, %v7626_v59  ;;  %v7353_v59 = vld [vmem:[#allocation4 + $0x60] sm:$0xff] }
 0x67b   : > { %v6509_v15 = vadd.f32 %v6449_v14, %v15953_v9  ;;  %v7352_v9 = vld [vmem:[#allocation4 + $0x50] sm:$0xff] }
 0x67c   : > { %12428 = vmatmul.msk.f32.gmra.mxu0 %vm5674_vm4, %v7351_v4  ;;  %12375 = vmatmul.msk.f32.gmra.mxu2 %vm5674_vm4, %v15571_v34 }
 0x67d   : > { %v16120_v24 = vadd.f32 %v6724_v62, %v6509_v15  ;;  %12408 = vmatmul.msk.f32.gmra.mxu3 %vm5674_vm4, %v15865_v39  ;;  %v6153_v15 = vadd.f32 %v15539_v49, %v15545_v19 }
 0x67f   : > { %v6727_v46 = vpop.f32.mrf.mxu1  ;;  %v6036_v30 = vpop.f32.mrf.mxu2  ;;  %v6491_v39 = vadd.f32 %v15827_v25, %v6153_v15  ;;  %v7354_v15 = vld [vmem:[#allocation4 + $0x68] sm:$0xff] }
 0x680   : > { %v6245_v14 = vpop.f32.mrf.mxu3 }
 0x681   : > { %v16137_v34 = vadd.f32 %v6245_v14, %v6036_v30  ;;  %v6766_v31 = vadd.f32 %v15834_v50, %v6491_v39  ;;  %v18907_v50 = vld [vmem:[#allocation10_spill] sm:$0xff] }
 0x682   : > { %v6452_v56 = vpop.f32.mrf.mxu0  ;;  %12462 = vmatmul.msk.f32.gmra.mxu1 %vm5674_vm4, %v7627_v16  ;;  %v18906_v16 = vld [vmem:[#allocation52_spill] sm:$0xff]  ;;  %v7629_v39 = vld [vmem:[#allocation4 + $0x69] sm:$0xff] }
 0x683   : > { %v6510_v52 = vadd.f32 %v6452_v56, %v15967_v38 }
 0x684   : > { %12429 = vmatmul.msk.f32.gmra.mxu0 %vm5674_vm4, %v7352_v9  ;;  %12376 = vmatmul.msk.f32.gmra.mxu2 %vm5674_vm4, %v15592_v2  ;;  %v18904_v2 = vld [vmem:[#allocation47_spill] sm:$0xff] }
 0x685   : > { %v16131_v20 = vadd.f32 %v6727_v46, %v6510_v52  ;;  %12409 = vmatmul.msk.f32.gmra.mxu3 %vm5674_vm4, %v15885_v51  ;;  %v6156_v25 = vadd.f32 %v18904_v2, %v15575_v40  ;;  %v18905_v51 = vld [vmem:[#allocation65_spill] sm:$0xff] }
 0x686   : > { %v18911_v2 = vld [vmem:[#allocation13_spill] sm:$0xff] }
 0x687   : > { %v6730_v4 = vpop.f32.mrf.mxu1  ;;  %v6945_v49 = vpop.f32.mrf.mxu2  ;;  %v6492_v46 = vadd.f32 %v18905_v51, %v6156_v25  ;;  %v18912_v51 = vld [vmem:[#allocation55_spill] sm:$0xff] }
 0x688   : > { %v7220_v19 = vpop.f32.mrf.mxu3  ;;  %v7041_v52 = vadd.f32 %v6945_v49, %v6766_v31  ;;  %v18910_v31 = vld [vmem:[#allocation49_spill] sm:$0xff] }
 0x68a   : > { %v6455_v62 = vpop.f32.mrf.mxu0  ;;  %12463 = vmatmul.msk.f32.gmra.mxu1 %vm5674_vm4, %v7628_v61  ;;  %v18909_v61 = vld [vmem:[#allocation50_spill] sm:$0xff] }
 0x68b   : > { %v6511_v38 = vadd.f32 %v6455_v62, %v15981_v35  ;;  %v16153_v35 = vadd.f32 %v7220_v19, %v7041_v52  ;;  %v18908_v62 = vld [vmem:[#allocation64_spill] sm:$0xff]  ;;  %v6159_v49 = vadd.f32 %v18910_v31, %v18909_v61 }
 0x68c   : > { %12430 = vmatmul.msk.f32.gmra.mxu0 %vm5674_vm4, %v7353_v59  ;;  %12377 = vmatmul.msk.f32.gmra.mxu2 %vm5674_vm4, %v18906_v16  ;;  %v7355_v16 = vld [vmem:[#allocation4 + $0x78] sm:$0xff] }
 0x68d   : > { %v16146_v56 = vadd.f32 %v6730_v4, %v6511_v38  ;;  %12410 = vmatmul.msk.f32.gmra.mxu3 %vm5674_vm4, %v18907_v50  ;;  %v6767_v38 = vadd.f32 %v18908_v62, %v6492_v46  ;;  %v6493_v25 = vadd.f32 %v18911_v2, %v6159_v49  ;;  %v7630_v50 = vld [vmem:[#allocation4 + $0x79] sm:$0xff] }
 0x68f   : > { %v6733_v14 = vpop.f32.mrf.mxu1  ;;  %v6948_v4 = vpop.f32.mrf.mxu2 }
 0x690   : > { %v7223_v59 = vpop.f32.mrf.mxu3  ;;  %v7042_v19 = vadd.f32 %v6948_v4, %v6767_v38  ;;  %v18914_v38 = vld [vmem:[#allocation51_spill] sm:$0xff]  ;;  %v18915_v4 = vld [vmem:[#allocation53_spill] sm:$0xff] }
 0x692   : > { %v6458_v9 = vpop.f32.mrf.mxu0  ;;  %12464 = vmatmul.msk.f32.gmra.mxu1 %vm5674_vm4, %v7629_v39 }
 0x693   : > { %v6512_v30 = vadd.f32 %v6458_v9, %v15995_v28  ;;  %v16168_v28 = vadd.f32 %v7223_v59, %v7042_v19  ;;  %v6162_v59 = vadd.f32 %v18915_v4, %v18914_v38  ;;  %v18917_v19 = vld [vmem:[#allocation54_spill] sm:$0xff]  ;;  %v7357_v4 = vld [vmem:[#allocation4 + $0x90] sm:$0xff] }
 0x694   : > { %12431 = vmatmul.msk.f32.gmra.mxu0 %vm5674_vm4, %v7354_v15  ;;  %12378 = vmatmul.msk.f32.gmra.mxu2 %vm5674_vm4, %v18912_v51  ;;  %v7631_v51 = vld [vmem:[#allocation4 + $0x81] sm:$0xff] }
 0x695   : > { %v16161_v40 = vadd.f32 %v6733_v14, %v6512_v30  ;;  %12411 = vmatmul.msk.f32.gmra.mxu3 %vm5674_vm4, %v15917_v57  ;;  %v18913_v30 = vld [vmem:[#allocation7_spill] sm:$0xff]  ;;  %v18916_v57 = vld [vmem:[#allocation14_spill] sm:$0xff] }
 0x696   : > { %v6768_v14 = vadd.f32 %v18913_v30, %v6493_v25  ;;  %v6494_v31 = vadd.f32 %v18916_v57, %v6162_v59  ;;  %v7632_v59 = vld [vmem:[#allocation4 + $0x91] sm:$0xff] }
 0x697   : > { %v6736_v9 = vpop.f32.mrf.mxu1  ;;  %v6951_v39 = vpop.f32.mrf.mxu2 }
 0x698   : > { %v7226_v62 = vpop.f32.mrf.mxu3  ;;  %v7043_v61 = vadd.f32 %v6951_v39, %v6768_v14 }
 0x69a   : > { %v6461_v52 = vpop.f32.mrf.mxu0  ;;  %12465 = vmatmul.msk.f32.gmra.mxu1 %vm5674_vm4, %v7630_v50 }
 0x69b   : > { %v6513_v46 = vadd.f32 %v6461_v52, %v16009_v23  ;;  %v16183_v23 = vadd.f32 %v7226_v62, %v7043_v61  ;;  %v7356_v52 = vld [vmem:[#allocation4 + $0x80] sm:$0xff] }
 0x69c   : > { %12432 = vmatmul.msk.f32.gmra.mxu0 %vm5674_vm4, %v7355_v16  ;;  %12379 = vmatmul.msk.f32.gmra.mxu2 %vm5674_vm4, %v18917_v19 }
 0x69d   : > { %v16176_v15 = vadd.f32 %v6736_v9, %v6513_v46  ;;  %12412 = vmatmul.msk.f32.gmra.mxu3 %vm5674_vm4, %v15931_v63  ;;  %v18918_v46 = vld [vmem:[#allocation17_spill] sm:$0xff]  ;;  %v18919_v63 = vld [vmem:[#allocation56_spill] sm:$0xff] }
 0x69e   : > { %v6769_v9 = vadd.f32 %v18918_v46, %v6494_v31 }
 0x69f   : > { %v6739_v25 = vpop.f32.mrf.mxu1  ;;  %v6954_v50 = vpop.f32.mrf.mxu2 }
 0x6a0   : > { %v7229_v30 = vpop.f32.mrf.mxu3  ;;  %v7044_v14 = vadd.f32 %v6954_v50, %v6769_v9 }
 0x6a2   : > { %v6464_v49 = vpop.f32.mrf.mxu0  ;;  %12466 = vmatmul.msk.f32.gmra.mxu1 %vm5674_vm4, %v7631_v51  ;;  %v16195_v39 = vadd.f32 %v7229_v30, %v7044_v14  ;;  %v7633_v51 = vld [vmem:[#allocation4 + $0x99] sm:$0xff] }
 0x6a3   : > { %v6514_v2 = vadd.f32 %v6464_v49, %v16024_v60 }
 0x6a4   : > { %12433 = vmatmul.msk.f32.gmra.mxu0 %vm5674_vm4, %v7356_v52  ;;  %12380 = vmatmul.msk.f32.gmra.mxu2 %vm5674_vm4, %v18919_v63  ;;  %v7358_v52 = vld [vmem:[#allocation4 + $0x98] sm:$0xff]  ;;  %v7359_v63 = vld [vmem:[#allocation4 + $0xa8] sm:$0xff] }
 0x6a5   : > { %v16191_v16 = vadd.f32 %v6739_v25, %v6514_v2  ;;  %12413 = vmatmul.msk.f32.gmra.mxu3 %vm5674_vm4, %v15945_v8  ;;  %v18920_v25 = vld [vmem:[#allocation57_spill] sm:$0xff] }
 0x6a7   : > { %v6742_v38 = vpop.f32.mrf.mxu1  ;;  %v6957_v57 = vpop.f32.mrf.mxu2 }
 0x6a8   : > { %v7232_v31 = vpop.f32.mrf.mxu3  ;;  %v7045_v49 = vadd.f32 %v6957_v57, %v15919_v12 }
 0x6aa   : > { %v6467_v62 = vpop.f32.mrf.mxu0  ;;  %12467 = vmatmul.msk.f32.gmra.mxu1 %vm5674_vm4, %v7632_v59  ;;  %v16207_v19 = vadd.f32 %v7232_v31, %v7045_v49  ;;  %v18922_v49 = vld [vmem:[#allocation58_spill] sm:$0xff] }
 0x6ab   : > { %v6515_v60 = vadd.f32 %v6467_v62, %v16039_v26  ;;  %v18921_v62 = vld [vmem:[#allocation59_spill] sm:$0xff] }
 0x6ac   : > { %12434 = vmatmul.msk.f32.gmra.mxu0 %vm5674_vm4, %v7357_v4  ;;  %12381 = vmatmul.msk.f32.gmra.mxu2 %vm5674_vm4, %v18920_v25  ;;  %v7635_v25 = vld [vmem:[#allocation4 + $0xb1] sm:$0xff] }
 0x6ad   : > { %v16202_v61 = vadd.f32 %v6742_v38, %v6515_v60  ;;  %12414 = vmatmul.msk.f32.gmra.mxu3 %vm5674_vm4, %v15959_v53  ;;  %v7634_v60 = vld [vmem:[#allocation4 + $0xa9] sm:$0xff] }
 0x6af   : > { %v6745_v26 = vpop.f32.mrf.mxu1  ;;  %v6960_v12 = vpop.f32.mrf.mxu2 }
 0x6b0   : > { %v7235_v9 = vpop.f32.mrf.mxu3  ;;  %v7046_v50 = vadd.f32 %v6960_v12, %v15933_v36 }
 0x6b2   : > { %v6470_v2 = vpop.f32.mrf.mxu0  ;;  %12468 = vmatmul.msk.f32.gmra.mxu1 %vm5674_vm4, %v7633_v51  ;;  %v16219_v30 = vadd.f32 %v7235_v9, %v7046_v50  ;;  %v18923_v9 = vld [vmem:[#allocation60_spill] sm:$0xff]  ;;  %v7361_v50 = vld [vmem:[#allocation4 + $0xc0] sm:$0xff] }
 0x6b3   : > { %v6516_v8 = vadd.f32 %v6470_v2, %v16054_v37  ;;  %v7360_v2 = vld [vmem:[#allocation4 + $0xb0] sm:$0xff] }
 0x6b4   : > { %12435 = vmatmul.msk.f32.gmra.mxu0 %vm5674_vm4, %v7358_v52  ;;  %12382 = vmatmul.msk.f32.gmra.mxu2 %vm5674_vm4, %v18921_v62 }
 0x6b5   : > { %v16214_v46 = vadd.f32 %v6745_v26, %v6516_v8  ;;  %12415 = vmatmul.msk.f32.gmra.mxu3 %vm5674_vm4, %v15973_v1 }
 0x6b7   : > { %v6748_v37 = vpop.f32.mrf.mxu1  ;;  %v6963_v36 = vpop.f32.mrf.mxu2 }
 0x6b8   : > { %v7238_v4 = vpop.f32.mrf.mxu3  ;;  %v7047_v59 = vadd.f32 %v6963_v36, %v15947_v43  ;;  %v7637_v36 = vld [vmem:[#allocation4 + $0xc9] sm:$0xff] }
 0x6ba   : > { %v6473_v14 = vpop.f32.mrf.mxu0  ;;  %12469 = vmatmul.msk.f32.gmra.mxu1 %vm5674_vm4, %v7634_v60  ;;  %v16231_v57 = vadd.f32 %v7238_v4, %v7047_v59  ;;  %v7362_v60 = vld [vmem:[#allocation4 + $0xc8] sm:$0xff] }
 0x6bb   : > { %v6517_v53 = vadd.f32 %v6473_v14, %v16071_v7  ;;  %v7636_v14 = vld [vmem:[#allocation4 + $0xc1] sm:$0xff] }
 0x6bc   : > { %12436 = vmatmul.msk.f32.gmra.mxu0 %vm5674_vm4, %v7359_v63  ;;  %12383 = vmatmul.msk.f32.gmra.mxu2 %vm5674_vm4, %v18922_v49  ;;  %v18924_v63 = vld [vmem:[#allocation61_spill] sm:$0xff]  ;;  %v18925_v49 = vld [vmem:[#allocation63_spill] sm:$0xff] }
 0x6bd   : > { %v16226_v38 = vadd.f32 %v6748_v37, %v6517_v53  ;;  %12416 = vmatmul.msk.f32.gmra.mxu3 %vm5674_vm4, %v15987_v22 }
 0x6bf   : > { %v6751_v7 = vpop.f32.mrf.mxu1  ;;  %v6966_v43 = vpop.f32.mrf.mxu2 }
 0x6c0   : > { %v7048_v26 = vadd.f32 %v6966_v43, %v15961_v55  ;;  %v7241_v52 = vpop.f32.mrf.mxu3 }
 0x6c2   : > { %v6476_v31 = vpop.f32.mrf.mxu0  ;;  %12470 = vmatmul.msk.f32.gmra.mxu1 %vm5674_vm4, %v7635_v25  ;;  %v16243_v51 = vadd.f32 %v7241_v52, %v7048_v26  ;;  %v18926_v26 = vld [vmem:[#allocation62_spill] sm:$0xff]  ;;  %v7364_v52 = vld [vmem:[#allocation4 + $0xe0] sm:$0xff] }
 0x6c3   : > { %v6518_v1 = vadd.f32 %v6476_v31, %v16088_v3 }
 0x6c4   : > { %12437 = vmatmul.msk.f32.gmra.mxu0 %vm5674_vm4, %v7360_v2  ;;  %12384 = vmatmul.msk.f32.gmra.mxu2 %vm5674_vm4, %v18923_v9 }
 0x6c5   : > { %v16238_v8 = vadd.f32 %v6751_v7, %v6518_v1  ;;  %12417 = vmatmul.msk.f32.gmra.mxu3 %vm5674_vm4, %v16001_v11  ;;  %v7363_v1 = vld [vmem:[#allocation4 + $0xd8] sm:$0xff] }
 0x6c6   : > { %v7638_v7 = vld [vmem:[#allocation4 + $0xd9] sm:$0xff] }
 0x6c7   : > { %v6754_v3 = vpop.f32.mrf.mxu1  ;;  %v6969_v55 = vpop.f32.mrf.mxu2 }
 0x6c8   : > { %v16255_v53 = vadd.f32 %v6969_v55, %v15975_v48  ;;  %v7640_v55 = vld [vmem:[#allocation4 + $0xf1] sm:$0xff] }
 0x6ca   : > { %v6479_v12 = vpop.f32.mrf.mxu0  ;;  %12471 = vmatmul.msk.f32.gmra.mxu1 %vm5674_vm4, %v7636_v14  ;;  %v7365_v14 = vld [vmem:[#allocation4 + $0xf0] sm:$0xff] }
 0x6cb   : > { %v6519_v22 = vadd.f32 %v6479_v12, %v16102_v47  ;;  %v7639_v12 = vld [vmem:[#allocation4 + $0xe1] sm:$0xff] }
 0x6cc   : > { %12438 = vmatmul.msk.f32.gmra.mxu0 %vm5674_vm4, %v7361_v50  ;;  %12385 = vmatmul.msk.f32.gmra.mxu2 %vm5674_vm4, %v18924_v63  ;;  %v18927_v50 = vld [vmem:[#allocation12_spill] sm:$0xff] }
 0x6cd   : > { %v16250_v62 = vadd.f32 %v6754_v3, %v6519_v22  ;;  %12418 = vmatmul.msk.f32.gmra.mxu3 %vm5674_vm4, %v16016_v6 }
 0x6cf   : > { %v6757_v47 = vpop.f32.mrf.mxu1  ;;  %v6972_v48 = vpop.f32.mrf.mxu2 }
 0x6d0   : > { %v16267_v59 = vadd.f32 %v6972_v48, %v15989_v21 }
 0x6d2   : > { %v6482_v37 = vpop.f32.mrf.mxu0  ;;  %12472 = vmatmul.msk.f32.gmra.mxu1 %vm5674_vm4, %v7637_v36  ;;  %v7641_v36 = vld [vmem:[#allocation4 + $0xf9] sm:$0xff] }
 0x6d3   : > { %v6520_v11 = vadd.f32 %v6482_v37, %v16113_v58 }
 0x6d4   : > { %12439 = vmatmul.msk.f32.gmra.mxu0 %vm5674_vm4, %v7362_v60  ;;  %12386 = vmatmul.msk.f32.gmra.mxu2 %vm5674_vm4, %v18925_v49  ;;  %v7366_v60 = vld [vmem:[#allocation4 + $0xf8] sm:$0xff]  ;;  %v16317_v49 = vld [vmem:[#allocation4 + $0x181] sm:$0xff] }
 0x6d5   : > { %v16262_v4 = vadd.f32 %v6757_v47, %v6520_v11  ;;  %12419 = vmatmul.msk.f32.gmra.mxu3 %vm5674_vm4, %v16031_v29  ;;  %v18928_v47 = vld [vmem:[#allocation8_spill] sm:$0xff] }
 0x6d7   : > { %v6760_v58 = vpop.f32.mrf.mxu1  ;;  %v6975_v21 = vpop.f32.mrf.mxu2 }
 0x6d8   : > { %v16279_v25 = vadd.f32 %v6975_v21, %v16003_v44 }
 0x6da   : > { %v6485_v31 = vpop.f32.mrf.mxu0  ;;  %12473 = vmatmul.msk.f32.gmra.mxu1 %vm5674_vm4, %v7638_v7  ;;  %v7642_v7 = vld [vmem:[#allocation4 + $0x109] sm:$0xff] }
 0x6db   : > { %v6521_v6 = vadd.f32 %v6485_v31, %v16124_v18 }
 0x6dc   : > { %12440 = vmatmul.msk.f32.gmra.mxu0 %vm5674_vm4, %v7363_v1  ;;  %12387 = vmatmul.msk.f32.gmra.mxu2 %vm5674_vm4, %v18926_v26  ;;  %v7367_v1 = vld [vmem:[#allocation4 + $0x108] sm:$0xff] }
 0x6dd   : > { %v16274_v2 = vadd.f32 %v6760_v58, %v6521_v6  ;;  %12420 = vmatmul.msk.f32.gmra.mxu3 %vm5674_vm4, %v16046_v33  ;;  %v16319_v6 = vld [vmem:[#allocation4 + $0x182] sm:$0xff] }
 0x6de   : > { %v16333_v26 = vld [vmem:[#allocation4 + $0x189] sm:$0xff] }
 0x6df   : > { %v6763_v18 = vpop.f32.mrf.mxu1  ;;  %v6978_v44 = vpop.f32.mrf.mxu2 }
 0x6e0   : > { %v16291_v22 = vadd.f32 %v6978_v44, %v16018_v5  ;;  %v7643_v44 = vld [vmem:[#allocation4 + $0x111] sm:$0xff] }
 0x6e2   : > { %v6488_v43 = vpop.f32.mrf.mxu0  ;;  %12474 = vmatmul.msk.f32.gmra.mxu1 %vm5674_vm4, %v7639_v12  ;;  %v7368_v12 = vld [vmem:[#allocation4 + $0x110] sm:$0xff] }
 0x6e3   : > { %v6522_v29 = vadd.f32 %v6488_v43, %v16137_v34 }
 0x6e4   : > { %12441 = vmatmul.msk.f32.gmra.mxu0 %vm5674_vm4, %v7364_v52  ;;  %12388 = vmatmul.msk.f32.gmra.mxu2 %vm5674_vm4, %v18927_v50 }
 0x6e5   : > { %v16286_v9 = vadd.f32 %v6763_v18, %v6522_v29  ;;  %12421 = vmatmul.msk.f32.gmra.mxu3 %vm5674_vm4, %v16061_v41  ;;  %v16335_v29 = vld [vmem:[#allocation4 + $0x18a] sm:$0xff] }
 0x6e7   : > { %v7771_v34 = vpop.f32.mrf.mxu1  ;;  %v6981_v5 = vpop.f32.mrf.mxu2 }
 0x6e8   : > { %v16303_v63 = vadd.f32 %v6981_v5, %v16033_v32  ;;  %v7644_v5 = vld [vmem:[#allocation4 + $0x121] sm:$0xff] }
 0x6ea   : > { %v7496_v3 = vpop.f32.mrf.mxu0  ;;  %12475 = vmatmul.msk.f32.gmra.mxu1 %vm5674_vm4, %v7640_v55  ;;  %v7369_v55 = vld [vmem:[#allocation4 + $0x120] sm:$0xff] }
 0x6eb   : > { %v7592_v33 = vadd.f32 %v7496_v3, %v16153_v35 }
 0x6ec   : > { %12442 = vmatmul.msk.f32.gmra.mxu0 %vm5674_vm4, %v7365_v14  ;;  %12389 = vmatmul.msk.f32.gmra.mxu2 %vm5674_vm4, %v18928_v47 }
 0x6ed   : > { %v16298_v37 = vadd.f32 %v7771_v34, %v7592_v33  ;;  %12422 = vmatmul.msk.f32.gmra.mxu3 %vm5674_vm4, %v16078_v54  ;;  %v7899_v33 = vld [vmem:[#allocation4 + $0x32] sm:$0xff] }
 0x6ef   : > { %v7774_v35 = vpop.f32.mrf.mxu1  ;;  %v6984_v32 = vpop.f32.mrf.mxu2 }
 0x6f0   : > { %v16315_v31 = vadd.f32 %v6984_v32, %v16048_v10  ;;  %v7645_v32 = vld [vmem:[#allocation4 + $0x129] sm:$0xff] }
 0x6f2   : > { %v7499_v11 = vpop.f32.mrf.mxu0  ;;  %12476 = vmatmul.msk.f32.gmra.mxu1 %vm5674_vm4, %v7641_v36  ;;  %v7370_v36 = vld [vmem:[#allocation4 + $0x128] sm:$0xff] }
 0x6f3   : > { %v7593_v41 = vadd.f32 %v7499_v11, %v16168_v28 }
 0x6f4   : > { %12443 = vmatmul.msk.f32.gmra.mxu0 %vm5674_vm4, %v7366_v60  ;;  %12390 = vmatmul.msk.f32.gmra.mxu2 %vm5674_vm4, %v16317_v49 }
 0x6f5   : > { %v16310_v48 = vadd.f32 %v7774_v35, %v7593_v41  ;;  %12423 = vmatmul.msk.f32.gmra.mxu3 %vm5674_vm4, %v16319_v6 }
 0x6f7   : > { %v7777_v58 = vpop.f32.mrf.mxu1  ;;  %v6987_v10 = vpop.f32.mrf.mxu2 }
 0x6f8   : > { %v16331_v43 = vadd.f32 %v6987_v10, %v16065_v0  ;;  %v7646_v10 = vld [vmem:[#allocation4 + $0x139] sm:$0xff] }
 0x6fa   : > { %v7502_v54 = vpop.f32.mrf.mxu0  ;;  %12477 = vmatmul.msk.f32.gmra.mxu1 %vm5674_vm4, %v7642_v7 }
 0x6fb   : > { %v7594_v28 = vadd.f32 %v7502_v54, %v16183_v23 }
 0x6fc   : > { %12444 = vmatmul.msk.f32.gmra.mxu0 %vm5674_vm4, %v7367_v1  ;;  %12391 = vmatmul.msk.f32.gmra.mxu2 %vm5674_vm4, %v16333_v26 }
 0x6fd   : > { %v16326_v21 = vadd.f32 %v7777_v58, %v7594_v28  ;;  %12424 = vmatmul.msk.f32.gmra.mxu3 %vm5674_vm4, %v16335_v29 }
 0x6ff   : > { %v7780_v52 = vpop.f32.mrf.mxu1  ;;  %v6990_v0 = vpop.f32.mrf.mxu2 }
 0x700   : > { %v16347_v50 = vadd.f32 %v6990_v0, %v16082_v45  ;;  %v7900_v45 = vld [vmem:[#allocation4 + $0x3a] sm:$0xff] }
 0x701   : > { %v7372_v0 = vld [vmem:[#allocation4 + $0x140] sm:$0xff] }
 0x702   : > { %v7505_v18 = vpop.f32.mrf.mxu0  ;;  %12478 = vmatmul.msk.f32.gmra.mxu1 %vm5674_vm4, %v7643_v44 }
 0x703   : > { %v7595_v23 = vadd.f32 %v7505_v18, %v16195_v39  ;;  %v16374_v18 = vpop.f32.mrf.mxu3 }
 0x704   : > { %12445 = vmatmul.msk.f32.gmra.mxu0 %vm5674_vm4, %v7368_v12  ;;  %12492 = vmatmul.msk.f32.vlgmr.msra.gmra.mxu2 %vm5674_vm4, %v7899_v33  ;;  %v7647_v33 = vld [vmem:[#allocation4 + $0x141] sm:$0xff] }
 0x705   : > { %v16342_v3 = vadd.f32 %v7780_v52, %v7595_v23 }
 0x707   : > { %v7783_v39 = vpop.f32.mrf.mxu1  ;;  %v6993_v47 = vpop.f32.mrf.mxu2 }
 0x708   : > { %v16356_v41 = vadd.f32 %v6993_v47, %v16098_v42  ;;  %v7901_v42 = vld [vmem:[#allocation4 + $0x4a] sm:$0xff] }
 0x709   : > { %v7373_v47 = vld [vmem:[#allocation4 + $0x150] sm:$0xff] }
 0x70a   : > { %v7508_v34 = vpop.f32.mrf.mxu0  ;;  %12479 = vmatmul.msk.f32.gmra.mxu1 %vm5674_vm4, %v7644_v5 }
 0x70b   : > { %v7596_v14 = vadd.f32 %v7508_v34, %v16207_v19 }
 0x70c   : > { %12446 = vmatmul.msk.f32.gmra.mxu0 %vm5674_vm4, %v7369_v55  ;;  %12493 = vmatmul.msk.f32.gmra.mxu2 %vm5674_vm4, %v7900_v45  ;;  %v7648_v45 = vld [vmem:[#allocation4 + $0x151] sm:$0xff] }
 0x70d   : > { %v16351_v11 = vadd.f32 %v7783_v39, %v7596_v14  ;;  %v16389_v39 = vpop.f32.mrf.mxu3 }
 0x70f   : > { %v7786_v19 = vpop.f32.mrf.mxu1  ;;  %v6996_v28 = vpop.f32.mrf.mxu2 }
 0x710   : > { %v16365_v58 = vadd.f32 %v6996_v28, %v16109_v17  ;;  %v7902_v17 = vld [vmem:[#allocation4 + $0x52] sm:$0xff] }
 0x711   : > { %v7374_v28 = vld [vmem:[#allocation4 + $0x158] sm:$0xff] }
 0x712   : > { %v7511_v35 = vpop.f32.mrf.mxu0  ;;  %12480 = vmatmul.msk.f32.gmra.mxu1 %vm5674_vm4, %v7645_v32  ;;  %18929 = vst [vmem:[#allocation11_spill] sm:$0xff] %v16365_v58 }
 0x713   : > { %v7597_v60 = vadd.f32 %v7511_v35, %v16219_v30  ;;  %v7371_v30 = vld [vmem:[#allocation4 + $0x138] sm:$0xff] }
 0x714   : > { %12447 = vmatmul.msk.f32.gmra.mxu0 %vm5674_vm4, %v7370_v36  ;;  %12494 = vmatmul.msk.f32.gmra.mxu2 %vm5674_vm4, %v7901_v42  ;;  %v7649_v42 = vld [vmem:[#allocation4 + $0x159] sm:$0xff] }
 0x715   : > { %v16360_v54 = vadd.f32 %v7786_v19, %v7597_v60  ;;  %v7904_v19 = vld [vmem:[#allocation4 + $0x6a] sm:$0xff] }
 0x717   : > { %v16370_v7 = vpop.f32.mrf.mxu1  ;;  %v6999_v23 = vpop.f32.mrf.mxu2 }
 0x718   : > { %v16377_v52 = vadd.f32 %v6999_v23, %v16120_v24  ;;  %v7903_v24 = vld [vmem:[#allocation4 + $0x62] sm:$0xff] }
 0x71a   : > { %v16367_v1 = vpop.f32.mrf.mxu0  ;;  %12481 = vmatmul.msk.f32.gmra.mxu1 %vm5674_vm4, %v7646_v10  ;;  %18930 = vst [vmem:[#allocation15_spill] sm:$0xff] %v16377_v52 }
 0x71c   : > { %12448 = vmatmul.msk.f32.gmra.mxu0 %vm5674_vm4, %v7371_v30  ;;  %12495 = vmatmul.msk.f32.gmra.mxu2 %vm5674_vm4, %v7902_v17 }
 0x71f   : > { %v16382_v44 = vpop.f32.mrf.mxu1  ;;  %v7002_v34 = vpop.f32.mrf.mxu2 }
 0x720   : > { %v16387_v14 = vadd.f32 %v7002_v34, %v16131_v20  ;;  %v16401_v20 = vpop.f32.mrf.mxu3  ;;  %v7650_v34 = vld [vmem:[#allocation4 + $0x169] sm:$0xff] }
 0x722   : > { %v16379_v12 = vpop.f32.mrf.mxu0  ;;  %12482 = vmatmul.msk.f32.gmra.mxu1 %vm5674_vm4, %v7647_v33  ;;  %18931 = vst [vmem:[#allocation20_spill] sm:$0xff] %v16387_v14  ;;  %v7375_v33 = vld [vmem:[#allocation4 + $0x168] sm:$0xff] }
 0x724   : > { %12449 = vmatmul.msk.f32.gmra.mxu0 %vm5674_vm4, %v7372_v0  ;;  %12496 = vmatmul.msk.f32.gmra.mxu2 %vm5674_vm4, %v7903_v24 }
 0x727   : > { %v16394_v5 = vpop.f32.mrf.mxu1  ;;  %v7005_v35 = vpop.f32.mrf.mxu2 }
 0x728   : > { %v16399_v60 = vadd.f32 %v7005_v35, %v16146_v56  ;;  %v7905_v56 = vld [vmem:[#allocation4 + $0x7a] sm:$0xff]  ;;  %v16418_v0 = vpop.f32.mrf.mxu3 }
 0x72a   : > { %v16391_v55 = vpop.f32.mrf.mxu0  ;;  %12483 = vmatmul.msk.f32.gmra.mxu1 %vm5674_vm4, %v7648_v45  ;;  %18932 = vst [vmem:[#allocation22_spill] sm:$0xff] %v16399_v60  ;;  %v7912_v60 = vld [vmem:[#allocation4 + $0xca] sm:$0xff] }
 0x72c   : > { %12450 = vmatmul.msk.f32.gmra.mxu0 %vm5674_vm4, %v7373_v47  ;;  %12497 = vmatmul.msk.f32.gmra.mxu2 %vm5674_vm4, %v7904_v19  ;;  %v7376_v19 = vld [vmem:[#allocation4 + $0x170] sm:$0xff] }
 0x72f   : > { %v16406_v32 = vpop.f32.mrf.mxu1  ;;  %v7008_v30 = vpop.f32.mrf.mxu2 }
 0x730   : > { %v16411_v10 = vadd.f32 %v7008_v30, %v16161_v40  ;;  %v7906_v40 = vld [vmem:[#allocation4 + $0x82] sm:$0xff] }
 0x732   : > { %v16403_v36 = vpop.f32.mrf.mxu0  ;;  %12484 = vmatmul.msk.f32.gmra.mxu1 %vm5674_vm4, %v7649_v42  ;;  %18933 = vst [vmem:[#allocation23_spill] sm:$0xff] %v16411_v10  ;;  %v16432_v42 = vpop.f32.mrf.mxu3 }
 0x734   : > { %12451 = vmatmul.msk.f32.gmra.mxu0 %vm5674_vm4, %v7374_v28  ;;  %12498 = vmatmul.msk.f32.gmra.mxu2 %vm5674_vm4, %v7905_v56  ;;  %v7651_v28 = vld [vmem:[#allocation4 + $0x171] sm:$0xff] }
 0x737   : > { %v16416_v17 = vpop.f32.mrf.mxu1  ;;  %v7011_v24 = vpop.f32.mrf.mxu2 }
 0x738   : > { %v16423_v47 = vadd.f32 %v7011_v24, %v16176_v15  ;;  %v7907_v15 = vld [vmem:[#allocation4 + $0x92] sm:$0xff] }
 0x73a   : > { %v16413_v23 = vpop.f32.mrf.mxu0  ;;  %12485 = vmatmul.msk.f32.gmra.mxu1 %vm5674_vm4, %v7650_v34  ;;  %18934 = vst [vmem:[#allocation25_spill] sm:$0xff] %v16423_v47  ;;  %v7910_v47 = vld [vmem:[#allocation4 + $0xb2] sm:$0xff] }
 0x73c   : > { %12452 = vmatmul.msk.f32.gmra.mxu0 %vm5674_vm4, %v7375_v33  ;;  %12499 = vmatmul.msk.f32.gmra.mxu2 %vm5674_vm4, %v7906_v40 }
 0x73f   : > { %v16428_v35 = vpop.f32.mrf.mxu1  ;;  %v7014_v30 = vpop.f32.mrf.mxu2 }
 0x740   : > { %v16435_v56 = vadd.f32 %v7014_v30, %v16191_v16  ;;  %v7908_v16 = vld [vmem:[#allocation4 + $0x9a] sm:$0xff] }
 0x742   : > { %v16425_v45 = vpop.f32.mrf.mxu0  ;;  %12486 = vmatmul.msk.f32.gmra.mxu1 %vm5674_vm4, %v7651_v28  ;;  %18935 = vst [vmem:[#allocation27_spill] sm:$0xff] %v16435_v56 }
 0x744   : > { %12453 = vmatmul.msk.f32.gmra.mxu0 %vm5674_vm4, %v7376_v19  ;;  %12500 = vmatmul.msk.f32.gmra.mxu2 %vm5674_vm4, %v7907_v15  ;;  %v16449_v19 = vpop.f32.mrf.mxu3  ;;  %v7909_v15 = vld [vmem:[#allocation4 + $0xaa] sm:$0xff] }
 0x747   : > { %v16440_v34 = vpop.f32.mrf.mxu1  ;;  %v7017_v24 = vpop.f32.mrf.mxu2 }
 0x748   : > { %v16447_v40 = vadd.f32 %v7017_v24, %v16202_v61 }
 0x74a   : > { %v16437_v33 = vpop.f32.mrf.mxu0  ;;  %12487 = vmatmul.msk.f32.gmra.mxu1 %vm5674_vm4, %v16317_v49  ;;  %18936 = vst [vmem:[#allocation28_spill] sm:$0xff] %v16447_v40 }
 0x74c   : > { %12454 = vmatmul.msk.f32.gmra.mxu0 %vm5674_vm4, %v16063_v13  ;;  %12501 = vmatmul.msk.f32.gmra.mxu2 %vm5674_vm4, %v7908_v16  ;;  %v16463_v61 = vpop.f32.mrf.mxu3  ;;  %v7379_v16 = vld [vmem:[#allocation4 + $0x198] sm:$0xff] }
 0x74f   : > { %v16454_v30 = vpop.f32.mrf.mxu1  ;;  %v7020_v13 = vpop.f32.mrf.mxu2 }
 0x750   : > { %v16461_v49 = vadd.f32 %v7020_v13, %v16214_v46  ;;  %v7380_v13 = vld [vmem:[#allocation4 + $0x1a0] sm:$0xff] }
 0x752   : > { %v16451_v28 = vpop.f32.mrf.mxu0  ;;  %12488 = vmatmul.msk.f32.gmra.mxu1 %vm5674_vm4, %v16333_v26  ;;  %18937 = vst [vmem:[#allocation29_spill] sm:$0xff] %v16461_v49  ;;  %v7654_v26 = vld [vmem:[#allocation4 + $0x199] sm:$0xff] }
 0x754   : > { %12455 = vmatmul.msk.f32.gmra.mxu0 %vm5674_vm4, %v16080_v27  ;;  %12502 = vmatmul.msk.f32.gmra.mxu2 %vm5674_vm4, %v7909_v15  ;;  %v16478_v49 = vpop.f32.mrf.mxu3 }
 0x757   : > { %v7023_v40 = vpop.f32.mrf.mxu2  ;;  %v16472_v56 = vpop.f32.mrf.mxu1 }
 0x758   : > { %v16470_v27 = vadd.f32 %v7023_v40, %v16226_v38  ;;  %v7655_v40 = vld [vmem:[#allocation4 + $0x1a1] sm:$0xff] }
 0x75a   : > { %v16465_v24 = vpop.f32.mrf.mxu0  ;;  %18938 = vst [vmem:[#allocation30_spill] sm:$0xff] %v16470_v27  ;;  %12489 = vmatmul.msk.f32.gmra.mxu1 %vm5674_vm4, %v7654_v26  ;;  %v7911_v27 = vld [vmem:[#allocation4 + $0xc2] sm:$0xff] }
 0x75c   : > { %12456 = vmatmul.msk.f32.gmra.mxu0 %vm5674_vm4, %v7379_v16  ;;  %12503 = vmatmul.msk.f32.gmra.mxu2 %vm5674_vm4, %v7910_v47  ;;  %v12622_v47 = vld [vmem:[%s18540_s8 + $0x18] sm:$0xff] }
 0x75d   : > { %9234 = vmatpush.msrb.mxu2 %v12622_v47 }
 0x75f   : > { %v7026_v15 = vpop.f32.mrf.mxu2  ;;  %v16484_v38 = vpop.f32.mrf.mxu1 }
 0x760   : > { %v16482_v16 = vadd.f32 %v7026_v15, %v16238_v8  ;;  %v8362_v8 = vld [vmem:[#allocation5 + $0x1] sm:$0xff] }
 0x761   : > { %v8329_v15 = vld [vmem:[#allocation5] sm:$0xff]  ;;  %12525 = vmatmul.msk.f32.vlgmr.msra.gmra.mxu3 %vm5674_vm4, %v8362_v8  ;;  %v8363_v8 = vld [vmem:[#allocation5 + $0x9] sm:$0xff] }
 0x762   : > { %v16475_v46 = vpop.f32.mrf.mxu0  ;;  %18939 = vst [vmem:[#allocation32_spill] sm:$0xff] %v16482_v16  ;;  %12490 = vmatmul.msk.f32.gmra.mxu1 %vm5674_vm4, %v7655_v40  ;;  %v12655_v40 = vld [vmem:[%s18540_s8 + $0x20] sm:$0xff] }
 0x763   : > { %9509 = vmatpush.msrb.mxu3 %v12655_v40  ;;  %v8814_v40 = vld [vmem:[#allocation5 + $0x2] sm:$0xff] }
 0x764   : > { %12457 = vmatmul.msk.f32.gmra.mxu0 %vm5674_vm4, %v7380_v13  ;;  %12504 = vmatmul.msk.f32.gmra.mxu2 %vm5674_vm4, %v7911_v27  ;;  %v8361_v13 = vld [vmem:[%s18540_s8] sm:$0xff]  ;;  %v16501_v27 = vpop.f32.mrf.mxu3 }
 0x765   : > { %8716 = vmatpush.msrb.mxu0 %v8361_v13  ;;  %v12589_v13 = vld [vmem:[%s18540_s8 + $0x10] sm:$0xff] }
 0x766   : > { %8959 = vmatpush.msrb.mxu1 %v12589_v13  ;;  %v8815_v13 = vld [vmem:[#allocation5 + $0xa] sm:$0xff] }
 0x767   : > { %v7029_v16 = vpop.f32.mrf.mxu2  ;;  %v16507_v47 = vpop.f32.mrf.mxu1 }
 0x768   : > { %v16504_v10 = vadd.f32 %v7029_v16, %v16250_v62  ;;  %v7913_v16 = vld [vmem:[#allocation4 + $0xda] sm:$0xff] }
 0x769   : > { %12526 = vmatmul.msk.f32.gmra.mxu3 %vm5674_vm4, %v8363_v8 }
 0x76a   : > { %v16488_v26 = vpop.f32.mrf.mxu0  ;;  %18940 = vst [vmem:[#allocation31_spill] sm:$0xff] %v16504_v10  ;;  %12590 = vmatmul.msk.f32.vlgmr.msrb.gmra.mxu1 %vm5674_vm4, %v8814_v40 }
 0x76c   : > { %12557 = vmatmul.msk.f32.vlgmr.msrb.gmra.mxu0 %vm5674_vm4, %v8329_v15  ;;  %12505 = vmatmul.msk.f32.gmra.mxu2 %vm5674_vm4, %v7912_v60  ;;  %v8330_v15 = vld [vmem:[#allocation5 + $0x8] sm:$0xff]  ;;  %v16520_v60 = vpop.f32.mrf.mxu3 }
 0x76f   : > { %v7032_v52 = vpop.f32.mrf.mxu2  ;;  %v16523_v10 = vpop.f32.mrf.mxu1 }
 0x770   : > { %v16516_v62 = vadd.f32 %v7032_v52, %v16262_v4  ;;  %v7914_v52 = vld [vmem:[#allocation4 + $0xe2] sm:$0xff] }
 0x772   : > { %v16512_v14 = vpop.f32.mrf.mxu0  ;;  %18942 = vst [vmem:[#allocation9_spill] sm:$0xff] %v16516_v62  ;;  %12591 = vmatmul.msk.f32.gmra.mxu1 %vm5674_vm4, %v8815_v13 }
 0x773   : > { %18941 = vst [vmem:[#allocation33_spill] sm:$0xff] %v16512_v14 }
 0x774   : > { %12558 = vmatmul.msk.f32.gmra.mxu0 %vm5674_vm4, %v8330_v15  ;;  %12506 = vmatmul.msk.f32.gmra.mxu2 %vm5674_vm4, %v7913_v16  ;;  %v16531_v4 = vpop.f32.mrf.mxu3 }
 0x775   : > { %18945 = vst [vmem:[#allocation18_spill] sm:$0xff] %v16531_v4 }
 0x777   : > { %v7035_v58 = vpop.f32.mrf.mxu2  ;;  %v16539_v62 = vpop.f32.mrf.mxu1 }
 0x778   : > { %v16528_v8 = vadd.f32 %v7035_v58, %v16274_v2  ;;  %18948 = vst [vmem:[#allocation16_spill] sm:$0xff] %v16539_v62  ;;  %v16547_v58 = vld [vmem:[%s18539_s7] ss:$0 sm:$0xff] }
 0x77a   : > { %v16525_v14 = vpop.f32.mrf.mxu0  ;;  %18944 = vst [vmem:[#allocation36_spill] sm:$0xff] %v16528_v8 }
 0x77b   : > { %18943 = vst [vmem:[#allocation34_spill] sm:$0xff] %v16525_v14  ;;  %v7915_v14 = vld [vmem:[#allocation4 + $0xf2] sm:$0xff] }
 0x77c   : > { %12507 = vmatmul.msk.f32.gmra.mxu2 %vm5674_vm4, %v7914_v52  ;;  %v16542_v2 = vpop.f32.mrf.mxu3 }
 0x77d   : > { %18949 = vst [vmem:[#allocation38_spill] sm:$0xff] %v16542_v2 }
 0x77f   : > { %v7038_v40 = vpop.f32.mrf.mxu2 }
 0x780   : > { %v16537_v16 = vadd.f32 %v7038_v40, %v16286_v9  ;;  %v16553_v40 = vpop.f32.mrf.mxu1 }
 0x781   : > { %18951 = vst [vmem:[#allocation19_spill] sm:$0xff] %v16553_v40 }
 0x782   : > { %v16534_v15 = vpop.f32.mrf.mxu0  ;;  %18947 = vst [vmem:[#allocation37_spill] sm:$0xff] %v16537_v16  ;;  %v7916_v16 = vld [vmem:[#allocation4 + $0xfa] sm:$0xff] }
 0x783   : > { %18946 = vst [vmem:[#allocation35_spill] sm:$0xff] %v16534_v15 }
 0x784   : > { %12508 = vmatmul.msk.f32.gmra.mxu2 %vm5674_vm4, %v7915_v14  ;;  %v16557_v14 = vpop.f32.mrf.mxu3 }
 0x787   : > { %v8046_v13 = vpop.f32.mrf.mxu2 }
 0x788   : > { %v8142_v8 = vadd.f32 %v8046_v13, %v16298_v37  ;;  %v7917_v37 = vld [vmem:[#allocation4 + $0x10a] sm:$0xff] }
 0x78a   : > { %v16549_v52 = vpop.f32.mrf.mxu0  ;;  %v8178_v9 = vadd.f32 %v16547_v58, %v8142_v8  ;;  %v16564_v8 = vpop.f32.mrf.mxu1 }
 0x78b   : > { %18950 = vst [vmem:[#allocation40_spill] sm:$0xff] %v16549_v52 }
 0x78c   : > { %v8210_v15 = vmax.f32 %v8178_v9, 0.0  ;;  %12509 = vmatmul.msk.f32.gmra.mxu2 %vm5674_vm4, %v7916_v16  ;;  %18953 = vst [vmem:[#allocation41_spill] sm:$0xff] %v16564_v8 }
 0x78e   : > { %8297 = vst.msk [vmem:[#allocation5 + $0x19] sm:$0xff] %vm5674_vm4, %v8210_v15 }
 0x78f   : > { %v8049_v2 = vpop.f32.mrf.mxu2 }
 0x790   : > { %v8143_v62 = vadd.f32 %v8049_v2, %v16310_v48  ;;  %v7918_v2 = vld [vmem:[#allocation4 + $0x112] sm:$0xff] }
 0x792   : > { %v16560_v4 = vpop.f32.mrf.mxu0  ;;  %v8179_v52 = vadd.f32 %v16547_v58, %v8143_v62  ;;  %v16573_v62 = vpop.f32.mrf.mxu3 }
 0x793   : > { %18952 = vst [vmem:[#allocation39_spill] sm:$0xff] %v16560_v4 }
 0x794   : > { %v8211_v13 = vmax.f32 %v8179_v52, 0.0  ;;  %12510 = vmatmul.msk.f32.gmra.mxu2 %vm5674_vm4, %v7917_v37  ;;  %18954 = vst [vmem:[#allocation21_spill] sm:$0xff] %v16573_v62 }
 0x795   : > { %v8364_v9 = vld [vmem:[#allocation5 + $0x19] sm:$0xff] }
 0x796   : > { %v16566_v40 = vld [vmem:[#allocation5 + $0x18] sm:$0xff]  ;;  %8298 = vst.msk [vmem:[#allocation5 + $0x21] sm:$0xff] %vm5674_vm4, %v8211_v13  ;;  %12527 = vmatmul.msk.f32.gmra.mxu3 %vm5674_vm4, %v8364_v9 }
 0x797   : > { %12559 = vmatmul.msk.f32.gmra.mxu0 %vm5674_vm4, %v16566_v40  ;;  %v8052_v48 = vpop.f32.mrf.mxu2 }
 0x798   : > { %v8144_v15 = vadd.f32 %v8052_v48, %v16326_v21  ;;  %v16585_v21 = vpop.f32.mrf.mxu1 }
 0x799   : > { %18956 = vst [vmem:[#allocation44_spill] sm:$0xff] %v16585_v21 }
 0x79a   : > { %v8180_v16 = vadd.f32 %v16547_v58, %v8144_v15  ;;  %v16576_v52 = vpop.f32.mrf.mxu0 }
 0x79b   : > { %18955 = vst [vmem:[#allocation42_spill] sm:$0xff] %v16576_v52  ;;  %v7919_v52 = vld [vmem:[#allocation4 + $0x122] sm:$0xff] }
 0x79c   : > { %v8212_v37 = vmax.f32 %v8180_v16, 0.0  ;;  %12511 = vmatmul.msk.f32.gmra.mxu2 %vm5674_vm4, %v7918_v2  ;;  %v16590_v2 = vpop.f32.mrf.mxu3 }
 0x79d   : > { %v8365_v4 = vld [vmem:[#allocation5 + $0x21] sm:$0xff]  ;;  %18957 = vst [vmem:[#allocation24_spill] sm:$0xff] %v16590_v2 }
 0x79e   : > { %v16579_v13 = vld [vmem:[#allocation5 + $0x20] sm:$0xff]  ;;  %8299 = vst.msk [vmem:[#allocation5 + $0x31] sm:$0xff] %vm5674_vm4, %v8212_v37  ;;  %12528 = vmatmul.msk.f32.gmra.mxu3 %vm5674_vm4, %v8365_v4 }
 0x79f   : > { %v8816_v9 = vld [vmem:[#allocation5 + $0x1a] sm:$0xff]  ;;  %12560 = vmatmul.msk.f32.gmra.mxu0 %vm5674_vm4, %v16579_v13  ;;  %v8055_v48 = vpop.f32.mrf.mxu2 }
 0x7a0   : > { %12592 = vmatmul.msk.f32.gmra.mxu1 %vm5674_vm4, %v8816_v9  ;;  %v8145_v15 = vadd.f32 %v8055_v48, %v16342_v3  ;;  %v8817_v3 = vld [vmem:[#allocation5 + $0x22] sm:$0xff] }
 0x7a2   : > { %v8181_v16 = vadd.f32 %v16547_v58, %v8145_v15  ;;  %v16595_v8 = vpop.f32.mrf.mxu0  ;;  %v16603_v15 = vpop.f32.mrf.mxu1 }
 0x7a3   : > { %18958 = vst [vmem:[#allocation43_spill] sm:$0xff] %v16595_v8 }
 0x7a4   : > { %v8213_v62 = vmax.f32 %v8181_v16, 0.0  ;;  %12512 = vmatmul.msk.f32.gmra.mxu2 %vm5674_vm4, %v7919_v52  ;;  %18959 = vst [vmem:[#allocation45_spill] sm:$0xff] %v16603_v15  ;;  %v7920_v16 = vld [vmem:[#allocation4 + $0x12a] sm:$0xff] }
 0x7a5   : > { %v8366_v37 = vld [vmem:[#allocation5 + $0x31] sm:$0xff] }
 0x7a6   : > { %v16593_v4 = vld [vmem:[#allocation5 + $0x30] sm:$0xff]  ;;  %8300 = vst.msk [vmem:[#allocation5 + $0x39] sm:$0xff] %vm5674_vm4, %v8213_v62  ;;  %12529 = vmatmul.msk.f32.gmra.mxu3 %vm5674_vm4, %v8366_v37  ;;  %v16607_v62 = vpop.f32.mrf.mxu3 }
 0x7a7   : > { %12561 = vmatmul.msk.f32.gmra.mxu0 %vm5674_vm4, %v16593_v4  ;;  %v8058_v9 = vpop.f32.mrf.mxu2  ;;  %18960 = vst [vmem:[#allocation26_spill] sm:$0xff] %v16607_v62 }
 0x7a8   : > { %12593 = vmatmul.msk.f32.gmra.mxu1 %vm5674_vm4, %v8817_v3  ;;  %v8146_v48 = vadd.f32 %v8058_v9, %v16351_v11 }
 0x7aa   : > { %v8182_v52 = vadd.f32 %v16547_v58, %v8146_v48  ;;  %v16616_v3 = vpop.f32.mrf.mxu0  ;;  %v7598_v48 = vadd.f32 %v16367_v1, %v16231_v57 }
 0x7ab   : > { %18961 = vst [vmem:[#allocation46_spill] sm:$0xff] %v16616_v3 }
 0x7ac   : > { %v8214_v2 = vmax.f32 %v8182_v52, 0.0  ;;  %12513 = vmatmul.msk.f32.gmra.mxu2 %vm5674_vm4, %v7920_v16  ;;  %v16622_v16 = vpop.f32.mrf.mxu1 }
 0x7ad   : > { %v8367_v37 = vld [vmem:[#allocation5 + $0x39] sm:$0xff] }
 0x7ae   : > { %v16609_v8 = vld [vmem:[#allocation5 + $0x38] sm:$0xff]  ;;  %8301 = vst.msk [vmem:[#allocation5 + $0x49] sm:$0xff] %vm5674_vm4, %v8214_v2  ;;  %12530 = vmatmul.msk.f32.gmra.mxu3 %vm5674_vm4, %v8367_v37  ;;  %v7921_v2 = vld [vmem:[#allocation4 + $0x13a] sm:$0xff] }
 0x7af   : > { %v8818_v21 = vld [vmem:[#allocation5 + $0x32] sm:$0xff]  ;;  %12562 = vmatmul.msk.f32.gmra.mxu0 %vm5674_vm4, %v16609_v8  ;;  %v8061_v11 = vpop.f32.mrf.mxu2  ;;  %v8819_v57 = vld [vmem:[#allocation5 + $0x3a] sm:$0xff] }
 0x7b0   : > { %12594 = vmatmul.msk.f32.gmra.mxu1 %vm5674_vm4, %v8818_v21  ;;  %v8147_v9 = vadd.f32 %v8061_v11, %v16360_v54  ;;  %v7873_v21 = vadd.f32 %v16370_v7, %v7598_v48  ;;  %v16632_v54 = vpop.f32.mrf.mxu3 }
 0x7b1   : > { %18962 = vst [vmem:[#allocation48_spill] sm:$0xff] %v16632_v54 }
 0x7b2   : > { %v8183_v52 = vadd.f32 %v16547_v58, %v8147_v9  ;;  %v16635_v9 = vpop.f32.mrf.mxu0 }
 0x7b4   : > { %v8215_v62 = vmax.f32 %v8183_v52, 0.0  ;;  %12514 = vmatmul.msk.f32.gmra.mxu2 %vm5674_vm4, %v7921_v2  ;;  %v7599_v52 = vadd.f32 %v16379_v12, %v16243_v51  ;;  %v16641_v2 = vpop.f32.mrf.mxu1  ;;  %v7324_v12 = vadd.f32 %v16374_v18, %v16255_v53 }
 0x7b5   : > { %v8368_v37 = vld [vmem:[#allocation5 + $0x49] sm:$0xff] }
 0x7b6   : > { %v16625_v15 = vld [vmem:[#allocation5 + $0x48] sm:$0xff]  ;;  %8302 = vst.msk [vmem:[#allocation5 + $0x51] sm:$0xff] %vm5674_vm4, %v8215_v62  ;;  %12531 = vmatmul.msk.f32.gmra.mxu3 %vm5674_vm4, %v8368_v37  ;;  %v7922_v62 = vld [vmem:[#allocation4 + $0x142] sm:$0xff] }
 0x7b7   : > { %12563 = vmatmul.msk.f32.gmra.mxu0 %vm5674_vm4, %v16625_v15  ;;  %v8064_v1 = vpop.f32.mrf.mxu2 }
 0x7b8   : > { %12595 = vmatmul.msk.f32.gmra.mxu1 %vm5674_vm4, %v8819_v57  ;;  %v8148_v11 = vadd.f32 %v8064_v1, %v7873_v21  ;;  %v7874_v57 = vadd.f32 %v16382_v44, %v7599_v52  ;;  %v16653_v1 = vpop.f32.mrf.mxu3  ;;  %v7923_v52 = vld [vmem:[#allocation4 + $0x152] sm:$0xff] }
 0x7ba   : > { %v8184_v7 = vadd.f32 %v16547_v58, %v8148_v11  ;;  %v7600_v11 = vadd.f32 %v16391_v55, %v7324_v12 }
 0x7bc   : > { %v8216_v48 = vmax.f32 %v8184_v7, 0.0  ;;  %12515 = vmatmul.msk.f32.gmra.mxu2 %vm5674_vm4, %v7922_v62  ;;  %v16657_v7 = vpop.f32.mrf.mxu0  ;;  %v16669_v18 = vpop.f32.mrf.mxu1 }
 0x7bd   : > { %v8369_v37 = vld [vmem:[#allocation5 + $0x51] sm:$0xff] }
 0x7be   : > { %v16643_v3 = vld [vmem:[#allocation5 + $0x50] sm:$0xff]  ;;  %8303 = vst.msk [vmem:[#allocation5 + $0x61] sm:$0xff] %vm5674_vm4, %v8216_v48  ;;  %12532 = vmatmul.msk.f32.gmra.mxu3 %vm5674_vm4, %v8369_v37 }
 0x7bf   : > { %v8820_v54 = vld [vmem:[#allocation5 + $0x4a] sm:$0xff]  ;;  %12564 = vmatmul.msk.f32.gmra.mxu0 %vm5674_vm4, %v16643_v3  ;;  %v8067_v51 = vpop.f32.mrf.mxu2  ;;  %v16667_v53 = vld [vmem:[#allocation5 + $0x52] sm:$0xff] }
 0x7c0   : > { %12596 = vmatmul.msk.f32.gmra.mxu1 %vm5674_vm4, %v8820_v54  ;;  %v8149_v21 = vadd.f32 %v8067_v51, %v7874_v57  ;;  %v7875_v54 = vadd.f32 %v16394_v5, %v7600_v11  ;;  %18963 = vst [vmem:[#allocation47_spill] sm:$0xff] %v16667_v53  ;;  %v7325_v57 = vadd.f32 %v16389_v39, %v16267_v59  ;;  %v7924_v11 = vld [vmem:[#allocation4 + $0x15a] sm:$0xff] }
 0x7c2   : > { %v8185_v44 = vadd.f32 %v16547_v58, %v8149_v21  ;;  %v7601_v5 = vadd.f32 %v16403_v36, %v7325_v57  ;;  %v16677_v21 = vpop.f32.mrf.mxu3  ;;  %v7326_v36 = vadd.f32 %v16401_v20, %v16279_v25 }
 0x7c4   : > { %v8217_v62 = vmax.f32 %v8185_v44, 0.0  ;;  %12516 = vmatmul.msk.f32.gmra.mxu2 %vm5674_vm4, %v7923_v52  ;;  %v7876_v59 = vadd.f32 %v16406_v32, %v7601_v5  ;;  %v7602_v57 = vadd.f32 %v16413_v23, %v7326_v36 }
 0x7c5   : > { %v8370_v48 = vld [vmem:[#allocation5 + $0x61] sm:$0xff] }
 0x7c6   : > { %v16660_v37 = vld [vmem:[#allocation5 + $0x60] sm:$0xff]  ;;  %8304 = vst.msk [vmem:[#allocation5 + $0x69] sm:$0xff] %vm5674_vm4, %v8217_v62  ;;  %12533 = vmatmul.msk.f32.gmra.mxu3 %vm5674_vm4, %v8370_v48 }
 0x7c7   : > { %12565 = vmatmul.msk.f32.gmra.mxu0 %vm5674_vm4, %v16660_v37  ;;  %v8070_v55 = vpop.f32.mrf.mxu2 }
 0x7c8   : > { %12597 = vmatmul.msk.f32.gmra.mxu1 %vm5674_vm4, %v16667_v53  ;;  %v8150_v51 = vadd.f32 %v8070_v55, %v7875_v54  ;;  %v16684_v53 = vpop.f32.mrf.mxu0  ;;  %v16695_v55 = vpop.f32.mrf.mxu1 }
 0x7ca   : > { %v8186_v12 = vadd.f32 %v16547_v58, %v8150_v51  ;;  %v7925_v51 = vld [vmem:[#allocation4 + $0x16a] sm:$0xff] }
 0x7cc   : > { %v8218_v44 = vmax.f32 %v8186_v12, 0.0  ;;  %12517 = vmatmul.msk.f32.gmra.mxu2 %vm5674_vm4, %v7924_v11  ;;  %v16700_v12 = vpop.f32.mrf.mxu3 }
 0x7cd   : > { %v8371_v52 = vld [vmem:[#allocation5 + $0x69] sm:$0xff] }
 0x7ce   : > { %v16680_v62 = vld [vmem:[#allocation5 + $0x68] sm:$0xff]  ;;  %8305 = vst.msk [vmem:[#allocation5 + $0x79] sm:$0xff] %vm5674_vm4, %v8218_v44  ;;  %12534 = vmatmul.msk.f32.gmra.mxu3 %vm5674_vm4, %v8371_v52  ;;  %v7877_v52 = vadd.f32 %v16416_v17, %v7602_v57 }
 0x7cf   : > { %18964 = vst [vmem:[#allocation65_spill] sm:$0xff] %v16680_v62  ;;  %v16682_v48 = vld [vmem:[#allocation5 + $0x62] sm:$0xff]  ;;  %12566 = vmatmul.msk.f32.gmra.mxu0 %vm5674_vm4, %v16680_v62  ;;  %v8073_v39 = vpop.f32.mrf.mxu2  ;;  %v16709_v25 = vld [vmem:[#allocation5 + $0x6a] sm:$0xff] }
 0x7d0   : > { %18965 = vst [vmem:[#allocation52_spill] sm:$0xff] %v16682_v48  ;;  %12598 = vmatmul.msk.f32.gmra.mxu1 %vm5674_vm4, %v16682_v48  ;;  %v8151_v54 = vadd.f32 %v8073_v39, %v7876_v59  ;;  %v16713_v23 = vpop.f32.mrf.mxu0  ;;  %v7327_v59 = vadd.f32 %v16418_v0, %v16291_v22  ;;  %v7926_v57 = vld [vmem:[#allocation4 + $0x172] sm:$0xff] }
 0x7d1   : > { %18966 = vst [vmem:[#allocation10_spill] sm:$0xff] %v16709_v25 }
 0x7d2   : > { %v8187_v32 = vadd.f32 %v16547_v58, %v8151_v54  ;;  %v7603_v17 = vadd.f32 %v16425_v45, %v7327_v59  ;;  %v16719_v54 = vpop.f32.mrf.mxu1  ;;  %v7328_v45 = vadd.f32 %v16432_v42, %v16303_v63  ;;  %v7329_v42 = vadd.f32 %v16449_v19, %v16315_v31 }
 0x7d4   : > { %v8219_v5 = vmax.f32 %v8187_v32, 0.0  ;;  %12518 = vmatmul.msk.f32.gmra.mxu2 %vm5674_vm4, %v7925_v51  ;;  %v16731_v22 = vpop.f32.mrf.mxu3 }
 0x7d5   : > { %v8372_v11 = vld [vmem:[#allocation5 + $0x79] sm:$0xff] }
 0x7d6   : > { %v16702_v44 = vld [vmem:[#allocation5 + $0x78] sm:$0xff]  ;;  %8306 = vst.msk [vmem:[#allocation5 + $0x81] sm:$0xff] %vm5674_vm4, %v8219_v5  ;;  %12535 = vmatmul.msk.f32.gmra.mxu3 %vm5674_vm4, %v8372_v11 }
 0x7d7   : > { %12567 = vmatmul.msk.f32.gmra.mxu0 %vm5674_vm4, %v16702_v44  ;;  %v8076_v20 = vpop.f32.mrf.mxu2 }
 0x7d8   : > { %12599 = vmatmul.msk.f32.gmra.mxu1 %vm5674_vm4, %v16709_v25  ;;  %v8152_v39 = vadd.f32 %v8076_v20, %v7877_v52  ;;  %v7878_v25 = vadd.f32 %v16428_v35, %v7603_v17  ;;  %v16737_v20 = vpop.f32.mrf.mxu0  ;;  %v7604_v35 = vadd.f32 %v16437_v33, %v7328_v45 }
 0x7da   : > { %v8188_v36 = vadd.f32 %v16547_v58, %v8152_v39  ;;  %v16741_v17 = vpop.f32.mrf.mxu1 }
 0x7dc   : > { %v8220_v32 = vmax.f32 %v8188_v36, 0.0  ;;  %12519 = vmatmul.msk.f32.gmra.mxu2 %vm5674_vm4, %v7926_v57 }
 0x7dd   : > { %v8373_v51 = vld [vmem:[#allocation5 + $0x81] sm:$0xff] }
 0x7de   : > { %v16722_v5 = vld [vmem:[#allocation5 + $0x80] sm:$0xff]  ;;  %8307 = vst.msk [vmem:[#allocation5 + $0x91] sm:$0xff] %vm5674_vm4, %v8220_v32  ;;  %12536 = vmatmul.msk.f32.gmra.mxu3 %vm5674_vm4, %v8373_v51  ;;  %v7879_v32 = vadd.f32 %v16440_v34, %v7604_v35  ;;  %v7605_v34 = vadd.f32 %v16451_v28, %v7329_v42  ;;  %v7330_v28 = vadd.f32 %v16463_v61, %v16331_v43 }
 0x7df   : > { %v16724_v11 = vld [vmem:[#allocation5 + $0x7a] sm:$0xff]  ;;  %12568 = vmatmul.msk.f32.gmra.mxu0 %vm5674_vm4, %v16722_v5  ;;  %v8079_v0 = vpop.f32.mrf.mxu2  ;;  %v16755_v63 = vld [vmem:[#allocation5 + $0x82] sm:$0xff] }
 0x7e0   : > { %18967 = vst [vmem:[#allocation64_spill] sm:$0xff] %v16724_v11  ;;  %12600 = vmatmul.msk.f32.gmra.mxu1 %vm5674_vm4, %v16724_v11  ;;  %v8153_v52 = vadd.f32 %v8079_v0, %v7878_v25  ;;  %v16761_v25 = vpop.f32.mrf.mxu3  ;;  %v16765_v0 = vpop.f32.mrf.mxu0  ;;  %v7880_v31 = vadd.f32 %v16454_v30, %v7605_v34  ;;  %v7606_v30 = vadd.f32 %v16465_v24, %v7330_v28 }
 0x7e1   : > { %18969 = vst [vmem:[#allocation49_spill] sm:$0xff] %v16755_v63 }
 0x7e2   : > { %v8189_v59 = vadd.f32 %v16547_v58, %v8153_v52  ;;  %v16777_v19 = vpop.f32.mrf.mxu1 }
 0x7e4   : > { %v8221_v39 = vmax.f32 %v8189_v59, 0.0  ;;  %12520 = vmatmul.msk.f32.gmra.mxu2 %vm5674_vm4, %v16319_v6 }
 0x7e5   : > { %v16745_v36 = vld [vmem:[#allocation5 + $0x91] sm:$0xff] }
 0x7e6   : > { %18968 = vst [vmem:[#allocation50_spill] sm:$0xff] %v16745_v36  ;;  %v16747_v57 = vld [vmem:[#allocation5 + $0x90] sm:$0xff]  ;;  %12537 = vmatmul.msk.f32.gmra.mxu3 %vm5674_vm4, %v16745_v36 }
 0x7e7   : > { %8308 = vst.msk [vmem:[#allocation5 + $0x99] sm:$0xff] %vm5674_vm4, %v8221_v39  ;;  %12569 = vmatmul.msk.f32.gmra.mxu0 %vm5674_vm4, %v16747_v57  ;;  %v8082_v6 = vpop.f32.mrf.mxu2 }
 0x7e8   : > { %12601 = vmatmul.msk.f32.gmra.mxu1 %vm5674_vm4, %v16755_v63  ;;  %v8154_v33 = vadd.f32 %v8082_v6, %v7879_v32  ;;  %v7929_v32 = vld [vmem:[#allocation4 + $0x19a] sm:$0xff]  ;;  %v16789_v42 = vpop.f32.mrf.mxu3 }
 0x7ea   : > { %v8190_v51 = vadd.f32 %v16547_v58, %v8154_v33  ;;  %v16800_v43 = vpop.f32.mrf.mxu1 }
 0x7ec   : > { %v8222_v45 = vmax.f32 %v8190_v51, 0.0  ;;  %12521 = vmatmul.msk.f32.gmra.mxu2 %vm5674_vm4, %v16335_v29 }
 0x7ee   : > { %v16769_v52 = vld [vmem:[#allocation5 + $0x99] sm:$0xff]  ;;  %8309 = vst.msk [vmem:[#allocation5 + $0xa9] sm:$0xff] %vm5674_vm4, %v8222_v45  ;;  %v16796_v45 = vpop.f32.mrf.mxu0 }
 0x7ef   : > { %18970 = vst [vmem:[#allocation13_spill] sm:$0xff] %v16769_v52  ;;  %v16771_v35 = vld [vmem:[#allocation5 + $0x98] sm:$0xff]  ;;  %12538 = vmatmul.msk.f32.gmra.mxu3 %vm5674_vm4, %v16769_v52  ;;  %v8085_v29 = vpop.f32.mrf.mxu2  ;;  %v7881_v52 = vadd.f32 %v16472_v56, %v7606_v30 }
 0x7f0   : > { %v16773_v59 = vld [vmem:[#allocation5 + $0x92] sm:$0xff]  ;;  %12570 = vmatmul.msk.f32.gmra.mxu0 %vm5674_vm4, %v16771_v35  ;;  %v8155_v39 = vadd.f32 %v8085_v29, %v7880_v31  ;;  %v16806_v61 = vld [vmem:[#allocation5 + $0x9a] sm:$0xff]  ;;  %v7331_v31 = vadd.f32 %v16478_v49, %v16347_v50  ;;  %v16815_v30 = vpop.f32.mrf.mxu3 }
 0x7f1   : > { %18971 = vst [vmem:[#allocation55_spill] sm:$0xff] %v16773_v59  ;;  %12602 = vmatmul.msk.f32.gmra.mxu1 %vm5674_vm4, %v16773_v59  ;;  %v7930_v29 = vld [vmem:[#allocation4 + $0x1a2] sm:$0xff] }
 0x7f2   : > { %v8191_v6 = vadd.f32 %v16547_v58, %v8155_v39  ;;  %18973 = vst [vmem:[#allocation51_spill] sm:$0xff] %v16806_v61  ;;  %v7607_v28 = vadd.f32 %v16475_v46, %v7331_v31  ;;  %v7332_v46 = vadd.f32 %v16501_v27, %v16356_v41  ;;  %v18980_v27 = vld [vmem:[#allocation11_spill] sm:$0xff] }
 0x7f4   : > { %v8223_v33 = vmax.f32 %v8191_v6, 0.0  ;;  %12522 = vmatmul.msk.f32.gmra.mxu2 %vm5674_vm4, %v7929_v32 }
 0x7f5   : > { %v16792_v34 = vld [vmem:[#allocation5 + $0xa9] sm:$0xff] }
 0x7f6   : > { %18972 = vst [vmem:[#allocation7_spill] sm:$0xff] %v16792_v34  ;;  %v16794_v51 = vld [vmem:[#allocation5 + $0xa8] sm:$0xff]  ;;  %v16831_v49 = vpop.f32.mrf.mxu0 }
 0x7f7   : > { %8310 = vst.msk [vmem:[#allocation5 + $0xb1] sm:$0xff] %vm5674_vm4, %v8223_v33  ;;  %12539 = vmatmul.msk.f32.gmra.mxu3 %vm5674_vm4, %v16792_v34  ;;  %v8088_v24 = vpop.f32.mrf.mxu2 }
 0x7f8   : > { %12571 = vmatmul.msk.f32.gmra.mxu0 %vm5674_vm4, %v16794_v51  ;;  %v8156_v56 = vadd.f32 %v8088_v24, %v7881_v52  ;;  %18976 = vst [vmem:[#allocation54_spill] sm:$0xff] %v16831_v49  ;;  %v16835_v52 = vpop.f32.mrf.mxu1  ;;  %v7608_v24 = vadd.f32 %v16488_v26, %v7332_v46  ;;  %v18983_v46 = vld [vmem:[#allocation33_spill] sm:$0xff] }
 0x7f9   : > { %12603 = vmatmul.msk.f32.gmra.mxu1 %vm5674_vm4, %v16806_v61  ;;  %v7882_v61 = vadd.f32 %v16484_v38, %v7607_v28 }
 0x7fa   : > { %v8192_v39 = vadd.f32 %v16547_v58, %v8156_v56 }
 0x7fc   : > { %v8224_v32 = vmax.f32 %v8192_v39, 0.0  ;;  %12523 = vmatmul.msk.f32.gmra.mxu2 %vm5674_vm4, %v7930_v29  ;;  %v16845_v39 = vpop.f32.mrf.mxu3 }
 0x7fd   : > { %18978 = vst [vmem:[#allocation56_spill] sm:$0xff] %v16845_v39 }
 0x7fe   : > { %v16817_v6 = vld [vmem:[#allocation5 + $0xb1] sm:$0xff]  ;;  %8311 = vst.msk [vmem:[#allocation5 + $0xc1] sm:$0xff] %vm5674_vm4, %v8224_v32  ;;  %v7883_v32 = vadd.f32 %v16507_v47, %v7608_v24  ;;  %v16861_v47 = vpop.f32.mrf.mxu0 }
 0x7ff   : > { %18974 = vst [vmem:[#allocation53_spill] sm:$0xff] %v16817_v6  ;;  %v16819_v33 = vld [vmem:[#allocation5 + $0xb0] sm:$0xff]  ;;  %12540 = vmatmul.msk.f32.gmra.mxu3 %vm5674_vm4, %v16817_v6  ;;  %v8091_v50 = vpop.f32.mrf.mxu2 }
 0x800   : > { %v16821_v34 = vld [vmem:[#allocation5 + $0xaa] sm:$0xff]  ;;  %12572 = vmatmul.msk.f32.gmra.mxu0 %vm5674_vm4, %v16819_v33  ;;  %v8157_v38 = vadd.f32 %v8091_v50, %v7882_v61  ;;  %v16853_v41 = vld [vmem:[#allocation5 + $0xb2] sm:$0xff]  ;;  %v16859_v50 = vpop.f32.mrf.mxu1  ;;  %18982 = vst [vmem:[#allocation58_spill] sm:$0xff] %v16861_v47 }
 0x801   : > { %18975 = vst [vmem:[#allocation14_spill] sm:$0xff] %v16821_v34  ;;  %12604 = vmatmul.msk.f32.gmra.mxu1 %vm5674_vm4, %v16821_v34 }
 0x802   : > { %v8193_v31 = vadd.f32 %v16547_v58, %v8157_v38  ;;  %18979 = vst [vmem:[#allocation57_spill] sm:$0xff] %v16853_v41 }
 0x803   : > { %18981 = vst [vmem:[#allocation59_spill] sm:$0xff] %v16859_v50 }
 0x804   : > { %v8225_v56 = vmax.f32 %v8193_v31, 0.0  ;;  %12623 = vmatmul.msk.f32.vlgmr.msrb.gmra.mxu2 %vm5674_vm4, %v16566_v40  ;;  %v7333_v40 = vadd.f32 %v16520_v60, %v18980_v27  ;;  %v18988_v27 = vld [vmem:[#allocation18_spill] sm:$0xff] }
 0x805   : > { %v16841_v29 = vld [vmem:[#allocation5 + $0xc1] sm:$0xff] }
 0x806   : > { %18977 = vst [vmem:[#allocation17_spill] sm:$0xff] %v16841_v29  ;;  %v16843_v28 = vld [vmem:[#allocation5 + $0xc0] sm:$0xff]  ;;  %v7609_v38 = vadd.f32 %v18983_v46, %v7333_v40  ;;  %v18989_v46 = vld [vmem:[#allocation34_spill] sm:$0xff] }
 0x807   : > { %8312 = vst.msk [vmem:[#allocation5 + $0xc9] sm:$0xff] %vm5674_vm4, %v8225_v56  ;;  %12541 = vmatmul.msk.f32.gmra.mxu3 %vm5674_vm4, %v16841_v29  ;;  %v8094_v26 = vpop.f32.mrf.mxu2 }
 0x808   : > { %12573 = vmatmul.msk.f32.gmra.mxu0 %vm5674_vm4, %v16843_v28  ;;  %v8158_v61 = vadd.f32 %v8094_v26, %v7883_v32  ;;  %v7884_v60 = vadd.f32 %v16523_v10, %v7609_v38  ;;  %v16881_v32 = vpop.f32.mrf.mxu3  ;;  %v18987_v26 = vld [vmem:[#allocation15_spill] sm:$0xff] }
 0x809   : > { %12605 = vmatmul.msk.f32.gmra.mxu1 %vm5674_vm4, %v16853_v41  ;;  %18986 = vst [vmem:[#allocation63_spill] sm:$0xff] %v16881_v32  ;;  %v7334_v40 = vadd.f32 %v18988_v27, %v18987_v26  ;;  %v18992_v32 = vld [vmem:[#allocation16_spill] sm:$0xff]  ;;  %v18995_v26 = vld [vmem:[#allocation38_spill] sm:$0xff] }
 0x80a   : > { %v8194_v24 = vadd.f32 %v16547_v58, %v8158_v61 }
 0x80b   : > { %v7610_v10 = vadd.f32 %v18989_v46, %v7334_v40 }
 0x80c   : > { %v8226_v31 = vmax.f32 %v8194_v24, 0.0  ;;  %12624 = vmatmul.msk.f32.gmra.mxu2 %vm5674_vm4, %v16579_v13  ;;  %v16887_v24 = vpop.f32.mrf.mxu1 }
 0x80d   : > { %18990 = vst [vmem:[#allocation62_spill] sm:$0xff] %v16887_v24 }
 0x80e   : > { %v16867_v56 = vld [vmem:[#allocation5 + $0xc9] sm:$0xff]  ;;  %8313 = vst.msk [vmem:[#allocation5 + $0xd9] sm:$0xff] %vm5674_vm4, %v8226_v31 }
 0x80f   : > { %18984 = vst [vmem:[#allocation60_spill] sm:$0xff] %v16867_v56  ;;  %v16869_v49 = vld [vmem:[#allocation5 + $0xc8] sm:$0xff]  ;;  %12542 = vmatmul.msk.f32.gmra.mxu3 %vm5674_vm4, %v16867_v56  ;;  %v8097_v13 = vpop.f32.mrf.mxu2 }
 0x810   : > { %v16871_v39 = vld [vmem:[#allocation5 + $0xc2] sm:$0xff]  ;;  %12574 = vmatmul.msk.f32.gmra.mxu0 %vm5674_vm4, %v16869_v49  ;;  %v8159_v61 = vadd.f32 %v8097_v13, %v7884_v60  ;;  %v16901_v60 = vld [vmem:[#allocation5 + $0xca] sm:$0xff] }
 0x811   : > { %18985 = vst [vmem:[#allocation61_spill] sm:$0xff] %v16871_v39  ;;  %12606 = vmatmul.msk.f32.gmra.mxu1 %vm5674_vm4, %v16871_v39  ;;  %v7885_v39 = vadd.f32 %v18992_v32, %v7610_v10  ;;  %v18994_v13 = vld [vmem:[#allocation20_spill] sm:$0xff]  ;;  %v18996_v32 = vld [vmem:[#allocation35_spill] sm:$0xff] }
 0x812   : > { %v8195_v38 = vadd.f32 %v16547_v58, %v8159_v61  ;;  %18993 = vst [vmem:[#allocation8_spill] sm:$0xff] %v16901_v60  ;;  %v7335_v27 = vadd.f32 %v18995_v26, %v18994_v13 }
 0x814   : > { %v8724_v31 = vpop.f32.mrf.mxu0  ;;  %v8227_v47 = vmax.f32 %v8195_v38, 0.0  ;;  %12625 = vmatmul.msk.f32.gmra.mxu2 %vm5674_vm4, %v16593_v4  ;;  %v7611_v46 = vadd.f32 %v18996_v32, %v7335_v27 }
 0x815   : > { %v16891_v50 = vld [vmem:[#allocation5 + $0xd9] sm:$0xff] }
 0x816   : > { %18991 = vst [vmem:[#allocation12_spill] sm:$0xff] %v16891_v50  ;;  %v16893_v56 = vld [vmem:[#allocation5 + $0xd8] sm:$0xff] }
 0x817   : > { %8314 = vst.msk [vmem:[#allocation5 + $0xe1] sm:$0xff] %vm5674_vm4, %v8227_v47  ;;  %12543 = vmatmul.msk.f32.gmra.mxu3 %vm5674_vm4, %v16891_v50  ;;  %v8100_v4 = vpop.f32.mrf.mxu2 }
 0x818   : > { %12575 = vmatmul.msk.f32.gmra.mxu0 %vm5674_vm4, %v16893_v56  ;;  %v8160_v40 = vadd.f32 %v8100_v4, %v7885_v39  ;;  %v18999_v39 = vld [vmem:[#allocation19_spill] sm:$0xff] }
 0x819   : > { %12607 = vmatmul.msk.f32.gmra.mxu1 %vm5674_vm4, %v16901_v60  ;;  %v8515_v61 = vpop.f32.mrf.mxu3  ;;  %v7886_v4 = vadd.f32 %v18999_v39, %v7611_v46 }
 0x81a   : > { %v8196_v47 = vadd.f32 %v16547_v58, %v8160_v40  ;;  %v16909_v10 = vadd.f32 %v8724_v31, %v8515_v61  ;;  %v19000_v31 = vld [vmem:[#allocation22_spill] sm:$0xff]  ;;  %v19001_v61 = vld [vmem:[#allocation40_spill] sm:$0xff] }
 0x81b   : > { %v7336_v26 = vadd.f32 %v16557_v14, %v19000_v31  ;;  %v19003_v14 = vld [vmem:[#allocation41_spill] sm:$0xff] }
 0x81c   : > { %v8727_v38 = vpop.f32.mrf.mxu0  ;;  %v8228_v24 = vmax.f32 %v8196_v47, 0.0  ;;  %12626 = vmatmul.msk.f32.gmra.mxu2 %vm5674_vm4, %v16609_v8  ;;  %v19006_v31 = vld [vmem:[#allocation21_spill] sm:$0xff] }
 0x81d   : > { %v16911_v50 = vpop.f32.mrf.mxu1  ;;  %v7612_v32 = vadd.f32 %v19001_v61, %v7336_v26  ;;  %v19007_v61 = vld [vmem:[#allocation39_spill] sm:$0xff] }
 0x81e   : > { %v16915_v60 = vld [vmem:[#allocation5 + $0xe1] sm:$0xff]  ;;  %8315 = vst.msk [vmem:[#allocation5 + $0xf1] sm:$0xff] %vm5674_vm4, %v8228_v24 }
 0x81f   : > { %18997 = vst [vmem:[#allocation11_spill] sm:$0xff] %v16915_v60  ;;  %v16917_v29 = vld [vmem:[#allocation5 + $0xe0] sm:$0xff]  ;;  %12544 = vmatmul.msk.f32.gmra.mxu3 %vm5674_vm4, %v16915_v60  ;;  %v8103_v8 = vpop.f32.mrf.mxu2 }
 0x820   : > { %v16919_v13 = vld [vmem:[#allocation5 + $0xda] sm:$0xff]  ;;  %12576 = vmatmul.msk.f32.gmra.mxu0 %vm5674_vm4, %v16917_v29  ;;  %v8161_v27 = vadd.f32 %v8103_v8, %v7886_v4  ;;  %v7887_v4 = vadd.f32 %v19003_v14, %v7612_v32 }
 0x821   : > { %18998 = vst [vmem:[#allocation33_spill] sm:$0xff] %v16919_v13  ;;  %12608 = vmatmul.msk.f32.gmra.mxu1 %vm5674_vm4, %v16919_v13  ;;  %v8518_v40 = vpop.f32.mrf.mxu3  ;;  %v19005_v8 = vld [vmem:[#allocation23_spill] sm:$0xff] }
 0x822   : > { %v8197_v46 = vadd.f32 %v16547_v58, %v8161_v27  ;;  %v16933_v24 = vadd.f32 %v8727_v38, %v8518_v40  ;;  %v16949_v38 = vld [vmem:[#allocation5 + $0xe2] sm:$0xff]  ;;  %v7337_v26 = vadd.f32 %v19006_v31, %v19005_v8 }
 0x823   : > { %19004 = vst [vmem:[#allocation18_spill] sm:$0xff] %v16949_v38  ;;  %v19013_v31 = vld [vmem:[#allocation24_spill] sm:$0xff] }
 0x824   : > { %v8730_v47 = vpop.f32.mrf.mxu0  ;;  %v8229_v39 = vmax.f32 %v8197_v46, 0.0  ;;  %12627 = vmatmul.msk.f32.gmra.mxu2 %vm5674_vm4, %v16625_v15  ;;  %v7613_v32 = vadd.f32 %v19007_v61, %v7337_v26  ;;  %v19014_v61 = vld [vmem:[#allocation42_spill] sm:$0xff] }
 0x825   : > { %v16935_v60 = vpop.f32.mrf.mxu1  ;;  %v16939_v13 = vld [vmem:[#allocation5 + $0xf1] sm:$0xff] }
 0x826   : > { %19002 = vst [vmem:[#allocation15_spill] sm:$0xff] %v16939_v13  ;;  %v16941_v41 = vld [vmem:[#allocation5 + $0xf0] sm:$0xff] }
 0x827   : > { %8316 = vst.msk [vmem:[#allocation5 + $0xf9] sm:$0xff] %vm5674_vm4, %v8229_v39  ;;  %12545 = vmatmul.msk.f32.gmra.mxu3 %vm5674_vm4, %v16939_v13  ;;  %v8106_v15 = vpop.f32.mrf.mxu2 }
 0x828   : > { %12577 = vmatmul.msk.f32.gmra.mxu0 %vm5674_vm4, %v16941_v41  ;;  %v8162_v27 = vadd.f32 %v8106_v15, %v7887_v4  ;;  %v19011_v4 = vld [vmem:[#allocation44_spill] sm:$0xff] }
 0x829   : > { %12609 = vmatmul.msk.f32.gmra.mxu1 %vm5674_vm4, %v16949_v38  ;;  %v8521_v40 = vpop.f32.mrf.mxu3  ;;  %v7888_v15 = vadd.f32 %v19011_v4, %v7613_v32 }
 0x82a   : > { %v8198_v46 = vadd.f32 %v16547_v58, %v8162_v27  ;;  %v16957_v39 = vadd.f32 %v8730_v47, %v8521_v40  ;;  %v19012_v47 = vld [vmem:[#allocation25_spill] sm:$0xff] }
 0x82b   : > { %v7338_v26 = vadd.f32 %v19013_v31, %v19012_v47  ;;  %v19017_v47 = vld [vmem:[#allocation45_spill] sm:$0xff]  ;;  %v19019_v31 = vld [vmem:[#allocation27_spill] sm:$0xff] }
 0x82c   : > { %v8733_v14 = vpop.f32.mrf.mxu0  ;;  %v8230_v13 = vmax.f32 %v8198_v46, 0.0  ;;  %12628 = vmatmul.msk.f32.gmra.mxu2 %vm5674_vm4, %v16643_v3 }
 0x82d   : > { %v16959_v6 = vpop.f32.mrf.mxu1  ;;  %v7614_v46 = vadd.f32 %v19014_v61, %v7338_v26  ;;  %v19020_v26 = vld [vmem:[#allocation26_spill] sm:$0xff] }
 0x82e   : > { %v16963_v38 = vld [vmem:[#allocation5 + $0xf9] sm:$0xff]  ;;  %8317 = vst.msk [vmem:[#allocation5 + $0x109] sm:$0xff] %vm5674_vm4, %v8230_v13 }
 0x82f   : > { %19008 = vst [vmem:[#allocation34_spill] sm:$0xff] %v16963_v38  ;;  %v16965_v34 = vld [vmem:[#allocation5 + $0xf8] sm:$0xff]  ;;  %12546 = vmatmul.msk.f32.gmra.mxu3 %vm5674_vm4, %v16963_v38  ;;  %v8109_v3 = vpop.f32.mrf.mxu2 }
 0x830   : > { %19009 = vst [vmem:[#allocation16_spill] sm:$0xff] %v16965_v34  ;;  %v16967_v8 = vld [vmem:[#allocation5 + $0xf2] sm:$0xff]  ;;  %12578 = vmatmul.msk.f32.gmra.mxu0 %vm5674_vm4, %v16965_v34  ;;  %v8163_v27 = vadd.f32 %v8109_v3, %v7888_v15  ;;  %v7889_v15 = vadd.f32 %v19017_v47, %v7614_v46  ;;  %v19021_v46 = vld [vmem:[#allocation43_spill] sm:$0xff] }
 0x831   : > { %19010 = vst [vmem:[#allocation20_spill] sm:$0xff] %v16967_v8  ;;  %12610 = vmatmul.msk.f32.gmra.mxu1 %vm5674_vm4, %v16967_v8  ;;  %v8524_v40 = vpop.f32.mrf.mxu3 }
 0x832   : > { %v8199_v32 = vadd.f32 %v16547_v58, %v8163_v27  ;;  %v16981_v13 = vadd.f32 %v8733_v14, %v8524_v40  ;;  %v16997_v14 = vld [vmem:[#allocation5 + $0xfa] sm:$0xff]  ;;  %v7339_v27 = vadd.f32 %v19020_v26, %v19019_v31  ;;  %v19026_v26 = vld [vmem:[#allocation48_spill] sm:$0xff] }
 0x833   : > { %19018 = vst [vmem:[#allocation19_spill] sm:$0xff] %v16997_v14 }
 0x834   : > { %v8736_v4 = vpop.f32.mrf.mxu0  ;;  %v8231_v38 = vmax.f32 %v8199_v32, 0.0  ;;  %12629 = vmatmul.msk.f32.gmra.mxu2 %vm5674_vm4, %v16660_v37  ;;  %v7615_v32 = vadd.f32 %v19021_v46, %v7339_v27  ;;  %v19027_v46 = vld [vmem:[#allocation46_spill] sm:$0xff] }
 0x835   : > { %v16983_v59 = vpop.f32.mrf.mxu1  ;;  %v16987_v8 = vld [vmem:[#allocation5 + $0x109] sm:$0xff] }
 0x836   : > { %19015 = vst [vmem:[#allocation38_spill] sm:$0xff] %v16987_v8  ;;  %v16989_v36 = vld [vmem:[#allocation5 + $0x108] sm:$0xff] }
 0x837   : > { %19016 = vst [vmem:[#allocation35_spill] sm:$0xff] %v16989_v36  ;;  %12547 = vmatmul.msk.f32.gmra.mxu3 %vm5674_vm4, %v16987_v8  ;;  %v8112_v3 = vpop.f32.mrf.mxu2 }
 0x838   : > { %8318 = vst.msk [vmem:[#allocation5 + $0x111] sm:$0xff] %vm5674_vm4, %v8231_v38  ;;  %12579 = vmatmul.msk.f32.gmra.mxu0 %vm5674_vm4, %v16989_v36  ;;  %v8164_v40 = vadd.f32 %v8112_v3, %v7889_v15  ;;  %v7890_v15 = vadd.f32 %v16622_v16, %v7615_v32  ;;  %v19025_v3 = vld [vmem:[#allocation28_spill] sm:$0xff] }
 0x839   : > { %12611 = vmatmul.msk.f32.gmra.mxu1 %vm5674_vm4, %v16997_v14  ;;  %v8527_v61 = vpop.f32.mrf.mxu3  ;;  %v7340_v27 = vadd.f32 %v19026_v26, %v19025_v3  ;;  %v19031_v3 = vld [vmem:[#allocation29_spill] sm:$0xff] }
 0x83a   : > { %v8200_v38 = vadd.f32 %v16547_v58, %v8164_v40  ;;  %v17005_v47 = vadd.f32 %v8736_v4, %v8527_v61  ;;  %v7341_v26 = vadd.f32 %v16653_v1, %v19031_v3 }
 0x83c   : > { %v8739_v8 = vpop.f32.mrf.mxu0  ;;  %v8232_v63 = vmax.f32 %v8200_v38, 0.0  ;;  %12630 = vmatmul.msk.f32.gmra.mxu2 %vm5674_vm4, %v16680_v62  ;;  %v7616_v38 = vadd.f32 %v19027_v46, %v7340_v27 }
 0x83d   : > { %v17009_v11 = vpop.f32.mrf.mxu1 }
 0x83e   : > { %19022 = vst [vmem:[#allocation22_spill] sm:$0xff] %v17009_v11  ;;  %v7891_v11 = vadd.f32 %v16641_v2, %v7616_v38 }
 0x83f   : > { %v17011_v14 = vld [vmem:[#allocation5 + $0x111] sm:$0xff]  ;;  %8319 = vst.msk [vmem:[#allocation5 + $0x121] sm:$0xff] %vm5674_vm4, %v8232_v63  ;;  %v8115_v4 = vpop.f32.mrf.mxu2 }
 0x840   : > { %19023 = vst [vmem:[#allocation40_spill] sm:$0xff] %v17011_v14  ;;  %v17013_v48 = vld [vmem:[#allocation5 + $0x110] sm:$0xff]  ;;  %12548 = vmatmul.msk.f32.gmra.mxu3 %vm5674_vm4, %v17011_v14  ;;  %v8165_v40 = vadd.f32 %v8115_v4, %v7890_v15 }
 0x841   : > { %v17015_v31 = vld [vmem:[#allocation5 + $0x10a] sm:$0xff]  ;;  %12580 = vmatmul.msk.f32.gmra.mxu0 %vm5674_vm4, %v17013_v48  ;;  %v8530_v61 = vpop.f32.mrf.mxu3 }
 0x842   : > { %19024 = vst [vmem:[#allocation41_spill] sm:$0xff] %v17015_v31  ;;  %12612 = vmatmul.msk.f32.gmra.mxu1 %vm5674_vm4, %v17015_v31  ;;  %v8201_v16 = vadd.f32 %v16547_v58, %v8165_v40  ;;  %v17029_v63 = vadd.f32 %v8739_v8, %v8530_v61  ;;  %v17043_v8 = vld [vmem:[#allocation5 + $0x112] sm:$0xff] }
 0x843   : > { %19030 = vst [vmem:[#allocation39_spill] sm:$0xff] %v17043_v8 }
 0x844   : > { %v8742_v32 = vpop.f32.mrf.mxu0  ;;  %v8233_v14 = vmax.f32 %v8201_v16, 0.0  ;;  %12631 = vmatmul.msk.f32.gmra.mxu2 %vm5674_vm4, %v16702_v44 }
 0x845   : > { %v17045_v15 = vpop.f32.mrf.mxu1 }
 0x846   : > { %v17033_v62 = vld [vmem:[#allocation5 + $0x121] sm:$0xff]  ;;  %8320 = vst.msk [vmem:[#allocation5 + $0x129] sm:$0xff] %vm5674_vm4, %v8233_v14  ;;  %v7617_v14 = vadd.f32 %v16635_v9, %v7341_v26 }
 0x847   : > { %19028 = vst [vmem:[#allocation23_spill] sm:$0xff] %v17033_v62  ;;  %v17035_v31 = vld [vmem:[#allocation5 + $0x120] sm:$0xff]  ;;  %v8118_v4 = vpop.f32.mrf.mxu2 }
 0x848   : > { %19029 = vst [vmem:[#allocation21_spill] sm:$0xff] %v17035_v31  ;;  %12549 = vmatmul.msk.f32.gmra.mxu3 %vm5674_vm4, %v17033_v62  ;;  %v8166_v2 = vadd.f32 %v8118_v4, %v7891_v11  ;;  %v7892_v1 = vadd.f32 %v16669_v18, %v7617_v14  ;;  %v19034_v11 = vld [vmem:[#allocation30_spill] sm:$0xff] }
 0x849   : > { %12581 = vmatmul.msk.f32.gmra.mxu0 %vm5674_vm4, %v17035_v31  ;;  %v8533_v27 = vpop.f32.mrf.mxu3 }
 0x84a   : > { %12613 = vmatmul.msk.f32.gmra.mxu1 %vm5674_vm4, %v17043_v8  ;;  %v8202_v40 = vadd.f32 %v16547_v58, %v8166_v2  ;;  %v17053_v61 = vadd.f32 %v8742_v32, %v8533_v27  ;;  %v7342_v32 = vadd.f32 %v16677_v21, %v19034_v11 }
 0x84c   : > { %v8745_v46 = vpop.f32.mrf.mxu0  ;;  %v8234_v38 = vmax.f32 %v8202_v40, 0.0  ;;  %12632 = vmatmul.msk.f32.gmra.mxu2 %vm5674_vm4, %v16722_v5  ;;  %v7618_v18 = vadd.f32 %v16657_v7, %v7342_v32 }
 0x84d   : > { %v17057_v16 = vld [vmem:[#allocation5 + $0x129] sm:$0xff]  ;;  %v17073_v3 = vpop.f32.mrf.mxu1 }
 0x84e   : > { %19032 = vst [vmem:[#allocation44_spill] sm:$0xff] %v17057_v16  ;;  %v17059_v62 = vld [vmem:[#allocation5 + $0x128] sm:$0xff]  ;;  %v7893_v21 = vadd.f32 %v16695_v55, %v7618_v18 }
 0x84f   : > { %v17061_v8 = vld [vmem:[#allocation5 + $0x122] sm:$0xff]  ;;  %8321 = vst.msk [vmem:[#allocation5 + $0x139] sm:$0xff] %vm5674_vm4, %v8234_v38  ;;  %v8121_v9 = vpop.f32.mrf.mxu2  ;;  %v17091_v7 = vld [vmem:[#allocation5 + $0x12a] sm:$0xff] }
 0x850   : > { %19033 = vst [vmem:[#allocation25_spill] sm:$0xff] %v17061_v8  ;;  %12550 = vmatmul.msk.f32.gmra.mxu3 %vm5674_vm4, %v17057_v16  ;;  %v8167_v4 = vadd.f32 %v8121_v9, %v7892_v1  ;;  %v19037_v1 = vld [vmem:[#allocation32_spill] sm:$0xff] }
 0x851   : > { %12582 = vmatmul.msk.f32.gmra.mxu0 %vm5674_vm4, %v17059_v62  ;;  %v8536_v26 = vpop.f32.mrf.mxu3  ;;  %19036 = vst [vmem:[#allocation42_spill] sm:$0xff] %v17091_v7  ;;  %v7343_v9 = vadd.f32 %v16700_v12, %v19037_v1 }
 0x852   : > { %12614 = vmatmul.msk.f32.gmra.mxu1 %vm5674_vm4, %v17061_v8  ;;  %v8203_v2 = vadd.f32 %v16547_v58, %v8167_v4  ;;  %v17077_v27 = vadd.f32 %v8745_v46, %v8536_v26 }
 0x853   : > { %v7619_v55 = vadd.f32 %v16684_v53, %v7343_v9 }
 0x854   : > { %v8748_v14 = vpop.f32.mrf.mxu0  ;;  %v8235_v40 = vmax.f32 %v8203_v2, 0.0  ;;  %12633 = vmatmul.msk.f32.gmra.mxu2 %vm5674_vm4, %v16747_v57 }
 0x855   : > { %v17101_v18 = vpop.f32.mrf.mxu1 }
 0x856   : > { %v17081_v38 = vld [vmem:[#allocation5 + $0x139] sm:$0xff]  ;;  %8322 = vst.msk [vmem:[#allocation5 + $0x141] sm:$0xff] %vm5674_vm4, %v8235_v40 }
 0x857   : > { %19035 = vst [vmem:[#allocation24_spill] sm:$0xff] %v17081_v38  ;;  %v17083_v16 = vld [vmem:[#allocation5 + $0x138] sm:$0xff]  ;;  %v8124_v46 = vpop.f32.mrf.mxu2 }
 0x858   : > { %12551 = vmatmul.msk.f32.gmra.mxu3 %vm5674_vm4, %v17081_v38  ;;  %v8168_v11 = vadd.f32 %v8124_v46, %v7893_v21  ;;  %v7894_v21 = vadd.f32 %v16719_v54, %v7619_v55 }
 0x859   : > { %12583 = vmatmul.msk.f32.gmra.mxu0 %vm5674_vm4, %v17083_v16  ;;  %v8539_v32 = vpop.f32.mrf.mxu3 }
 0x85a   : > { %12615 = vmatmul.msk.f32.gmra.mxu1 %vm5674_vm4, %v17091_v7  ;;  %v8204_v4 = vadd.f32 %v16547_v58, %v8168_v11  ;;  %v17099_v26 = vadd.f32 %v8748_v14, %v8539_v32  ;;  %v19040_v14 = vld [vmem:[#allocation31_spill] sm:$0xff] }
 0x85b   : > { %v7344_v46 = vadd.f32 %v16731_v22, %v19040_v14  ;;  %v19043_v14 = vld [vmem:[#allocation9_spill] sm:$0xff] }
 0x85c   : > { %v8751_v2 = vpop.f32.mrf.mxu0  ;;  %v8236_v40 = vmax.f32 %v8204_v4, 0.0  ;;  %12634 = vmatmul.msk.f32.gmra.mxu2 %vm5674_vm4, %v16771_v35 }
 0x85d   : > { %v17105_v38 = vld [vmem:[#allocation5 + $0x141] sm:$0xff]  ;;  %v7620_v11 = vadd.f32 %v16713_v23, %v7344_v46  ;;  %v7345_v46 = vadd.f32 %v16761_v25, %v19043_v14 }
 0x85e   : > { %19038 = vst [vmem:[#allocation45_spill] sm:$0xff] %v17105_v38  ;;  %v17107_v7 = vld [vmem:[#allocation5 + $0x140] sm:$0xff] }
 0x85f   : > { %v17109_v12 = vld [vmem:[#allocation5 + $0x13a] sm:$0xff]  ;;  %8323 = vst.msk [vmem:[#allocation5 + $0x151] sm:$0xff] %vm5674_vm4, %v8236_v40  ;;  %v8127_v53 = vpop.f32.mrf.mxu2  ;;  %v17127_v40 = vpop.f32.mrf.mxu1  ;;  %v7895_v22 = vadd.f32 %v16741_v17, %v7620_v11  ;;  %v17139_v23 = vld [vmem:[#allocation5 + $0x142] sm:$0xff] }
 0x860   : > { %19039 = vst [vmem:[#allocation27_spill] sm:$0xff] %v17109_v12  ;;  %12552 = vmatmul.msk.f32.gmra.mxu3 %vm5674_vm4, %v17105_v38  ;;  %v8169_v1 = vadd.f32 %v8127_v53, %v7894_v21  ;;  %v12688_v21 = vld [vmem:[%s18540_s8 + $0x28] sm:$0xff]  ;;  %v12787_v53 = vld [vmem:[%s18540_s8 + $0x40] sm:$0xff] }
 0x861   : > { %12584 = vmatmul.msk.f32.gmra.mxu0 %vm5674_vm4, %v17107_v7  ;;  %v8542_v9 = vpop.f32.mrf.mxu3  ;;  %19042 = vst [vmem:[#allocation43_spill] sm:$0xff] %v17139_v23  ;;  %10610 = vmatpush.msra.mxu3 %v12787_v53 }
 0x862   : > { %12616 = vmatmul.msk.f32.gmra.mxu1 %vm5674_vm4, %v17109_v12  ;;  %v8205_v54 = vadd.f32 %v16547_v58, %v8169_v1  ;;  %v17123_v32 = vadd.f32 %v8751_v2, %v8542_v9  ;;  %v12754_v2 = vld [vmem:[%s18540_s8 + $0x38] sm:$0xff]  ;;  %9784 = vmatpush.msra.mxu0 %v12688_v21  ;;  %v12721_v9 = vld [vmem:[%s18540_s8 + $0x30] sm:$0xff] }
 0x863   : > { %10335 = vmatpush.msra.mxu2 %v12754_v2  ;;  %10060 = vmatpush.msra.mxu1 %v12721_v9 }
 0x864   : > { %v8754_v55 = vpop.f32.mrf.mxu0  ;;  %v8237_v4 = vmax.f32 %v8205_v54, 0.0  ;;  %12635 = vmatmul.msk.f32.gmra.mxu2 %vm5674_vm4, %v16794_v51  ;;  %v7621_v54 = vadd.f32 %v16737_v20, %v7345_v46 }
 0x866   : > { %v17129_v38 = vld [vmem:[#allocation5 + $0x151] sm:$0xff]  ;;  %8324 = vst.msk [vmem:[#allocation5 + $0x159] sm:$0xff] %vm5674_vm4, %v8237_v4 }
 0x867   : > { %19041 = vst [vmem:[#allocation26_spill] sm:$0xff] %v17129_v38  ;;  %v17131_v12 = vld [vmem:[#allocation5 + $0x150] sm:$0xff]  ;;  %v8130_v17 = vpop.f32.mrf.mxu2 }
 0x868   : > { %12553 = vmatmul.msk.f32.gmra.mxu3 %vm5674_vm4, %v17129_v38  ;;  %v8170_v1 = vadd.f32 %v8130_v17, %v7895_v22  ;;  %v7896_v17 = vadd.f32 %v16777_v19, %v7621_v54 }
 0x869   : > { %12585 = vmatmul.msk.f32.gmra.mxu0 %vm5674_vm4, %v17131_v12  ;;  %v8545_v11 = vpop.f32.mrf.mxu3 }
 0x86a   : > { %12617 = vmatmul.msk.f32.gmra.mxu1 %vm5674_vm4, %v17139_v23  ;;  %v8206_v4 = vadd.f32 %v16547_v58, %v8170_v1  ;;  %v17159_v2 = vadd.f32 %v8754_v55, %v8545_v11  ;;  %v17175_v58 = vpop.f32.mrf.mxu1  ;;  %v19046_v55 = vld [vmem:[#allocation36_spill] sm:$0xff] }
 0x86b   : > { %v7346_v53 = vadd.f32 %v16789_v42, %v19046_v55 }
 0x86c   : > { %v8238_v23 = vmax.f32 %v8206_v4, 0.0  ;;  %12636 = vmatmul.msk.f32.gmra.mxu2 %vm5674_vm4, %v16819_v33 }
 0x86d   : > { %v8757_v38 = vpop.f32.mrf.mxu0  ;;  %v17163_v25 = vld [vmem:[#allocation5 + $0x159] sm:$0xff]  ;;  %v7622_v19 = vadd.f32 %v16765_v0, %v7346_v53 }
 0x86e   : > { %19044 = vst [vmem:[#allocation28_spill] sm:$0xff] %v17163_v25  ;;  %v17165_v22 = vld [vmem:[#allocation5 + $0x158] sm:$0xff] }
 0x86f   : > { %v17167_v21 = vld [vmem:[#allocation5 + $0x152] sm:$0xff]  ;;  %8325 = vst.msk [vmem:[#allocation5 + $0x169] sm:$0xff] %vm5674_vm4, %v8238_v23  ;;  %v8133_v20 = vpop.f32.mrf.mxu2  ;;  %v12849_v23 = vld [vmem:[%s18539_s7] ss:$0 sm:$0xff]  ;;  %v7897_v42 = vadd.f32 %v16800_v43, %v7622_v19  ;;  %v17199_v0 = vld [vmem:[#allocation5 + $0x15a] sm:$0xff] }
 0x870   : > { %19045 = vst [vmem:[#allocation48_spill] sm:$0xff] %v17167_v21  ;;  %12554 = vmatmul.msk.f32.gmra.mxu3 %vm5674_vm4, %v17163_v25  ;;  %v8171_v14 = vadd.f32 %v8133_v20, %v7896_v17  ;;  %v19049_v17 = vld [vmem:[#allocation37_spill] sm:$0xff] }
 0x871   : > { %12586 = vmatmul.msk.f32.gmra.mxu0 %vm5674_vm4, %v17165_v22  ;;  %19048 = vst [vmem:[#allocation29_spill] sm:$0xff] %v17199_v0  ;;  %v7347_v20 = vadd.f32 %v16815_v30, %v19049_v17 }
 0x872   : > { %12618 = vmatmul.msk.f32.gmra.mxu1 %vm5674_vm4, %v17167_v21  ;;  %v8548_v46 = vpop.f32.mrf.mxu3  ;;  %v8207_v1 = vadd.f32 %v12849_v23, %v8171_v14  ;;  %v17205_v53 = vpop.f32.mrf.mxu1 }
 0x873   : > { %v17185_v9 = vadd.f32 %v8757_v38, %v8548_v46  ;;  %v7623_v14 = vadd.f32 %v16796_v45, %v7347_v20 }
 0x874   : > { %v8239_v54 = vmax.f32 %v8207_v1, 0.0  ;;  %12637 = vmatmul.msk.f32.gmra.mxu2 %vm5674_vm4, %v16843_v28 }
 0x875   : > { %v8760_v11 = vpop.f32.mrf.mxu0  ;;  %v7898_v30 = vadd.f32 %v16835_v52, %v7623_v14 }
 0x876   : > { %v17189_v4 = vld [vmem:[#allocation5 + $0x169] sm:$0xff]  ;;  %8326 = vst.msk [vmem:[#allocation5 + $0x171] sm:$0xff] %vm5674_vm4, %v8239_v54 }
 0x877   : > { %19047 = vst [vmem:[#allocation46_spill] sm:$0xff] %v17189_v4  ;;  %v17191_v25 = vld [vmem:[#allocation5 + $0x168] sm:$0xff]  ;;  %v8136_v38 = vpop.f32.mrf.mxu2 }
 0x878   : > { %12555 = vmatmul.msk.f32.gmra.mxu3 %vm5674_vm4, %v17189_v4  ;;  %v8172_v55 = vadd.f32 %v8136_v38, %v7897_v42 }
 0x879   : > { %12587 = vmatmul.msk.f32.gmra.mxu0 %vm5674_vm4, %v17191_v25 }
 0x87a   : > { %12619 = vmatmul.msk.f32.gmra.mxu1 %vm5674_vm4, %v17199_v0  ;;  %v8551_v43 = vpop.f32.mrf.mxu3  ;;  %v8208_v46 = vadd.f32 %v12849_v23, %v8172_v55  ;;  %v17228_v20 = vpop.f32.mrf.mxu1 }
 0x87b   : > { %v17208_v19 = vadd.f32 %v8760_v11, %v8551_v43  ;;  %v9364_v43 = vld [vmem:[#allocation5 + $0x19] sm:$0xff] }
 0x87c   : > { %v8240_v54 = vmax.f32 %v8208_v46, 0.0  ;;  %12638 = vmatmul.msk.f32.gmra.mxu2 %vm5674_vm4, %v16869_v49  ;;  %v12850_v46 = vld [vmem:[#allocation5 + $0x1a] sm:$0xff] }
 0x87d   : > { %v8763_v1 = vpop.f32.mrf.mxu0  ;;  %v17212_v4 = vld [vmem:[#allocation5 + $0x171] sm:$0xff] }
 0x87e   : > { %19050 = vst [vmem:[#allocation30_spill] sm:$0xff] %v17212_v4  ;;  %v17214_v0 = vld [vmem:[#allocation5 + $0x170] sm:$0xff] }
 0x87f   : > { %v17216_v21 = vld [vmem:[#allocation5 + $0x16a] sm:$0xff]  ;;  %8327 = vst.msk [vmem:[#allocation5 + $0x181] sm:$0xff] %vm5674_vm4, %v8240_v54  ;;  %v8139_v45 = vpop.f32.mrf.mxu2  ;;  %v17233_v14 = vld [vmem:[#allocation5 + $0x172] sm:$0xff] }
 0x880   : > { %19051 = vst [vmem:[#allocation32_spill] sm:$0xff] %v17216_v21  ;;  %12556 = vmatmul.msk.f32.gmra.mxu3 %vm5674_vm4, %v17212_v4  ;;  %v8173_v11 = vadd.f32 %v8139_v45, %v7898_v30 }
 0x881   : > { %12588 = vmatmul.msk.f32.gmra.mxu0 %vm5674_vm4, %v17214_v0  ;;  %19052 = vst [vmem:[#allocation31_spill] sm:$0xff] %v17233_v14 }
 0x882   : > { %12620 = vmatmul.msk.f32.gmra.mxu1 %vm5674_vm4, %v17216_v21  ;;  %v8554_v42 = vpop.f32.mrf.mxu3  ;;  %v8209_v38 = vadd.f32 %v12849_v23, %v8173_v11  ;;  %v17245_v45 = vpop.f32.mrf.mxu1  ;;  %v9365_v11 = vld [vmem:[#allocation5 + $0x21] sm:$0xff] }
 0x883   : > { %v17226_v17 = vadd.f32 %v8763_v1, %v8554_v42  ;;  %v12851_v42 = vld [vmem:[#allocation5 + $0x22] sm:$0xff] }
 0x884   : > { %v8241_v55 = vmax.f32 %v8209_v38, 0.0  ;;  %12639 = vmatmul.msk.f32.gmra.mxu2 %vm5674_vm4, %v16893_v56  ;;  %v9915_v38 = vld [vmem:[#allocation5 + $0x30] sm:$0xff] }
 0x885   : > { %v8766_v52 = vpop.f32.mrf.mxu0 }
 0x886   : > { %8328 = vst.msk [vmem:[#allocation5 + $0x189] sm:$0xff] %vm5674_vm4, %v8241_v55 }
 0x887   : > { %v17239_v23 = vpop.f32.mrf.mxu2 }
 0x888   : > { %12656 = vmatmul.msk.f32.vlgmr.msrb.gmra.mxu3 %vm5674_vm4, %v9364_v43 }
 0x889   : > { %12689 = vmatmul.msk.f32.vlgmr.msra.gmra.mxu0 %vm5674_vm4, %v12850_v46 }
 0x88a   : > { %12621 = vmatmul.msk.f32.gmra.mxu1 %vm5674_vm4, %v17233_v14  ;;  %v8557_v1 = vpop.f32.mrf.mxu3  ;;  %v12853_v14 = vld [vmem:[#allocation5 + $0x38] sm:$0xff] }
 0x88b   : > { %v17241_v54 = vadd.f32 %v8766_v52, %v8557_v1  ;;  %v17256_v1 = vld [vmem:[#allocation5 + $0x31] sm:$0xff] }
 0x88c   : > { %12640 = vmatmul.msk.f32.gmra.mxu2 %vm5674_vm4, %v16917_v29 }
 0x88d   : > { %v8769_v30 = vpop.f32.mrf.mxu0 }
 0x88f   : > { %v17250_v55 = vpop.f32.mrf.mxu2 }
 0x890   : > { %12657 = vmatmul.msk.f32.gmra.mxu3 %vm5674_vm4, %v9365_v11  ;;  %v9059_v11 = vadd.f32 %v16911_v50, %v16909_v10  ;;  %v17272_v50 = vld [vmem:[#allocation5 + $0x39] sm:$0xff]  ;;  %v9060_v10 = vadd.f32 %v16935_v60, %v16933_v24  ;;  %v17288_v60 = vld [vmem:[#allocation5 + $0x49] sm:$0xff]  ;;  %v9061_v24 = vadd.f32 %v16959_v6, %v16957_v39  ;;  %v17304_v6 = vld [vmem:[#allocation5 + $0x51] sm:$0xff]  ;;  %v9062_v39 = vadd.f32 %v16983_v59, %v16981_v13 }
 0x891   : > { %12690 = vmatmul.msk.f32.gmra.mxu0 %vm5674_vm4, %v12851_v42  ;;  %v12852_v42 = vld [vmem:[#allocation5 + $0x32] sm:$0xff]  ;;  %v17322_v13 = vld [vmem:[#allocation5 + $0x61] sm:$0xff] }
 0x892   : > { %12722 = vmatmul.msk.f32.vlgmr.msra.gmra.mxu1 %vm5674_vm4, %v9915_v38  ;;  %v8560_v43 = vpop.f32.mrf.mxu3  ;;  %v17263_v38 = vpop.f32.mrf.mxu1 }
 0x893   : > { %v17252_v52 = vadd.f32 %v8769_v30, %v8560_v43 }
 0x894   : > { %12641 = vmatmul.msk.f32.gmra.mxu2 %vm5674_vm4, %v16941_v41 }
 0x895   : > { %v8772_v46 = vpop.f32.mrf.mxu0 }
 0x897   : > { %v9242_v30 = vpop.f32.mrf.mxu2 }
 0x898   : > { %12658 = vmatmul.msk.f32.gmra.mxu3 %vm5674_vm4, %v17256_v1  ;;  %v17266_v43 = vadd.f32 %v9242_v30, %v9059_v11 }
 0x899   : > { %12691 = vmatmul.msk.f32.gmra.mxu0 %vm5674_vm4, %v12852_v42  ;;  %v12854_v42 = vld [vmem:[#allocation5 + $0x3a] sm:$0xff] }
 0x89a   : > { %12723 = vmatmul.msk.f32.gmra.mxu1 %vm5674_vm4, %v12853_v14  ;;  %19053 = vst [vmem:[#allocation9_spill] sm:$0xff] %v17266_v43  ;;  %v8563_v4 = vpop.f32.mrf.mxu3  ;;  %v12855_v14 = vld [vmem:[#allocation5 + $0x48] sm:$0xff]  ;;  %v17282_v11 = vpop.f32.mrf.mxu1 }
 0x89b   : > { %v17268_v21 = vadd.f32 %v8772_v46, %v8563_v4 }
 0x89c   : > { %12642 = vmatmul.msk.f32.gmra.mxu2 %vm5674_vm4, %v16965_v34 }
 0x89d   : > { %v8775_v8 = vpop.f32.mrf.mxu0 }
 0x89f   : > { %v9245_v4 = vpop.f32.mrf.mxu2 }
 0x8a0   : > { %12659 = vmatmul.msk.f32.gmra.mxu3 %vm5674_vm4, %v17272_v50  ;;  %v17280_v46 = vadd.f32 %v9245_v4, %v9060_v10  ;;  %v12857_v10 = vld [vmem:[#allocation5 + $0x50] sm:$0xff] }
 0x8a1   : > { %12692 = vmatmul.msk.f32.gmra.mxu0 %vm5674_vm4, %v12854_v42  ;;  %v12856_v42 = vld [vmem:[#allocation5 + $0x4a] sm:$0xff] }
 0x8a2   : > { %12724 = vmatmul.msk.f32.gmra.mxu1 %vm5674_vm4, %v12855_v14  ;;  %19054 = vst [vmem:[#allocation36_spill] sm:$0xff] %v17280_v46  ;;  %v8566_v30 = vpop.f32.mrf.mxu3  ;;  %v17300_v46 = vpop.f32.mrf.mxu1 }
 0x8a3   : > { %v17284_v43 = vadd.f32 %v8775_v8, %v8566_v30 }
 0x8a4   : > { %12643 = vmatmul.msk.f32.gmra.mxu2 %vm5674_vm4, %v16989_v36 }
 0x8a5   : > { %v8778_v34 = vpop.f32.mrf.mxu0 }
 0x8a7   : > { %v9248_v8 = vpop.f32.mrf.mxu2 }
 0x8a8   : > { %12660 = vmatmul.msk.f32.gmra.mxu3 %vm5674_vm4, %v17288_v60  ;;  %v17296_v14 = vadd.f32 %v9248_v8, %v9061_v24 }
 0x8a9   : > { %12693 = vmatmul.msk.f32.gmra.mxu0 %vm5674_vm4, %v12856_v42  ;;  %v19056_v42 = vld [vmem:[#allocation47_spill] sm:$0xff] }
 0x8aa   : > { %12725 = vmatmul.msk.f32.gmra.mxu1 %vm5674_vm4, %v12857_v10  ;;  %19055 = vst [vmem:[#allocation37_spill] sm:$0xff] %v17296_v14  ;;  %v8569_v4 = vpop.f32.mrf.mxu3  ;;  %v17320_v59 = vpop.f32.mrf.mxu1  ;;  %v19058_v14 = vld [vmem:[#allocation22_spill] sm:$0xff] }
 0x8ab   : > { %v17298_v30 = vadd.f32 %v8778_v34, %v8569_v4 }
 0x8ac   : > { %12644 = vmatmul.msk.f32.gmra.mxu2 %vm5674_vm4, %v17013_v48 }
 0x8ad   : > { %v8781_v36 = vpop.f32.mrf.mxu0 }
 0x8af   : > { %v9251_v34 = vpop.f32.mrf.mxu2 }
 0x8b0   : > { %12661 = vmatmul.msk.f32.gmra.mxu3 %vm5674_vm4, %v17304_v6  ;;  %v17314_v24 = vadd.f32 %v9251_v34, %v9062_v39  ;;  %v19060_v39 = vld [vmem:[#allocation65_spill] sm:$0xff] }
 0x8b1   : > { %12694 = vmatmul.msk.f32.gmra.mxu0 %vm5674_vm4, %v19056_v42  ;;  %v9063_v42 = vadd.f32 %v19058_v14, %v17005_v47  ;;  %v17338_v47 = vld [vmem:[#allocation5 + $0x69] sm:$0xff]  ;;  %v9064_v14 = vadd.f32 %v17045_v15, %v17029_v63  ;;  %v17356_v63 = vld [vmem:[#allocation5 + $0x79] sm:$0xff]  ;;  %v9065_v15 = vadd.f32 %v17073_v3, %v17053_v61  ;;  %v17374_v61 = vld [vmem:[#allocation5 + $0x81] sm:$0xff]  ;;  %v9066_v3 = vadd.f32 %v17101_v18, %v17077_v27 }
 0x8b2   : > { %12726 = vmatmul.msk.f32.gmra.mxu1 %vm5674_vm4, %v16660_v37  ;;  %19057 = vst [vmem:[#allocation47_spill] sm:$0xff] %v17314_v24  ;;  %v8572_v10 = vpop.f32.mrf.mxu3  ;;  %v19059_v37 = vld [vmem:[#allocation52_spill] sm:$0xff]  ;;  %v9067_v27 = vadd.f32 %v17127_v40, %v17099_v26  ;;  %v19067_v18 = vld [vmem:[#allocation50_spill] sm:$0xff]  ;;  %v9068_v40 = vadd.f32 %v17175_v58, %v17123_v32  ;;  %v9069_v32 = vadd.f32 %v17205_v53, %v17159_v2  ;;  %v19071_v58 = vld [vmem:[#allocation7_spill] sm:$0xff] }
 0x8b3   : > { %v17316_v8 = vadd.f32 %v8781_v36, %v8572_v10  ;;  %v9070_v2 = vadd.f32 %v17228_v20, %v17185_v9  ;;  %v19074_v53 = vld [vmem:[#allocation53_spill] sm:$0xff]  ;;  %v9071_v9 = vadd.f32 %v17245_v45, %v17208_v19  ;;  %v9072_v19 = vadd.f32 %v17263_v38, %v17226_v17  ;;  %v19081_v45 = vld [vmem:[#allocation60_spill] sm:$0xff]  ;;  %v19086_v38 = vld [vmem:[#allocation59_spill] sm:$0xff] }
 0x8b4   : > { %12645 = vmatmul.msk.f32.gmra.mxu2 %vm5674_vm4, %v17035_v31  ;;  %v19077_v20 = vld [vmem:[#allocation17_spill] sm:$0xff] }
 0x8b5   : > { %v8784_v4 = vpop.f32.mrf.mxu0 }
 0x8b7   : > { %v9254_v36 = vpop.f32.mrf.mxu2 }
 0x8b8   : > { %12662 = vmatmul.msk.f32.gmra.mxu3 %vm5674_vm4, %v17322_v13  ;;  %v17332_v34 = vadd.f32 %v9254_v36, %v9063_v42  ;;  %v17346_v42 = vpop.f32.mrf.mxu1 }
 0x8b9   : > { %12695 = vmatmul.msk.f32.gmra.mxu0 %vm5674_vm4, %v19059_v37  ;;  %v19062_v37 = vld [vmem:[#allocation10_spill] sm:$0xff] }
 0x8ba   : > { %12727 = vmatmul.msk.f32.gmra.mxu1 %vm5674_vm4, %v19060_v39  ;;  %19061 = vst [vmem:[#allocation22_spill] sm:$0xff] %v17332_v34  ;;  %v8575_v10 = vpop.f32.mrf.mxu3 }
 0x8bb   : > { %v17334_v24 = vadd.f32 %v8784_v4, %v8575_v10 }
 0x8bc   : > { %12646 = vmatmul.msk.f32.gmra.mxu2 %vm5674_vm4, %v17059_v62 }
 0x8be   : > { %v8787_v31 = vpop.f32.mrf.mxu0 }
 0x8bf   : > { %v9257_v4 = vpop.f32.mrf.mxu2 }
 0x8c0   : > { %12663 = vmatmul.msk.f32.gmra.mxu3 %vm5674_vm4, %v17338_v47  ;;  %v17350_v39 = vadd.f32 %v9257_v4, %v9064_v14  ;;  %v17368_v14 = vpop.f32.mrf.mxu1 }
 0x8c1   : > { %12696 = vmatmul.msk.f32.gmra.mxu0 %vm5674_vm4, %v19062_v37  ;;  %v19064_v37 = vld [vmem:[#allocation64_spill] sm:$0xff] }
 0x8c2   : > { %12728 = vmatmul.msk.f32.gmra.mxu1 %vm5674_vm4, %v16702_v44  ;;  %19063 = vst [vmem:[#allocation52_spill] sm:$0xff] %v17350_v39 }
 0x8c3   : > { %v8578_v36 = vpop.f32.mrf.mxu3 }
 0x8c4   : > { %v17352_v10 = vadd.f32 %v8787_v31, %v8578_v36  ;;  %12647 = vmatmul.msk.f32.gmra.mxu2 %vm5674_vm4, %v17083_v16 }
 0x8c6   : > { %v8790_v34 = vpop.f32.mrf.mxu0 }
 0x8c7   : > { %v9260_v44 = vpop.f32.mrf.mxu2 }
 0x8c8   : > { %12664 = vmatmul.msk.f32.gmra.mxu3 %vm5674_vm4, %v17356_v63  ;;  %v17366_v31 = vadd.f32 %v9260_v44, %v9065_v15 }
 0x8c9   : > { %12697 = vmatmul.msk.f32.gmra.mxu0 %vm5674_vm4, %v19064_v37 }
 0x8ca   : > { %12729 = vmatmul.msk.f32.gmra.mxu1 %vm5674_vm4, %v16722_v5  ;;  %19065 = vst [vmem:[#allocation65_spill] sm:$0xff] %v17366_v31  ;;  %v19066_v5 = vld [vmem:[#allocation49_spill] sm:$0xff] }
 0x8cb   : > { %v8581_v4 = vpop.f32.mrf.mxu3 }
 0x8cc   : > { %v17370_v36 = vadd.f32 %v8790_v34, %v8581_v4  ;;  %12648 = vmatmul.msk.f32.gmra.mxu2 %vm5674_vm4, %v17107_v7  ;;  %v17388_v4 = vpop.f32.mrf.mxu1 }
 0x8ce   : > { %v8793_v39 = vpop.f32.mrf.mxu0 }
 0x8cf   : > { %v9263_v34 = vpop.f32.mrf.mxu2 }
 0x8d0   : > { %12665 = vmatmul.msk.f32.gmra.mxu3 %vm5674_vm4, %v17374_v61  ;;  %v17384_v15 = vadd.f32 %v9263_v34, %v9066_v3 }
 0x8d1   : > { %12698 = vmatmul.msk.f32.gmra.mxu0 %vm5674_vm4, %v19066_v5  ;;  %v19068_v5 = vld [vmem:[#allocation55_spill] sm:$0xff] }
 0x8d2   : > { %12730 = vmatmul.msk.f32.gmra.mxu1 %vm5674_vm4, %v16747_v57 }
 0x8d3   : > { %v8584_v37 = vpop.f32.mrf.mxu3 }
 0x8d4   : > { %v17386_v44 = vadd.f32 %v8793_v39, %v8584_v37  ;;  %12649 = vmatmul.msk.f32.gmra.mxu2 %vm5674_vm4, %v17131_v12  ;;  %v17406_v26 = vpop.f32.mrf.mxu1 }
 0x8d6   : > { %v8796_v31 = vpop.f32.mrf.mxu0 }
 0x8d7   : > { %v9266_v57 = vpop.f32.mrf.mxu2 }
 0x8d8   : > { %12666 = vmatmul.msk.f32.gmra.mxu3 %vm5674_vm4, %v19067_v18  ;;  %v17400_v39 = vadd.f32 %v9266_v57, %v9067_v27  ;;  %v19069_v18 = vld [vmem:[#allocation13_spill] sm:$0xff] }
 0x8d9   : > { %12699 = vmatmul.msk.f32.gmra.mxu0 %vm5674_vm4, %v19068_v5  ;;  %v19070_v5 = vld [vmem:[#allocation51_spill] sm:$0xff] }
 0x8da   : > { %12731 = vmatmul.msk.f32.gmra.mxu1 %vm5674_vm4, %v16771_v35 }
 0x8db   : > { %v8587_v3 = vpop.f32.mrf.mxu3 }
 0x8dc   : > { %v17402_v34 = vadd.f32 %v8796_v31, %v8587_v3  ;;  %12650 = vmatmul.msk.f32.gmra.mxu2 %vm5674_vm4, %v17165_v22 }
 0x8de   : > { %v8799_v37 = vpop.f32.mrf.mxu0 }
 0x8df   : > { %v9269_v35 = vpop.f32.mrf.mxu2 }
 0x8e0   : > { %12667 = vmatmul.msk.f32.gmra.mxu3 %vm5674_vm4, %v19069_v18  ;;  %v17416_v31 = vadd.f32 %v9269_v35, %v9068_v40  ;;  %v19072_v18 = vld [vmem:[#allocation14_spill] sm:$0xff] }
 0x8e1   : > { %12700 = vmatmul.msk.f32.gmra.mxu0 %vm5674_vm4, %v19070_v5 }
 0x8e2   : > { %12732 = vmatmul.msk.f32.gmra.mxu1 %vm5674_vm4, %v16794_v51  ;;  %v17428_v51 = vpop.f32.mrf.mxu1 }
 0x8e3   : > { %v8590_v27 = vpop.f32.mrf.mxu3 }
 0x8e4   : > { %v17418_v57 = vadd.f32 %v8799_v37, %v8590_v27  ;;  %12651 = vmatmul.msk.f32.gmra.mxu2 %vm5674_vm4, %v17191_v25 }
 0x8e6   : > { %v8802_v3 = vpop.f32.mrf.mxu0 }
 0x8e7   : > { %v9272_v37 = vpop.f32.mrf.mxu2 }
 0x8e8   : > { %12668 = vmatmul.msk.f32.gmra.mxu3 %vm5674_vm4, %v19071_v58  ;;  %v17432_v40 = vadd.f32 %v9272_v37, %v9069_v32  ;;  %v19075_v58 = vld [vmem:[#allocation57_spill] sm:$0xff] }
 0x8e9   : > { %12701 = vmatmul.msk.f32.gmra.mxu0 %vm5674_vm4, %v19072_v18 }
 0x8ea   : > { %12733 = vmatmul.msk.f32.gmra.mxu1 %vm5674_vm4, %v16819_v33  ;;  %19073 = vst [vmem:[#allocation10_spill] sm:$0xff] %v17432_v40  ;;  %v17452_v40 = vld [vmem:[#allocation5 + $0x180] sm:$0xff] }
 0x8eb   : > { %v8593_v5 = vpop.f32.mrf.mxu3 }
 0x8ec   : > { %v17434_v35 = vadd.f32 %v8802_v3, %v8593_v5  ;;  %12652 = vmatmul.msk.f32.gmra.mxu2 %vm5674_vm4, %v17214_v0  ;;  %v17448_v3 = vpop.f32.mrf.mxu1 }
 0x8ee   : > { %v8805_v27 = vpop.f32.mrf.mxu0 }
 0x8ef   : > { %v9275_v33 = vpop.f32.mrf.mxu2 }
 0x8f0   : > { %12669 = vmatmul.msk.f32.gmra.mxu3 %vm5674_vm4, %v19074_v53  ;;  %v17446_v32 = vadd.f32 %v9275_v33, %v9070_v2 }
 0x8f1   : > { %12702 = vmatmul.msk.f32.gmra.mxu0 %vm5674_vm4, %v19075_v58 }
 0x8f2   : > { %12734 = vmatmul.msk.f32.gmra.mxu1 %vm5674_vm4, %v16843_v28  ;;  %19076 = vst [vmem:[#allocation64_spill] sm:$0xff] %v17446_v32  ;;  %v19078_v28 = vld [vmem:[#allocation61_spill] sm:$0xff]  ;;  %v17470_v32 = vld [vmem:[#allocation5 + $0x188] sm:$0xff] }
 0x8f3   : > { %v8596_v18 = vpop.f32.mrf.mxu3  ;;  %19080 = vst [vmem:[#allocation50_spill] sm:$0xff] %v17470_v32 }
 0x8f4   : > { %v17450_v37 = vadd.f32 %v8805_v27, %v8596_v18  ;;  %12653 = vmatmul.msk.f32.gmra.mxu2 %vm5674_vm4, %v17452_v40  ;;  %v17468_v33 = vpop.f32.mrf.mxu1 }
 0x8f6   : > { %v8808_v5 = vpop.f32.mrf.mxu0 }
 0x8f7   : > { %v9278_v27 = vpop.f32.mrf.mxu2 }
 0x8f8   : > { %12670 = vmatmul.msk.f32.gmra.mxu3 %vm5674_vm4, %v19077_v20  ;;  %v17464_v2 = vadd.f32 %v9278_v27, %v9071_v9  ;;  %v19085_v27 = vld [vmem:[#allocation54_spill] sm:$0xff] }
 0x8f9   : > { %12703 = vmatmul.msk.f32.gmra.mxu0 %vm5674_vm4, %v19078_v28  ;;  %v19084_v28 = vld [vmem:[#allocation56_spill] sm:$0xff] }
 0x8fa   : > { %12735 = vmatmul.msk.f32.gmra.mxu1 %vm5674_vm4, %v16869_v49  ;;  %19079 = vst [vmem:[#allocation49_spill] sm:$0xff] %v17464_v2  ;;  %v19082_v49 = vld [vmem:[#allocation8_spill] sm:$0xff] }
 0x8fb   : > { %v8599_v53 = vpop.f32.mrf.mxu3 }
 0x8fc   : > { %v17466_v58 = vadd.f32 %v8808_v5, %v8599_v53  ;;  %12654 = vmatmul.msk.f32.gmra.mxu2 %vm5674_vm4, %v17470_v32  ;;  %v8719_v53 = vadd.f32 %v19085_v27, %v19084_v28  ;;  %v17490_v17 = vpop.f32.mrf.mxu1  ;;  %v19089_v28 = vld [vmem:[#allocation63_spill] sm:$0xff]  ;;  %v19090_v27 = vld [vmem:[#allocation58_spill] sm:$0xff] }
 0x8fe   : > { %v8811_v18 = vpop.f32.mrf.mxu0 }
 0x8ff   : > { %v9281_v5 = vpop.f32.mrf.mxu2 }
 0x900   : > { %12671 = vmatmul.msk.f32.gmra.mxu3 %vm5674_vm4, %v19081_v45  ;;  %v17482_v9 = vadd.f32 %v9281_v5, %v9072_v19  ;;  %v9057_v45 = vadd.f32 %v19086_v38, %v8719_v53  ;;  %v19088_v19 = vld [vmem:[#allocation33_spill] sm:$0xff]  ;;  %v8722_v53 = vadd.f32 %v19090_v27, %v19089_v28 }
 0x901   : > { %12704 = vmatmul.msk.f32.gmra.mxu0 %vm5674_vm4, %v19082_v49  ;;  %v19087_v49 = vld [vmem:[#allocation12_spill] sm:$0xff] }
 0x902   : > { %12736 = vmatmul.msk.f32.gmra.mxu1 %vm5674_vm4, %v16893_v56  ;;  %19083 = vst [vmem:[#allocation55_spill] sm:$0xff] %v17482_v9  ;;  %v9073_v56 = vadd.f32 %v17282_v11, %v17241_v54  ;;  %v9332_v5 = vadd.f32 %v17239_v23, %v9057_v45  ;;  %v19092_v9 = vld [vmem:[#allocation11_spill] sm:$0xff]  ;;  %v19093_v23 = vld [vmem:[#allocation18_spill] sm:$0xff] }
 0x903   : > { %v8602_v20 = vpop.f32.mrf.mxu3 }
 0x904   : > { %v17486_v2 = vadd.f32 %v8811_v18, %v8602_v20  ;;  %12755 = vmatmul.msk.f32.vlgmr.msra.gmra.mxu2 %vm5674_vm4, %v17256_v1  ;;  %v17517_v45 = vpop.f32.mrf.mxu1 }
 0x906   : > { %v9786_v32 = vpop.f32.mrf.mxu0 }
 0x907   : > { %v9284_v18 = vpop.f32.mrf.mxu2 }
 0x908   : > { %12672 = vmatmul.msk.f32.gmra.mxu3 %vm5674_vm4, %v19087_v49  ;;  %v17502_v1 = vadd.f32 %v9284_v18, %v9073_v56  ;;  %v19091_v49 = vld [vmem:[#allocation62_spill] sm:$0xff] }
 0x909   : > { %12705 = vmatmul.msk.f32.gmra.mxu0 %vm5674_vm4, %v19088_v19  ;;  %v9058_v19 = vadd.f32 %v19091_v49, %v8722_v53 }
 0x90a   : > { %12737 = vmatmul.msk.f32.gmra.mxu1 %vm5674_vm4, %v16917_v29  ;;  %v9074_v29 = vadd.f32 %v17300_v46, %v17252_v52  ;;  %v9075_v46 = vadd.f32 %v17320_v59, %v17268_v21  ;;  %v9076_v21 = vadd.f32 %v17346_v42, %v17284_v43  ;;  %v19098_v59 = vld [vmem:[#allocation34_spill] sm:$0xff]  ;;  %v9077_v42 = vadd.f32 %v17368_v14, %v17298_v30 }
 0x90b   : > { %v9511_v20 = vpop.f32.mrf.mxu3  ;;  %v9333_v56 = vadd.f32 %v17250_v55, %v9058_v19  ;;  %v19096_v55 = vld [vmem:[#allocation16_spill] sm:$0xff]  ;;  %v9078_v14 = vadd.f32 %v17388_v4, %v17316_v8  ;;  %v9079_v8 = vadd.f32 %v17406_v26, %v17334_v24  ;;  %v19109_v4 = vld [vmem:[#allocation23_spill] sm:$0xff]  ;;  %v9080_v24 = vadd.f32 %v17428_v51, %v17352_v10 }
 0x90c   : > { %v9607_v38 = vadd.f32 %v9511_v20, %v9332_v5  ;;  %12756 = vmatmul.msk.f32.gmra.mxu2 %vm5674_vm4, %v17272_v50  ;;  %v17538_v53 = vpop.f32.mrf.mxu1  ;;  %v19112_v26 = vld [vmem:[#allocation44_spill] sm:$0xff]  ;;  %v9081_v51 = vadd.f32 %v17448_v3, %v17370_v36  ;;  %v9082_v36 = vadd.f32 %v17468_v33, %v17386_v44  ;;  %v19118_v3 = vld [vmem:[#allocation45_spill] sm:$0xff]  ;;  %v9083_v33 = vadd.f32 %v17490_v17, %v17402_v34 }
 0x90d   : > { %v9084_v34 = vadd.f32 %v17517_v45, %v17418_v57  ;;  %v19122_v17 = vld [vmem:[#allocation28_spill] sm:$0xff]  ;;  %v9085_v57 = vadd.f32 %v17538_v53, %v17434_v35  ;;  %v19124_v45 = vld [vmem:[#allocation46_spill] sm:$0xff] }
 0x90e   : > { %v9789_v54 = vpop.f32.mrf.mxu0  ;;  %v17506_v11 = vadd.f32 %v9786_v32, %v9607_v38  ;;  %v19127_v53 = vld [vmem:[#allocation30_spill] sm:$0xff] }
 0x90f   : > { %v9287_v32 = vpop.f32.mrf.mxu2 }
 0x910   : > { %12673 = vmatmul.msk.f32.gmra.mxu3 %vm5674_vm4, %v19092_v9  ;;  %v17522_v50 = vadd.f32 %v9287_v32, %v9074_v29  ;;  %v19094_v9 = vld [vmem:[#allocation15_spill] sm:$0xff] }
 0x911   : > { %12706 = vmatmul.msk.f32.gmra.mxu0 %vm5674_vm4, %v19093_v23  ;;  %v19099_v29 = vld [vmem:[#allocation19_spill] sm:$0xff] }
 0x912   : > { %12738 = vmatmul.msk.f32.gmra.mxu1 %vm5674_vm4, %v16941_v41  ;;  %v19095_v41 = vld [vmem:[#allocation20_spill] sm:$0xff]  ;;  %v19100_v23 = vld [vmem:[#allocation35_spill] sm:$0xff] }
 0x913   : > { %v9514_v18 = vpop.f32.mrf.mxu3 }
 0x914   : > { %v9608_v5 = vadd.f32 %v9514_v18, %v9333_v56  ;;  %12757 = vmatmul.msk.f32.gmra.mxu2 %vm5674_vm4, %v17288_v60 }
 0x916   : > { %v9792_v20 = vpop.f32.mrf.mxu0  ;;  %v17524_v52 = vadd.f32 %v9789_v54, %v9608_v5  ;;  %v19097_v54 = vld [vmem:[#allocation9_spill] sm:$0xff]  ;;  %v19101_v5 = vld [vmem:[#allocation36_spill] sm:$0xff] }
 0x917   : > { %v9290_v28 = vpop.f32.mrf.mxu2 }
 0x918   : > { %12674 = vmatmul.msk.f32.gmra.mxu3 %vm5674_vm4, %v19094_v9  ;;  %v17536_v27 = vadd.f32 %v9290_v28, %v9075_v46  ;;  %v17556_v46 = vpop.f32.mrf.mxu1  ;;  %v19102_v9 = vld [vmem:[#allocation38_spill] sm:$0xff] }
 0x919   : > { %12707 = vmatmul.msk.f32.gmra.mxu0 %vm5674_vm4, %v19095_v41  ;;  %v19103_v41 = vld [vmem:[#allocation41_spill] sm:$0xff]  ;;  %v9086_v35 = vadd.f32 %v17556_v46, %v17450_v37  ;;  %v17721_v37 = vld [vmem:[#allocation5 + $0x181] sm:$0xff] }
 0x91a   : > { %12739 = vmatmul.msk.f32.gmra.mxu1 %vm5674_vm4, %v19096_v55  ;;  %v9669_v46 = vld [vmem:[#allocation5 + $0x182] sm:$0xff] }
 0x91b   : > { %v9517_v38 = vpop.f32.mrf.mxu3 }
 0x91c   : > { %v9609_v60 = vadd.f32 %v9517_v38, %v19097_v54  ;;  %12758 = vmatmul.msk.f32.gmra.mxu2 %vm5674_vm4, %v17304_v6  ;;  %v19104_v54 = vld [vmem:[#allocation37_spill] sm:$0xff] }
 0x91e   : > { %v9795_v49 = vpop.f32.mrf.mxu0  ;;  %v17541_v19 = vadd.f32 %v9792_v20, %v9609_v60 }
 0x91f   : > { %v9293_v32 = vpop.f32.mrf.mxu2 }
 0x920   : > { %12675 = vmatmul.msk.f32.gmra.mxu3 %vm5674_vm4, %v19098_v59  ;;  %v17553_v56 = vadd.f32 %v9293_v32, %v9076_v21  ;;  %v17577_v30 = vpop.f32.mrf.mxu1  ;;  %v19107_v59 = vld [vmem:[#allocation21_spill] sm:$0xff] }
 0x921   : > { %12708 = vmatmul.msk.f32.gmra.mxu0 %vm5674_vm4, %v19099_v29 }
 0x922   : > { %12740 = vmatmul.msk.f32.gmra.mxu1 %vm5674_vm4, %v19100_v23 }
 0x923   : > { %v9520_v18 = vpop.f32.mrf.mxu3 }
 0x924   : > { %v9610_v20 = vadd.f32 %v9520_v18, %v19101_v5  ;;  %12759 = vmatmul.msk.f32.gmra.mxu2 %vm5674_vm4, %v17322_v13 }
 0x926   : > { %v17558_v6 = vadd.f32 %v9795_v49, %v9610_v20  ;;  %v9798_v43 = vpop.f32.mrf.mxu0  ;;  %v19105_v49 = vld [vmem:[#allocation40_spill] sm:$0xff]  ;;  %v19110_v20 = vld [vmem:[#allocation25_spill] sm:$0xff] }
 0x927   : > { %v9296_v55 = vpop.f32.mrf.mxu2 }
 0x928   : > { %12676 = vmatmul.msk.f32.gmra.mxu3 %vm5674_vm4, %v19102_v9  ;;  %v17570_v28 = vadd.f32 %v9296_v55, %v9077_v42 }
 0x929   : > { %12709 = vmatmul.msk.f32.gmra.mxu0 %vm5674_vm4, %v19103_v41 }
 0x92a   : > { %12741 = vmatmul.msk.f32.gmra.mxu1 %vm5674_vm4, %v17013_v48  ;;  %v19106_v48 = vld [vmem:[#allocation39_spill] sm:$0xff] }
 0x92b   : > { %v9523_v38 = vpop.f32.mrf.mxu3 }
 0x92c   : > { %v9611_v60 = vadd.f32 %v9523_v38, %v19104_v54  ;;  %12760 = vmatmul.msk.f32.gmra.mxu2 %vm5674_vm4, %v17338_v47  ;;  %v19108_v47 = vld [vmem:[#allocation47_spill] sm:$0xff] }
 0x92e   : > { %v17573_v13 = vadd.f32 %v9798_v43, %v9611_v60  ;;  %v9801_v21 = vpop.f32.mrf.mxu0  ;;  %v17600_v43 = vpop.f32.mrf.mxu1  ;;  %v19113_v60 = vld [vmem:[#allocation42_spill] sm:$0xff] }
 0x92f   : > { %v9299_v29 = vpop.f32.mrf.mxu2 }
 0x930   : > { %12677 = vmatmul.msk.f32.gmra.mxu3 %vm5674_vm4, %v19105_v49  ;;  %v17587_v23 = vadd.f32 %v9299_v29, %v9078_v14  ;;  %v10198_v29 = vld [vmem:[#allocation5 + $0x91] sm:$0xff] }
 0x931   : > { %12710 = vmatmul.msk.f32.gmra.mxu0 %vm5674_vm4, %v19106_v48 }
 0x932   : > { %12742 = vmatmul.msk.f32.gmra.mxu1 %vm5674_vm4, %v19107_v59 }
 0x933   : > { %v9526_v32 = vpop.f32.mrf.mxu3 }
 0x934   : > { %v9612_v18 = vadd.f32 %v9526_v32, %v19108_v47  ;;  %12761 = vmatmul.msk.f32.gmra.mxu2 %vm5674_vm4, %v17356_v63  ;;  %v19111_v63 = vld [vmem:[#allocation22_spill] sm:$0xff]  ;;  %v19115_v32 = vld [vmem:[#allocation24_spill] sm:$0xff] }
 0x936   : > { %v17590_v5 = vadd.f32 %v9801_v21, %v9612_v18  ;;  %v9804_v41 = vpop.f32.mrf.mxu0  ;;  %v17621_v49 = vpop.f32.mrf.mxu1  ;;  %v19114_v21 = vld [vmem:[#allocation52_spill] sm:$0xff] }
 0x937   : > { %v9302_v42 = vpop.f32.mrf.mxu2 }
 0x938   : > { %12678 = vmatmul.msk.f32.gmra.mxu3 %vm5674_vm4, %v19109_v4  ;;  %v17604_v9 = vadd.f32 %v9302_v42, %v9079_v8  ;;  %v19117_v4 = vld [vmem:[#allocation65_spill] sm:$0xff] }
 0x939   : > { %12711 = vmatmul.msk.f32.gmra.mxu0 %vm5674_vm4, %v19110_v20 }
 0x93a   : > { %12743 = vmatmul.msk.f32.gmra.mxu1 %vm5674_vm4, %v17059_v62 }
 0x93b   : > { %v9529_v55 = vpop.f32.mrf.mxu3 }
 0x93c   : > { %v9613_v38 = vadd.f32 %v9529_v55, %v19111_v63  ;;  %12762 = vmatmul.msk.f32.gmra.mxu2 %vm5674_vm4, %v17374_v61  ;;  %v19119_v55 = vld [vmem:[#allocation43_spill] sm:$0xff] }
 0x93e   : > { %v17607_v54 = vadd.f32 %v9804_v41, %v9613_v38  ;;  %v9807_v59 = vpop.f32.mrf.mxu0  ;;  %v17640_v42 = vpop.f32.mrf.mxu1  ;;  %v10199_v41 = vld [vmem:[#allocation5 + $0x99] sm:$0xff] }
 0x93f   : > { %v9305_v62 = vpop.f32.mrf.mxu2 }
 0x940   : > { %12679 = vmatmul.msk.f32.gmra.mxu3 %vm5674_vm4, %v19112_v26  ;;  %v17619_v14 = vadd.f32 %v9305_v62, %v9080_v24  ;;  %v10200_v26 = vld [vmem:[#allocation5 + $0xa9] sm:$0xff] }
 0x941   : > { %12712 = vmatmul.msk.f32.gmra.mxu0 %vm5674_vm4, %v19113_v60  ;;  %v19120_v60 = vld [vmem:[#allocation26_spill] sm:$0xff]  ;;  %v19121_v62 = vld [vmem:[#allocation48_spill] sm:$0xff] }
 0x942   : > { %12744 = vmatmul.msk.f32.gmra.mxu1 %vm5674_vm4, %v17083_v16  ;;  %v19116_v16 = vld [vmem:[#allocation27_spill] sm:$0xff] }
 0x943   : > { %v9532_v48 = vpop.f32.mrf.mxu3 }
 0x944   : > { %v9614_v61 = vadd.f32 %v9532_v48, %v19114_v21  ;;  %12763 = vmatmul.msk.f32.gmra.mxu2 %vm5674_vm4, %v10198_v29 }
 0x946   : > { %v17624_v10 = vadd.f32 %v9807_v59, %v9614_v61  ;;  %v17657_v44 = vpop.f32.mrf.mxu1  ;;  %v10201_v61 = vld [vmem:[#allocation5 + $0xb1] sm:$0xff] }
 0x947   : > { %v9308_v47 = vpop.f32.mrf.mxu2  ;;  %v19123_v59 = vld [vmem:[#allocation29_spill] sm:$0xff] }
 0x948   : > { %12680 = vmatmul.msk.f32.gmra.mxu3 %vm5674_vm4, %v19115_v32  ;;  %v17635_v18 = vadd.f32 %v9308_v47, %v9081_v51  ;;  %v19125_v47 = vld [vmem:[#allocation32_spill] sm:$0xff] }
 0x949   : > { %12713 = vmatmul.msk.f32.gmra.mxu0 %vm5674_vm4, %v19116_v16  ;;  %v10202_v16 = vld [vmem:[#allocation5 + $0xc1] sm:$0xff] }
 0x94a   : > { %12745 = vmatmul.msk.f32.gmra.mxu1 %vm5674_vm4, %v17107_v7 }
 0x94b   : > { %v9535_v8 = vpop.f32.mrf.mxu3 }
 0x94c   : > { %v17638_v20 = vadd.f32 %v9535_v8, %v19117_v4  ;;  %12764 = vmatmul.msk.f32.gmra.mxu2 %vm5674_vm4, %v10199_v41  ;;  %v19126_v41 = vld [vmem:[#allocation10_spill] sm:$0xff] }
 0x94f   : > { %v9311_v7 = vpop.f32.mrf.mxu2 }
 0x950   : > { %12681 = vmatmul.msk.f32.gmra.mxu3 %vm5674_vm4, %v19118_v3  ;;  %v17651_v63 = vadd.f32 %v9311_v7, %v9082_v36  ;;  %v10203_v3 = vld [vmem:[#allocation5 + $0xc9] sm:$0xff] }
 0x951   : > { %12714 = vmatmul.msk.f32.gmra.mxu0 %vm5674_vm4, %v19119_v55  ;;  %v19128_v55 = vld [vmem:[#allocation31_spill] sm:$0xff] }
 0x952   : > { %12746 = vmatmul.msk.f32.gmra.mxu1 %vm5674_vm4, %v17131_v12 }
 0x953   : > { %v9538_v38 = vpop.f32.mrf.mxu3 }
 0x954   : > { %v17654_v24 = vadd.f32 %v9538_v38, %v17384_v15  ;;  %12765 = vmatmul.msk.f32.gmra.mxu2 %vm5674_vm4, %v10200_v26  ;;  %v19129_v26 = vld [vmem:[#allocation64_spill] sm:$0xff] }
 0x957   : > { %v9314_v12 = vpop.f32.mrf.mxu2 }
 0x958   : > { %12682 = vmatmul.msk.f32.gmra.mxu3 %vm5674_vm4, %v19120_v60  ;;  %v17667_v15 = vadd.f32 %v9314_v12, %v9083_v33  ;;  %v9087_v12 = vadd.f32 %v17577_v30, %v17466_v58  ;;  %v17738_v30 = vld [vmem:[#allocation5 + $0x189] sm:$0xff] }
 0x959   : > { %12715 = vmatmul.msk.f32.gmra.mxu0 %vm5674_vm4, %v19121_v62  ;;  %v10204_v62 = vld [vmem:[#allocation5 + $0xd9] sm:$0xff] }
 0x95a   : > { %12747 = vmatmul.msk.f32.gmra.mxu1 %vm5674_vm4, %v17165_v22  ;;  %v17679_v22 = vpop.f32.mrf.mxu1 }
 0x95b   : > { %v9541_v48 = vpop.f32.mrf.mxu3 }
 0x95c   : > { %v17670_v21 = vadd.f32 %v9541_v48, %v17400_v39  ;;  %12766 = vmatmul.msk.f32.gmra.mxu2 %vm5674_vm4, %v10201_v61 }
 0x95f   : > { %v9317_v29 = vpop.f32.mrf.mxu2 }
 0x960   : > { %12683 = vmatmul.msk.f32.gmra.mxu3 %vm5674_vm4, %v19122_v17  ;;  %v17683_v39 = vadd.f32 %v9317_v29, %v9084_v34  ;;  %v19131_v17 = vld [vmem:[#allocation49_spill] sm:$0xff]  ;;  %v10205_v29 = vld [vmem:[#allocation5 + $0xe1] sm:$0xff] }
 0x961   : > { %12716 = vmatmul.msk.f32.gmra.mxu0 %vm5674_vm4, %v19123_v59 }
 0x962   : > { %12748 = vmatmul.msk.f32.gmra.mxu1 %vm5674_vm4, %v17191_v25 }
 0x963   : > { %v9544_v51 = vpop.f32.mrf.mxu3 }
 0x964   : > { %v17686_v32 = vadd.f32 %v9544_v51, %v17416_v31  ;;  %12767 = vmatmul.msk.f32.gmra.mxu2 %vm5674_vm4, %v10202_v16  ;;  %v17699_v31 = vpop.f32.mrf.mxu1  ;;  %v9945_v51 = vld [vmem:[#allocation5 + $0x198] sm:$0xff]  ;;  %v9670_v16 = vld [vmem:[#allocation5 + $0x18a] sm:$0xff] }
 0x967   : > { %v9320_v25 = vpop.f32.mrf.mxu2 }
 0x968   : > { %12684 = vmatmul.msk.f32.gmra.mxu3 %vm5674_vm4, %v19124_v45  ;;  %v17697_v8 = vadd.f32 %v9320_v25, %v9085_v57  ;;  %v9088_v57 = vadd.f32 %v17600_v43, %v17486_v2  ;;  %v10158_v2 = vadd.f32 %v17621_v49, %v17506_v11  ;;  %v10159_v11 = vadd.f32 %v17640_v42, %v17524_v52 }
 0x969   : > { %12717 = vmatmul.msk.f32.gmra.mxu0 %vm5674_vm4, %v19125_v47 }
 0x96a   : > { %12749 = vmatmul.msk.f32.gmra.mxu1 %vm5674_vm4, %v17214_v0 }
 0x96b   : > { %v9547_v4 = vpop.f32.mrf.mxu3 }
 0x96c   : > { %v17702_v36 = vadd.f32 %v9547_v4, %v19126_v41  ;;  %12768 = vmatmul.msk.f32.gmra.mxu2 %vm5674_vm4, %v10203_v3  ;;  %v17718_v60 = vpop.f32.mrf.mxu1  ;;  %v19132_v4 = vld [vmem:[#allocation55_spill] sm:$0xff]  ;;  %v10206_v3 = vld [vmem:[#allocation5 + $0xf1] sm:$0xff] }
 0x96f   : > { %v9323_v0 = vpop.f32.mrf.mxu2 }
 0x970   : > { %12685 = vmatmul.msk.f32.gmra.mxu3 %vm5674_vm4, %v19127_v53  ;;  %v17713_v7 = vadd.f32 %v9323_v0, %v9086_v35  ;;  %v9946_v35 = vld [vmem:[#allocation5 + $0x1a0] sm:$0xff]  ;;  %v10465_v53 = vld [vmem:[#allocation5 + $0x32] sm:$0xff] }
 0x971   : > { %12718 = vmatmul.msk.f32.gmra.mxu0 %vm5674_vm4, %v19128_v55 }
 0x972   : > { %12750 = vmatmul.msk.f32.gmra.mxu1 %vm5674_vm4, %v17452_v40  ;;  %v19130_v40 = vld [vmem:[#allocation50_spill] sm:$0xff] }
 0x973   : > { %v9550_v38 = vpop.f32.mrf.mxu3 }
 0x974   : > { %v17716_v33 = vadd.f32 %v9550_v38, %v19129_v26  ;;  %12769 = vmatmul.msk.f32.gmra.mxu2 %vm5674_vm4, %v10204_v62  ;;  %v17736_v58 = vpop.f32.mrf.mxu1  ;;  %v10207_v62 = vld [vmem:[#allocation5 + $0xf9] sm:$0xff] }
 0x977   : > { %v9326_v48 = vpop.f32.mrf.mxu2 }
 0x978   : > { %12686 = vmatmul.msk.f32.gmra.mxu3 %vm5674_vm4, %v17721_v37  ;;  %v17730_v61 = vadd.f32 %v9326_v48, %v9087_v12 }
 0x979   : > { %12719 = vmatmul.msk.f32.gmra.mxu0 %vm5674_vm4, %v9669_v46  ;;  %v10466_v46 = vld [vmem:[#allocation5 + $0x3a] sm:$0xff] }
 0x97a   : > { %12751 = vmatmul.msk.f32.gmra.mxu1 %vm5674_vm4, %v19130_v40 }
 0x97b   : > { %v9553_v34 = vpop.f32.mrf.mxu3 }
 0x97c   : > { %v17733_v59 = vadd.f32 %v9553_v34, %v19131_v17  ;;  %12770 = vmatmul.msk.f32.gmra.mxu2 %vm5674_vm4, %v10205_v29  ;;  %v17755_v43 = vpop.f32.mrf.mxu1  ;;  %v10208_v34 = vld [vmem:[#allocation5 + $0x109] sm:$0xff]  ;;  %v10160_v17 = vadd.f32 %v17657_v44, %v17541_v19 }
 0x97f   : > { %v9329_v45 = vpop.f32.mrf.mxu2 }
 0x980   : > { %12687 = vmatmul.msk.f32.gmra.mxu3 %vm5674_vm4, %v17738_v30  ;;  %v17746_v47 = vadd.f32 %v9329_v45, %v9088_v57  ;;  %v10161_v57 = vadd.f32 %v17679_v22, %v17558_v6 }
 0x981   : > { %12720 = vmatmul.msk.f32.gmra.mxu0 %vm5674_vm4, %v9670_v16  ;;  %v10209_v16 = vld [vmem:[#allocation5 + $0x111] sm:$0xff] }
 0x982   : > { %12752 = vmatmul.msk.f32.gmra.mxu1 %vm5674_vm4, %v9945_v51 }
 0x983   : > { %v9556_v25 = vpop.f32.mrf.mxu3 }
 0x984   : > { %v17749_v41 = vadd.f32 %v9556_v25, %v19132_v4  ;;  %12771 = vmatmul.msk.f32.gmra.mxu2 %vm5674_vm4, %v10206_v3  ;;  %v10210_v4 = vld [vmem:[#allocation5 + $0x121] sm:$0xff]  ;;  %v10162_v3 = vadd.f32 %v17699_v31, %v17573_v13 }
 0x987   : > { %v10337_v55 = vpop.f32.mrf.mxu2 }
 0x988   : > { %12788 = vmatmul.msk.f32.vlgmr.msra.gmra.mxu3 %vm5674_vm4, %v10465_v53  ;;  %v17758_v0 = vadd.f32 %v10337_v55, %v10158_v2  ;;  %v10211_v2 = vld [vmem:[#allocation5 + $0x129] sm:$0xff]  ;;  %v10163_v55 = vadd.f32 %v17718_v60, %v17590_v5 }
 0x98a   : > { %12753 = vmatmul.msk.f32.gmra.mxu1 %vm5674_vm4, %v9946_v35 }
 0x98b   : > { %v9559_v38 = vpop.f32.mrf.mxu3 }
 0x98c   : > { %v17761_v26 = vadd.f32 %v9559_v38, %v17502_v1  ;;  %12772 = vmatmul.msk.f32.gmra.mxu2 %vm5674_vm4, %v10207_v62  ;;  %v10467_v1 = vld [vmem:[#allocation5 + $0x4a] sm:$0xff] }
 0x98f   : > { %v10340_v49 = vpop.f32.mrf.mxu2 }
 0x990   : > { %12789 = vmatmul.msk.f32.gmra.mxu3 %vm5674_vm4, %v10466_v46  ;;  %v17767_v12 = vadd.f32 %v10340_v49, %v10159_v11  ;;  %v10212_v46 = vld [vmem:[#allocation5 + $0x139] sm:$0xff]  ;;  %v10164_v11 = vadd.f32 %v17736_v58, %v17607_v54 }
 0x993   : > { %v9562_v40 = vpop.f32.mrf.mxu3 }
 0x994   : > { %v17770_v48 = vadd.f32 %v9562_v40, %v17522_v50  ;;  %12773 = vmatmul.msk.f32.gmra.mxu2 %vm5674_vm4, %v10208_v34  ;;  %v10468_v50 = vld [vmem:[#allocation5 + $0x52] sm:$0xff]  ;;  %v10213_v34 = vld [vmem:[#allocation5 + $0x141] sm:$0xff] }
 0x997   : > { %v10343_v29 = vpop.f32.mrf.mxu2 }
 0x998   : > { %12790 = vmatmul.msk.f32.gmra.mxu3 %vm5674_vm4, %v10467_v1  ;;  %v17776_v52 = vadd.f32 %v10343_v29, %v10160_v17  ;;  %v10165_v1 = vadd.f32 %v17755_v43, %v17624_v10  ;;  %v10215_v10 = vld [vmem:[#allocation5 + $0x159] sm:$0xff] }
 0x999   : > { %v10474_v43 = vld [vmem:[#allocation5 + $0x9a] sm:$0xff] }
 0x99b   : > { %v9565_v42 = vpop.f32.mrf.mxu3 }
 0x99c   : > { %v17779_v51 = vadd.f32 %v9565_v42, %v17536_v27  ;;  %12774 = vmatmul.msk.f32.gmra.mxu2 %vm5674_vm4, %v10209_v16  ;;  %v10469_v27 = vld [vmem:[#allocation5 + $0x62] sm:$0xff]  ;;  %v10214_v42 = vld [vmem:[#allocation5 + $0x151] sm:$0xff] }
 0x99f   : > { %v10346_v45 = vpop.f32.mrf.mxu2 }
 0x9a0   : > { %12791 = vmatmul.msk.f32.gmra.mxu3 %vm5674_vm4, %v10468_v50  ;;  %v17785_v19 = vadd.f32 %v10346_v45, %v10161_v57  ;;  %v10216_v45 = vld [vmem:[#allocation5 + $0x169] sm:$0xff] }
 0x9a3   : > { %v9568_v44 = vpop.f32.mrf.mxu3 }
 0x9a4   : > { %v17788_v25 = vadd.f32 %v9568_v44, %v17553_v56  ;;  %12775 = vmatmul.msk.f32.gmra.mxu2 %vm5674_vm4, %v10210_v4  ;;  %v10470_v56 = vld [vmem:[#allocation5 + $0x6a] sm:$0xff] }
 0x9a5   : > { %v10475_v44 = vld [vmem:[#allocation5 + $0xaa] sm:$0xff] }
 0x9a7   : > { %v10349_v35 = vpop.f32.mrf.mxu2 }
 0x9a8   : > { %12792 = vmatmul.msk.f32.gmra.mxu3 %vm5674_vm4, %v10469_v27  ;;  %v17794_v6 = vadd.f32 %v10349_v35, %v10162_v3  ;;  %v10217_v27 = vld [vmem:[#allocation5 + $0x171] sm:$0xff] }
 0x9a9   : > { %v10476_v3 = vld [vmem:[#allocation5 + $0xb2] sm:$0xff] }
 0x9ab   : > { %v9571_v22 = vpop.f32.mrf.mxu3 }
 0x9ac   : > { %v17797_v53 = vadd.f32 %v9571_v22, %v17570_v28  ;;  %12776 = vmatmul.msk.f32.gmra.mxu2 %vm5674_vm4, %v10211_v2  ;;  %v10471_v28 = vld [vmem:[#allocation5 + $0x7a] sm:$0xff]  ;;  %v10477_v22 = vld [vmem:[#allocation5 + $0xc2] sm:$0xff] }
 0x9af   : > { %v10352_v38 = vpop.f32.mrf.mxu2 }
 0x9b0   : > { %12793 = vmatmul.msk.f32.gmra.mxu3 %vm5674_vm4, %v10470_v56  ;;  %v17803_v13 = vadd.f32 %v10352_v38, %v10163_v55  ;;  %v10478_v56 = vld [vmem:[#allocation5 + $0xca] sm:$0xff]  ;;  %v12868_v55 = vmov -inf   ;;  %v10221_v38 = vld [vmem:[#allocation5 + $0x1a1] sm:$0xff] }
 0x9b1   : > { %10776 = vst.msk [vmem:[#allocation6] sm:$0xff] %vm3016_vm3, %v12868_v55 }
 0x9b2   : > { %10777 = vst.msk [vmem:[#allocation6 + $0x8] sm:$0xff] %vm3016_vm3, %v12868_v55 }
 0x9b3   : > { %v9574_v31 = vpop.f32.mrf.mxu3  ;;  %10780 = vst.msk [vmem:[#allocation6 + $0x18] sm:$0xff] %vm3016_vm3, %v12868_v55 }
 0x9b4   : > { %v17806_v62 = vadd.f32 %v9574_v31, %v17587_v23  ;;  %12777 = vmatmul.msk.f32.gmra.mxu2 %vm5674_vm4, %v10212_v46  ;;  %v10472_v23 = vld [vmem:[#allocation5 + $0x82] sm:$0xff]  ;;  %10781 = vst.msk [vmem:[#allocation6 + $0x20] sm:$0xff] %vm3016_vm3, %v12868_v55 }
 0x9b5   : > { %10783 = vst.msk [vmem:[#allocation6 + $0x30] sm:$0xff] %vm3016_vm3, %v12868_v55  ;;  %v10480_v46 = vld [vmem:[#allocation5 + $0xe2] sm:$0xff] }
 0x9b6   : > { %10784 = vst.msk [vmem:[#allocation6 + $0x38] sm:$0xff] %vm3016_vm3, %v12868_v55 }
 0x9b7   : > { %v10355_v49 = vpop.f32.mrf.mxu2  ;;  %10786 = vst.msk [vmem:[#allocation6 + $0x48] sm:$0xff] %vm3016_vm3, %v12868_v55 }
 0x9b8   : > { %12794 = vmatmul.msk.f32.gmra.mxu3 %vm5674_vm4, %v10471_v28  ;;  %v17812_v5 = vadd.f32 %v10355_v49, %v10164_v11  ;;  %10787 = vst.msk [vmem:[#allocation6 + $0x50] sm:$0xff] %vm3016_vm3, %v12868_v55  ;;  %v10481_v11 = vld [vmem:[#allocation5 + $0xf2] sm:$0xff] }
 0x9b9   : > { %10789 = vst.msk [vmem:[#allocation6 + $0x60] sm:$0xff] %vm3016_vm3, %v12868_v55 }
 0x9ba   : > { %10790 = vst.msk [vmem:[#allocation6 + $0x68] sm:$0xff] %vm3016_vm3, %v12868_v55 }
 0x9bb   : > { %v9577_v60 = vpop.f32.mrf.mxu3  ;;  %10792 = vst.msk [vmem:[#allocation6 + $0x78] sm:$0xff] %vm3016_vm3, %v12868_v55 }
 0x9bc   : > { %v17815_v40 = vadd.f32 %v9577_v60, %v17604_v9  ;;  %12778 = vmatmul.msk.f32.gmra.mxu2 %vm5674_vm4, %v10213_v34  ;;  %v10473_v9 = vld [vmem:[#allocation5 + $0x92] sm:$0xff]  ;;  %10793 = vst.msk [vmem:[#allocation6 + $0x80] sm:$0xff] %vm3016_vm3, %v12868_v55 }
 0x9bd   : > { %10795 = vst.msk [vmem:[#allocation6 + $0x90] sm:$0xff] %vm3016_vm3, %v12868_v55 }
 0x9be   : > { %10796 = vst.msk [vmem:[#allocation6 + $0x98] sm:$0xff] %vm3016_vm3, %v12868_v55 }
 0x9bf   : > { %v10358_v17 = vpop.f32.mrf.mxu2  ;;  %10798 = vst.msk [vmem:[#allocation6 + $0xa8] sm:$0xff] %vm3016_vm3, %v12868_v55 }
 0x9c0   : > { %12795 = vmatmul.msk.f32.gmra.mxu3 %vm5674_vm4, %v10472_v23  ;;  %v17821_v54 = vadd.f32 %v10358_v17, %v10165_v1  ;;  %10799 = vst.msk [vmem:[#allocation6 + $0xb0] sm:$0xff] %vm3016_vm3, %v12868_v55  ;;  %v10482_v23 = vld [vmem:[#allocation5 + $0xfa] sm:$0xff]  ;;  %v17955_v17 = vpop.f32.mrf.mxu0 }
 0x9c1   : > { %10801 = vst.msk [vmem:[#allocation6 + $0xc0] sm:$0xff] %vm3016_vm3, %v12868_v55 }
 0x9c2   : > { %10802 = vst.msk [vmem:[#allocation6 + $0xc8] sm:$0xff] %vm3016_vm3, %v12868_v55 }
 0x9c3   : > { %v9580_v58 = vpop.f32.mrf.mxu3  ;;  %10804 = vst.msk [vmem:[#allocation6 + $0xd8] sm:$0xff] %vm3016_vm3, %v12868_v55 }
 0x9c4   : > { %v17824_v29 = vadd.f32 %v9580_v58, %v17619_v14  ;;  %12779 = vmatmul.msk.f32.gmra.mxu2 %vm5674_vm4, %v10214_v42  ;;  %10805 = vst.msk [vmem:[#allocation6 + $0xe0] sm:$0xff] %vm3016_vm3, %v12868_v55  ;;  %v10483_v42 = vld [vmem:[#allocation5 + $0x10a] sm:$0xff] }
 0x9c5   : > { %10807 = vst.msk [vmem:[#allocation6 + $0xf0] sm:$0xff] %vm3016_vm3, %v12868_v55 }
 0x9c6   : > { %10808 = vst.msk [vmem:[#allocation6 + $0xf8] sm:$0xff] %vm3016_vm3, %v12868_v55 }
 0x9c7   : > { %10810 = vst.msk [vmem:[#allocation6 + $0x108] sm:$0xff] %vm3016_vm3, %v12868_v55 }
 0x9c8   : > { %12796 = vmatmul.msk.f32.gmra.mxu3 %vm5674_vm4, %v10473_v9  ;;  %10811 = vst.msk [vmem:[#allocation6 + $0x110] sm:$0xff] %vm3016_vm3, %v12868_v55  ;;  %v17968_v9 = vpop.f32.mrf.mxu2 }
 0x9c9   : > { %10813 = vst.msk [vmem:[#allocation6 + $0x120] sm:$0xff] %vm3016_vm3, %v12868_v55 }
 0x9ca   : > { %10814 = vst.msk [vmem:[#allocation6 + $0x128] sm:$0xff] %vm3016_vm3, %v12868_v55 }
 0x9cb   : > { %v9583_v16 = vpop.f32.mrf.mxu3  ;;  %10816 = vst.msk [vmem:[#allocation6 + $0x138] sm:$0xff] %vm3016_vm3, %v12868_v55 }
 0x9cc   : > { %v17829_v50 = vadd.f32 %v9583_v16, %v17635_v18  ;;  %12780 = vmatmul.msk.f32.gmra.mxu2 %vm5674_vm4, %v10215_v10  ;;  %10817 = vst.msk [vmem:[#allocation6 + $0x140] sm:$0xff] %vm3016_vm3, %v12868_v55  ;;  %v10896_v10 = vld [vmem:[#allocation6] sm:$0xff] }
 0x9cd   : > { %10819 = vst.msk [vmem:[#allocation6 + $0x150] sm:$0xff] %vm3016_vm3, %v12868_v55 }
 0x9ce   : > { %10820 = vst.msk [vmem:[#allocation6 + $0x158] sm:$0xff] %vm3016_vm3, %v12868_v55 }
 0x9cf   : > { %10822 = vst.msk [vmem:[#allocation6 + $0x168] sm:$0xff] %vm3016_vm3, %v12868_v55 }
 0x9d0   : > { %12797 = vmatmul.msk.f32.gmra.mxu3 %vm5674_vm4, %v10474_v43  ;;  %10823 = vst.msk [vmem:[#allocation6 + $0x170] sm:$0xff] %vm3016_vm3, %v12868_v55 }
 0x9d1   : > { %10825 = vst.msk [vmem:[#allocation6 + $0x180] sm:$0xff] %vm3016_vm3, %v12868_v55 }
 0x9d2   : > { %10826 = vst.msk [vmem:[#allocation6 + $0x188] sm:$0xff] %vm3016_vm3, %v12868_v55 }
 0x9d3   : > { %v9586_v57 = vpop.f32.mrf.mxu3  ;;  %10828 = vst.msk [vmem:[#allocation6 + $0x198] sm:$0xff] %vm3016_vm3, %v12868_v55 }
 0x9d4   : > { %v17834_v14 = vadd.f32 %v9586_v57, %v17651_v63  ;;  %12781 = vmatmul.msk.f32.gmra.mxu2 %vm5674_vm4, %v10216_v45  ;;  %10829 = vst.msk [vmem:[#allocation6 + $0x1a0] sm:$0xff] %vm3016_vm3, %v12868_v55  ;;  %v10897_v45 = vld [vmem:[#allocation6 + $0x8] sm:$0xff] }
 0x9d5   : > { %10779 = vst.msk [vmem:[#allocation6 + $0x10] sm:$0x3] %vm10778_vm6, %v12868_v55 }
 0x9d6   : > { %10782 = vst.msk [vmem:[#allocation6 + $0x28] sm:$0x3] %vm10778_vm6, %v12868_v55 }
 0x9d7   : > { %10785 = vst.msk [vmem:[#allocation6 + $0x40] sm:$0x3] %vm10778_vm6, %v12868_v55 }
 0x9d8   : > { %12798 = vmatmul.msk.f32.gmra.mxu3 %vm5674_vm4, %v10475_v44  ;;  %10788 = vst.msk [vmem:[#allocation6 + $0x58] sm:$0x3] %vm10778_vm6, %v12868_v55  ;;  %v10960_v44 = vld [vmem:[#allocation6 + $0x1] sm:$0xff] }
 0x9d9   : > { %10791 = vst.msk [vmem:[#allocation6 + $0x70] sm:$0x3] %vm10778_vm6, %v12868_v55 }
 0x9da   : > { %10794 = vst.msk [vmem:[#allocation6 + $0x88] sm:$0x3] %vm10778_vm6, %v12868_v55 }
 0x9db   : > { %v9589_v4 = vpop.f32.mrf.mxu3  ;;  %10797 = vst.msk [vmem:[#allocation6 + $0xa0] sm:$0x3] %vm10778_vm6, %v12868_v55 }
 0x9dc   : > { %v17839_v18 = vadd.f32 %v9589_v4, %v17667_v15  ;;  %12782 = vmatmul.msk.f32.gmra.mxu2 %vm5674_vm4, %v10217_v27  ;;  %10800 = vst.msk [vmem:[#allocation6 + $0xb8] sm:$0x3] %vm10778_vm6, %v12868_v55  ;;  %v10961_v27 = vld [vmem:[#allocation6 + $0x9] sm:$0xff] }
 0x9dd   : > { %10803 = vst.msk [vmem:[#allocation6 + $0xd0] sm:$0x3] %vm10778_vm6, %v12868_v55 }
 0x9de   : > { %10806 = vst.msk [vmem:[#allocation6 + $0xe8] sm:$0x3] %vm10778_vm6, %v12868_v55 }
 0x9df   : > { %10809 = vst.msk [vmem:[#allocation6 + $0x100] sm:$0x3] %vm10778_vm6, %v12868_v55 }
 0x9e0   : > { %12799 = vmatmul.msk.f32.gmra.mxu3 %vm5674_vm4, %v10476_v3  ;;  %10812 = vst.msk [vmem:[#allocation6 + $0x118] sm:$0x3] %vm10778_vm6, %v12868_v55 }
 0x9e1   : > { %10815 = vst.msk [vmem:[#allocation6 + $0x130] sm:$0x3] %vm10778_vm6, %v12868_v55 }
 0x9e2   : > { %10818 = vst.msk [vmem:[#allocation6 + $0x148] sm:$0x3] %vm10778_vm6, %v12868_v55 }
 0x9e3   : > { %v9592_v35 = vpop.f32.mrf.mxu3  ;;  %10821 = vst.msk [vmem:[#allocation6 + $0x160] sm:$0x3] %vm10778_vm6, %v12868_v55 }
 0x9e4   : > { %v17844_v63 = vadd.f32 %v9592_v35, %v17683_v39  ;;  %12783 = vmatmul.msk.f32.gmra.mxu2 %vm5674_vm4, %v17721_v37  ;;  %v10484_v35 = vld [vmem:[#allocation5 + $0x112] sm:$0xff]  ;;  %10824 = vst.msk [vmem:[#allocation6 + $0x178] sm:$0x3] %vm10778_vm6, %v12868_v55 }
 0x9e5   : > { %10827 = vst.msk [vmem:[#allocation6 + $0x190] sm:$0x3] %vm10778_vm6, %v12868_v55 }
 0x9e6   : > { %10830 = vst.msk [vmem:[#allocation6 + $0x1a8] sm:$0x3] %vm10778_vm6, %v12868_v55 }
 0x9e8   : > { %12800 = vmatmul.msk.f32.gmra.mxu3 %vm5674_vm4, %v10477_v22  ;;  %v17986_v22 = vpop.f32.mrf.mxu0 }
 0x9eb   : > { %v9595_v2 = vpop.f32.mrf.mxu3 }
 0x9ec   : > { %v17850_v15 = vadd.f32 %v9595_v2, %v17697_v8  ;;  %12784 = vmatmul.msk.f32.gmra.mxu2 %vm5674_vm4, %v17738_v30  ;;  %v10220_v8 = vld [vmem:[#allocation5 + $0x199] sm:$0xff] }
 0x9ed   : > { %v10479_v30 = vld [vmem:[#allocation5 + $0xda] sm:$0xff] }
 0x9f0   : > { %12801 = vmatmul.msk.f32.gmra.mxu3 %vm5674_vm4, %v10478_v56 }
 0x9f3   : > { %v9598_v39 = vpop.f32.mrf.mxu3 }
 0x9f4   : > { %v17866_v37 = vadd.f32 %v9598_v39, %v17713_v7  ;;  %12785 = vmatmul.msk.f32.gmra.mxu2 %vm5674_vm4, %v10220_v8  ;;  %v11024_v39 = vld [vmem:[#allocation6 + $0x2] sm:$0xff] }
 0x9f8   : > { %12802 = vmatmul.msk.f32.gmra.mxu3 %vm5674_vm4, %v10479_v30 }
 0x9fb   : > { %v9601_v7 = vpop.f32.mrf.mxu3 }
 0x9fc   : > { %v17887_v31 = vadd.f32 %v9601_v7, %v17730_v61  ;;  %12786 = vmatmul.msk.f32.gmra.mxu2 %vm5674_vm4, %v10221_v38 }
 0xa00   : > { %12803 = vmatmul.msk.f32.gmra.mxu3 %vm5674_vm4, %v10480_v46  ;;  %v18000_v46 = vpop.f32.mrf.mxu2 }
 0xa03   : > { %v9604_v61 = vpop.f32.mrf.mxu3 }
 0xa04   : > { %v17908_v28 = vadd.f32 %v9604_v61, %v17746_v47  ;;  %v17926_v47 = vld [vmem:[%s18541_s9] ss:$0 sm:$0xff] }
 0xa08   : > { %12804 = vmatmul.msk.f32.gmra.mxu3 %vm5674_vm4, %v10481_v11 }
 0xa0b   : > { %v10612_v49 = vpop.f32.mrf.mxu3 }
 0xa0c   : > { %v10708_v60 = vadd.f32 %v10612_v49, %v17758_v0 }
 0xa0e   : > { %v10744_v34 = vadd.f32 %v17926_v47, %v10708_v60 }
 0xa10   : > { %10832 = vst.msk [vmem:[#allocation6 + $0x19] sm:$0xff] %vm3016_vm3, %v10744_v34  ;;  %12805 = vmatmul.msk.f32.gmra.mxu3 %vm5674_vm4, %v10482_v23  ;;  %v10485_v34 = vld [vmem:[#allocation5 + $0x122] sm:$0xff] }
 0xa13   : > { %v10615_v0 = vpop.f32.mrf.mxu3 }
 0xa14   : > { %v10709_v1 = vadd.f32 %v10615_v0, %v17767_v12  ;;  %v17964_v12 = vpop.f32.mrf.mxu1 }
 0xa16   : > { %v10745_v58 = vadd.f32 %v17926_v47, %v10709_v1  ;;  %v18013_v1 = vpop.f32.mrf.mxu0 }
 0xa17   : > { %v17970_v16 = vld [vmem:[#allocation6 + $0x19] sm:$0xff] }
 0xa18   : > { %10833 = vst.msk [vmem:[#allocation6 + $0x21] sm:$0xff] %vm3016_vm3, %v10745_v58  ;;  %12806 = vmatmul.msk.f32.gmra.mxu3 %vm5674_vm4, %v10483_v42  ;;  %v10928_v57 = vmax.f32 %v17970_v16, %v10896_v10  ;;  %v10898_v23 = vld [vmem:[#allocation6 + $0x18] sm:$0xff] }
 0xa1a   : > { %v10992_v56 = vmax.f32 %v10928_v57, %v10960_v44  ;;  %v18018_v44 = vpop.f32.mrf.mxu2 }
 0xa1b   : > { %v10618_v43 = vpop.f32.mrf.mxu3 }
 0xa1c   : > { %v10710_v3 = vadd.f32 %v10618_v43, %v17776_v52  ;;  %v17995_v30 = vpop.f32.mrf.mxu1  ;;  %v11025_v52 = vld [vmem:[#allocation6 + $0xa] sm:$0xff]  ;;  %v11056_v11 = vmax.f32 %v10992_v56, %v11024_v39 }
 0xa1e   : > { %v10746_v7 = vadd.f32 %v17926_v47, %v10710_v3  ;;  %v11120_v0 = vmax.f32 %v11056_v11, %v10898_v23 }
 0xa1f   : > { %v10865_v4 = vld [vmem:[#allocation6 + $0x21] sm:$0xff] }
 0xa20   : > { %v10929_v2 = vmax.f32 %v10865_v4, %v10897_v45  ;;  %12807 = vmatmul.msk.f32.gmra.mxu3 %vm5674_vm4, %v10484_v35  ;;  %10834 = vst.msk [vmem:[#allocation6 + $0x31] sm:$0xff] %vm3016_vm3, %v10746_v7  ;;  %v11026_v58 = vld [vmem:[#allocation6 + $0x1a] sm:$0xff]  ;;  %v11027_v57 = vld [vmem:[#allocation6 + $0x22] sm:$0xff] }
 0xa21   : > { %v11184_v45 = vmax.f32 %v11120_v0, %v11026_v58  ;;  %v10486_v7 = vld [vmem:[#allocation5 + $0x12a] sm:$0xff] }
 0xa22   : > { %v10993_v8 = vmax.f32 %v10929_v2, %v10961_v27 }
 0xa23   : > { %v10621_v38 = vpop.f32.mrf.mxu3 }
 0xa24   : > { %v10711_v61 = vadd.f32 %v10621_v38, %v17785_v19  ;;  %v11057_v49 = vmax.f32 %v10993_v8, %v11025_v52  ;;  %v10899_v19 = vld [vmem:[#allocation6 + $0x20] sm:$0xff]  ;;  %v18016_v55 = vpop.f32.mrf.mxu1 }
 0xa26   : > { %v10747_v60 = vadd.f32 %v17926_v47, %v10711_v61  ;;  %v11121_v42 = vmax.f32 %v11057_v49, %v10899_v19 }
 0xa27   : > { %v10866_v3 = vld [vmem:[#allocation6 + $0x31] sm:$0xff] }
 0xa28   : > { %10835 = vst.msk [vmem:[#allocation6 + $0x39] sm:$0xff] %vm3016_vm3, %v10747_v60  ;;  %12808 = vmatmul.msk.f32.gmra.mxu3 %vm5674_vm4, %v10485_v34  ;;  %v11185_v27 = vmax.f32 %v11121_v42, %v11027_v57  ;;  %v10900_v35 = vld [vmem:[#allocation6 + $0x30] sm:$0xff]  ;;  %v10930_v56 = vmax.f32 %v10866_v3, %v10898_v23 }
 0xa29   : > { %v11249_v39 = vmax.f32 %v11184_v45, %v10900_v35  ;;  %v18027_v45 = vpop.f32.mrf.mxu0 }
 0xa2a   : > { %v10994_v11 = vmax.f32 %v10930_v56, %v17970_v16 }
 0xa2b   : > { %v10624_v10 = vpop.f32.mrf.mxu3  ;;  %v11313_v49 = vmax.f32 %v11249_v39, %v10866_v3 }
 0xa2c   : > { %v10712_v43 = vadd.f32 %v10624_v10, %v17794_v6  ;;  %v11058_v34 = vmax.f32 %v10994_v11, %v11026_v58  ;;  %v11410_v58 = vld [vmem:[%s14250_s25 + $0x8] sm:$0xff]  ;;  %v18039_v39 = vpop.f32.mrf.mxu1  ;;  %v18045_v11 = vpop.f32.mrf.mxu2 }
 0xa2e   : > { %v10748_v2 = vadd.f32 %v17926_v47, %v10712_v43  ;;  %v11409_v43 = vld [vmem:[%s14250_s25] sm:$0xff] }
 0xa2f   : > { %v10867_v8 = vld [vmem:[#allocation6 + $0x39] sm:$0xff] }
 0xa30   : > { %v10901_v52 = vld [vmem:[#allocation6 + $0x38] sm:$0xff]  ;;  %v10931_v38 = vmax.f32 %v10867_v8, %v10899_v19  ;;  %10836 = vst.msk [vmem:[#allocation6 + $0x49] sm:$0xff] %vm3016_vm3, %v10748_v2  ;;  %12809 = vmatmul.msk.f32.gmra.mxu3 %vm5674_vm4, %v10486_v7 }
 0xa31   : > { %v11028_v6 = vld [vmem:[#allocation6 + $0x32] sm:$0xff]  ;;  %v11250_v61 = vmax.f32 %v11185_v27, %v10901_v52  ;;  %v18024_v0 = vld [vmem:[#allocation6 + $0x3a] sm:$0xff] }
 0xa32   : > { %v10995_v23 = vmax.f32 %v10931_v38, %v10865_v4  ;;  %v11377_v42 = vmax.f32 %v11313_v49, %v11028_v6  ;;  %v11122_v4 = vmax.f32 %v11058_v34, %v10900_v35 }
 0xa33   : > { %v11314_v60 = vmax.f32 %v11250_v61, %v10867_v8  ;;  %v10627_v10 = vpop.f32.mrf.mxu3  ;;  %v10487_v61 = vld [vmem:[#allocation5 + $0x13a] sm:$0xff] }
 0xa34   : > { %v10713_v19 = vadd.f32 %v10627_v10, %v17803_v13  ;;  %v11441_v27 = vadd.f32 %v11409_v43, %v11377_v42  ;;  %v11059_v7 = vmax.f32 %v10995_v23, %v11027_v57  ;;  %v18053_v43 = vpop.f32.mrf.mxu0 }
 0xa35   : > { %v11378_v16 = vmax.f32 %v11314_v60, %v18024_v0  ;;  %v11186_v60 = vmax.f32 %v11122_v4, %v11028_v6 }
 0xa36   : > { %v10749_v56 = vadd.f32 %v17926_v47, %v10713_v19  ;;  %11473 = vst.msk [vmem:[%s18033_s16] sm:$0xff] %vm3016_vm3, %v11441_v27  ;;  %v11123_v34 = vmax.f32 %v11059_v7, %v10901_v52 }
 0xa37   : > { %v11442_v2 = vadd.f32 %v11410_v58, %v11378_v16  ;;  %v18043_v38 = vld [vmem:[#allocation6 + $0x49] sm:$0xff]  ;;  %v10488_v58 = vld [vmem:[#allocation5 + $0x142] sm:$0xff] }
 0xa38   : > { %v10902_v49 = vld [vmem:[#allocation6 + $0x48] sm:$0xff]  ;;  %v10932_v13 = vmax.f32 %v18043_v38, %v10900_v35  ;;  %12810 = vmatmul.msk.f32.gmra.mxu3 %vm5674_vm4, %v10487_v61  ;;  %10837 = vst.msk [vmem:[#allocation6 + $0x51] sm:$0xff] %vm3016_vm3, %v10749_v56  ;;  %v11187_v19 = vmax.f32 %v11123_v34, %v18024_v0  ;;  %v11411_v61 = vld [vmem:[%s14250_s25 + $0x10] sm:$0xff] }
 0xa39   : > { %11474 = vst.msk [vmem:[%s18033_s16 + $0x8] sm:$0xff] %vm3016_vm3, %v11442_v2  ;;  %v11251_v42 = vmax.f32 %v11186_v60, %v10902_v49 }
 0xa3a   : > { %v10996_v23 = vmax.f32 %v10932_v13, %v10866_v3  ;;  %v18072_v13 = vpop.f32.mrf.mxu2 }
 0xa3b   : > { %v10630_v57 = vpop.f32.mrf.mxu3  ;;  %v11315_v35 = vmax.f32 %v11251_v42, %v18043_v38 }
 0xa3c   : > { %v10714_v10 = vadd.f32 %v10630_v57, %v17812_v5  ;;  %v11060_v27 = vmax.f32 %v10996_v23, %v11028_v6  ;;  %v18066_v5 = vpop.f32.mrf.mxu1  ;;  %v9890_v23 = vadd.f32 %v17955_v17, %v17638_v20  ;;  %v10489_v20 = vld [vmem:[#allocation5 + $0x152] sm:$0xff] }
 0xa3e   : > { %v10750_v16 = vadd.f32 %v17926_v47, %v10714_v10  ;;  %v11124_v10 = vmax.f32 %v11060_v27, %v10902_v49  ;;  %v10166_v17 = vadd.f32 %v17964_v12, %v9890_v23  ;;  %v18091_v27 = vpop.f32.mrf.mxu0 }
 0xa3f   : > { %v18058_v4 = vld [vmem:[#allocation6 + $0x51] sm:$0xff] }
 0xa40   : > { %v18060_v2 = vld [vmem:[#allocation6 + $0x50] sm:$0xff]  ;;  %10838 = vst.msk [vmem:[#allocation6 + $0x61] sm:$0xff] %vm3016_vm3, %v10750_v16  ;;  %12811 = vmatmul.msk.f32.gmra.mxu3 %vm5674_vm4, %v10488_v58  ;;  %v10933_v3 = vmax.f32 %v18058_v4, %v10901_v52 }
 0xa41   : > { %v18062_v56 = vld [vmem:[#allocation6 + $0x4a] sm:$0xff]  ;;  %v11252_v7 = vmax.f32 %v11187_v19, %v18060_v2  ;;  %v18077_v16 = vld [vmem:[#allocation6 + $0x52] sm:$0xff] }
 0xa42   : > { %v11379_v6 = vmax.f32 %v11315_v35, %v18062_v56  ;;  %v10997_v60 = vmax.f32 %v10933_v3, %v10867_v8  ;;  %v11412_v35 = vld [vmem:[%s14250_s25 + $0x18] sm:$0xff]  ;;  %v18106_v23 = vpop.f32.mrf.mxu2 }
 0xa43   : > { %v11316_v34 = vmax.f32 %v11252_v7, %v18058_v4  ;;  %v10633_v57 = vpop.f32.mrf.mxu3 }
 0xa44   : > { %v11443_v42 = vadd.f32 %v11411_v61, %v11379_v6  ;;  %v10715_v52 = vadd.f32 %v10633_v57, %v17821_v54  ;;  %v11061_v8 = vmax.f32 %v10997_v60, %v18024_v0  ;;  %v11188_v54 = vmax.f32 %v11124_v10, %v18062_v56 }
 0xa45   : > { %v11380_v19 = vmax.f32 %v11316_v34, %v18077_v16  ;;  %v10441_v61 = vadd.f32 %v17968_v9, %v10166_v17  ;;  %v9891_v57 = vadd.f32 %v17986_v22, %v17654_v24  ;;  %v11413_v17 = vld [vmem:[%s14250_s25 + $0x20] sm:$0xff] }
 0xa46   : > { %11475 = vst.msk [vmem:[%s18033_s16 + $0x10] sm:$0xff] %vm3016_vm3, %v11443_v42  ;;  %v10751_v58 = vadd.f32 %v17926_v47, %v10715_v52  ;;  %v11125_v60 = vmax.f32 %v11061_v8, %v18060_v2  ;;  %v18102_v42 = vpop.f32.mrf.mxu1 }
 0xa47   : > { %v11444_v3 = vadd.f32 %v11412_v35, %v11380_v19  ;;  %v18086_v7 = vld [vmem:[#allocation6 + $0x61] sm:$0xff]  ;;  %v10167_v24 = vadd.f32 %v17995_v30, %v9891_v57  ;;  %v9892_v57 = vadd.f32 %v18013_v1, %v17670_v21 }
 0xa48   : > { %v18088_v6 = vld [vmem:[#allocation6 + $0x60] sm:$0xff]  ;;  %10839 = vst.msk [vmem:[#allocation6 + $0x69] sm:$0xff] %vm3016_vm3, %v10751_v58  ;;  %12812 = vmatmul.msk.f32.gmra.mxu3 %vm5674_vm4, %v10489_v20  ;;  %v10934_v0 = vmax.f32 %v18086_v7, %v10902_v49  ;;  %v11189_v49 = vmax.f32 %v11125_v60, %v18077_v16  ;;  %v10490_v20 = vld [vmem:[#allocation5 + $0x15a] sm:$0xff] }
 0xa49   : > { %11476 = vst.msk [vmem:[%s18033_s16 + $0x18] sm:$0xff] %vm3016_vm3, %v11444_v3  ;;  %v11253_v34 = vmax.f32 %v11188_v54, %v18088_v6  ;;  %v10442_v30 = vadd.f32 %v18000_v46, %v10167_v24  ;;  %v10168_v21 = vadd.f32 %v18016_v55, %v9892_v57 }
 0xa4a   : > { %v10998_v52 = vmax.f32 %v10934_v0, %v18043_v38  ;;  %v18127_v0 = vpop.f32.mrf.mxu0 }
 0xa4b   : > { %v10636_v12 = vpop.f32.mrf.mxu3  ;;  %v11317_v9 = vmax.f32 %v11253_v34, %v18086_v7 }
 0xa4c   : > { %v10716_v10 = vadd.f32 %v10636_v12, %v10441_v61  ;;  %v11062_v54 = vmax.f32 %v10998_v52, %v18062_v56  ;;  %v11414_v52 = vld [vmem:[%s14250_s25 + $0x28] sm:$0xff] }
 0xa4e   : > { %v10752_v19 = vadd.f32 %v17926_v47, %v10716_v10  ;;  %v11126_v46 = vmax.f32 %v11062_v54, %v18088_v6 }
 0xa4f   : > { %v18112_v35 = vld [vmem:[#allocation6 + $0x69] sm:$0xff] }
 0xa50   : > { %v18114_v8 = vld [vmem:[#allocation6 + $0x68] sm:$0xff]  ;;  %v10935_v22 = vmax.f32 %v18112_v35, %v18060_v2  ;;  %10840 = vst.msk [vmem:[#allocation6 + $0x79] sm:$0xff] %vm3016_vm3, %v10752_v19  ;;  %12813 = vmatmul.msk.f32.gmra.mxu3 %vm5674_vm4, %v10490_v20 }
 0xa51   : > { %v18116_v58 = vld [vmem:[#allocation6 + $0x62] sm:$0xff]  ;;  %v11254_v3 = vmax.f32 %v11189_v49, %v18114_v8  ;;  %v18132_v34 = vld [vmem:[#allocation6 + $0x6a] sm:$0xff]  ;;  %v18140_v49 = vpop.f32.mrf.mxu1 }
 0xa52   : > { %v11381_v38 = vmax.f32 %v11317_v9, %v18116_v58  ;;  %v10999_v60 = vmax.f32 %v10935_v22, %v18058_v4  ;;  %v18143_v9 = vpop.f32.mrf.mxu2  ;;  %v11190_v20 = vmax.f32 %v11126_v46, %v18116_v58 }
 0xa53   : > { %v11318_v2 = vmax.f32 %v11254_v3, %v18112_v35  ;;  %v10639_v12 = vpop.f32.mrf.mxu3 }
 0xa54   : > { %v11445_v61 = vadd.f32 %v11413_v17, %v11381_v38  ;;  %v10717_v10 = vadd.f32 %v10639_v12, %v10442_v30  ;;  %v11063_v24 = vmax.f32 %v10999_v60, %v18077_v16  ;;  %v10491_v38 = vld [vmem:[#allocation5 + $0x16a] sm:$0xff]  ;;  %v10443_v16 = vadd.f32 %v18018_v44, %v10168_v21 }
 0xa55   : > { %v11382_v56 = vmax.f32 %v11318_v2, %v18132_v34  ;;  %v9893_v30 = vadd.f32 %v18027_v45, %v17686_v32  ;;  %v18164_v2 = vpop.f32.mrf.mxu0 }
 0xa56   : > { %11477 = vst.msk [vmem:[%s18033_s16 + $0x20] sm:$0xff] %vm3016_vm3, %v11445_v61  ;;  %v10753_v19 = vadd.f32 %v17926_v47, %v10717_v10  ;;  %v11127_v17 = vmax.f32 %v11063_v24, %v18114_v8 }
 0xa57   : > { %v11446_v4 = vadd.f32 %v11414_v52, %v11382_v56  ;;  %v18147_v22 = vld [vmem:[#allocation6 + $0x79] sm:$0xff]  ;;  %v10492_v56 = vld [vmem:[#allocation5 + $0x172] sm:$0xff]  ;;  %v10169_v10 = vadd.f32 %v18039_v39, %v9893_v30 }
 0xa58   : > { %v18152_v1 = vld [vmem:[#allocation6 + $0x78] sm:$0xff]  ;;  %v10936_v3 = vmax.f32 %v18147_v22, %v18088_v6  ;;  %10841 = vst.msk [vmem:[#allocation6 + $0x81] sm:$0xff] %vm3016_vm3, %v10753_v19  ;;  %12814 = vmatmul.msk.f32.gmra.mxu3 %vm5674_vm4, %v10491_v38  ;;  %v11191_v44 = vmax.f32 %v11127_v17, %v18132_v34 }
 0xa59   : > { %11478 = vst.msk [vmem:[%s18033_s16 + $0x28] sm:$0xff] %vm3016_vm3, %v11446_v4  ;;  %v11255_v55 = vmax.f32 %v11190_v20, %v18152_v1  ;;  %v18168_v12 = vpop.f32.mrf.mxu1  ;;  %v10444_v24 = vadd.f32 %v18045_v11, %v10169_v10  ;;  %v11416_v11 = vld [vmem:[%s14250_s25 + $0x38] sm:$0xff] }
 0xa5a   : > { %v11000_v6 = vmax.f32 %v10936_v3, %v18086_v7  ;;  %v18173_v52 = vpop.f32.mrf.mxu2 }
 0xa5b   : > { %v10642_v54 = vpop.f32.mrf.mxu3  ;;  %v11319_v57 = vmax.f32 %v11255_v55, %v18147_v22 }
 0xa5c   : > { %v10718_v61 = vadd.f32 %v10642_v54, %v10443_v16  ;;  %v11064_v32 = vmax.f32 %v11000_v6, %v18116_v58  ;;  %v11415_v58 = vld [vmem:[%s14250_s25 + $0x30] sm:$0xff]  ;;  %v9894_v16 = vadd.f32 %v18053_v43, %v17702_v36 }
 0xa5d   : > { %v18201_v30 = vpop.f32.mrf.mxu0 }
 0xa5e   : > { %v10754_v60 = vadd.f32 %v17926_v47, %v10718_v61  ;;  %v10170_v43 = vadd.f32 %v18066_v5, %v9894_v16 }
 0xa5f   : > { %v18176_v45 = vld [vmem:[#allocation6 + $0x81] sm:$0xff] }
 0xa60   : > { %v18178_v7 = vld [vmem:[#allocation6 + $0x80] sm:$0xff]  ;;  %10842 = vst.msk [vmem:[#allocation6 + $0x91] sm:$0xff] %vm3016_vm3, %v10754_v60  ;;  %v10937_v4 = vmax.f32 %v18176_v45, %v18114_v8  ;;  %12815 = vmatmul.msk.f32.gmra.mxu3 %vm5674_vm4, %v10492_v56  ;;  %v11128_v8 = vmax.f32 %v11064_v32, %v18152_v1  ;;  %v10445_v10 = vadd.f32 %v18072_v13, %v10170_v43 }
 0xa61   : > { %v18180_v46 = vld [vmem:[#allocation6 + $0x7a] sm:$0xff]  ;;  %v11256_v19 = vmax.f32 %v11191_v44, %v18178_v7  ;;  %v18195_v17 = vld [vmem:[#allocation6 + $0x82] sm:$0xff]  ;;  %v18212_v56 = vpop.f32.mrf.mxu1 }
 0xa62   : > { %v11383_v39 = vmax.f32 %v11319_v57, %v18180_v46  ;;  %v11001_v21 = vmax.f32 %v10937_v4, %v18112_v35  ;;  %v11192_v44 = vmax.f32 %v11128_v8, %v18180_v46  ;;  %v10493_v57 = vld [vmem:[#allocation5 + $0x182] sm:$0xff]  ;;  %v18220_v32 = vpop.f32.mrf.mxu2 }
 0xa63   : > { %v11320_v3 = vmax.f32 %v11256_v19, %v18176_v45  ;;  %v10645_v20 = vpop.f32.mrf.mxu3 }
 0xa64   : > { %v11447_v38 = vadd.f32 %v11415_v58, %v11383_v39  ;;  %v10719_v55 = vadd.f32 %v10645_v20, %v10444_v24  ;;  %v11065_v35 = vmax.f32 %v11001_v21, %v18132_v34  ;;  %v9895_v39 = vadd.f32 %v18091_v27, %v17716_v33 }
 0xa65   : > { %v11384_v54 = vmax.f32 %v11320_v3, %v18195_v17  ;;  %v18237_v8 = vpop.f32.mrf.mxu0 }
 0xa66   : > { %11479 = vst.msk [vmem:[%s18033_s16 + $0x30] sm:$0xff] %vm3016_vm3, %v11447_v38  ;;  %v10755_v6 = vadd.f32 %v17926_v47, %v10719_v55  ;;  %v11129_v5 = vmax.f32 %v11065_v35, %v18178_v7  ;;  %v10171_v16 = vadd.f32 %v18102_v42, %v9895_v39  ;;  %v10494_v55 = vld [vmem:[#allocation5 + $0x18a] sm:$0xff] }
 0xa67   : > { %v11448_v61 = vadd.f32 %v11416_v11, %v11384_v54  ;;  %v18205_v60 = vld [vmem:[#allocation6 + $0x91] sm:$0xff]  ;;  %v11417_v54 = vld [vmem:[%s14250_s25 + $0x40] sm:$0xff] }
 0xa68   : > { %v18207_v36 = vld [vmem:[#allocation6 + $0x90] sm:$0xff]  ;;  %10843 = vst.msk [vmem:[#allocation6 + $0x99] sm:$0xff] %vm3016_vm3, %v10755_v6  ;;  %v10938_v34 = vmax.f32 %v18205_v60, %v18152_v1  ;;  %12816 = vmatmul.msk.f32.gmra.mxu3 %vm5674_vm4, %v10493_v57  ;;  %v11193_v1 = vmax.f32 %v11129_v5, %v18195_v17  ;;  %v10446_v42 = vadd.f32 %v18106_v23, %v10171_v16 }
 0xa69   : > { %11480 = vst.msk [vmem:[%s18033_s16 + $0x38] sm:$0xff] %vm3016_vm3, %v11448_v61  ;;  %v11257_v4 = vmax.f32 %v11192_v44, %v18207_v36  ;;  %v9896_v57 = vadd.f32 %v18127_v0, %v17733_v59 }
 0xa6a   : > { %v11002_v24 = vmax.f32 %v10938_v34, %v18147_v22  ;;  %v18256_v34 = vpop.f32.mrf.mxu2 }
 0xa6b   : > { %v10648_v19 = vpop.f32.mrf.mxu3  ;;  %v11321_v21 = vmax.f32 %v11257_v4, %v18205_v60  ;;  %v10172_v59 = vadd.f32 %v18140_v49, %v9896_v57 }
 0xa6c   : > { %v10720_v58 = vadd.f32 %v10648_v19, %v10445_v10  ;;  %v11066_v11 = vmax.f32 %v11002_v24, %v18180_v46  ;;  %v11418_v10 = vld [vmem:[%s14250_s25 + $0x48] sm:$0xff] }
 0xa6d   : > { %v10495_v19 = vld [vmem:[#allocation5 + $0x19a] sm:$0xff] }
 0xa6e   : > { %v10756_v13 = vadd.f32 %v17926_v47, %v10720_v58  ;;  %v11130_v5 = vmax.f32 %v11066_v11, %v18207_v36  ;;  %v10496_v11 = vld [vmem:[#allocation5 + $0x1a2] sm:$0xff] }
 0xa6f   : > { %v18230_v3 = vld [vmem:[#allocation6 + $0x99] sm:$0xff] }
 0xa70   : > { %v18232_v38 = vld [vmem:[#allocation6 + $0x98] sm:$0xff]  ;;  %v10939_v33 = vmax.f32 %v18230_v3, %v18178_v7  ;;  %10844 = vst.msk [vmem:[#allocation6 + $0xa9] sm:$0xff] %vm3016_vm3, %v10756_v13  ;;  %12817 = vmatmul.msk.f32.gmra.mxu3 %vm5674_vm4, %v10494_v55  ;;  %v18249_v7 = vpop.f32.mrf.mxu1 }
 0xa71   : > { %v18234_v20 = vld [vmem:[#allocation6 + $0x92] sm:$0xff]  ;;  %v11258_v27 = vmax.f32 %v11193_v1, %v18232_v38  ;;  %v18252_v43 = vld [vmem:[#allocation6 + $0x9a] sm:$0xff] }
 0xa72   : > { %v11385_v22 = vmax.f32 %v11321_v21, %v18234_v20  ;;  %v11003_v61 = vmax.f32 %v10939_v33, %v18176_v45  ;;  %v11194_v1 = vmax.f32 %v11130_v5, %v18234_v20  ;;  %v18275_v21 = vpop.f32.mrf.mxu0  ;;  %v9897_v33 = vadd.f32 %v18164_v2, %v17749_v41  ;;  %v18284_v55 = vpop.f32.mrf.mxu2 }
 0xa73   : > { %v11322_v35 = vmax.f32 %v11258_v27, %v18230_v3  ;;  %v10651_v44 = vpop.f32.mrf.mxu3 }
 0xa74   : > { %v11449_v6 = vadd.f32 %v11417_v54, %v11385_v22  ;;  %v10721_v23 = vadd.f32 %v10651_v44, %v10446_v42  ;;  %v11067_v39 = vmax.f32 %v11003_v61, %v18195_v17  ;;  %v10447_v17 = vadd.f32 %v18143_v9, %v10172_v59 }
 0xa75   : > { %v11386_v46 = vmax.f32 %v11322_v35, %v18252_v43  ;;  %v10173_v35 = vadd.f32 %v18168_v12, %v9897_v33 }
 0xa76   : > { %11481 = vst.msk [vmem:[%s18033_s16 + $0x40] sm:$0xff] %vm3016_vm3, %v11449_v6  ;;  %v10757_v45 = vadd.f32 %v17926_v47, %v10721_v23  ;;  %v11131_v13 = vmax.f32 %v11067_v39, %v18232_v38 }
 0xa77   : > { %v11450_v4 = vadd.f32 %v11418_v10, %v11386_v46  ;;  %v18265_v58 = vld [vmem:[#allocation6 + $0xa9] sm:$0xff]  ;;  %v10448_v12 = vadd.f32 %v18173_v52, %v10173_v35  ;;  %v11420_v52 = vld [vmem:[%s14250_s25 + $0x58] sm:$0xff] }
 0xa78   : > { %v10910_v0 = vld [vmem:[#allocation6 + $0xa8] sm:$0xff]  ;;  %v10940_v24 = vmax.f32 %v18265_v58, %v18207_v36  ;;  %10845 = vst.msk [vmem:[#allocation6 + $0xb1] sm:$0xff] %vm3016_vm3, %v10757_v45  ;;  %12818 = vmatmul.msk.f32.gmra.mxu3 %vm5674_vm4, %v10495_v19  ;;  %v18282_v22 = vpop.f32.mrf.mxu1  ;;  %v11195_v9 = vmax.f32 %v11131_v13, %v18252_v43  ;;  %v11419_v46 = vld [vmem:[%s14250_s25 + $0x50] sm:$0xff] }
 0xa79   : > { %11482 = vst.msk [vmem:[%s18033_s16 + $0x48] sm:$0xff] %vm3016_vm3, %v11450_v4  ;;  %v11259_v16 = vmax.f32 %v11194_v1, %v10910_v0  ;;  %v9898_v4 = vadd.f32 %v18201_v30, %v17761_v26 }
 0xa7a   : > { %v11004_v27 = vmax.f32 %v10940_v24, %v18205_v60  ;;  %v18302_v45 = vpop.f32.mrf.mxu0 }
 0xa7b   : > { %v10654_v49 = vpop.f32.mrf.mxu3  ;;  %v11323_v42 = vmax.f32 %v11259_v16, %v18265_v58  ;;  %v10174_v13 = vadd.f32 %v18212_v56, %v9898_v4  ;;  %v18315_v16 = vpop.f32.mrf.mxu2 }
 0xa7c   : > { %v10722_v36 = vadd.f32 %v10654_v49, %v10447_v17  ;;  %v11068_v6 = vmax.f32 %v11004_v27, %v18234_v20 }
 0xa7e   : > { %v10758_v54 = vadd.f32 %v17926_v47, %v10722_v36 }
 0xa7f   : > { %v10877_v41 = vld [vmem:[#allocation6 + $0xb1] sm:$0xff] }
 0xa80   : > { %v10911_v2 = vld [vmem:[#allocation6 + $0xb0] sm:$0xff]  ;;  %10846 = vst.msk [vmem:[#allocation6 + $0xc1] sm:$0xff] %vm3016_vm3, %v10758_v54  ;;  %v10941_v61 = vmax.f32 %v10877_v41, %v18232_v38  ;;  %12819 = vmatmul.msk.f32.gmra.mxu3 %vm5674_vm4, %v10496_v11  ;;  %v11132_v38 = vmax.f32 %v11068_v6, %v10910_v0  ;;  %v18312_v1 = vpop.f32.mrf.mxu1  ;;  %v9899_v11 = vadd.f32 %v18237_v8, %v17770_v48  ;;  %v11421_v8 = vld [vmem:[%s14250_s25 + $0x60] sm:$0xff] }
 0xa81   : > { %v18291_v60 = vld [vmem:[#allocation6 + $0xaa] sm:$0xff]  ;;  %v11260_v44 = vmax.f32 %v11195_v9, %v10911_v2  ;;  %v18304_v19 = vld [vmem:[#allocation6 + $0xb2] sm:$0xff] }
 0xa82   : > { %v11387_v57 = vmax.f32 %v11323_v42, %v18291_v60  ;;  %v11005_v20 = vmax.f32 %v10941_v61, %v18230_v3  ;;  %v11196_v49 = vmax.f32 %v11132_v38, %v18291_v60  ;;  %v18325_v42 = vpop.f32.mrf.mxu0 }
 0xa83   : > { %v11324_v23 = vmax.f32 %v11260_v44, %v10877_v41  ;;  %v10657_v5 = vpop.f32.mrf.mxu3 }
 0xa84   : > { %v11451_v10 = vadd.f32 %v11419_v46, %v11387_v57  ;;  %v10723_v39 = vadd.f32 %v10657_v5, %v10448_v12  ;;  %v11069_v3 = vmax.f32 %v11005_v20, %v18252_v43  ;;  %v10449_v43 = vadd.f32 %v18220_v32, %v10174_v13 }
 0xa85   : > { %v11388_v59 = vmax.f32 %v11324_v23, %v18304_v19  ;;  %v10175_v57 = vadd.f32 %v18249_v7, %v9899_v11 }
 0xa86   : > { %11483 = vst.msk [vmem:[%s18033_s16 + $0x50] sm:$0xff] %vm3016_vm3, %v11451_v10  ;;  %v10759_v24 = vadd.f32 %v17926_v47, %v10723_v39  ;;  %v11133_v27 = vmax.f32 %v11069_v3, %v10911_v2  ;;  %v18339_v10 = vpop.f32.mrf.mxu2  ;;  %v9900_v39 = vadd.f32 %v18275_v21, %v17779_v51 }
 0xa87   : > { %v11452_v17 = vadd.f32 %v11420_v52, %v11388_v59  ;;  %v10878_v26 = vld [vmem:[#allocation6 + $0xc1] sm:$0xff]  ;;  %v10450_v23 = vadd.f32 %v18256_v34, %v10175_v57 }
 0xa88   : > { %v10912_v30 = vld [vmem:[#allocation6 + $0xc0] sm:$0xff]  ;;  %10847 = vst.msk [vmem:[#allocation6 + $0xc9] sm:$0xff] %vm3016_vm3, %v10759_v24  ;;  %v10942_v33 = vmax.f32 %v10878_v26, %v10910_v0  ;;  %v11197_v35 = vmax.f32 %v11133_v27, %v18304_v19 }
 0xa89   : > { %11484 = vst.msk [vmem:[%s18033_s16 + $0x58] sm:$0xff] %vm3016_vm3, %v11452_v17  ;;  %v11261_v36 = vmax.f32 %v11196_v49, %v10912_v30 }
 0xa8a   : > { %v11006_v56 = vmax.f32 %v10942_v33, %v18265_v58  ;;  %v18335_v58 = vpop.f32.mrf.mxu1  ;;  %v9849_v49 = vpop.f32.mrf.mxu0 }
 0xa8b   : > { %v10660_v54 = vpop.f32.mrf.mxu3  ;;  %v11325_v6 = vmax.f32 %v11261_v36, %v10878_v26 }
 0xa8c   : > { %v10724_v9 = vadd.f32 %v10660_v54, %v10449_v43  ;;  %v11070_v20 = vmax.f32 %v11006_v56, %v18291_v60  ;;  %v11422_v60 = vld [vmem:[%s14250_s25 + $0x68] sm:$0xff] }
 0xa8e   : > { %v10760_v61 = vadd.f32 %v17926_v47, %v10724_v9  ;;  %v11134_v3 = vmax.f32 %v11070_v20, %v10912_v30 }
 0xa8f   : > { %v10879_v0 = vld [vmem:[#allocation6 + $0xc9] sm:$0xff] }
 0xa90   : > { %v10913_v44 = vld [vmem:[#allocation6 + $0xc8] sm:$0xff]  ;;  %v10943_v46 = vmax.f32 %v10879_v0, %v10911_v2  ;;  %10848 = vst.msk [vmem:[#allocation6 + $0xd9] sm:$0xff] %vm3016_vm3, %v10760_v61 }
 0xa91   : > { %v18329_v32 = vld [vmem:[#allocation6 + $0xc2] sm:$0xff]  ;;  %v11262_v12 = vmax.f32 %v11197_v35, %v10913_v44  ;;  %v18341_v2 = vld [vmem:[#allocation6 + $0xca] sm:$0xff] }
 0xa92   : > { %v11389_v48 = vmax.f32 %v11325_v6, %v18329_v32  ;;  %v11007_v7 = vmax.f32 %v10943_v46, %v10877_v41  ;;  %v10176_v41 = vadd.f32 %v18282_v22, %v9900_v39  ;;  %v11198_v21 = vmax.f32 %v11134_v3, %v18329_v32  ;;  %v10125_v27 = vpop.f32.mrf.mxu1  ;;  %v18359_v22 = vpop.f32.mrf.mxu2 }
 0xa93   : > { %v11326_v5 = vmax.f32 %v11262_v12, %v10879_v0  ;;  %v10663_v38 = vpop.f32.mrf.mxu3 }
 0xa94   : > { %v11453_v4 = vadd.f32 %v11421_v8, %v11389_v48  ;;  %v10725_v52 = vadd.f32 %v10663_v38, %v10450_v23  ;;  %v11071_v17 = vmax.f32 %v11007_v7, %v18304_v19  ;;  %v10451_v43 = vadd.f32 %v18284_v55, %v10176_v41  ;;  %v11423_v48 = vld [vmem:[%s14250_s25 + $0x70] sm:$0xff]  ;;  %v9852_v8 = vpop.f32.mrf.mxu0 }
 0xa95   : > { %v11390_v59 = vmax.f32 %v11326_v5, %v18341_v2  ;;  %v9901_v19 = vadd.f32 %v18302_v45, %v17788_v25 }
 0xa96   : > { %11485 = vst.msk [vmem:[%s18033_s16 + $0x60] sm:$0xff] %vm3016_vm3, %v11453_v4  ;;  %v10761_v24 = vadd.f32 %v17926_v47, %v10725_v52  ;;  %v11135_v36 = vmax.f32 %v11071_v17, %v10913_v44  ;;  %v9902_v4 = vadd.f32 %v18325_v42, %v17797_v53  ;;  %v11424_v52 = vld [vmem:[%s14250_s25 + $0x78] sm:$0xff] }
 0xa97   : > { %v11454_v34 = vadd.f32 %v11422_v60, %v11390_v59  ;;  %v10880_v13 = vld [vmem:[#allocation6 + $0xd9] sm:$0xff]  ;;  %v10177_v61 = vadd.f32 %v18312_v1, %v9901_v19 }
 0xa98   : > { %v10914_v33 = vld [vmem:[#allocation6 + $0xd8] sm:$0xff]  ;;  %v10944_v51 = vmax.f32 %v10880_v13, %v10912_v30  ;;  %10849 = vst.msk [vmem:[#allocation6 + $0xe1] sm:$0xff] %vm3016_vm3, %v10761_v24  ;;  %v11199_v35 = vmax.f32 %v11135_v36, %v18341_v2  ;;  %v10178_v53 = vadd.f32 %v18335_v58, %v9902_v4 }
 0xa99   : > { %11486 = vst.msk [vmem:[%s18033_s16 + $0x68] sm:$0xff] %vm3016_vm3, %v11454_v34  ;;  %v11263_v54 = vmax.f32 %v11198_v21, %v10914_v33  ;;  %v10452_v20 = vadd.f32 %v18315_v16, %v10177_v61 }
 0xa9a   : > { %v11008_v9 = vmax.f32 %v10944_v51, %v10878_v26  ;;  %v10128_v39 = vpop.f32.mrf.mxu1  ;;  %v10403_v60 = vpop.f32.mrf.mxu2  ;;  %v10453_v41 = vadd.f32 %v18339_v10, %v10178_v53 }
 0xa9b   : > { %v10666_v11 = vpop.f32.mrf.mxu3  ;;  %v11327_v6 = vmax.f32 %v11263_v54, %v10880_v13 }
 0xa9c   : > { %v10726_v56 = vadd.f32 %v10666_v11, %v10451_v43  ;;  %v11072_v55 = vmax.f32 %v11008_v9, %v18329_v32  ;;  %v9855_v36 = vpop.f32.mrf.mxu0 }
 0xa9e   : > { %v10762_v30 = vadd.f32 %v17926_v47, %v10726_v56  ;;  %v11136_v7 = vmax.f32 %v11072_v55, %v10914_v33 }
 0xa9f   : > { %v10881_v57 = vld [vmem:[#allocation6 + $0xe1] sm:$0xff] }
 0xaa0   : > { %v10915_v46 = vld [vmem:[#allocation6 + $0xe0] sm:$0xff]  ;;  %10850 = vst.msk [vmem:[#allocation6 + $0xf1] sm:$0xff] %vm3016_vm3, %v10762_v30  ;;  %v10945_v25 = vmax.f32 %v10881_v57, %v10913_v44 }
 0xaa1   : > { %v18365_v12 = vld [vmem:[#allocation6 + $0xda] sm:$0xff]  ;;  %v11264_v45 = vmax.f32 %v11199_v35, %v10915_v46  ;;  %v18373_v38 = vld [vmem:[#allocation6 + $0xe2] sm:$0xff] }
 0xaa2   : > { %v11391_v26 = vmax.f32 %v11327_v6, %v18365_v12  ;;  %v11009_v23 = vmax.f32 %v10945_v25, %v10879_v0  ;;  %v11200_v42 = vmax.f32 %v11136_v7, %v18365_v12  ;;  %v10131_v56 = vpop.f32.mrf.mxu1  ;;  %v10406_v6 = vpop.f32.mrf.mxu2 }
 0xaa3   : > { %v11328_v1 = vmax.f32 %v11264_v45, %v10881_v57  ;;  %v10669_v32 = vpop.f32.mrf.mxu3 }
 0xaa4   : > { %v11455_v5 = vadd.f32 %v11423_v48, %v11391_v26  ;;  %v10727_v44 = vadd.f32 %v10669_v32, %v10452_v20  ;;  %v11073_v16 = vmax.f32 %v11009_v23, %v18341_v2  ;;  %v9903_v2 = vadd.f32 %v9849_v49, %v17806_v62  ;;  %v9858_v4 = vpop.f32.mrf.mxu0 }
 0xaa5   : > { %v11392_v59 = vmax.f32 %v11328_v1, %v18373_v38 }
 0xaa6   : > { %11487 = vst.msk [vmem:[%s18033_s16 + $0x70] sm:$0xff] %vm3016_vm3, %v11455_v5  ;;  %v10763_v0 = vadd.f32 %v17926_v47, %v10727_v44  ;;  %v11137_v51 = vmax.f32 %v11073_v16, %v10915_v46  ;;  %v10179_v10 = vadd.f32 %v10125_v27, %v9903_v2  ;;  %v11426_v5 = vld [vmem:[%s14250_s25 + $0x88] sm:$0xff] }
 0xaa7   : > { %v11456_v3 = vadd.f32 %v11424_v52, %v11392_v59  ;;  %v10882_v34 = vld [vmem:[#allocation6 + $0xf1] sm:$0xff] }
 0xaa8   : > { %v10916_v24 = vld [vmem:[#allocation6 + $0xf0] sm:$0xff]  ;;  %10851 = vst.msk [vmem:[#allocation6 + $0xf9] sm:$0xff] %vm3016_vm3, %v10763_v0  ;;  %v10946_v17 = vmax.f32 %v10882_v34, %v10914_v33  ;;  %v11201_v58 = vmax.f32 %v11137_v51, %v18373_v38  ;;  %v10454_v25 = vadd.f32 %v18359_v22, %v10179_v10 }
 0xaa9   : > { %11488 = vst.msk [vmem:[%s18033_s16 + $0x78] sm:$0xff] %vm3016_vm3, %v11456_v3  ;;  %v11265_v21 = vmax.f32 %v11200_v42, %v10916_v24 }
 0xaaa   : > { %v11010_v11 = vmax.f32 %v10946_v17, %v10880_v13  ;;  %v11425_v13 = vld [vmem:[%s14250_s25 + $0x80] sm:$0xff]  ;;  %v10409_v0 = vpop.f32.mrf.mxu2 }
 0xaab   : > { %v10672_v43 = vpop.f32.mrf.mxu3  ;;  %v11329_v19 = vmax.f32 %v11265_v21, %v10882_v34  ;;  %v18417_v17 = vld [vmem:[%s18541_s9] ss:$0 sm:$0xff] }
 0xaac   : > { %v10728_v54 = vadd.f32 %v10672_v43, %v10453_v41  ;;  %v11074_v55 = vmax.f32 %v11010_v11, %v18365_v12  ;;  %v9861_v21 = vpop.f32.mrf.mxu0 }
 0xaae   : > { %v10764_v9 = vadd.f32 %v17926_v47, %v10728_v54  ;;  %v11138_v32 = vmax.f32 %v11074_v55, %v10916_v24 }
 0xaaf   : > { %v10883_v30 = vld [vmem:[#allocation6 + $0xf9] sm:$0xff] }
 0xab0   : > { %v10917_v35 = vld [vmem:[#allocation6 + $0xf8] sm:$0xff]  ;;  %v10947_v61 = vmax.f32 %v10883_v30, %v10915_v46  ;;  %10852 = vst.msk [vmem:[#allocation6 + $0x109] sm:$0xff] %vm3016_vm3, %v10764_v9  ;;  %v9904_v46 = vadd.f32 %v9852_v8, %v17815_v40  ;;  %v10134_v8 = vpop.f32.mrf.mxu1 }
 0xab1   : > { %v18390_v33 = vld [vmem:[#allocation6 + $0xf2] sm:$0xff]  ;;  %v11266_v62 = vmax.f32 %v11201_v58, %v10917_v35  ;;  %v18397_v20 = vld [vmem:[#allocation6 + $0xfa] sm:$0xff] }
 0xab2   : > { %v11393_v49 = vmax.f32 %v11329_v19, %v18390_v33  ;;  %v11011_v48 = vmax.f32 %v10947_v61, %v10881_v57  ;;  %v10180_v57 = vadd.f32 %v10128_v39, %v9904_v46  ;;  %v11202_v52 = vmax.f32 %v11138_v32, %v18390_v33  ;;  %v11427_v58 = vld [vmem:[%s14250_s25 + $0x90] sm:$0xff] }
 0xab3   : > { %v11330_v45 = vmax.f32 %v11266_v62, %v10883_v30  ;;  %v10675_v27 = vpop.f32.mrf.mxu3 }
 0xab4   : > { %v11457_v26 = vadd.f32 %v11425_v13, %v11393_v49  ;;  %v10729_v1 = vadd.f32 %v10675_v27, %v10454_v25  ;;  %v11075_v7 = vmax.f32 %v11011_v48, %v18373_v38  ;;  %v10455_v16 = vadd.f32 %v10403_v60, %v10180_v57  ;;  %v10412_v49 = vpop.f32.mrf.mxu2 }
 0xab5   : > { %v11394_v23 = vmax.f32 %v11330_v45, %v18397_v20  ;;  %v9905_v38 = vadd.f32 %v9855_v36, %v17824_v29  ;;  %v11428_v45 = vld [vmem:[%s14250_s25 + $0x98] sm:$0xff] }
 0xab6   : > { %11489 = vst.msk [vmem:[%s18033_s16 + $0x80] sm:$0xff] %vm3016_vm3, %v11457_v26  ;;  %v10765_v22 = vadd.f32 %v17926_v47, %v10729_v1  ;;  %v11139_v3 = vmax.f32 %v11075_v7, %v10917_v35  ;;  %v9864_v1 = vpop.f32.mrf.mxu0 }
 0xab7   : > { %v11458_v12 = vadd.f32 %v11426_v5, %v11394_v23  ;;  %v18406_v44 = vld [vmem:[#allocation6 + $0x109] sm:$0xff]  ;;  %v10181_v51 = vadd.f32 %v10131_v56, %v9905_v38 }
 0xab8   : > { %v10918_v59 = vld [vmem:[#allocation6 + $0x108] sm:$0xff]  ;;  %v10948_v40 = vmax.f32 %v18406_v44, %v10916_v24  ;;  %10853 = vst.msk [vmem:[#allocation6 + $0x111] sm:$0xff] %vm3016_vm3, %v10765_v22  ;;  %v11203_v41 = vmax.f32 %v11139_v3, %v18397_v20  ;;  %v10137_v9 = vpop.f32.mrf.mxu1  ;;  %v9907_v22 = vadd.f32 %v9861_v21, %v17834_v14  ;;  %v11429_v14 = vld [vmem:[%s14250_s25 + $0xa0] sm:$0xff] }
 0xab9   : > { %11490 = vst.msk [vmem:[%s18033_s16 + $0x88] sm:$0xff] %vm3016_vm3, %v11458_v12  ;;  %v11267_v53 = vmax.f32 %v11202_v52, %v10918_v59  ;;  %v10456_v19 = vadd.f32 %v10406_v6, %v10181_v51 }
 0xaba   : > { %v11012_v42 = vmax.f32 %v10948_v40, %v10882_v34 }
 0xabb   : > { %v10678_v47 = vpop.f32.mrf.mxu3  ;;  %v11331_v60 = vmax.f32 %v11267_v53, %v18406_v44 }
 0xabc   : > { %v10730_v39 = vadd.f32 %v10678_v47, %v10455_v16  ;;  %v11076_v43 = vmax.f32 %v11012_v42, %v18390_v33  ;;  %v9906_v33 = vadd.f32 %v9858_v4, %v17829_v50  ;;  %v10415_v40 = vpop.f32.mrf.mxu2 }
 0xabe   : > { %v10766_v24 = vadd.f32 %v18417_v17, %v10730_v39  ;;  %v11140_v13 = vmax.f32 %v11076_v43, %v10918_v59  ;;  %v10182_v46 = vadd.f32 %v10134_v8, %v9906_v33  ;;  %v9867_v21 = vpop.f32.mrf.mxu0 }
 0xabf   : > { %v10885_v2 = vld [vmem:[#allocation6 + $0x111] sm:$0xff] }
 0xac0   : > { %v10919_v29 = vld [vmem:[#allocation6 + $0x110] sm:$0xff]  ;;  %10854 = vst.msk [vmem:[#allocation6 + $0x121] sm:$0xff] %vm3016_vm3, %v10766_v24  ;;  %v10949_v36 = vmax.f32 %v10885_v2, %v10917_v35  ;;  %v10457_v5 = vadd.f32 %v10409_v0, %v10182_v46  ;;  %v10140_v7 = vpop.f32.mrf.mxu1 }
 0xac1   : > { %v18423_v34 = vld [vmem:[#allocation6 + $0x10a] sm:$0xff]  ;;  %v11268_v54 = vmax.f32 %v11203_v41, %v10919_v29  ;;  %v18429_v55 = vld [vmem:[#allocation6 + $0x112] sm:$0xff] }
 0xac2   : > { %v11395_v11 = vmax.f32 %v11331_v60, %v18423_v34  ;;  %v11013_v10 = vmax.f32 %v10949_v36, %v10883_v30  ;;  %v11204_v50 = vmax.f32 %v11140_v13, %v18423_v34  ;;  %v11430_v36 = vld [vmem:[%s14250_s25 + $0xa8] sm:$0xff] }
 0xac3   : > { %v11332_v56 = vmax.f32 %v11268_v54, %v10885_v2  ;;  %v10681_v62 = vpop.f32.mrf.mxu3  ;;  %v9908_v54 = vadd.f32 %v9864_v1, %v17839_v18 }
 0xac4   : > { %v11459_v61 = vadd.f32 %v11427_v58, %v11395_v11  ;;  %v10731_v35 = vadd.f32 %v10681_v62, %v10456_v19  ;;  %v11077_v6 = vmax.f32 %v11013_v10, %v18397_v20 }
 0xac5   : > { %v11396_v25 = vmax.f32 %v11332_v56, %v18429_v55  ;;  %v10418_v56 = vpop.f32.mrf.mxu2  ;;  %v10184_v62 = vadd.f32 %v10140_v7, %v9908_v54 }
 0xac6   : > { %11491 = vst.msk [vmem:[%s18033_s16 + $0x90] sm:$0xff] %vm3016_vm3, %v11459_v61  ;;  %v10767_v30 = vadd.f32 %v18417_v17, %v10731_v35  ;;  %v11141_v32 = vmax.f32 %v11077_v6, %v10919_v29  ;;  %v9870_v6 = vpop.f32.mrf.mxu0 }
 0xac7   : > { %v11460_v26 = vadd.f32 %v11428_v45, %v11396_v25  ;;  %v10886_v48 = vld [vmem:[#allocation6 + $0x121] sm:$0xff]  ;;  %v10459_v18 = vadd.f32 %v10415_v40, %v10184_v62  ;;  %v9909_v45 = vadd.f32 %v9867_v21, %v17844_v63 }
 0xac8   : > { %v10920_v27 = vld [vmem:[#allocation6 + $0x120] sm:$0xff]  ;;  %10855 = vst.msk [vmem:[#allocation6 + $0x129] sm:$0xff] %vm3016_vm3, %v10767_v30  ;;  %v10950_v23 = vmax.f32 %v10886_v48, %v10918_v59  ;;  %v11205_v8 = vmax.f32 %v11141_v32, %v18429_v55 }
 0xac9   : > { %11492 = vst.msk [vmem:[%s18033_s16 + $0x98] sm:$0xff] %vm3016_vm3, %v11460_v26  ;;  %v11269_v4 = vmax.f32 %v11204_v50, %v10920_v27 }
 0xaca   : > { %v11014_v57 = vmax.f32 %v10950_v23, %v18406_v44  ;;  %v10183_v44 = vadd.f32 %v10137_v9, %v9907_v22 }
 0xacb   : > { %v10684_v12 = vpop.f32.mrf.mxu3  ;;  %v11333_v52 = vmax.f32 %v11269_v4, %v10886_v48 }
 0xacc   : > { %v10732_v20 = vadd.f32 %v10684_v12, %v10457_v5  ;;  %v11078_v42 = vmax.f32 %v11014_v57, %v18423_v34  ;;  %v10458_v41 = vadd.f32 %v10412_v49, %v10183_v44  ;;  %v10143_v34 = vpop.f32.mrf.mxu1 }
 0xace   : > { %v10768_v16 = vadd.f32 %v18417_v17, %v10732_v20  ;;  %v11142_v11 = vmax.f32 %v11078_v42, %v10920_v27  ;;  %v10421_v20 = vpop.f32.mrf.mxu2  ;;  %v9873_v42 = vpop.f32.mrf.mxu0 }
 0xacf   : > { %v10887_v3 = vld [vmem:[#allocation6 + $0x129] sm:$0xff] }
 0xad0   : > { %v10921_v59 = vld [vmem:[#allocation6 + $0x128] sm:$0xff]  ;;  %v10951_v53 = vmax.f32 %v10887_v3, %v10919_v29  ;;  %10856 = vst.msk [vmem:[#allocation6 + $0x139] sm:$0xff] %vm3016_vm3, %v10768_v16 }
 0xad1   : > { %v18445_v0 = vld [vmem:[#allocation6 + $0x122] sm:$0xff]  ;;  %v11270_v47 = vmax.f32 %v11205_v8, %v10921_v59  ;;  %v18451_v51 = vld [vmem:[#allocation6 + $0x12a] sm:$0xff] }
 0xad2   : > { %v11397_v38 = vmax.f32 %v11333_v52, %v18445_v0  ;;  %v11015_v60 = vmax.f32 %v10951_v53, %v10885_v2  ;;  %v11206_v33 = vmax.f32 %v11142_v11, %v18445_v0 }
 0xad3   : > { %v11334_v39 = vmax.f32 %v11270_v47, %v10887_v3  ;;  %v10687_v29 = vpop.f32.mrf.mxu3 }
 0xad4   : > { %v11461_v24 = vadd.f32 %v11429_v14, %v11397_v38  ;;  %v10733_v58 = vadd.f32 %v10687_v29, %v10458_v41  ;;  %v11079_v9 = vmax.f32 %v11015_v60, %v18429_v55  ;;  %v10146_v32 = vpop.f32.mrf.mxu1  ;;  %v11432_v38 = vld [vmem:[%s14250_s25 + $0xb8] sm:$0xff] }
 0xad5   : > { %v11398_v43 = vmax.f32 %v11334_v39, %v18451_v51 }
 0xad6   : > { %11493 = vst.msk [vmem:[%s18033_s16 + $0xa0] sm:$0xff] %vm3016_vm3, %v11461_v24  ;;  %v10769_v2 = vadd.f32 %v18417_v17, %v10733_v58  ;;  %v11143_v13 = vmax.f32 %v11079_v9, %v10921_v59  ;;  %v10424_v29 = vpop.f32.mrf.mxu2  ;;  %v9911_v58 = vadd.f32 %v9873_v42, %v17866_v37 }
 0xad7   : > { %v11462_v19 = vadd.f32 %v11430_v36, %v11398_v43  ;;  %v10888_v10 = vld [vmem:[#allocation6 + $0x139] sm:$0xff] }
 0xad8   : > { %v10922_v61 = vld [vmem:[#allocation6 + $0x138] sm:$0xff]  ;;  %10857 = vst.msk [vmem:[#allocation6 + $0x141] sm:$0xff] %vm3016_vm3, %v10769_v2  ;;  %v10952_v49 = vmax.f32 %v10888_v10, %v10920_v27  ;;  %v11207_v26 = vmax.f32 %v11143_v13, %v18451_v51  ;;  %v10185_v27 = vadd.f32 %v10143_v34, %v9909_v45 }
 0xad9   : > { %11494 = vst.msk [vmem:[%s18033_s16 + $0xa8] sm:$0xff] %vm3016_vm3, %v11462_v19  ;;  %v11271_v35 = vmax.f32 %v11206_v33, %v10922_v61 }
 0xada   : > { %v11016_v30 = vmax.f32 %v10952_v49, %v10886_v48  ;;  %v11431_v48 = vld [vmem:[%s14250_s25 + $0xb0] sm:$0xff]  ;;  %v10460_v7 = vadd.f32 %v10418_v56, %v10185_v27 }
 0xadb   : > { %v10690_v25 = vpop.f32.mrf.mxu3  ;;  %v11335_v46 = vmax.f32 %v11271_v35, %v10888_v10  ;;  %v11433_v35 = vld [vmem:[%s14250_s25 + $0xc0] sm:$0xff] }
 0xadc   : > { %v10734_v55 = vadd.f32 %v10690_v25, %v10459_v18  ;;  %v11080_v22 = vmax.f32 %v11016_v30, %v18445_v0  ;;  %v10149_v21 = vpop.f32.mrf.mxu1  ;;  %v9876_v18 = vpop.f32.mrf.mxu0 }
 0xadd   : > { %v10187_v56 = vadd.f32 %v10149_v21, %v9911_v58 }
 0xade   : > { %v10770_v50 = vadd.f32 %v18417_v17, %v10734_v55  ;;  %v11144_v14 = vmax.f32 %v11080_v22, %v10922_v61 }
 0xadf   : > { %v10889_v23 = vld [vmem:[#allocation6 + $0x141] sm:$0xff]  ;;  %v10462_v25 = vadd.f32 %v10424_v29, %v10187_v56 }
 0xae0   : > { %v10923_v1 = vld [vmem:[#allocation6 + $0x140] sm:$0xff]  ;;  %v10953_v4 = vmax.f32 %v10889_v23, %v10921_v59  ;;  %10858 = vst.msk [vmem:[#allocation6 + $0x151] sm:$0xff] %vm3016_vm3, %v10770_v50  ;;  %v9910_v59 = vadd.f32 %v9870_v6, %v17850_v15 }
 0xae1   : > { %v18467_v5 = vld [vmem:[#allocation6 + $0x13a] sm:$0xff]  ;;  %v11272_v12 = vmax.f32 %v11207_v26, %v10923_v1  ;;  %v18473_v52 = vld [vmem:[#allocation6 + $0x142] sm:$0xff] }
 0xae2   : > { %v11399_v63 = vmax.f32 %v11335_v46, %v18467_v5  ;;  %v11017_v8 = vmax.f32 %v10953_v4, %v10887_v3  ;;  %v10186_v3 = vadd.f32 %v10146_v32, %v9910_v59  ;;  %v11208_v15 = vmax.f32 %v11144_v14, %v18467_v5  ;;  %v10427_v32 = vpop.f32.mrf.mxu2  ;;  %v11434_v4 = vld [vmem:[%s14250_s25 + $0xc8] sm:$0xff] }
 0xae3   : > { %v11336_v57 = vmax.f32 %v11272_v12, %v10889_v23  ;;  %v10693_v16 = vpop.f32.mrf.mxu3  ;;  %v9912_v46 = vadd.f32 %v9876_v18, %v17887_v31 }
 0xae4   : > { %v11463_v40 = vadd.f32 %v11431_v48, %v11399_v63  ;;  %v10735_v47 = vadd.f32 %v10693_v16, %v10460_v7  ;;  %v11081_v39 = vmax.f32 %v11017_v8, %v18451_v51  ;;  %v10461_v43 = vadd.f32 %v10421_v20, %v10186_v3  ;;  %v10152_v45 = vpop.f32.mrf.mxu1  ;;  %v9879_v16 = vpop.f32.mrf.mxu0 }
 0xae5   : > { %v11400_v53 = vmax.f32 %v11336_v57, %v18473_v52  ;;  %v10188_v22 = vadd.f32 %v10152_v45, %v9912_v46 }
 0xae6   : > { %11495 = vst.msk [vmem:[%s18033_s16 + $0xb0] sm:$0xff] %vm3016_vm3, %v11463_v40  ;;  %v10771_v0 = vadd.f32 %v18417_v17, %v10735_v47  ;;  %v11145_v36 = vmax.f32 %v11081_v39, %v10923_v1 }
 0xae7   : > { %v11464_v44 = vadd.f32 %v11432_v38, %v11400_v53  ;;  %v10890_v24 = vld [vmem:[#allocation6 + $0x151] sm:$0xff]  ;;  %v10463_v57 = vadd.f32 %v10427_v32, %v10188_v22  ;;  %v11375_v22 = vld [vmem:[#allocation6 + $0x19a] sm:$0xff] }
 0xae8   : > { %v10924_v41 = vld [vmem:[#allocation6 + $0x150] sm:$0xff]  ;;  %v10954_v60 = vmax.f32 %v10890_v24, %v10922_v61  ;;  %10859 = vst.msk [vmem:[#allocation6 + $0x159] sm:$0xff] %vm3016_vm3, %v10771_v0  ;;  %v11209_v9 = vmax.f32 %v11145_v36, %v18473_v52 }
 0xae9   : > { %11496 = vst.msk [vmem:[%s18033_s16 + $0xb8] sm:$0xff] %vm3016_vm3, %v11464_v44  ;;  %v11273_v54 = vmax.f32 %v11208_v15, %v10924_v41 }
 0xaea   : > { %v11018_v51 = vmax.f32 %v10954_v60, %v10888_v10  ;;  %v10430_v42 = vpop.f32.mrf.mxu2 }
 0xaeb   : > { %v10696_v11 = vpop.f32.mrf.mxu3  ;;  %v11337_v2 = vmax.f32 %v11273_v54, %v10890_v24 }
 0xaec   : > { %v10736_v19 = vadd.f32 %v10696_v11, %v10461_v43  ;;  %v11082_v61 = vmax.f32 %v11018_v51, %v18467_v5  ;;  %v10155_v47 = vpop.f32.mrf.mxu1 }
 0xaee   : > { %v10772_v34 = vadd.f32 %v18417_v17, %v10736_v19  ;;  %v11146_v50 = vmax.f32 %v11082_v61, %v10924_v41 }
 0xaef   : > { %v10891_v62 = vld [vmem:[#allocation6 + $0x159] sm:$0xff] }
 0xaf0   : > { %v10925_v33 = vld [vmem:[#allocation6 + $0x158] sm:$0xff]  ;;  %10860 = vst.msk [vmem:[#allocation6 + $0x169] sm:$0xff] %vm3016_vm3, %v10772_v34  ;;  %v10955_v13 = vmax.f32 %v10891_v62, %v10923_v1 }
 0xaf1   : > { %v18490_v49 = vld [vmem:[#allocation6 + $0x152] sm:$0xff]  ;;  %v11274_v37 = vmax.f32 %v11209_v9, %v10925_v33  ;;  %v11053_v5 = vld [vmem:[#allocation6 + $0x15a] sm:$0xff] }
 0xaf2   : > { %v11401_v10 = vmax.f32 %v11337_v2, %v18490_v49  ;;  %v11019_v55 = vmax.f32 %v10955_v13, %v10889_v23  ;;  %v11210_v7 = vmax.f32 %v11146_v50, %v18490_v49  ;;  %v11436_v9 = vld [vmem:[%s14250_s25 + $0xd8] sm:$0xff] }
 0xaf3   : > { %v11338_v6 = vmax.f32 %v11274_v37, %v10891_v62  ;;  %v10699_v26 = vpop.f32.mrf.mxu3 }
 0xaf4   : > { %v11465_v30 = vadd.f32 %v11433_v35, %v11401_v10  ;;  %v10737_v27 = vadd.f32 %v10699_v26, %v10462_v25  ;;  %v11083_v12 = vmax.f32 %v11019_v55, %v18473_v52  ;;  %v9913_v52 = vadd.f32 %v9879_v16, %v17908_v28  ;;  %v11435_v28 = vld [vmem:[%s14250_s25 + $0xd0] sm:$0xff] }
 0xaf5   : > { %v11402_v1 = vmax.f32 %v11338_v6, %v11053_v5 }
 0xaf6   : > { %11497 = vst.msk [vmem:[%s18033_s16 + $0xc0] sm:$0xff] %vm3016_vm3, %v11465_v30  ;;  %v10773_v63 = vadd.f32 %v18417_v17, %v10737_v27  ;;  %v11147_v40 = vmax.f32 %v11083_v12, %v10925_v33  ;;  %v10189_v60 = vadd.f32 %v10155_v47, %v9913_v52  ;;  %v11247_v30 = vld [vmem:[#allocation6 + $0x198] sm:$0xff]  ;;  %v11439_v52 = vld [vmem:[%s14250_s25 + $0xf0] sm:$0xff] }
 0xaf7   : > { %v11466_v48 = vadd.f32 %v11434_v4, %v11402_v1  ;;  %v10892_v23 = vld [vmem:[#allocation6 + $0x169] sm:$0xff]  ;;  %v11437_v1 = vld [vmem:[%s14250_s25 + $0xe0] sm:$0xff] }
 0xaf8   : > { %v10926_v20 = vld [vmem:[#allocation6 + $0x168] sm:$0xff]  ;;  %10861 = vst.msk [vmem:[#allocation6 + $0x171] sm:$0xff] %vm3016_vm3, %v10773_v63  ;;  %v10956_v31 = vmax.f32 %v10892_v23, %v10924_v41  ;;  %v11211_v14 = vmax.f32 %v11147_v40, %v11053_v5  ;;  %v11311_v4 = vld [vmem:[#allocation6 + $0x199] sm:$0xff] }
 0xaf9   : > { %11498 = vst.msk [vmem:[%s18033_s16 + $0xc8] sm:$0xff] %vm3016_vm3, %v11466_v48  ;;  %v11275_v8 = vmax.f32 %v11210_v7, %v10926_v20  ;;  %v11438_v40 = vld [vmem:[%s14250_s25 + $0xe8] sm:$0xff] }
 0xafa   : > { %v11020_v38 = vmax.f32 %v10956_v31, %v10890_v24  ;;  %v10464_v24 = vadd.f32 %v10430_v42, %v10189_v60 }
 0xafb   : > { %v10702_v59 = vpop.f32.mrf.mxu3  ;;  %v11339_v44 = vmax.f32 %v11275_v8, %v10892_v23 }
 0xafc   : > { %v10738_v53 = vadd.f32 %v10702_v59, %v10463_v57  ;;  %v11084_v29 = vmax.f32 %v11020_v38, %v18490_v49 }
 0xafe   : > { %v10774_v0 = vadd.f32 %v18417_v17, %v10738_v53  ;;  %v11148_v2 = vmax.f32 %v11084_v29, %v10926_v20  ;;  %v11248_v53 = vld [vmem:[#allocation6 + $0x1a0] sm:$0xff] }
 0xaff   : > { %v10893_v39 = vld [vmem:[#allocation6 + $0x171] sm:$0xff] }
 0xb00   : > { %v10927_v3 = vld [vmem:[#allocation6 + $0x170] sm:$0xff]  ;;  %v10957_v15 = vmax.f32 %v10893_v39, %v10925_v33  ;;  %10862 = vst.msk [vmem:[#allocation6 + $0x181] sm:$0xff] %vm3016_vm3, %v10774_v0  ;;  %v11376_v0 = vld [vmem:[#allocation6 + $0x1a2] sm:$0xff] }
 0xb01   : > { %v11054_v41 = vld [vmem:[#allocation6 + $0x16a] sm:$0xff]  ;;  %v11276_v21 = vmax.f32 %v11211_v14, %v10927_v3  ;;  %v11055_v58 = vld [vmem:[#allocation6 + $0x172] sm:$0xff]  ;;  %v11312_v14 = vld [vmem:[#allocation6 + $0x1a1] sm:$0xff] }
 0xb02   : > { %v11403_v43 = vmax.f32 %v11339_v44, %v11054_v41  ;;  %v11021_v11 = vmax.f32 %v10957_v15, %v10891_v62  ;;  %v11212_v37 = vmax.f32 %v11148_v2, %v11054_v41 }
 0xb03   : > { %v11340_v36 = vmax.f32 %v11276_v21, %v10893_v39  ;;  %v10705_v51 = vpop.f32.mrf.mxu3 }
 0xb04   : > { %v11467_v54 = vadd.f32 %v11435_v28, %v11403_v43  ;;  %v10739_v34 = vadd.f32 %v10705_v51, %v10464_v24  ;;  %v11085_v33 = vmax.f32 %v11021_v11, %v11053_v5 }
 0xb05   : > { %v11404_v19 = vmax.f32 %v11340_v36, %v11055_v58 }
 0xb06   : > { %11499 = vst.msk [vmem:[%s18033_s16 + $0xd0] sm:$0xff] %vm3016_vm3, %v11467_v54  ;;  %v10775_v61 = vadd.f32 %v18417_v17, %v10739_v34  ;;  %v11149_v10 = vmax.f32 %v11085_v33, %v10927_v3 }
 0xb07   : > { %v11468_v56 = vadd.f32 %v11436_v9, %v11404_v19  ;;  %v10894_v18 = vld [vmem:[#allocation6 + $0x181] sm:$0xff] }
 0xb08   : > { %v10958_v49 = vmax.f32 %v10894_v18, %v10926_v20  ;;  %v11118_v13 = vld [vmem:[#allocation6 + $0x180] sm:$0xff]  ;;  %10863 = vst.msk [vmem:[#allocation6 + $0x189] sm:$0xff] %vm3016_vm3, %v10775_v61  ;;  %v11213_v55 = vmax.f32 %v11149_v10, %v11055_v58 }
 0xb09   : > { %11500 = vst.msk [vmem:[%s18033_s16 + $0xd8] sm:$0xff] %vm3016_vm3, %v11468_v56  ;;  %v11277_v35 = vmax.f32 %v11212_v37, %v11118_v13 }
 0xb0a   : > { %v11022_v62 = vmax.f32 %v10958_v49, %v10892_v23 }
 0xb0b   : > { %v11341_v6 = vmax.f32 %v11277_v35, %v10894_v18 }
 0xb0c   : > { %v11086_v25 = vmax.f32 %v11022_v62, %v11054_v41 }
 0xb0e   : > { %v11150_v45 = vmax.f32 %v11086_v25, %v11118_v13 }
 0xb0f   : > { %v10895_v26 = vld [vmem:[#allocation6 + $0x189] sm:$0xff] }
 0xb10   : > { %v11119_v17 = vld [vmem:[#allocation6 + $0x188] sm:$0xff]  ;;  %v10959_v50 = vmax.f32 %v10895_v26, %v10927_v3  ;;  %v11440_v3 = vld [vmem:[%s14250_s25 + $0xf8] sm:$0xff] }
 0xb11   : > { %v11182_v46 = vld [vmem:[#allocation6 + $0x182] sm:$0xff]  ;;  %v11278_v27 = vmax.f32 %v11213_v55, %v11119_v17  ;;  %v11183_v20 = vld [vmem:[#allocation6 + $0x18a] sm:$0xff] }
 0xb12   : > { %v11214_v5 = vmax.f32 %v11150_v45, %v11182_v46  ;;  %v11405_v32 = vmax.f32 %v11341_v6, %v11182_v46  ;;  %v11023_v12 = vmax.f32 %v10959_v50, %v10893_v39 }
 0xb13   : > { %v11342_v48 = vmax.f32 %v11278_v27, %v10895_v26 }
 0xb14   : > { %v11279_v63 = vmax.f32 %v11214_v5, %v11247_v30  ;;  %v11469_v23 = vadd.f32 %v11437_v1, %v11405_v32  ;;  %v11087_v7 = vmax.f32 %v11023_v12, %v11055_v58 }
 0xb15   : > { %v11406_v57 = vmax.f32 %v11342_v48, %v11183_v20 }
 0xb16   : > { %v11343_v31 = vmax.f32 %v11279_v63, %v11311_v4  ;;  %11501 = vst.msk [vmem:[%s18033_s16 + $0xe0] sm:$0xff] %vm3016_vm3, %v11469_v23  ;;  %v11151_v8 = vmax.f32 %v11087_v7, %v11119_v17 }
 0xb17   : > { %v11470_v59 = vadd.f32 %v11438_v40, %v11406_v57 }
 0xb18   : > { %v11407_v16 = vmax.f32 %v11343_v31, %v11375_v22  ;;  %v11215_v47 = vmax.f32 %v11151_v8, %v11183_v20 }
 0xb19   : > { %11502 = vst.msk [vmem:[%s18033_s16 + $0xe8] sm:$0xff] %vm3016_vm3, %v11470_v59 }
 0xb1a   : > { %v11471_v38 = vadd.f32 %v11439_v52, %v11407_v16  ;;  %v11280_v44 = vmax.f32 %v11215_v47, %v11248_v53 }
 0xb1c   : > { %11503 = vst.msk [vmem:[%s18033_s16 + $0xf0] sm:$0xff] %vm3016_vm3, %v11471_v38  ;;  %v11344_v42 = vmax.f32 %v11280_v44, %v11312_v14 }
 0xb1e   : > { %v11408_v39 = vmax.f32 %v11344_v42, %v11376_v0 }
 0xb20   : > { %v11472_v41 = vadd.f32 %v11440_v3, %v11408_v39 }
 0xb22   : > { %11504 = vst.msk [vmem:[%s18033_s16 + $0xf8] sm:$0xff] %vm3016_vm3, %v11472_v41 }
 0xb23 PF: > { %s22_s17 = sadd.s32 1, %s12865_s17  }
 0xb24   : > { %p19_p4 = scmp.ge.s32.totalorder %s22_s17, 4  }
 0xb26   :  { %21 = sbr.rel (!%p19_p4) target bundleno = 1 (0x1), region = 147 }

</bundles_post_ra>
